<compile_context>
chip_gen: v6e
topology: v6e:2x2x1
jax: 0.10.0
libtpu: 0.0.40
codegen_flags: <defaults>
</compile_context>

<pallas_src>
import jax
import jax.numpy as jnp
from jax.experimental import pallas as pl
from jax.experimental.pallas import tpu as pltpu


def _round_up(x, m):
    return (x + m - 1) // m * m


def decoder_mlp_kernel(h_ref,
                       w1_ref, b1_ref,
                       w2_ref, b2_ref,
                       w3_ref, b3_ref,
                       w4_ref, b4_ref,
                       out_ref):
    """Fused 4-layer MLP: bf16 weights, f32 accumulation, ReLU x3 + Tanh."""
    x = h_ref[...]                                                  # (TM, L) f32

    x = jnp.dot(x.astype(jnp.bfloat16), w1_ref[...],
                preferred_element_type=jnp.float32) + b1_ref[...]
    x = jnp.maximum(x, 0.0)                                         # ReLU

    x = jnp.dot(x.astype(jnp.bfloat16), w2_ref[...],
                preferred_element_type=jnp.float32) + b2_ref[...]
    x = jnp.maximum(x, 0.0)                                         # ReLU

    x = jnp.dot(x.astype(jnp.bfloat16), w3_ref[...],
                preferred_element_type=jnp.float32) + b3_ref[...]
    x = jnp.maximum(x, 0.0)                                         # ReLU

    x = jnp.dot(x.astype(jnp.bfloat16), w4_ref[...],
                preferred_element_type=jnp.float32) + b4_ref[...]
    out_ref[...] = jnp.tanh(x).astype(out_ref.dtype)                # Tanh


def decoder_mnist_forward(h, kernel_params, out_channels, *, tile_m=128):
    """h: (B, latent_dim) f32 -> (B, out_channels, 28, 28) f32.

    kernel_params come from prepare_params(): bf16 weights, f32 biases,
    last layer zero-padded to a lane-dense (multiple-of-128) width.
    """
    (w1, b1), (w2, b2), (w3, b3), (w4, b4) = kernel_params
    B, L = h.shape
    out_dim = out_channels * 28 * 28
    out_pad = w4.shape[1]                       # lane-dense, multiple of 128

    # Pad batch (sublane) dim to a multiple of 8 and tile it on a 1-D grid.
    tm = min(tile_m, _round_up(B, 8))
    b_pad = _round_up(B, tm)
    if b_pad != B:
        h = jnp.pad(h, ((0, b_pad - B), (0, 0)))
    grid = (b_pad // tm,)

    def const_spec(arr):
        # Weights/biases: same block every batch tile -> stay VMEM-resident.
        return pl.BlockSpec(arr.shape, lambda i: (0,) * arr.ndim)

    flops = 2 * b_pad * (L * w1.shape[1]
                         + w2.shape[0] * w2.shape[1]
                         + w3.shape[0] * w3.shape[1]
                         + w4.shape[0] * out_pad)
    bytes_accessed = sum(int(a.size) * a.dtype.itemsize
                         for a in (h, w1, b1, w2, b2, w3, b3, w4, b4))
    bytes_accessed += b_pad * out_pad * 4       # f32 output writeback

    flat = pl.pallas_call(
        decoder_mlp_kernel,
        out_shape=jax.ShapeDtypeStruct((b_pad, out_pad), jnp.float32),
        grid=grid,
        in_specs=[pl.BlockSpec((tm, L), lambda i: (i, 0)),
                  const_spec(w1), const_spec(b1),
                  const_spec(w2), const_spec(b2),
                  const_spec(w3), const_spec(b3),
                  const_spec(w4), const_spec(b4)],
        out_specs=pl.BlockSpec((tm, out_pad), lambda i: (i, 0)),
        compiler_params=pltpu.CompilerParams(
            dimension_semantics=("parallel",),
            vmem_limit_bytes=48 << 20),         # portable to v7x (64 MiB VMEM)
        cost_estimate=pl.CostEstimate(
            flops=flops,
            transcendentals=b_pad * out_pad,
            bytes_accessed=bytes_accessed),
    )(h, w1, b1, w2, b2, w3, b3, w4, b4)

    # Drop batch / lane padding; equivalent of torch `x.view(-1, C, 28, 28)`.
    return flat[:B, :out_dim].reshape(B, out_channels, 28, 28)


def init_params(key, latent_dim, out_channels):
    """Deterministic synthetic f32 weights, stored as (in, out) so kernel does x @ W + b."""
    dims = [latent_dim, 512, 1024, 2048, out_channels * 28 * 28]
    params = []
    for i in range(4):
        key, kw, kb = jax.random.split(key, 3)
        scale = 1.0 / jnp.sqrt(jnp.float32(dims[i]))
        w = jax.random.uniform(kw, (dims[i], dims[i + 1]), jnp.float32, -scale, scale)
        b = jax.random.uniform(kb, (1, dims[i + 1]), jnp.float32, -scale, scale)
        params.append((w, b))
    return params


def prepare_params(params):
    """Kernel-side params: bf16 weights (halve HBM bytes) and the last layer
    zero-padded to a multiple of 128 output columns (896 for C=1)."""
    (w1, b1), (w2, b2), (w3, b3), (w4, b4) = params
    out_dim = w4.shape[1]
    pad = _round_up(out_dim, 128) - out_dim
    w4p = jnp.pad(w4, ((0, 0), (0, pad)))
    b4p = jnp.pad(b4, ((0, 0), (0, pad)))
    return [(w1.astype(jnp.bfloat16), b1),
            (w2.astype(jnp.bfloat16), b2),
            (w3.astype(jnp.bfloat16), b3),
            (w4p.astype(jnp.bfloat16), b4p)]


def reference_forward(h, kernel_params, out_channels):
    """Pure-JAX reference using the same (bf16-rounded) weights in f32 math."""
    out_dim = out_channels * 28 * 28
    x = h
    for i, (w, b) in enumerate(kernel_params):
        x = x @ w.astype(jnp.float32) + b
        x = jnp.maximum(x, 0.0) if i < 3 else jnp.tanh(x)
    return x[:, :out_dim].reshape(-1, out_channels, 28, 28)


if __name__ == "__main__":
    latent_dim = 32
    out_channels = 1
    batch = 2

    key = jax.random.PRNGKey(0)
    key, kh = jax.random.split(key)
    h = jax.random.normal(kh, (batch, latent_dim), jnp.float32)

    params = init_params(key, latent_dim, out_channels)
    kernel_params = prepare_params(params)

    out = decoder_mnist_forward(h, kernel_params, out_channels)
    out = jax.block_until_ready(out)

    ref = reference_forward(h, kernel_params, out_channels)
    assert out.shape == (batch, out_channels, 28, 28)
    # bf16 weights/activations on the MXU vs f32 reference -> loosened tolerance.
    assert jnp.allclose(out, ref, atol=2e-2, rtol=2e-2), float(jnp.max(jnp.abs(out - ref)))

    print("KERNEL_OK")
</pallas_src>

<mosaic_0001>
module attributes {stable_mosaic.version = 11 : i64} {
  func.func @decoder_mlp_kernel(%arg0: i32, %arg1: memref<8x32xf32, #tpu.memory_space<vmem>>, %arg2: memref<32x512xbf16, #tpu.memory_space<vmem>>, %arg3: memref<1x512xf32, #tpu.memory_space<vmem>>, %arg4: memref<512x1024xbf16, #tpu.memory_space<vmem>>, %arg5: memref<1x1024xf32, #tpu.memory_space<vmem>>, %arg6: memref<1024x2048xbf16, #tpu.memory_space<vmem>>, %arg7: memref<1x2048xf32, #tpu.memory_space<vmem>>, %arg8: memref<2048x896xbf16, #tpu.memory_space<vmem>>, %arg9: memref<1x896xf32, #tpu.memory_space<vmem>>, %arg10: memref<8x896xf32, #tpu.memory_space<vmem>>) attributes {dimension_semantics = [#tpu.dimension_semantics<parallel>], iteration_bounds = array<i64: 1>, scalar_prefetch = 0 : i64, scratch_operands = 0 : i64, tpu.core_type = #tpu.core_type<tc>, window_params = [{transform_indices = @transform_0, window_bounds = array<i64: 8, 32>}, {pipeline_mode = #tpu.pipeline_mode<synchronous>, transform_indices = @transform_1, window_bounds = array<i64: 32, 512>}, {pipeline_mode = #tpu.pipeline_mode<synchronous>, transform_indices = @transform_2, window_bounds = array<i64: 1, 512>}, {pipeline_mode = #tpu.pipeline_mode<synchronous>, transform_indices = @transform_3, window_bounds = array<i64: 512, 1024>}, {pipeline_mode = #tpu.pipeline_mode<synchronous>, transform_indices = @transform_4, window_bounds = array<i64: 1, 1024>}, {pipeline_mode = #tpu.pipeline_mode<synchronous>, transform_indices = @transform_5, window_bounds = array<i64: 1024, 2048>}, {pipeline_mode = #tpu.pipeline_mode<synchronous>, transform_indices = @transform_6, window_bounds = array<i64: 1, 2048>}, {pipeline_mode = #tpu.pipeline_mode<synchronous>, transform_indices = @transform_7, window_bounds = array<i64: 2048, 896>}, {pipeline_mode = #tpu.pipeline_mode<synchronous>, transform_indices = @transform_8, window_bounds = array<i64: 1, 896>}, {transform_indices = @transform_9, window_bounds = array<i64: 8, 896>}]} {
    %c0 = arith.constant 0 : index
    %c0_0 = arith.constant 0 : index
    %0 = vector.load %arg1[%c0, %c0_0] : memref<8x32xf32, #tpu.memory_space<vmem>>, vector<8x32xf32>
    %1 = arith.truncf %0 : vector<8x32xf32> to vector<8x32xbf16>
    %c0_1 = arith.constant 0 : index
    %c0_2 = arith.constant 0 : index
    %2 = vector.load %arg2[%c0_1, %c0_2] : memref<32x512xbf16, #tpu.memory_space<vmem>>, vector<32x512xbf16>
    %cst = arith.constant dense<0.000000e+00> : vector<8x512xf32>
    %3 = tpu.matmul %1, %2, %cst {dimension_numbers = #tpu.dot_dimension_numbers<[1], [0], [0], [1], [0, 0, 1, 1], [], []>} : vector<8x32xbf16>, vector<32x512xbf16>, vector<8x512xf32> -> vector<8x512xf32>
    %c0_3 = arith.constant 0 : index
    %c0_4 = arith.constant 0 : index
    %4 = vector.load %arg3[%c0_3, %c0_4] : memref<1x512xf32, #tpu.memory_space<vmem>>, vector<1x512xf32>
    %5 = vector.broadcast %4 : vector<1x512xf32> to vector<8x512xf32>
    %6 = arith.addf %3, %5 : vector<8x512xf32>
    %cst_5 = arith.constant 0.000000e+00 : f32
    %7 = vector.broadcast %cst_5 : f32 to vector<8x512xf32>
    %8 = arith.maximumf %6, %7 : vector<8x512xf32>
    %9 = arith.truncf %8 : vector<8x512xf32> to vector<8x512xbf16>
    %c0_6 = arith.constant 0 : index
    %c0_7 = arith.constant 0 : index
    %10 = vector.load %arg4[%c0_6, %c0_7] : memref<512x1024xbf16, #tpu.memory_space<vmem>>, vector<512x1024xbf16>
    %cst_8 = arith.constant dense<0.000000e+00> : vector<8x1024xf32>
    %11 = tpu.matmul %9, %10, %cst_8 {dimension_numbers = #tpu.dot_dimension_numbers<[1], [0], [0], [1], [0, 0, 1, 1], [], []>} : vector<8x512xbf16>, vector<512x1024xbf16>, vector<8x1024xf32> -> vector<8x1024xf32>
    %c0_9 = arith.constant 0 : index
    %c0_10 = arith.constant 0 : index
    %12 = vector.load %arg5[%c0_9, %c0_10] : memref<1x1024xf32, #tpu.memory_space<vmem>>, vector<1x1024xf32>
    %13 = vector.broadcast %12 : vector<1x1024xf32> to vector<8x1024xf32>
    %14 = arith.addf %11, %13 : vector<8x1024xf32>
    %cst_11 = arith.constant 0.000000e+00 : f32
    %15 = vector.broadcast %cst_11 : f32 to vector<8x1024xf32>
    %16 = arith.maximumf %14, %15 : vector<8x1024xf32>
    %17 = arith.truncf %16 : vector<8x1024xf32> to vector<8x1024xbf16>
    %c0_12 = arith.constant 0 : index
    %c0_13 = arith.constant 0 : index
    %18 = vector.load %arg6[%c0_12, %c0_13] : memref<1024x2048xbf16, #tpu.memory_space<vmem>>, vector<1024x2048xbf16>
    %cst_14 = arith.constant dense<0.000000e+00> : vector<8x2048xf32>
    %19 = tpu.matmul %17, %18, %cst_14 {dimension_numbers = #tpu.dot_dimension_numbers<[1], [0], [0], [1], [0, 0, 1, 1], [], []>} : vector<8x1024xbf16>, vector<1024x2048xbf16>, vector<8x2048xf32> -> vector<8x2048xf32>
    %c0_15 = arith.constant 0 : index
    %c0_16 = arith.constant 0 : index
    %20 = vector.load %arg7[%c0_15, %c0_16] : memref<1x2048xf32, #tpu.memory_space<vmem>>, vector<1x2048xf32>
    %21 = vector.broadcast %20 : vector<1x2048xf32> to vector<8x2048xf32>
    %22 = arith.addf %19, %21 : vector<8x2048xf32>
    %cst_17 = arith.constant 0.000000e+00 : f32
    %23 = vector.broadcast %cst_17 : f32 to vector<8x2048xf32>
    %24 = arith.maximumf %22, %23 : vector<8x2048xf32>
    %25 = arith.truncf %24 : vector<8x2048xf32> to vector<8x2048xbf16>
    %c0_18 = arith.constant 0 : index
    %c0_19 = arith.constant 0 : index
    %26 = vector.load %arg8[%c0_18, %c0_19] : memref<2048x896xbf16, #tpu.memory_space<vmem>>, vector<2048x896xbf16>
    %cst_20 = arith.constant dense<0.000000e+00> : vector<8x896xf32>
    %27 = tpu.matmul %25, %26, %cst_20 {dimension_numbers = #tpu.dot_dimension_numbers<[1], [0], [0], [1], [0, 0, 1, 1], [], []>} : vector<8x2048xbf16>, vector<2048x896xbf16>, vector<8x896xf32> -> vector<8x896xf32>
    %c0_21 = arith.constant 0 : index
    %c0_22 = arith.constant 0 : index
    %28 = vector.load %arg9[%c0_21, %c0_22] : memref<1x896xf32, #tpu.memory_space<vmem>>, vector<1x896xf32>
    %29 = vector.broadcast %28 : vector<1x896xf32> to vector<8x896xf32>
    %30 = arith.addf %27, %29 : vector<8x896xf32>
    %31 = math.tanh %30 : vector<8x896xf32>
    %c0_23 = arith.constant 0 : index
    %c0_24 = arith.constant 0 : index
    %32 = vector.load %arg10[%c0_23, %c0_24] : memref<8x896xf32, #tpu.memory_space<vmem>>, vector<8x896xf32>
    tpu.vector_store %arg10[%c0_23, %c0_24], %31 {strides = array<i32>} : memref<8x896xf32, #tpu.memory_space<vmem>>, vector<8x896xf32>,
    return
  }
  func.func @transform_0(%arg0: i32) -> (i32, i32) {
    %c0_i32 = arith.constant 0 : i32
    %c0_i32_0 = arith.constant 0 : i32
    return %arg0, %c0_i32 : i32, i32
  }
  func.func @transform_1(%arg0: i32) -> (i32, i32) {
    %c0_i32 = arith.constant 0 : i32
    %c0_i32_0 = arith.constant 0 : i32
    %c0_i32_1 = arith.constant 0 : i32
    return %c0_i32, %c0_i32_0 : i32, i32
  }
  func.func @transform_2(%arg0: i32) -> (i32, i32) {
    %c0_i32 = arith.constant 0 : i32
    %c0_i32_0 = arith.constant 0 : i32
    %c0_i32_1 = arith.constant 0 : i32
    return %c0_i32, %c0_i32_0 : i32, i32
  }
  func.func @transform_3(%arg0: i32) -> (i32, i32) {
    %c0_i32 = arith.constant 0 : i32
    %c0_i32_0 = arith.constant 0 : i32
    %c0_i32_1 = arith.constant 0 : i32
    return %c0_i32, %c0_i32_0 : i32, i32
  }
  func.func @transform_4(%arg0: i32) -> (i32, i32) {
    %c0_i32 = arith.constant 0 : i32
    %c0_i32_0 = arith.constant 0 : i32
    %c0_i32_1 = arith.constant 0 : i32
    return %c0_i32, %c0_i32_0 : i32, i32
  }
  func.func @transform_5(%arg0: i32) -> (i32, i32) {
    %c0_i32 = arith.constant 0 : i32
    %c0_i32_0 = arith.constant 0 : i32
    %c0_i32_1 = arith.constant 0 : i32
    return %c0_i32, %c0_i32_0 : i32, i32
  }
  func.func @transform_6(%arg0: i32) -> (i32, i32) {
    %c0_i32 = arith.constant 0 : i32
    %c0_i32_0 = arith.constant 0 : i32
    %c0_i32_1 = arith.constant 0 : i32
    return %c0_i32, %c0_i32_0 : i32, i32
  }
  func.func @transform_7(%arg0: i32) -> (i32, i32) {
    %c0_i32 = arith.constant 0 : i32
    %c0_i32_0 = arith.constant 0 : i32
    %c0_i32_1 = arith.constant 0 : i32
    return %c0_i32, %c0_i32_0 : i32, i32
  }
  func.func @transform_8(%arg0: i32) -> (i32, i32) {
    %c0_i32 = arith.constant 0 : i32
    %c0_i32_0 = arith.constant 0 : i32
    %c0_i32_1 = arith.constant 0 : i32
    return %c0_i32, %c0_i32_0 : i32, i32
  }
  func.func @transform_9(%arg0: i32) -> (i32, i32) {
    %c0_i32 = arith.constant 0 : i32
    %c0_i32_0 = arith.constant 0 : i32
    return %arg0, %c0_i32 : i32, i32
  }
}

</mosaic_0001>

<bundles_post_ra>
// kernel: tpu_custom_call.1
= control target key start
LH: loop header
LB: loop body
LE: loop exit
PB: predicated region body
PF: predicated region fallthrough
CT: control target
= control target key end

     0   :  { %14 = vsyncpa [#allocation3], 0  ;;  %s21363_s0 = inlined_call_operand.hbm [shape: f32[8,32], index: 0, kind: input, shape index: {}]   ;;  %s21364_s1 = inlined_call_operand.hbm [shape: bf16[32,512], index: 1, kind: input, shape index: {}]   ;;  %s21365_s2 = inlined_call_operand.hbm [shape: f32[1,512], index: 2, kind: input, shape index: {}]   ;;  %s21366_s3 = inlined_call_operand.hbm [shape: bf16[512,1024], index: 3, kind: input, shape index: {}]   ;;  %s21367_s4 = inlined_call_operand.hbm [shape: f32[1,1024], index: 4, kind: input, shape index: {}]   ;;  %s21368_s5 = inlined_call_operand.hbm [shape: bf16[1024,2048], index: 5, kind: input, shape index: {}]   ;;  %s21369_s6 = inlined_call_operand.hbm [shape: f32[1,2048], index: 6, kind: input, shape index: {}]   ;;  %s21370_s7 = inlined_call_operand.hbm [shape: bf16[2048,896], index: 7, kind: input, shape index: {}]   ;;  %s21371_s8 = inlined_call_operand.hbm [shape: f32[1,896], index: 8, kind: input, shape index: {}]   ;;  %s21372_s9 = inlined_call_operand.hbm [shape: f32[8,896], index: 9, kind: output, shape index: {}]  }
   0x1   :  { %15 = vsyncpa [#allocation6], 0 }
   0x2   :  { %16 = vsyncpa [#allocation9], 0 }
   0x3   :  { %17 = vsyncpa [#allocation12], 0 }
   0x4   :  { %18 = vsyncpa [#allocation15], 0 }
   0x5   :  { %19 = vsyncpa [#allocation4], 0  ;;  %s20717_s30 = smov [#allocation5]  }
   0x6   :  { %s35_s10 = sshll.u32 %s20717_s30, 4  ;;  %s36_s10 = int_to_ptr.vmem [resolvable:$true] %s35_s10 }
   0x7   :  { %s20513_s11 = scalar_lea.vmem %s36_s10, 1024  ;;  %p20518_p1 = scmp.lt.s32.totalorder %s36_s10, %s36_s10 }
   0x8   :  { %p20514_p0 = scmp.ne.s32.totalorder %s36_s10, %s20513_s11  ;;  %p20519_p2 = scmp.lt.s32.totalorder %s20513_s11, %s20513_s11 }
   0xa   :  { %p20520_p3 = por %p20519_p2, %p20518_p1 }
   0xc   :  { %p20521_p4 = pnand %p20520_p3, %p20514_p0 }
   0xe   :  { %20524 = shalt.err (!%p20521_p4)
}
   0xf   :  { %s20718_s12 = smov 256   ;;  %s20719_s13 = smov 16  }
  0x10   :  { %41 = dma.hbm_to_vmem [thread:$0]  %s21364_s1, 1024, %s36_s10, [#allocation6], %s20718_s12, %s20718_s12, %s20719_s13  }
  0x11   :  { %s20720_s16 = smov [#allocation8]  }
  0x12   :  { %s57_s17 = sshll.u32 %s20720_s16, 4  ;;  %s58_s17 = int_to_ptr.vmem [resolvable:$true] %s57_s17 }
  0x13   :  { %s20533_s18 = scalar_lea.vmem %s58_s17, 32768  ;;  %p20538_p6 = scmp.lt.s32.totalorder %s58_s17, %s58_s17 }
  0x14   :  { %p20534_p5 = scmp.ne.s32.totalorder %s58_s17, %s20533_s18  ;;  %p20539_p7 = scmp.lt.s32.totalorder %s20533_s18, %s20533_s18 }
  0x16   :  { %p20540_p8 = por %p20539_p7, %p20538_p6 }
  0x18   :  { %p20541_p9 = pnand %p20540_p8, %p20534_p5 }
  0x1a   :  { %20544 = shalt.err (!%p20541_p9)
}
  0x1b   :  { %s20721_s19 = smov 512   ;;  %s20722_s20 = smov 32  }
  0x1c   :  { %63 = dma.hbm_to_vmem [thread:$0]  %s21366_s3, 32768, %s58_s17, [#allocation9], %s20721_s19, %s20721_s19, %s20722_s20  }
  0x1d   :  { %s20723_s23 = smov [#allocation11]  }
  0x1e   :  { %s79_s24 = sshll.u32 %s20723_s23, 4  ;;  %s80_s24 = int_to_ptr.vmem [resolvable:$true] %s79_s24 }
  0x1f   :  { %s20553_s1 = scalar_lea.vmem %s80_s24, 131072  ;;  %p20558_p11 = scmp.lt.s32.totalorder %s80_s24, %s80_s24 }
  0x20   :  { %p20554_p10 = scmp.ne.s32.totalorder %s80_s24, %s20553_s1  ;;  %p20559_p12 = scmp.lt.s32.totalorder %s20553_s1, %s20553_s1 }
  0x22   :  { %p20560_p13 = por %p20559_p12, %p20558_p11 }
  0x24   :  { %p20561_p0 = pnand %p20560_p13, %p20554_p10 }
  0x26   :  { %20564 = shalt.err (!%p20561_p0)
}
  0x27   :  { %s20724_s25 = smov 1024   ;;  %s20725_s26 = smov 64  }
  0x28   :  { %85 = dma.hbm_to_vmem [thread:$0]  %s21368_s5, 131072, %s80_s24, [#allocation12], %s20724_s25, %s20724_s25, %s20725_s26  }
  0x29   :  { %s20726_s29 = smov [#allocation14]  }
  0x2a   :  { %s101_s30 = sshll.u32 %s20726_s29, 4  ;;  %s102_s30 = int_to_ptr.vmem [resolvable:$true] %s101_s30 }
  0x2b   :  { %s20573_s3 = scalar_lea.vmem %s102_s30, 114688  ;;  %p20578_p2 = scmp.lt.s32.totalorder %s102_s30, %s102_s30 }
  0x2c   :  { %p20574_p1 = scmp.ne.s32.totalorder %s102_s30, %s20573_s3  ;;  %p20579_p3 = scmp.lt.s32.totalorder %s20573_s3, %s20573_s3 }
  0x2e   :  { %p20580_p4 = por %p20579_p3, %p20578_p2 }
  0x30   :  { %p20581_p5 = pnand %p20580_p4, %p20574_p1 }
  0x32   :  { %20584 = shalt.err (!%p20581_p5)
}
  0x33   :  { %s20727_s10 = smov 448   ;;  %s20728_s11 = smov 28  }
  0x34   :  { %107 = dma.hbm_to_vmem [thread:$0]  %s21370_s7, 114688, %s102_s30, [#allocation15], %s20727_s10, %s20727_s10, %s20728_s11  }
  0x35   :  { %s20729_s14 = smov [#allocation2]   ;;  %s20730_s16 = smov [#allocation7]  }
  0x36   :  { %s26_s15 = sshll.u32 %s20729_s14, 4  ;;  %s48_s5 = sshll.u32 %s20730_s16, 4  ;;  %s27_s15 = int_to_ptr.vmem [resolvable:$true] %s26_s15  ;;  %s49_s5 = int_to_ptr.vmem [resolvable:$true] %s48_s5 }
  0x37   :  { %s20593_s17 = scalar_lea.vmem %s27_s15, 128  ;;  %p20598_p7 = scmp.lt.s32.totalorder %s27_s15, %s27_s15 }
  0x38   :  { %p20594_p6 = scmp.ne.s32.totalorder %s27_s15, %s20593_s17  ;;  %p20599_p8 = scmp.lt.s32.totalorder %s20593_s17, %s20593_s17 }
  0x3a   :  { %p20600_p9 = por %p20599_p8, %p20598_p7 }
  0x3c   :  { %p20601_p10 = pnand %p20600_p9, %p20594_p6 }
  0x3e   :  { %20604 = shalt.err (!%p20601_p10)
}
  0x3f   :  { %29 = dma.hbm_to_vmem [thread:$0]  %s21363_s0, 128, %s27_s15, [#allocation3]  }
  0x40   :  { %s20613_s20 = scalar_lea.vmem %s49_s5, 64  ;;  %p20618_p12 = scmp.lt.s32.totalorder %s49_s5, %s49_s5 }
  0x41   :  { %p20614_p11 = scmp.ne.s32.totalorder %s49_s5, %s20613_s20  ;;  %p20619_p13 = scmp.lt.s32.totalorder %s20613_s20, %s20613_s20 }
  0x43   :  { %p20620_p0 = por %p20619_p13, %p20618_p12 }
  0x45   :  { %p20621_p1 = pnand %p20620_p0, %p20614_p11 }
  0x47   :  { %20624 = shalt.err (!%p20621_p1)
}
  0x48   :  { %51 = dma.hbm_to_vmem [thread:$0]  %s21365_s2, 64, %s49_s5, [#allocation6]  }
  0x49   :  { %s20731_s22 = smov [#allocation10]   ;;  %s20732_s24 = smov [#allocation13]  }
  0x4a   :  { %s70_s23 = sshll.u32 %s20731_s22, 4  ;;  %s92_s1 = sshll.u32 %s20732_s24, 4  ;;  %s71_s23 = int_to_ptr.vmem [resolvable:$true] %s70_s23  ;;  %s93_s1 = int_to_ptr.vmem [resolvable:$true] %s92_s1 }
  0x4b   :  { %s20633_s25 = scalar_lea.vmem %s71_s23, 128  ;;  %p20638_p3 = scmp.lt.s32.totalorder %s71_s23, %s71_s23 }
  0x4c   :  { %p20634_p2 = scmp.ne.s32.totalorder %s71_s23, %s20633_s25  ;;  %p20639_p4 = scmp.lt.s32.totalorder %s20633_s25, %s20633_s25 }
  0x4e   :  { %p20640_p5 = por %p20639_p4, %p20638_p3 }
  0x50   :  { %p20641_p6 = pnand %p20640_p5, %p20634_p2 }
  0x52   :  { %20644 = shalt.err (!%p20641_p6)
}
  0x53   :  { %73 = dma.hbm_to_vmem [thread:$0]  %s21367_s4, 128, %s71_s23, [#allocation9]  }
  0x54   :  { %s20653_s27 = scalar_lea.vmem %s93_s1, 256  ;;  %p20658_p8 = scmp.lt.s32.totalorder %s93_s1, %s93_s1 }
  0x55   :  { %p20654_p7 = scmp.ne.s32.totalorder %s93_s1, %s20653_s27  ;;  %p20659_p9 = scmp.lt.s32.totalorder %s20653_s27, %s20653_s27 }
  0x57   :  { %p20660_p10 = por %p20659_p9, %p20658_p8 }
  0x59   :  { %p20661_p11 = pnand %p20660_p10, %p20654_p7 }
  0x5b   :  { %20664 = shalt.err (!%p20661_p11)
}
  0x5c   :  { %95 = dma.hbm_to_vmem [thread:$0]  %s21369_s6, 256, %s93_s1, [#allocation12]  }
  0x5d   :  { %s20733_s29 = smov [#allocation16]  }
  0x5e   :  { %s114_s30 = sshll.u32 %s20733_s29, 4  ;;  %s115_s30 = int_to_ptr.vmem [resolvable:$true] %s114_s30 }
  0x5f   :  { %s20673_s3 = scalar_lea.vmem %s115_s30, 112  ;;  %s20677_s10 = scalar_lea.vmem %s115_s30, 128 }
  0x60   :  { %p20674_p12 = scmp.ne.s32.totalorder %s115_s30, %s20673_s3  ;;  %p20678_p13 = scmp.lt.s32.totalorder %s115_s30, %s115_s30 }
  0x61   :  { %p20679_p0 = scmp.lt.s32.totalorder %s20677_s10, %s20673_s3 }
  0x63   :  { %p20680_p1 = por %p20679_p0, %p20678_p13 }
  0x65   :  { %p20681_p2 = pnand %p20680_p1, %p20674_p12 }
  0x67   :  { %20684 = shalt.err (!%p20681_p2)
}
  0x68   :  { %117 = dma.hbm_to_vmem [thread:$0]  %s21371_s8, 112, %s115_s30, [#allocation15]  }
  0x69   :  { %20705 = dma.done.wait [#allocation3], 128  }
  0x6a   :  { %20706 = vsyncadd [#allocation3], 4294967168 }
  0x6b   :  { %20707 = dma.done.wait [#allocation6], 1088  }
  0x6c   :  { %20708 = vsyncadd [#allocation6], 4294966208 }
  0x6d   :  { %20709 = dma.done.wait [#allocation9], 32896  }
  0x6e   :  { %20710 = vsyncadd [#allocation9], 4294934400 }
  0x6f   :  { %20711 = dma.done.wait [#allocation12], 131328  }
  0x70   :  { %20712 = vsyncadd [#allocation12], 4294835968 }
  0x71   :  { %20713 = dma.done.wait [#allocation15], 114800  }
  0x72   :  { %20714 = vsyncadd [#allocation15], 4294852496  ;;  %v20734_v0 = vmov 0   ;;  %v19193_v1 = vld [vmem:[#allocation5 + $0x24] ss:$16 sps:$4 sm:$0xff]   ;;  %v146_v9 = vld [vmem:[#allocation2] sm:$0xff] }
  0x73   :  { %254 = vmatprep.mubr.bf16.mxu0 %v20734_v0  ;;  %295 = vmatprep.mubr.bf16.mxu1 %v20734_v0  ;;  %v19195_v2 = vld [vmem:[#allocation5 + $0x2c] ss:$16 sps:$4 sm:$0xff]   ;;  %v19197_v3 = vld [vmem:[#allocation5 + $0x20] ss:$16 sps:$4 sm:$0xff]   ;;  %v19198_v4 = vld [vmem:[#allocation5 + $0x28] ss:$16 sps:$4 sm:$0xff]   ;;  %v147_v14 = vpack.c.bf16 %v146_v9, %v146_v9 }
  0x74   :  { %234 = vmatprep.subr.bf16.mxu0 %v19193_v1  ;;  %275 = vmatprep.subr.bf16.mxu1 %v19195_v2  ;;  %v19199_v5 = vld [vmem:[#allocation5 + $0x4] ss:$16 sps:$4 sm:$0xff]   ;;  %v19201_v6 = vld [vmem:[#allocation5 + $0xc] ss:$16 sps:$4 sm:$0xff]   ;;  %v19203_v7 = vld [vmem:[#allocation5] ss:$16 sps:$4 sm:$0xff]  }
  0x75   :  { %235 = vmatpush1.bf16.msra.mxu0 %v19197_v3  ;;  %276 = vmatpush1.bf16.msra.mxu1 %v19198_v4  ;;  %v19204_v8 = vld [vmem:[#allocation5 + $0x8] ss:$16 sps:$4 sm:$0xff]   ;;  %vm218_vm0 = vcmask 261120   ;;  %s20735_s6 = smov [#allocation17]  }
  0x76   :  { %236 = vmatprep.subr.bf16.mxu0 %v19199_v5  ;;  %v368_v10 = vld [vmem:[#allocation8 + $0x1c0] sm:$0xff]  ;;  %277 = vmatprep.subr.bf16.mxu1 %v19201_v6  ;;  %s16799_s8 = sshll.u32 %s20735_s6, 4  ;;  %s16800_s8 = int_to_ptr.vmem [resolvable:$true] %s16799_s8 }
  0x77   :  { %v372_v11 = vld [vmem:[#allocation8 + $0x1e0] sm:$0xff]  ;;  %s20685_s12 = scalar_lea.vmem %s16800_s8, 896  ;;  %p20690_p4 = scmp.lt.s32.totalorder %s16800_s8, %s16800_s8 }
  0x78   :  { %v496_v12 = vld [vmem:[#allocation8 + $0x5c0] sm:$0xff]  ;;  %v16879_v15 = vcombine.high %v368_v10, %v372_v11  ;;  %v16878_v20 = vcombine.low %v368_v10, %v372_v11  ;;  %p20686_p3 = scmp.ne.s32.totalorder %s16800_s8, %s20685_s12  ;;  %p20691_p5 = scmp.lt.s32.totalorder %s20685_s12, %s20685_s12 }
  0x79   :  { %v500_v13 = vld [vmem:[#allocation8 + $0x5e0] sm:$0xff]  ;;  %237 = vmatpush1.bf16.msra.mxu0 %v19203_v7  ;;  %278 = vmatpush1.bf16.msra.mxu1 %v19204_v8 }
  0x7a   :  { %v17007_v16 = vcombine.high %v496_v12, %v500_v13  ;;  %v360_v17 = vld [vmem:[#allocation8 + $0x180] sm:$0xff]  ;;  %v17006_v21 = vcombine.low %v496_v12, %v500_v13  ;;  %1890 = vmatprep.subr.bf16.mxu0 %v16879_v15  ;;  %p20692_p6 = por %p20691_p5, %p20690_p4 }
  0x7b   :  { %v364_v18 = vld [vmem:[#allocation8 + $0x1a0] sm:$0xff] }
  0x7c   :  { %v488_v19 = vld [vmem:[#allocation8 + $0x580] sm:$0xff]  ;;  %1931 = vmatprep.subr.bf16.mxu1 %v17007_v16  ;;  %v16871_v23 = vcombine.high %v360_v17, %v364_v18  ;;  %16820 = vmatmul.mubr.msk.bf16.vlgmr.msra.gmra.mxu0 %vm218_vm0, %v147_v14  ;;  %v16870_v29 = vcombine.low %v360_v17, %v364_v18  ;;  %p20693_p7 = pnand %p20692_p6, %p20686_p3 }
  0x7d   :  { %v492_v22 = vld [vmem:[#allocation8 + $0x5a0] sm:$0xff]  ;;  %16821 = vmatmul.mubr.msk.bf16.vlgmr.msra.gmra.mxu1 %vm218_vm0, %v147_v14  ;;  %1891 = vmatpush1.bf16.msra.mxu0 %v16878_v20 }
  0x7e   :  { %v16999_v24 = vcombine.high %v488_v19, %v492_v22  ;;  %v352_v25 = vld [vmem:[#allocation8 + $0x140] sm:$0xff]  ;;  %1932 = vmatpush1.bf16.msra.mxu1 %v17006_v21  ;;  %v16998_v30 = vcombine.low %v488_v19, %v492_v22  ;;  %1892 = vmatprep.subr.bf16.mxu0 %v16871_v23 }
  0x7f   :  { %v356_v26 = vld [vmem:[#allocation8 + $0x160] sm:$0xff] }
  0x80   :  { %v480_v27 = vld [vmem:[#allocation8 + $0x540] sm:$0xff]  ;;  %1933 = vmatprep.subr.bf16.mxu1 %v16999_v24  ;;  %v16863_v31 = vcombine.high %v352_v25, %v356_v26  ;;  %v16862_v37 = vcombine.low %v352_v25, %v356_v26 }
  0x81   :  { %v484_v28 = vld [vmem:[#allocation8 + $0x560] sm:$0xff]  ;;  %1893 = vmatpush1.bf16.msra.mxu0 %v16870_v29 }
  0x82   :  { %v16991_v32 = vcombine.high %v480_v27, %v484_v28  ;;  %v344_v33 = vld [vmem:[#allocation8 + $0x100] sm:$0xff]  ;;  %1934 = vmatpush1.bf16.msra.mxu1 %v16998_v30  ;;  %v16990_v38 = vcombine.low %v480_v27, %v484_v28  ;;  %1894 = vmatprep.subr.bf16.mxu0 %v16863_v31 }
  0x83   :  { %v348_v34 = vld [vmem:[#allocation8 + $0x120] sm:$0xff] }
  0x84   :  { %v472_v35 = vld [vmem:[#allocation8 + $0x500] sm:$0xff]  ;;  %1935 = vmatprep.subr.bf16.mxu1 %v16991_v32  ;;  %v16855_v39 = vcombine.high %v344_v33, %v348_v34  ;;  %v16854_v45 = vcombine.low %v344_v33, %v348_v34 }
  0x85   :  { %v476_v36 = vld [vmem:[#allocation8 + $0x520] sm:$0xff]  ;;  %1895 = vmatpush1.bf16.msra.mxu0 %v16862_v37 }
  0x86   :  { %v16983_v40 = vcombine.high %v472_v35, %v476_v36  ;;  %v336_v41 = vld [vmem:[#allocation8 + $0xc0] sm:$0xff]  ;;  %1936 = vmatpush1.bf16.msra.mxu1 %v16990_v38  ;;  %v16982_v46 = vcombine.low %v472_v35, %v476_v36  ;;  %1896 = vmatprep.subr.bf16.mxu0 %v16855_v39 }
  0x87   :  { %v340_v42 = vld [vmem:[#allocation8 + $0xe0] sm:$0xff] }
  0x88   :  { %v464_v43 = vld [vmem:[#allocation8 + $0x4c0] sm:$0xff]  ;;  %1937 = vmatprep.subr.bf16.mxu1 %v16983_v40  ;;  %v16847_v47 = vcombine.high %v336_v41, %v340_v42  ;;  %v16846_v53 = vcombine.low %v336_v41, %v340_v42 }
  0x89   :  { %v468_v44 = vld [vmem:[#allocation8 + $0x4e0] sm:$0xff]  ;;  %1897 = vmatpush1.bf16.msra.mxu0 %v16854_v45 }
  0x8a   :  { %v16975_v48 = vcombine.high %v464_v43, %v468_v44  ;;  %v328_v49 = vld [vmem:[#allocation8 + $0x80] sm:$0xff]  ;;  %1938 = vmatpush1.bf16.msra.mxu1 %v16982_v46  ;;  %v16974_v54 = vcombine.low %v464_v43, %v468_v44  ;;  %1898 = vmatprep.subr.bf16.mxu0 %v16847_v47 }
  0x8b   :  { %v332_v50 = vld [vmem:[#allocation8 + $0xa0] sm:$0xff] }
  0x8c   :  { %v456_v51 = vld [vmem:[#allocation8 + $0x480] sm:$0xff]  ;;  %1939 = vmatprep.subr.bf16.mxu1 %v16975_v48  ;;  %v16839_v59 = vcombine.high %v328_v49, %v332_v50  ;;  %v16838_v61 = vcombine.low %v328_v49, %v332_v50 }
  0x8d   :  { %v460_v52 = vld [vmem:[#allocation8 + $0x4a0] sm:$0xff]  ;;  %1899 = vmatpush1.bf16.msra.mxu0 %v16846_v53 }
  0x8e   :  { %v320_v55 = vld [vmem:[#allocation8 + $0x40] sm:$0xff]  ;;  %v16967_v60 = vcombine.high %v456_v51, %v460_v52  ;;  %1940 = vmatpush1.bf16.msra.mxu1 %v16974_v54  ;;  %v16966_v62 = vcombine.low %v456_v51, %v460_v52  ;;  %1900 = vmatprep.subr.bf16.mxu0 %v16839_v59 }
  0x8f   :  { %v324_v56 = vld [vmem:[#allocation8 + $0x60] sm:$0xff] }
  0x90   :  { %v448_v57 = vld [vmem:[#allocation8 + $0x440] sm:$0xff]  ;;  %1941 = vmatprep.subr.bf16.mxu1 %v16967_v60  ;;  %v16831_v3 = vcombine.high %v320_v55, %v324_v56  ;;  %v16830_v5 = vcombine.low %v320_v55, %v324_v56 }
  0x91   :  { %v452_v58 = vld [vmem:[#allocation8 + $0x460] sm:$0xff]  ;;  %1901 = vmatpush1.bf16.msra.mxu0 %v16838_v61 }
  0x92   :  { %v312_v63 = vld [vmem:[#allocation8] sm:$0xff]  ;;  %v16959_v4 = vcombine.high %v448_v57, %v452_v58  ;;  %1942 = vmatpush1.bf16.msra.mxu1 %v16966_v62  ;;  %v16958_v6 = vcombine.low %v448_v57, %v452_v58  ;;  %1902 = vmatprep.subr.bf16.mxu0 %v16831_v3 }
  0x93   :  { %v316_v0 = vld [vmem:[#allocation8 + $0x20] sm:$0xff] }
  0x94   :  { %v440_v1 = vld [vmem:[#allocation8 + $0x400] sm:$0xff]  ;;  %1943 = vmatprep.subr.bf16.mxu1 %v16959_v4  ;;  %v16823_v11 = vcombine.high %v312_v63, %v316_v0  ;;  %v16822_v13 = vcombine.low %v312_v63, %v316_v0 }
  0x95   :  { %v444_v2 = vld [vmem:[#allocation8 + $0x420] sm:$0xff]  ;;  %1903 = vmatpush1.bf16.msra.mxu0 %v16830_v5 }
  0x96   :  { %v432_v7 = vld [vmem:[#allocation8 + $0x3c0] sm:$0xff]  ;;  %v16951_v12 = vcombine.high %v440_v1, %v444_v2  ;;  %1944 = vmatpush1.bf16.msra.mxu1 %v16958_v6  ;;  %v16950_v14 = vcombine.low %v440_v1, %v444_v2  ;;  %1904 = vmatprep.subr.bf16.mxu0 %v16823_v11  ;;  %v369_v11 = vld [vmem:[#allocation8 + $0x1c8] sm:$0xff] }
  0x97   :  { %v436_v8 = vld [vmem:[#allocation8 + $0x3e0] sm:$0xff] }
  0x98   :  { %v560_v9 = vld [vmem:[#allocation8 + $0x7c0] sm:$0xff]  ;;  %1945 = vmatprep.subr.bf16.mxu1 %v16951_v12  ;;  %v16943_v19 = vcombine.high %v432_v7, %v436_v8  ;;  %v16942_v21 = vcombine.low %v432_v7, %v436_v8  ;;  %v373_v12 = vld [vmem:[#allocation8 + $0x1e8] sm:$0xff] }
  0x99   :  { %v564_v10 = vld [vmem:[#allocation8 + $0x7e0] sm:$0xff]  ;;  %1905 = vmatpush1.bf16.msra.mxu0 %v16822_v13  ;;  %v497_v13 = vld [vmem:[#allocation8 + $0x5c8] sm:$0xff] }
  0x9a   :  { %v424_v15 = vld [vmem:[#allocation8 + $0x380] sm:$0xff]  ;;  %v17071_v20 = vcombine.high %v560_v9, %v564_v10  ;;  %1946 = vmatpush1.bf16.msra.mxu1 %v16950_v14  ;;  %v17070_v22 = vcombine.low %v560_v9, %v564_v10  ;;  %1906 = vmatprep.subr.bf16.mxu0 %v16943_v19  ;;  %v16881_v14 = vcombine.high %v369_v11, %v373_v12  ;;  %v158_v19 = vlaneseq }
  0x9b   :  { %v428_v16 = vld [vmem:[#allocation8 + $0x3a0] sm:$0xff] }
  0x9c   :  { %v552_v17 = vld [vmem:[#allocation8 + $0x780] sm:$0xff]  ;;  %1947 = vmatprep.subr.bf16.mxu1 %v17071_v20  ;;  %v16935_v27 = vcombine.high %v424_v15, %v428_v16  ;;  %v16934_v29 = vcombine.low %v424_v15, %v428_v16  ;;  %v501_v15 = vld [vmem:[#allocation8 + $0x5e8] sm:$0xff]  ;;  %v16880_v16 = vcombine.low %v369_v11, %v373_v12  ;;  %v20813_v20 = vshrl.u32 %v158_v19, 7 }
  0x9d   :  { %v556_v18 = vld [vmem:[#allocation8 + $0x7a0] sm:$0xff]  ;;  %1907 = vmatpush2.bf16.msra.mxu0 %v16942_v21  ;;  %v156_v21 = vld [vmem:[#allocation7] sm:$0xf]  ;;  %v469_v11 = vld [vmem:[#allocation8 + $0x4e8] sm:$0xff] }
  0x9e   :  { %v416_v23 = vld [vmem:[#allocation8 + $0x340] sm:$0xff]  ;;  %v17063_v28 = vcombine.high %v552_v17, %v556_v18  ;;  %1948 = vmatpush2.bf16.msra.mxu1 %v17070_v22  ;;  %v17062_v30 = vcombine.low %v552_v17, %v556_v18  ;;  %1908 = vmatprep.subr.bf16.mxu0 %v16935_v27  ;;  %v17008_v17 = vcombine.low %v497_v13, %v501_v15  ;;  %v20816_v22 = vsub.s32 0, %v20813_v20  ;;  %v461_v19 = vld [vmem:[#allocation8 + $0x4a8] sm:$0xff] }
  0x9f   :  { %v420_v24 = vld [vmem:[#allocation8 + $0x360] sm:$0xff]  ;;  %v17009_v18 = vcombine.high %v497_v13, %v501_v15 }
  0xa0   :  { %v544_v25 = vld [vmem:[#allocation8 + $0x740] sm:$0xff]  ;;  %1949 = vmatprep.subr.bf16.mxu1 %v17063_v28  ;;  %v16927_v35 = vcombine.high %v416_v23, %v420_v24  ;;  %v16926_v37 = vcombine.low %v416_v23, %v420_v24  ;;  %v20819_v23 = vsub.s32 2, %v20813_v20  ;;  %v20822_v24 = vsub.s32 1, %v20813_v20 }
  0xa1   :  { %v548_v26 = vld [vmem:[#allocation8 + $0x760] sm:$0xff]  ;;  %1909 = vmatpush2.bf16.msra.mxu0 %v16934_v29 }
  0xa2   :  { %v408_v31 = vld [vmem:[#allocation8 + $0x300] sm:$0xff]  ;;  %v17055_v36 = vcombine.high %v544_v25, %v548_v26  ;;  %1950 = vmatpush2.bf16.msra.mxu1 %v17062_v30  ;;  %v17054_v38 = vcombine.low %v544_v25, %v548_v26  ;;  %1910 = vmatprep.subr.bf16.mxu0 %v16927_v35  ;;  %v20825_v25 = vsub.s32 3, %v20813_v20  ;;  %v161_v26 = vrot.slane %v156_v21, %v20816_v22 }
  0xa3   :  { %v412_v32 = vld [vmem:[#allocation8 + $0x320] sm:$0xff]  ;;  %v169_v27 = vrot.slane %v156_v21, %v20819_v23  ;;  %v165_v28 = vrot.slane %v156_v21, %v20822_v24 }
  0xa4   :  { %v536_v33 = vld [vmem:[#allocation8 + $0x700] sm:$0xff]  ;;  %1951 = vmatprep.subr.bf16.mxu1 %v17055_v36  ;;  %v16919_v43 = vcombine.high %v408_v31, %v412_v32  ;;  %v16918_v45 = vcombine.low %v408_v31, %v412_v32  ;;  %v173_v29 = vrot.slane %v156_v21, %v20825_v25 }
  0xa5   :  { %v540_v34 = vld [vmem:[#allocation8 + $0x720] sm:$0xff]  ;;  %1911 = vmatpush2.bf16.msra.mxu0 %v16926_v37 }
  0xa6   :  { %v400_v39 = vld [vmem:[#allocation8 + $0x2c0] sm:$0xff]  ;;  %v17047_v44 = vcombine.high %v536_v33, %v540_v34  ;;  %1952 = vmatpush2.bf16.msra.mxu1 %v17054_v38  ;;  %v17046_v46 = vcombine.low %v536_v33, %v540_v34  ;;  %1912 = vmatprep.subr.bf16.mxu0 %v16919_v43  ;;  %v365_v43 = vld [vmem:[#allocation8 + $0x1a8] sm:$0xff] }
  0xa7   :  { %v404_v40 = vld [vmem:[#allocation8 + $0x2e0] sm:$0xff] }
  0xa8   :  { %v528_v41 = vld [vmem:[#allocation8 + $0x6c0] sm:$0xff]  ;;  %1953 = vmatprep.subr.bf16.mxu1 %v17047_v44  ;;  %v16911_v51 = vcombine.high %v400_v39, %v404_v40  ;;  %v16910_v53 = vcombine.low %v400_v39, %v404_v40  ;;  %v489_v44 = vld [vmem:[#allocation8 + $0x588] sm:$0xff] }
  0xa9   :  { %v532_v42 = vld [vmem:[#allocation8 + $0x6e0] sm:$0xff]  ;;  %1913 = vmatpush2.bf16.msra.mxu0 %v16918_v45 }
  0xaa   :  { %v392_v47 = vld [vmem:[#allocation8 + $0x280] sm:$0xff]  ;;  %v17039_v52 = vcombine.high %v528_v41, %v532_v42  ;;  %1954 = vmatpush2.bf16.msra.mxu1 %v17046_v46  ;;  %v17038_v54 = vcombine.low %v528_v41, %v532_v42  ;;  %1914 = vmatprep.subr.bf16.mxu0 %v16911_v51  ;;  %v361_v42 = vld [vmem:[#allocation8 + $0x188] sm:$0xff] }
  0xab   :  { %v396_v48 = vld [vmem:[#allocation8 + $0x2a0] sm:$0xff] }
  0xac   :  { %v520_v49 = vld [vmem:[#allocation8 + $0x680] sm:$0xff]  ;;  %1955 = vmatprep.subr.bf16.mxu1 %v17039_v52  ;;  %v16903_v55 = vcombine.high %v392_v47, %v396_v48  ;;  %v16902_v57 = vcombine.low %v392_v47, %v396_v48  ;;  %v493_v47 = vld [vmem:[#allocation8 + $0x5a8] sm:$0xff] }
  0xad   :  { %v524_v50 = vld [vmem:[#allocation8 + $0x6a0] sm:$0xff]  ;;  %1915 = vmatpush2.bf16.msra.mxu0 %v16910_v53 }
  0xae   :  { %v17031_v56 = vcombine.high %v520_v49, %v524_v50  ;;  %1956 = vmatpush2.bf16.msra.mxu1 %v17038_v54  ;;  %v17030_v58 = vcombine.low %v520_v49, %v524_v50  ;;  %1916 = vmatprep.subr.bf16.mxu0 %v16903_v55  ;;  %v384_v59 = vld [vmem:[#allocation8 + $0x240] sm:$0xff]  ;;  %v353_v54 = vld [vmem:[#allocation8 + $0x148] sm:$0xff] }
  0xaf   :  { %v388_v60 = vld [vmem:[#allocation8 + $0x260] sm:$0xff]  ;;  %v357_v55 = vld [vmem:[#allocation8 + $0x168] sm:$0xff] }
  0xb0   :  { %1957 = vmatprep.subr.bf16.mxu1 %v17031_v56  ;;  %v512_v61 = vld [vmem:[#allocation8 + $0x640] sm:$0xff]  ;;  %v16895_v62 = vcombine.high %v384_v59, %v388_v60  ;;  %v16894_v0 = vcombine.low %v384_v59, %v388_v60  ;;  %v481_v56 = vld [vmem:[#allocation8 + $0x548] sm:$0xff]  ;;  %v16872_v60 = vcombine.low %v361_v42, %v365_v43 }
  0xb1   :  { %1917 = vmatpush2.bf16.msra.mxu0 %v16902_v57  ;;  %v516_v63 = vld [vmem:[#allocation8 + $0x660] sm:$0xff]  ;;  %v16873_v57 = vcombine.high %v361_v42, %v365_v43  ;;  %v485_v59 = vld [vmem:[#allocation8 + $0x568] sm:$0xff] }
  0xb2   :  { %1958 = vmatpush2.bf16.msra.mxu1 %v17030_v58  ;;  %v17022_v1 = vcombine.low %v512_v61, %v516_v63  ;;  %v17023_v2 = vcombine.high %v512_v61, %v516_v63  ;;  %1918 = vmatprep.subr.bf16.mxu0 %v16895_v62  ;;  %v376_v3 = vld [vmem:[#allocation8 + $0x200] sm:$0xff]  ;;  %v17001_v58 = vcombine.high %v489_v44, %v493_v47  ;;  %v345_v62 = vld [vmem:[#allocation8 + $0x108] sm:$0xff] }
  0xb3   :  { %v380_v4 = vld [vmem:[#allocation8 + $0x220] sm:$0xff]  ;;  %v17000_v61 = vcombine.low %v489_v44, %v493_v47  ;;  %v16865_v63 = vcombine.high %v353_v54, %v357_v55  ;;  %v561_v47 = vld [vmem:[#allocation8 + $0x7c8] sm:$0xff] }
  0xb4   :  { %1959 = vmatprep.subr.bf16.mxu1 %v17023_v2  ;;  %v504_v5 = vld [vmem:[#allocation8 + $0x600] sm:$0xff]  ;;  %v16887_v6 = vcombine.high %v376_v3, %v380_v4  ;;  %v16886_v8 = vcombine.low %v376_v3, %v380_v4  ;;  %v473_v2 = vld [vmem:[#allocation8 + $0x508] sm:$0xff]  ;;  %v16864_v4 = vcombine.low %v353_v54, %v357_v55 }
  0xb5   :  { %1919 = vmatpush2.bf16.msra.mxu0 %v16894_v0  ;;  %v508_v7 = vld [vmem:[#allocation8 + $0x620] sm:$0xff]  ;;  %v16993_v0 = vcombine.high %v481_v56, %v485_v59  ;;  %v477_v3 = vld [vmem:[#allocation8 + $0x528] sm:$0xff] }
  0xb6   :  { %1960 = vmatpush2.bf16.msra.mxu1 %v17022_v1  ;;  %v17014_v9 = vcombine.low %v504_v5, %v508_v7  ;;  %v17015_v10 = vcombine.high %v504_v5, %v508_v7  ;;  %1920 = vmatprep.subr.bf16.mxu0 %v16887_v6  ;;  %v349_v1 = vld [vmem:[#allocation8 + $0x128] sm:$0xff]  ;;  %v16992_v5 = vcombine.low %v481_v56, %v485_v59 }
  0xb7   :  { %v16857_v6 = vcombine.high %v345_v62, %v349_v1  ;;  %v16985_v7 = vcombine.high %v473_v2, %v477_v3  ;;  %v16856_v12 = vcombine.low %v345_v62, %v349_v1  ;;  %v16984_v13 = vcombine.low %v473_v2, %v477_v3  ;;  %v553_v59 = vld [vmem:[#allocation8 + $0x788] sm:$0xff] }
  0xb8   :  { %1961 = vmatprep.subr.bf16.mxu1 %v17015_v10  ;;  %v465_v10 = vld [vmem:[#allocation8 + $0x4c8] sm:$0xff] }
  0xb9   :  { %1921 = vmatpush2.bf16.msra.mxu0 %v16886_v8  ;;  %v337_v8 = vld [vmem:[#allocation8 + $0xc8] sm:$0xff]  ;;  %v16977_v15 = vcombine.high %v465_v10, %v469_v11 }
  0xba   :  { %1962 = vmatpush2.bf16.msra.mxu1 %v17014_v9  ;;  %1972 = vmatprep.subr.bf16.mxu0 %v16881_v14  ;;  %v341_v9 = vld [vmem:[#allocation8 + $0xe8] sm:$0xff] }
  0xbb   :  { %2013 = vmatprep.subr.bf16.mxu1 %v17009_v18  ;;  %v16849_v14 = vcombine.high %v337_v8, %v341_v9  ;;  %v457_v18 = vld [vmem:[#allocation8 + $0x488] sm:$0xff]  ;;  %v16848_v21 = vcombine.low %v337_v8, %v341_v9 }
  0xbc   :  { %v417_v1 = vld [vmem:[#allocation8 + $0x348] sm:$0xff] }
  0xbd   :  { %v421_v2 = vld [vmem:[#allocation8 + $0x368] sm:$0xff] }
  0xbe   :  { %v545_v3 = vld [vmem:[#allocation8 + $0x748] sm:$0xff] }
  0xbf   :  { %v409_v9 = vld [vmem:[#allocation8 + $0x308] sm:$0xff] }
 0x13c   :  { %v256_v30 = vpop.f32.mrf.mxu0 }
 0x13d   :  { %v297_v31 = vpop.f32.mrf.mxu1  ;;  %v257_v32 = vadd.f32 %v256_v30, %v161_v26  ;;  %v16976_v26 = vcombine.low %v465_v10, %v469_v11  ;;  %v325_v30 = vld [vmem:[#allocation8 + $0x68] sm:$0xff] }
 0x13e   :  { %v298_v33 = vadd.f32 %v297_v31, %v169_v27  ;;  %v258_v34 = vpop.f32.mrf.mxu0  ;;  %v449_v31 = vld [vmem:[#allocation8 + $0x448] sm:$0xff] }
 0x13f   :  { %v299_v35 = vpop.f32.mrf.mxu1  ;;  %v259_v37 = vadd.f32 %v258_v34, %v165_v28  ;;  %v304_v39 = vmax.f32 %v257_v32, 0.0  ;;  %v16969_v28 = vcombine.high %v457_v18, %v461_v19  ;;  %v453_v32 = vld [vmem:[#allocation8 + $0x468] sm:$0xff]  ;;  %v16968_v34 = vcombine.low %v457_v18, %v461_v19 }
 0x140   :  { %v306_v36 = vmax.f32 %v298_v33, 0.0  ;;  %v300_v38 = vadd.f32 %v299_v35, %v173_v29  ;;  %v260_v40 = vpop.f32.mrf.mxu0  ;;  %v321_v29 = vld [vmem:[#allocation8 + $0x48] sm:$0xff]  ;;  %v16960_v42 = vcombine.low %v449_v31, %v453_v32 }
 0x141   :  { %v301_v41 = vpop.f32.mrf.mxu1  ;;  %v305_v45 = vmax.f32 %v259_v37, 0.0  ;;  %v20837_v53 = vpack.c.bf16 %v304_v39, %v304_v39  ;;  %v16833_v35 = vcombine.high %v321_v29, %v325_v30  ;;  %v313_v37 = vld [vmem:[#allocation8 + $0x8] sm:$0xff] }
 0x142   :  { %v307_v46 = vmax.f32 %v300_v38, 0.0  ;;  %v20831_v48 = vpack.c.bf16 %v306_v36, %v306_v36  ;;  %v261_v49 = vpop.f32.mrf.mxu0  ;;  %v16961_v36 = vcombine.high %v449_v31, %v453_v32  ;;  %v317_v38 = vld [vmem:[#allocation8 + $0x28] sm:$0xff]  ;;  %v16832_v41 = vcombine.low %v321_v29, %v325_v30 }
 0x143   :  { %v302_v50 = vpop.f32.mrf.mxu1  ;;  %v20833_v51 = vpack.c.bf16 %v305_v45, %v305_v45  ;;  %v441_v39 = vld [vmem:[#allocation8 + $0x408] sm:$0xff]  ;;  %v16825_v43 = vcombine.high %v313_v37, %v317_v38 }
 0x144   :  { %v20835_v52 = vpack.c.bf16 %v307_v46, %v307_v46  ;;  %v445_v40 = vld [vmem:[#allocation8 + $0x428] sm:$0xff]  ;;  %v16824_v50 = vcombine.low %v313_v37, %v317_v38 }
 0x145   :  { %1922 = vmatprep.mubr.bf16.mxu0 %v20833_v51  ;;  %v16953_v44 = vcombine.high %v441_v39, %v445_v40  ;;  %v433_v45 = vld [vmem:[#allocation8 + $0x3c8] sm:$0xff]  ;;  %v16952_v54 = vcombine.low %v441_v39, %v445_v40 }
 0x146   :  { %1963 = vmatprep.mubr.bf16.mxu1 %v20835_v52  ;;  %1923 = vmatmul.mubr.bf16.vlgmr.msra.gmra.mxu0 %v20837_v53  ;;  %v437_v46 = vld [vmem:[#allocation8 + $0x3e8] sm:$0xff] }
 0x147   :  { %1964 = vmatmul.mubr.bf16.vlgmr.msra.gmra.mxu1 %v20831_v48  ;;  %1973 = vmatpush1.bf16.msra.mxu0 %v16880_v16  ;;  %v329_v16 = vld [vmem:[#allocation8 + $0x88] sm:$0xff]  ;;  %v16945_v55 = vcombine.high %v433_v45, %v437_v46 }
 0x148   :  { %2014 = vmatpush1.bf16.msra.mxu1 %v17008_v17  ;;  %2004 = vmatprep.mubr.bf16.mxu0 %v20833_v51  ;;  %v333_v17 = vld [vmem:[#allocation8 + $0xa8] sm:$0xff] }
 0x149   :  { %2045 = vmatprep.mubr.bf16.mxu1 %v20835_v52  ;;  %1974 = vmatprep.subr.bf16.mxu0 %v16873_v57  ;;  %v16841_v27 = vcombine.high %v329_v16, %v333_v17  ;;  %v16840_v33 = vcombine.low %v329_v16, %v333_v17  ;;  %v565_v49 = vld [vmem:[#allocation8 + $0x7e8] sm:$0xff] }
 0x14a   :  { %2015 = vmatprep.subr.bf16.mxu1 %v17001_v58  ;;  %v17073_v56 = vcombine.high %v561_v47, %v565_v49  ;;  %v425_v57 = vld [vmem:[#allocation8 + $0x388] sm:$0xff]  ;;  %v17072_v62 = vcombine.low %v561_v47, %v565_v49 }
 0x14b   :  { %1975 = vmatpush1.bf16.msra.mxu0 %v16872_v60  ;;  %v429_v58 = vld [vmem:[#allocation8 + $0x3a8] sm:$0xff] }
 0x14c   :  { %2016 = vmatpush1.bf16.msra.mxu1 %v17000_v61  ;;  %1976 = vmatprep.subr.bf16.mxu0 %v16865_v63  ;;  %v557_v60 = vld [vmem:[#allocation8 + $0x7a8] sm:$0xff]  ;;  %v16944_v61 = vcombine.low %v433_v45, %v437_v46  ;;  %v16937_v63 = vcombine.high %v425_v57, %v429_v58 }
 0x14d   :  { %2017 = vmatprep.subr.bf16.mxu1 %v16993_v0  ;;  %v17065_v0 = vcombine.high %v553_v59, %v557_v60  ;;  %v413_v10 = vld [vmem:[#allocation8 + $0x328] sm:$0xff] }
 0x14e   :  { %v537_v11 = vld [vmem:[#allocation8 + $0x708] sm:$0xff] }
 0x14f   :  { %1977 = vmatpush1.bf16.msra.mxu0 %v16864_v4  ;;  %v549_v4 = vld [vmem:[#allocation8 + $0x768] sm:$0xff] }
 0x150   :  { %2018 = vmatpush1.bf16.msra.mxu1 %v16992_v5  ;;  %1978 = vmatprep.subr.bf16.mxu0 %v16857_v6  ;;  %v16936_v5 = vcombine.low %v425_v57, %v429_v58  ;;  %v17064_v6 = vcombine.low %v553_v59, %v557_v60  ;;  %v17057_v8 = vcombine.high %v545_v3, %v549_v4  ;;  %v401_v17 = vld [vmem:[#allocation8 + $0x2c8] sm:$0xff]  ;;  %v370_v58 = vld [vmem:[#allocation8 + $0x1d0] sm:$0xff] }
 0x151   :  { %2019 = vmatprep.subr.bf16.mxu1 %v16985_v7  ;;  %v16929_v7 = vcombine.high %v417_v1, %v421_v2  ;;  %v405_v18 = vld [vmem:[#allocation8 + $0x2e8] sm:$0xff]  ;;  %v374_v59 = vld [vmem:[#allocation8 + $0x1f0] sm:$0xff] }
 0x152   :  { %v529_v19 = vld [vmem:[#allocation8 + $0x6c8] sm:$0xff]  ;;  %v498_v60 = vld [vmem:[#allocation8 + $0x5d0] sm:$0xff] }
 0x153   :  { %1979 = vmatpush1.bf16.msra.mxu0 %v16856_v12  ;;  %v541_v12 = vld [vmem:[#allocation8 + $0x728] sm:$0xff] }
 0x154   :  { %2020 = vmatpush1.bf16.msra.mxu1 %v16984_v13  ;;  %1980 = vmatprep.subr.bf16.mxu0 %v16849_v14  ;;  %v16928_v13 = vcombine.low %v417_v1, %v421_v2  ;;  %v17056_v14 = vcombine.low %v545_v3, %v549_v4  ;;  %v17049_v16 = vcombine.high %v537_v11, %v541_v12  ;;  %v393_v30 = vld [vmem:[#allocation8 + $0x288] sm:$0xff]  ;;  %v362_v2 = vld [vmem:[#allocation8 + $0x190] sm:$0xff] }
 0x155   :  { %2021 = vmatprep.subr.bf16.mxu1 %v16977_v15  ;;  %v16921_v15 = vcombine.high %v409_v9, %v413_v10  ;;  %v397_v31 = vld [vmem:[#allocation8 + $0x2a8] sm:$0xff]  ;;  %v366_v3 = vld [vmem:[#allocation8 + $0x1b0] sm:$0xff] }
 0x156   :  { %v521_v32 = vld [vmem:[#allocation8 + $0x688] sm:$0xff]  ;;  %v490_v4 = vld [vmem:[#allocation8 + $0x590] sm:$0xff] }
 0x157   :  { %1981 = vmatpush1.bf16.msra.mxu0 %v16848_v21  ;;  %v533_v21 = vld [vmem:[#allocation8 + $0x6e8] sm:$0xff] }
 0x158   :  { %2022 = vmatpush1.bf16.msra.mxu1 %v16976_v26  ;;  %1982 = vmatprep.subr.bf16.mxu0 %v16841_v27  ;;  %v16920_v26 = vcombine.low %v409_v9, %v413_v10  ;;  %v17048_v27 = vcombine.low %v537_v11, %v541_v12  ;;  %v17041_v29 = vcombine.high %v529_v19, %v533_v21  ;;  %v385_v38 = vld [vmem:[#allocation8 + $0x248] sm:$0xff]  ;;  %v482_v12 = vld [vmem:[#allocation8 + $0x550] sm:$0xff] }
 0x159   :  { %2023 = vmatprep.subr.bf16.mxu1 %v16969_v28  ;;  %v16913_v28 = vcombine.high %v401_v17, %v405_v18  ;;  %v389_v39 = vld [vmem:[#allocation8 + $0x268] sm:$0xff]  ;;  %v16875_v10 = vcombine.high %v362_v2, %v366_v3 }
 0x15a   :  { %v513_v40 = vld [vmem:[#allocation8 + $0x648] sm:$0xff] }
 0x15b   :  { %1983 = vmatpush1.bf16.msra.mxu0 %v16840_v33  ;;  %v525_v33 = vld [vmem:[#allocation8 + $0x6a8] sm:$0xff] }
 0x15c   :  { %2024 = vmatpush1.bf16.msra.mxu1 %v16968_v34  ;;  %1984 = vmatprep.subr.bf16.mxu0 %v16833_v35  ;;  %v16912_v34 = vcombine.low %v401_v17, %v405_v18  ;;  %v17040_v35 = vcombine.low %v529_v19, %v533_v21  ;;  %v17033_v37 = vcombine.high %v521_v32, %v525_v33  ;;  %v377_v46 = vld [vmem:[#allocation8 + $0x208] sm:$0xff]  ;;  %v474_v21 = vld [vmem:[#allocation8 + $0x510] sm:$0xff] }
 0x15d   :  { %2025 = vmatprep.subr.bf16.mxu1 %v16961_v36  ;;  %v16905_v36 = vcombine.high %v393_v30, %v397_v31  ;;  %v381_v47 = vld [vmem:[#allocation8 + $0x228] sm:$0xff] }
 0x15e   :  { %v505_v49 = vld [vmem:[#allocation8 + $0x608] sm:$0xff] }
 0x15f   :  { %1985 = vmatpush1.bf16.msra.mxu0 %v16832_v41  ;;  %v517_v41 = vld [vmem:[#allocation8 + $0x668] sm:$0xff] }
 0x160   :  { %2026 = vmatpush1.bf16.msra.mxu1 %v16960_v42  ;;  %1986 = vmatprep.subr.bf16.mxu0 %v16825_v43  ;;  %v16904_v42 = vcombine.low %v393_v30, %v397_v31  ;;  %v17032_v43 = vcombine.low %v521_v32, %v525_v33  ;;  %v17025_v45 = vcombine.high %v513_v40, %v517_v41  ;;  %v466_v33 = vld [vmem:[#allocation8 + $0x4d0] sm:$0xff] }
 0x161   :  { %2027 = vmatprep.subr.bf16.mxu1 %v16953_v44  ;;  %v16897_v44 = vcombine.high %v385_v38, %v389_v39 }
 0x163   :  { %1987 = vmatpush1.bf16.msra.mxu0 %v16824_v50  ;;  %v509_v50 = vld [vmem:[#allocation8 + $0x628] sm:$0xff] }
 0x164   :  { %2028 = vmatpush1.bf16.msra.mxu1 %v16952_v54  ;;  %1988 = vmatprep.subr.bf16.mxu0 %v16945_v55  ;;  %v16896_v54 = vcombine.low %v385_v38, %v389_v39  ;;  %v17024_v55 = vcombine.low %v513_v40, %v517_v41  ;;  %v17017_v57 = vcombine.high %v505_v49, %v509_v50  ;;  %v458_v41 = vld [vmem:[#allocation8 + $0x490] sm:$0xff] }
 0x165   :  { %2029 = vmatprep.subr.bf16.mxu1 %v17073_v56  ;;  %v16889_v56 = vcombine.high %v377_v46, %v381_v47 }
 0x167   :  { %1989 = vmatpush2.bf16.msra.mxu0 %v16944_v61  ;;  %v502_v61 = vld [vmem:[#allocation8 + $0x5f0] sm:$0xff] }
 0x168   :  { %2030 = vmatpush2.bf16.msra.mxu1 %v17072_v62  ;;  %1990 = vmatprep.subr.bf16.mxu0 %v16937_v63  ;;  %v16888_v62 = vcombine.low %v377_v46, %v381_v47  ;;  %v17016_v63 = vcombine.low %v505_v49, %v509_v50  ;;  %v17011_v1 = vcombine.high %v498_v60, %v502_v61  ;;  %v450_v49 = vld [vmem:[#allocation8 + $0x450] sm:$0xff] }
 0x169   :  { %2031 = vmatprep.subr.bf16.mxu1 %v17065_v0  ;;  %v16883_v0 = vcombine.high %v370_v58, %v374_v59  ;;  %v17010_v9 = vcombine.low %v498_v60, %v502_v61  ;;  %v454_v50 = vld [vmem:[#allocation8 + $0x470] sm:$0xff] }
 0x16a   :  { %v442_v60 = vld [vmem:[#allocation8 + $0x410] sm:$0xff] }
 0x16b   :  { %1991 = vmatpush2.bf16.msra.mxu0 %v16936_v5  ;;  %v494_v5 = vld [vmem:[#allocation8 + $0x5b0] sm:$0xff] }
 0x16c   :  { %2032 = vmatpush2.bf16.msra.mxu1 %v17064_v6  ;;  %1992 = vmatprep.subr.bf16.mxu0 %v16929_v7  ;;  %v16882_v6 = vcombine.low %v370_v58, %v374_v59  ;;  %v354_v7 = vld [vmem:[#allocation8 + $0x150] sm:$0xff]  ;;  %v17003_v11 = vcombine.high %v490_v4, %v494_v5  ;;  %v17002_v17 = vcombine.low %v490_v4, %v494_v5 }
 0x16d   :  { %2033 = vmatprep.subr.bf16.mxu1 %v17057_v8  ;;  %v358_v8 = vld [vmem:[#allocation8 + $0x170] sm:$0xff] }
 0x16e   :  { %v16867_v18 = vcombine.high %v354_v7, %v358_v8  ;;  %v446_v61 = vld [vmem:[#allocation8 + $0x430] sm:$0xff] }
 0x16f   :  { %1993 = vmatpush2.bf16.msra.mxu0 %v16928_v13  ;;  %v486_v13 = vld [vmem:[#allocation8 + $0x570] sm:$0xff] }
 0x170   :  { %2034 = vmatpush2.bf16.msra.mxu1 %v17056_v14  ;;  %1994 = vmatprep.subr.bf16.mxu0 %v16921_v15  ;;  %v16874_v14 = vcombine.low %v362_v2, %v366_v3  ;;  %v346_v15 = vld [vmem:[#allocation8 + $0x110] sm:$0xff]  ;;  %v16995_v19 = vcombine.high %v482_v12, %v486_v13  ;;  %v16994_v30 = vcombine.low %v482_v12, %v486_v13 }
 0x171   :  { %2035 = vmatprep.subr.bf16.mxu1 %v17049_v16  ;;  %v350_v16 = vld [vmem:[#allocation8 + $0x130] sm:$0xff]  ;;  %v16962_v2 = vcombine.low %v450_v49, %v454_v50 }
 0x172   :  { %v16859_v31 = vcombine.high %v346_v15, %v350_v16  ;;  %v562_v4 = vld [vmem:[#allocation8 + $0x7d0] sm:$0xff] }
 0x173   :  { %1995 = vmatpush2.bf16.msra.mxu0 %v16920_v26  ;;  %v478_v26 = vld [vmem:[#allocation8 + $0x530] sm:$0xff] }
 0x174   :  { %2036 = vmatpush2.bf16.msra.mxu1 %v17048_v27  ;;  %1996 = vmatprep.subr.bf16.mxu0 %v16913_v28  ;;  %v16866_v27 = vcombine.low %v354_v7, %v358_v8  ;;  %v338_v28 = vld [vmem:[#allocation8 + $0xd0] sm:$0xff]  ;;  %v16987_v32 = vcombine.high %v474_v21, %v478_v26  ;;  %v16986_v38 = vcombine.low %v474_v21, %v478_v26 }
 0x175   :  { %2037 = vmatprep.subr.bf16.mxu1 %v17041_v29  ;;  %v342_v29 = vld [vmem:[#allocation8 + $0xf0] sm:$0xff] }
 0x176   :  { %v16851_v39 = vcombine.high %v338_v28, %v342_v29  ;;  %v566_v5 = vld [vmem:[#allocation8 + $0x7f0] sm:$0xff] }
 0x177   :  { %1997 = vmatpush2.bf16.msra.mxu0 %v16912_v34  ;;  %v470_v34 = vld [vmem:[#allocation8 + $0x4f0] sm:$0xff] }
 0x178   :  { %2038 = vmatpush2.bf16.msra.mxu1 %v17040_v35  ;;  %1998 = vmatprep.subr.bf16.mxu0 %v16905_v36  ;;  %v16858_v35 = vcombine.low %v346_v15, %v350_v16  ;;  %v330_v36 = vld [vmem:[#allocation8 + $0x90] sm:$0xff]  ;;  %v16979_v40 = vcombine.high %v466_v33, %v470_v34  ;;  %v16978_v46 = vcombine.low %v466_v33, %v470_v34 }
 0x179   :  { %2039 = vmatprep.subr.bf16.mxu1 %v17033_v37  ;;  %v334_v37 = vld [vmem:[#allocation8 + $0xb0] sm:$0xff] }
 0x17a   :  { %v16843_v47 = vcombine.high %v330_v36, %v334_v37  ;;  %v426_v8 = vld [vmem:[#allocation8 + $0x390] sm:$0xff] }
 0x17b   :  { %1999 = vmatpush2.bf16.msra.mxu0 %v16904_v42  ;;  %v462_v42 = vld [vmem:[#allocation8 + $0x4b0] sm:$0xff] }
 0x17c   :  { %2040 = vmatpush2.bf16.msra.mxu1 %v17032_v43  ;;  %2000 = vmatprep.subr.bf16.mxu0 %v16897_v44  ;;  %v16850_v43 = vcombine.low %v338_v28, %v342_v29  ;;  %v322_v44 = vld [vmem:[#allocation8 + $0x50] sm:$0xff]  ;;  %v16970_v58 = vcombine.low %v458_v41, %v462_v42 }
 0x17d   :  { %2041 = vmatprep.subr.bf16.mxu1 %v17025_v45  ;;  %v326_v45 = vld [vmem:[#allocation8 + $0x70] sm:$0xff] }
 0x17e   :  { %v16835_v59 = vcombine.high %v322_v44, %v326_v45  ;;  %v554_v12 = vld [vmem:[#allocation8 + $0x790] sm:$0xff] }
 0x17f   :  { %2001 = vmatpush2.bf16.msra.mxu0 %v16896_v54  ;;  %v16971_v54 = vcombine.high %v458_v41, %v462_v42  ;;  %v558_v13 = vld [vmem:[#allocation8 + $0x7b0] sm:$0xff] }
 0x180   :  { %2042 = vmatpush2.bf16.msra.mxu1 %v17024_v55  ;;  %2002 = vmatprep.subr.bf16.mxu0 %v16889_v56  ;;  %v16842_v55 = vcombine.low %v330_v36, %v334_v37  ;;  %v314_v56 = vld [vmem:[#allocation8 + $0x10] sm:$0xff] }
 0x181   :  { %2043 = vmatprep.subr.bf16.mxu1 %v17017_v57  ;;  %v318_v57 = vld [vmem:[#allocation8 + $0x30] sm:$0xff] }
 0x182   :  { %v16827_v3 = vcombine.high %v314_v56, %v318_v57  ;;  %v16826_v7 = vcombine.low %v314_v56, %v318_v57  ;;  %v418_v16 = vld [vmem:[#allocation8 + $0x350] sm:$0xff] }
 0x183   :  { %2003 = vmatpush2.bf16.msra.mxu0 %v16888_v62  ;;  %v16963_v62 = vcombine.high %v450_v49, %v454_v50  ;;  %v546_v21 = vld [vmem:[#allocation8 + $0x750] sm:$0xff] }
 0x184   :  { %2044 = vmatpush2.bf16.msra.mxu1 %v17016_v63  ;;  %2054 = vmatprep.subr.bf16.mxu0 %v16883_v0  ;;  %v16834_v63 = vcombine.low %v322_v44, %v326_v45  ;;  %v434_v0 = vld [vmem:[#allocation8 + $0x3d0] sm:$0xff] }
 0x185   :  { %2095 = vmatprep.subr.bf16.mxu1 %v17011_v1  ;;  %v438_v1 = vld [vmem:[#allocation8 + $0x3f0] sm:$0xff] }
 0x186   :  { %2005 = vmatmul.mubr.bf16.vlgmr.msra.gmra.mxu0 %v20837_v53  ;;  %v16946_v15 = vcombine.low %v434_v0, %v438_v1  ;;  %v550_v26 = vld [vmem:[#allocation8 + $0x770] sm:$0xff] }
 0x187   :  { %2046 = vmatmul.mubr.bf16.vlgmr.msra.gmra.mxu1 %v20831_v48  ;;  %2055 = vmatpush1.bf16.msra.mxu0 %v16882_v6  ;;  %v16955_v6 = vcombine.high %v442_v60, %v446_v61  ;;  %v410_v29 = vld [vmem:[#allocation8 + $0x310] sm:$0xff] }
 0x188   :  { %2086 = vmatprep.mubr.bf16.mxu0 %v20833_v51  ;;  %2096 = vmatpush1.bf16.msra.mxu1 %v17010_v9  ;;  %v430_v9 = vld [vmem:[#allocation8 + $0x3b0] sm:$0xff] }
 0x189   :  { %2127 = vmatprep.mubr.bf16.mxu1 %v20835_v52  ;;  %2056 = vmatprep.subr.bf16.mxu0 %v16875_v10  ;;  %v16954_v10 = vcombine.low %v442_v60, %v446_v61  ;;  %v16938_v28 = vcombine.low %v426_v8, %v430_v9  ;;  %v538_v33 = vld [vmem:[#allocation8 + $0x710] sm:$0xff] }
 0x18a   :  { %2097 = vmatprep.subr.bf16.mxu1 %v17003_v11  ;;  %v16947_v11 = vcombine.high %v434_v0, %v438_v1  ;;  %v542_v34 = vld [vmem:[#allocation8 + $0x730] sm:$0xff] }
 0x18b   :  { %2057 = vmatpush1.bf16.msra.mxu0 %v16874_v14  ;;  %v17075_v14 = vcombine.high %v562_v4, %v566_v5  ;;  %v402_v37 = vld [vmem:[#allocation8 + $0x2d0] sm:$0xff] }
 0x18c   :  { %2098 = vmatpush1.bf16.msra.mxu1 %v17002_v17  ;;  %2058 = vmatprep.subr.bf16.mxu0 %v16867_v18  ;;  %v422_v17 = vld [vmem:[#allocation8 + $0x370] sm:$0xff]  ;;  %v17074_v18 = vcombine.low %v562_v4, %v566_v5 }
 0x18d   :  { %2099 = vmatprep.subr.bf16.mxu1 %v16995_v19  ;;  %v16939_v19 = vcombine.high %v426_v8, %v430_v9  ;;  %v16930_v36 = vcombine.low %v418_v16, %v422_v17  ;;  %v530_v41 = vld [vmem:[#allocation8 + $0x6d0] sm:$0xff]  ;;  %v371_v9 = vld [vmem:[#allocation8 + $0x1d8] sm:$0xff] }
 0x18e   :  { %v534_v42 = vld [vmem:[#allocation8 + $0x6f0] sm:$0xff] }
 0x18f   :  { %2059 = vmatpush1.bf16.msra.mxu0 %v16866_v27  ;;  %v17067_v27 = vcombine.high %v554_v12, %v558_v13  ;;  %v394_v45 = vld [vmem:[#allocation8 + $0x290] sm:$0xff] }
 0x190   :  { %2100 = vmatpush1.bf16.msra.mxu1 %v16994_v30  ;;  %2060 = vmatprep.subr.bf16.mxu0 %v16859_v31  ;;  %v414_v30 = vld [vmem:[#allocation8 + $0x330] sm:$0xff]  ;;  %v17066_v31 = vcombine.low %v554_v12, %v558_v13  ;;  %v499_v13 = vld [vmem:[#allocation8 + $0x5d8] sm:$0xff] }
 0x191   :  { %2101 = vmatprep.subr.bf16.mxu1 %v16987_v32  ;;  %v16931_v32 = vcombine.high %v418_v16, %v422_v17  ;;  %v16922_v44 = vcombine.low %v410_v29, %v414_v30  ;;  %v522_v50 = vld [vmem:[#allocation8 + $0x690] sm:$0xff] }
 0x192   :  { %v386_v57 = vld [vmem:[#allocation8 + $0x250] sm:$0xff] }
 0x193   :  { %2061 = vmatpush1.bf16.msra.mxu0 %v16858_v35  ;;  %v17059_v35 = vcombine.high %v546_v21, %v550_v26  ;;  %v514_v61 = vld [vmem:[#allocation8 + $0x650] sm:$0xff] }
 0x194   :  { %2102 = vmatpush1.bf16.msra.mxu1 %v16986_v38  ;;  %2062 = vmatprep.subr.bf16.mxu0 %v16851_v39  ;;  %v406_v38 = vld [vmem:[#allocation8 + $0x2f0] sm:$0xff]  ;;  %v17058_v39 = vcombine.low %v546_v21, %v550_v26  ;;  %v367_v21 = vld [vmem:[#allocation8 + $0x1b8] sm:$0xff] }
 0x195   :  { %2103 = vmatprep.subr.bf16.mxu1 %v16979_v40  ;;  %v16923_v40 = vcombine.high %v410_v29, %v414_v30  ;;  %v16915_v49 = vcombine.high %v402_v37, %v406_v38  ;;  %v16914_v56 = vcombine.low %v402_v37, %v406_v38  ;;  %v378_v1 = vld [vmem:[#allocation8 + $0x210] sm:$0xff]  ;;  %v355_v30 = vld [vmem:[#allocation8 + $0x158] sm:$0xff] }
 0x196   :  { %v506_v5 = vld [vmem:[#allocation8 + $0x610] sm:$0xff]  ;;  %v347_v38 = vld [vmem:[#allocation8 + $0x118] sm:$0xff] }
 0x197   :  { %2063 = vmatpush1.bf16.msra.mxu0 %v16850_v43  ;;  %v17051_v43 = vcombine.high %v538_v33, %v542_v34 }
 0x198   :  { %2104 = vmatpush1.bf16.msra.mxu1 %v16978_v46  ;;  %2064 = vmatprep.subr.bf16.mxu0 %v16843_v47  ;;  %v398_v46 = vld [vmem:[#allocation8 + $0x2b0] sm:$0xff]  ;;  %v17050_v47 = vcombine.low %v538_v33, %v542_v34  ;;  %v483_v34 = vld [vmem:[#allocation8 + $0x558] sm:$0xff] }
 0x199   :  { %2105 = vmatprep.subr.bf16.mxu1 %v16971_v54  ;;  %v526_v54 = vld [vmem:[#allocation8 + $0x6b0] sm:$0xff]  ;;  %v16907_v60 = vcombine.high %v394_v45, %v398_v46  ;;  %v16906_v0 = vcombine.low %v394_v45, %v398_v46  ;;  %v339_v46 = vld [vmem:[#allocation8 + $0xd8] sm:$0xff] }
 0x19b   :  { %2065 = vmatpush1.bf16.msra.mxu0 %v16842_v55  ;;  %v17043_v55 = vcombine.high %v530_v41, %v534_v42 }
 0x19c   :  { %2106 = vmatpush1.bf16.msra.mxu1 %v16970_v58  ;;  %2066 = vmatprep.subr.bf16.mxu0 %v16835_v59  ;;  %v390_v58 = vld [vmem:[#allocation8 + $0x270] sm:$0xff]  ;;  %v17042_v59 = vcombine.low %v530_v41, %v534_v42 }
 0x19d   :  { %2107 = vmatprep.subr.bf16.mxu1 %v16963_v62  ;;  %v518_v62 = vld [vmem:[#allocation8 + $0x670] sm:$0xff]  ;;  %v16899_v4 = vcombine.high %v386_v57, %v390_v58  ;;  %v16898_v8 = vcombine.low %v386_v57, %v390_v58  ;;  %v331_v58 = vld [vmem:[#allocation8 + $0x98] sm:$0xff] }
 0x19f   :  { %2067 = vmatpush1.bf16.msra.mxu0 %v16834_v63  ;;  %v17035_v63 = vcombine.high %v522_v50, %v526_v54 }
 0x1a0   :  { %2108 = vmatpush1.bf16.msra.mxu1 %v16962_v2  ;;  %2068 = vmatprep.subr.bf16.mxu0 %v16827_v3  ;;  %v382_v2 = vld [vmem:[#allocation8 + $0x230] sm:$0xff]  ;;  %v17034_v3 = vcombine.low %v522_v50, %v526_v54  ;;  %v467_v54 = vld [vmem:[#allocation8 + $0x4d8] sm:$0xff] }
 0x1a1   :  { %2109 = vmatprep.subr.bf16.mxu1 %v16955_v6  ;;  %v510_v6 = vld [vmem:[#allocation8 + $0x630] sm:$0xff]  ;;  %v16891_v12 = vcombine.high %v378_v1, %v382_v2  ;;  %v16890_v16 = vcombine.low %v378_v1, %v382_v2  ;;  %v327_v1 = vld [vmem:[#allocation8 + $0x78] sm:$0xff] }
 0x1a2   :  { %v17018_v17 = vcombine.low %v506_v5, %v510_v6 }
 0x1a3   :  { %2069 = vmatpush1.bf16.msra.mxu0 %v16826_v7  ;;  %v17027_v7 = vcombine.high %v514_v61, %v518_v62 }
 0x1a4   :  { %2110 = vmatpush1.bf16.msra.mxu1 %v16954_v10  ;;  %2070 = vmatprep.subr.bf16.mxu0 %v16947_v11  ;;  %v375_v10 = vld [vmem:[#allocation8 + $0x1f8] sm:$0xff]  ;;  %v17026_v11 = vcombine.low %v514_v61, %v518_v62 }
 0x1a5   :  { %2111 = vmatprep.subr.bf16.mxu1 %v17075_v14  ;;  %v503_v14 = vld [vmem:[#allocation8 + $0x5f8] sm:$0xff]  ;;  %v16884_v29 = vcombine.low %v371_v9, %v375_v10 }
 0x1a6   :  { %v17013_v26 = vcombine.high %v499_v13, %v503_v14  ;;  %v459_v61 = vld [vmem:[#allocation8 + $0x498] sm:$0xff] }
 0x1a7   :  { %2071 = vmatpush2.bf16.msra.mxu0 %v16946_v15  ;;  %v17019_v15 = vcombine.high %v506_v5, %v510_v6  ;;  %v463_v62 = vld [vmem:[#allocation8 + $0x4b8] sm:$0xff] }
 0x1a8   :  { %2112 = vmatpush2.bf16.msra.mxu1 %v17074_v18  ;;  %2072 = vmatprep.subr.bf16.mxu0 %v16939_v19  ;;  %v16885_v18 = vcombine.high %v371_v9, %v375_v10  ;;  %v363_v19 = vld [vmem:[#allocation8 + $0x198] sm:$0xff]  ;;  %v16973_v6 = vcombine.high %v459_v61, %v463_v62  ;;  %v16972_v10 = vcombine.low %v459_v61, %v463_v62 }
 0x1a9   :  { %2113 = vmatprep.subr.bf16.mxu1 %v17067_v27  ;;  %v491_v27 = vld [vmem:[#allocation8 + $0x598] sm:$0xff]  ;;  %v16877_v33 = vcombine.high %v363_v19, %v367_v21  ;;  %v16876_v37 = vcombine.low %v363_v19, %v367_v21 }
 0x1aa   :  { %v455_v5 = vld [vmem:[#allocation8 + $0x478] sm:$0xff] }
 0x1ab   :  { %2073 = vmatpush2.bf16.msra.mxu0 %v16938_v28  ;;  %v495_v28 = vld [vmem:[#allocation8 + $0x5b8] sm:$0xff] }
 0x1ac   :  { %2114 = vmatpush2.bf16.msra.mxu1 %v17066_v31  ;;  %2074 = vmatprep.subr.bf16.mxu0 %v16931_v32  ;;  %v359_v31 = vld [vmem:[#allocation8 + $0x178] sm:$0xff]  ;;  %v17012_v32 = vcombine.low %v499_v13, %v503_v14 }
 0x1ad   :  { %2115 = vmatprep.subr.bf16.mxu1 %v17059_v35  ;;  %v487_v35 = vld [vmem:[#allocation8 + $0x578] sm:$0xff]  ;;  %v16869_v41 = vcombine.high %v355_v30, %v359_v31  ;;  %v16868_v45 = vcombine.low %v355_v30, %v359_v31 }
 0x1ae   :  { %v16997_v42 = vcombine.high %v483_v34, %v487_v35  ;;  %v319_v9 = vld [vmem:[#allocation8 + $0x38] sm:$0xff] }
 0x1af   :  { %2075 = vmatpush2.bf16.msra.mxu0 %v16930_v36  ;;  %v17005_v36 = vcombine.high %v491_v27, %v495_v28  ;;  %v447_v13 = vld [vmem:[#allocation8 + $0x438] sm:$0xff] }
 0x1b0   :  { %2116 = vmatpush2.bf16.msra.mxu1 %v17058_v39  ;;  %2076 = vmatprep.subr.bf16.mxu0 %v16923_v40  ;;  %v351_v39 = vld [vmem:[#allocation8 + $0x138] sm:$0xff]  ;;  %v17004_v40 = vcombine.low %v491_v27, %v495_v28 }
 0x1b1   :  { %2117 = vmatprep.subr.bf16.mxu1 %v17051_v43  ;;  %v475_v43 = vld [vmem:[#allocation8 + $0x518] sm:$0xff]  ;;  %v16861_v50 = vcombine.high %v347_v38, %v351_v39 }
 0x1b2   :  { %v563_v21 = vld [vmem:[#allocation8 + $0x7d8] sm:$0xff] }
 0x1b3   :  { %2077 = vmatpush2.bf16.msra.mxu0 %v16922_v44  ;;  %v479_v44 = vld [vmem:[#allocation8 + $0x538] sm:$0xff] }
 0x1b4   :  { %2118 = vmatpush2.bf16.msra.mxu1 %v17050_v47  ;;  %2078 = vmatprep.subr.bf16.mxu0 %v16915_v49  ;;  %v343_v47 = vld [vmem:[#allocation8 + $0xf8] sm:$0xff]  ;;  %v16996_v49 = vcombine.low %v483_v34, %v487_v35 }
 0x1b5   :  { %2119 = vmatprep.subr.bf16.mxu1 %v17043_v55  ;;  %v471_v55 = vld [vmem:[#allocation8 + $0x4f8] sm:$0xff]  ;;  %v16853_v57 = vcombine.high %v339_v46, %v343_v47 }
 0x1b6   :  { %v16980_v2 = vcombine.low %v467_v54, %v471_v55  ;;  %v431_v30 = vld [vmem:[#allocation8 + $0x3b8] sm:$0xff] }
 0x1b7   :  { %2079 = vmatpush2.bf16.msra.mxu0 %v16914_v56  ;;  %v16860_v56 = vcombine.low %v347_v38, %v351_v39  ;;  %v559_v34 = vld [vmem:[#allocation8 + $0x7b8] sm:$0xff] }
 0x1b8   :  { %2120 = vmatpush2.bf16.msra.mxu1 %v17042_v59  ;;  %2080 = vmatprep.subr.bf16.mxu0 %v16907_v60  ;;  %v335_v59 = vld [vmem:[#allocation8 + $0xb8] sm:$0xff]  ;;  %v16981_v60 = vcombine.high %v467_v54, %v471_v55 }
 0x1b9   :  { %2121 = vmatprep.subr.bf16.mxu1 %v17035_v63  ;;  %v16852_v63 = vcombine.low %v339_v46, %v343_v47  ;;  %v423_v38 = vld [vmem:[#allocation8 + $0x378] sm:$0xff] }
 0x1ba   :  { %v415_v46 = vld [vmem:[#allocation8 + $0x338] sm:$0xff] }
 0x1bb   :  { %2081 = vmatpush2.bf16.msra.mxu0 %v16906_v0  ;;  %v323_v0 = vld [vmem:[#allocation8 + $0x58] sm:$0xff] }
 0x1bc   :  { %2122 = vmatpush2.bf16.msra.mxu1 %v17034_v3  ;;  %2082 = vmatprep.subr.bf16.mxu0 %v16899_v4  ;;  %v16845_v3 = vcombine.high %v331_v58, %v335_v59  ;;  %v451_v4 = vld [vmem:[#allocation8 + $0x458] sm:$0xff] }
 0x1bd   :  { %2123 = vmatprep.subr.bf16.mxu1 %v17027_v7  ;;  %v16844_v7 = vcombine.low %v331_v58, %v335_v59  ;;  %v16965_v14 = vcombine.high %v451_v4, %v455_v5  ;;  %v531_v59 = vld [vmem:[#allocation8 + $0x6d8] sm:$0xff] }
 0x1bf   :  { %2083 = vmatpush2.bf16.msra.mxu0 %v16898_v8  ;;  %v315_v8 = vld [vmem:[#allocation8 + $0x18] sm:$0xff] }
 0x1c0   :  { %2124 = vmatpush2.bf16.msra.mxu1 %v17026_v11  ;;  %2084 = vmatprep.subr.bf16.mxu0 %v16891_v12  ;;  %v16837_v11 = vcombine.high %v323_v0, %v327_v1  ;;  %v443_v12 = vld [vmem:[#allocation8 + $0x418] sm:$0xff]  ;;  %v16829_v19 = vcombine.high %v315_v8, %v319_v9  ;;  %v16828_v28 = vcombine.low %v315_v8, %v319_v9 }
 0x1c1   :  { %2125 = vmatprep.subr.bf16.mxu1 %v17019_v15  ;;  %v16836_v15 = vcombine.low %v323_v0, %v327_v1  ;;  %v16957_v27 = vcombine.high %v443_v12, %v447_v13  ;;  %v16956_v31 = vcombine.low %v443_v12, %v447_v13  ;;  %v399_v0 = vld [vmem:[#allocation8 + $0x2b8] sm:$0xff] }
 0x1c2   :  { %v391_v8 = vld [vmem:[#allocation8 + $0x278] sm:$0xff] }
 0x1c3   :  { %2085 = vmatpush2.bf16.msra.mxu0 %v16890_v16  ;;  %v435_v16 = vld [vmem:[#allocation8 + $0x3d8] sm:$0xff] }
 0x1c4   :  { %2126 = vmatpush2.bf16.msra.mxu1 %v17018_v17  ;;  %2136 = vmatprep.subr.bf16.mxu0 %v16885_v18  ;;  %v439_v17 = vld [vmem:[#allocation8 + $0x3f8] sm:$0xff]  ;;  %v16964_v18 = vcombine.low %v451_v4, %v455_v5 }
 0x1c5   :  { %2177 = vmatprep.subr.bf16.mxu1 %v17013_v26  ;;  %v567_v26 = vld [vmem:[#allocation8 + $0x7f8] sm:$0xff] }
 0x1c6   :  { %2087 = vmatmul.mubr.bf16.vlgmr.msra.gmra.mxu0 %v20837_v53  ;;  %v17077_v35 = vcombine.high %v563_v21, %v567_v26  ;;  %v17076_v39 = vcombine.low %v563_v21, %v567_v26  ;;  %v527_v4 = vld [vmem:[#allocation8 + $0x6b8] sm:$0xff] }
 0x1c7   :  { %2128 = vmatmul.mubr.bf16.vlgmr.msra.gmra.mxu1 %v20831_v48  ;;  %2137 = vmatpush1.bf16.msra.mxu0 %v16884_v29  ;;  %v427_v29 = vld [vmem:[#allocation8 + $0x398] sm:$0xff] }
 0x1c8   :  { %2168 = vmatprep.mubr.bf16.mxu0 %v20833_v51  ;;  %2178 = vmatpush1.bf16.msra.mxu1 %v17012_v32  ;;  %v16989_v51 = vcombine.high %v475_v43, %v479_v44  ;;  %v16949_v32 = vcombine.high %v435_v16, %v439_v17  ;;  %v519_v12 = vld [vmem:[#allocation8 + $0x678] sm:$0xff] }
 0x1c9   :  { %2209 = vmatprep.mubr.bf16.mxu1 %v20835_v52  ;;  %2138 = vmatprep.subr.bf16.mxu0 %v16877_v33  ;;  %v16988_v52 = vcombine.low %v475_v43, %v479_v44  ;;  %v555_v33 = vld [vmem:[#allocation8 + $0x798] sm:$0xff]  ;;  %v16940_v44 = vcombine.low %v427_v29, %v431_v30 }
 0x1ca   :  { %2179 = vmatprep.subr.bf16.mxu1 %v17005_v36  ;;  %v16948_v36 = vcombine.low %v435_v16, %v439_v17  ;;  %v17069_v43 = vcombine.high %v555_v33, %v559_v34  ;;  %v17068_v47 = vcombine.low %v555_v33, %v559_v34  ;;  %v383_v16 = vld [vmem:[#allocation8 + $0x238] sm:$0xff]  ;;  %v2610_v33 = vld [vmem:[#allocation11 + $0xbc0] sm:$0xff] }
 0x1cb   :  { %2139 = vmatpush1.bf16.msra.mxu0 %v16876_v37  ;;  %v419_v37 = vld [vmem:[#allocation8 + $0x358] sm:$0xff] }
 0x1cc   :  { %2180 = vmatpush1.bf16.msra.mxu1 %v17004_v40  ;;  %2140 = vmatprep.subr.bf16.mxu0 %v16869_v41  ;;  %v16941_v40 = vcombine.high %v427_v29, %v431_v30  ;;  %v547_v41 = vld [vmem:[#allocation8 + $0x758] sm:$0xff]  ;;  %v16932_v55 = vcombine.low %v419_v37, %v423_v38  ;;  %v2354_v29 = vld [vmem:[#allocation11 + $0x3c0] sm:$0xff] }
 0x1cd   :  { %2181 = vmatprep.subr.bf16.mxu1 %v16997_v42  ;;  %v551_v42 = vld [vmem:[#allocation8 + $0x778] sm:$0xff] }
 0x1ce   :  { %v17061_v54 = vcombine.high %v547_v41, %v551_v42  ;;  %v511_v21 = vld [vmem:[#allocation8 + $0x638] sm:$0xff] }
 0x1cf   :  { %2141 = vmatpush1.bf16.msra.mxu0 %v16868_v45  ;;  %v411_v45 = vld [vmem:[#allocation8 + $0x318] sm:$0xff] }
 0x1d0   :  { %2182 = vmatpush1.bf16.msra.mxu1 %v16996_v49  ;;  %2142 = vmatprep.subr.bf16.mxu0 %v16861_v50  ;;  %v16933_v49 = vcombine.high %v419_v37, %v423_v38  ;;  %v539_v50 = vld [vmem:[#allocation8 + $0x718] sm:$0xff]  ;;  %v16925_v58 = vcombine.high %v411_v45, %v415_v46  ;;  %v16924_v62 = vcombine.low %v411_v45, %v415_v46  ;;  %v2338_v37 = vld [vmem:[#allocation11 + $0x340] sm:$0xff] }
 0x1d1   :  { %2183 = vmatprep.subr.bf16.mxu1 %v16989_v51  ;;  %v543_v51 = vld [vmem:[#allocation8 + $0x738] sm:$0xff]  ;;  %v2314_v45 = vld [vmem:[#allocation11 + $0x280] sm:$0xff] }
 0x1d2   :  { %v17053_v61 = vcombine.high %v539_v50, %v543_v51  ;;  %v17052_v1 = vcombine.low %v539_v50, %v543_v51  ;;  %v2322_v46 = vld [vmem:[#allocation11 + $0x2c0] sm:$0xff] }
 0x1d3   :  { %2143 = vmatpush1.bf16.msra.mxu0 %v16860_v56  ;;  %v403_v56 = vld [vmem:[#allocation8 + $0x2d8] sm:$0xff]  ;;  %v2570_v50 = vld [vmem:[#allocation11 + $0xa80] sm:$0xff] }
 0x1d4   :  { %2184 = vmatpush1.bf16.msra.mxu1 %v16988_v52  ;;  %2144 = vmatprep.subr.bf16.mxu0 %v16853_v57  ;;  %v407_v52 = vld [vmem:[#allocation8 + $0x2f8] sm:$0xff]  ;;  %v17060_v57 = vcombine.low %v547_v41, %v551_v42  ;;  %v2594_v41 = vld [vmem:[#allocation11 + $0xb40] sm:$0xff] }
 0x1d5   :  { %2185 = vmatprep.subr.bf16.mxu1 %v16981_v60  ;;  %v535_v60 = vld [vmem:[#allocation8 + $0x6f8] sm:$0xff]  ;;  %v2578_v51 = vld [vmem:[#allocation11 + $0xac0] sm:$0xff] }
 0x1d6   :  { %v17045_v5 = vcombine.high %v531_v59, %v535_v60  ;;  %v17044_v9 = vcombine.low %v531_v59, %v535_v60  ;;  %v2306_v59 = vld [vmem:[#allocation11 + $0x240] sm:$0xff] }
 0x1d7   :  { %2145 = vmatpush1.bf16.msra.mxu0 %v16852_v63  ;;  %v395_v63 = vld [vmem:[#allocation8 + $0x298] sm:$0xff] }
 0x1d8   :  { %2186 = vmatpush1.bf16.msra.mxu1 %v16980_v2  ;;  %2146 = vmatprep.subr.bf16.mxu0 %v16845_v3  ;;  %v16917_v2 = vcombine.high %v403_v56, %v407_v52  ;;  %v523_v3 = vld [vmem:[#allocation8 + $0x698] sm:$0xff] }
 0x1d9   :  { %2187 = vmatprep.subr.bf16.mxu1 %v16973_v6  ;;  %v16916_v6 = vcombine.low %v403_v56, %v407_v52  ;;  %v17037_v13 = vcombine.high %v523_v3, %v527_v4  ;;  %v17036_v17 = vcombine.low %v523_v3, %v527_v4 }
 0x1db   :  { %2147 = vmatpush1.bf16.msra.mxu0 %v16844_v7  ;;  %v387_v7 = vld [vmem:[#allocation8 + $0x258] sm:$0xff] }
 0x1dc   :  { %2188 = vmatpush1.bf16.msra.mxu1 %v16972_v10  ;;  %2148 = vmatprep.subr.bf16.mxu0 %v16837_v11  ;;  %v16909_v10 = vcombine.high %v395_v63, %v399_v0  ;;  %v515_v11 = vld [vmem:[#allocation8 + $0x658] sm:$0xff] }
 0x1dd   :  { %2189 = vmatprep.subr.bf16.mxu1 %v16965_v14  ;;  %v16908_v14 = vcombine.low %v395_v63, %v399_v0  ;;  %v17029_v26 = vcombine.high %v515_v11, %v519_v12  ;;  %v17028_v30 = vcombine.low %v515_v11, %v519_v12  ;;  %v2554_v0 = vld [vmem:[#allocation11 + $0xa00] sm:$0xff]  ;;  %v17414_v11 = vcombine.low %v2570_v50, %v2578_v51 }
 0x1de   :  { %v2538_v12 = vld [vmem:[#allocation11 + $0x980] sm:$0xff] }
 0x1df   :  { %2149 = vmatpush1.bf16.msra.mxu0 %v16836_v15  ;;  %v379_v15 = vld [vmem:[#allocation8 + $0x218] sm:$0xff] }
 0x1e0   :  { %2190 = vmatpush1.bf16.msra.mxu1 %v16964_v18  ;;  %2150 = vmatprep.subr.bf16.mxu0 %v16829_v19  ;;  %v16901_v18 = vcombine.high %v387_v7, %v391_v8  ;;  %v507_v19 = vld [vmem:[#allocation8 + $0x618] sm:$0xff] }
 0x1e1   :  { %2191 = vmatprep.subr.bf16.mxu1 %v16957_v27  ;;  %v16900_v27 = vcombine.low %v387_v7, %v391_v8  ;;  %v17021_v34 = vcombine.high %v507_v19, %v511_v21  ;;  %v17020_v38 = vcombine.low %v507_v19, %v511_v21  ;;  %v2266_v19 = vld [vmem:[#allocation11 + $0x100] sm:$0xff] }
 0x1e2   :  { %v2274_v21 = vld [vmem:[#allocation11 + $0x140] sm:$0xff] }
 0x1e3   :  { %2151 = vmatpush1.bf16.msra.mxu0 %v16828_v28  ;;  %v2346_v28 = vld [vmem:[#allocation11 + $0x380] sm:$0xff] }
 0x1e4   :  { %2192 = vmatpush1.bf16.msra.mxu1 %v16956_v31  ;;  %2152 = vmatprep.subr.bf16.mxu0 %v16949_v32  ;;  %v16893_v31 = vcombine.high %v379_v15, %v383_v16  ;;  %v2602_v32 = vld [vmem:[#allocation11 + $0xb80] sm:$0xff] }
 0x1e5   :  { %2193 = vmatprep.subr.bf16.mxu1 %v17077_v35  ;;  %v16892_v35 = vcombine.low %v379_v15, %v383_v16  ;;  %v17447_v42 = vcombine.high %v2602_v32, %v2610_v33  ;;  %v2546_v15 = vld [vmem:[#allocation11 + $0x9c0] sm:$0xff] }
 0x1e7   :  { %2153 = vmatpush2.bf16.msra.mxu0 %v16948_v36  ;;  %v2330_v36 = vld [vmem:[#allocation11 + $0x300] sm:$0xff] }
 0x1e8   :  { %2194 = vmatpush2.bf16.msra.mxu1 %v17076_v39  ;;  %2154 = vmatprep.subr.bf16.mxu0 %v16941_v40  ;;  %v17191_v39 = vcombine.high %v2346_v28, %v2354_v29  ;;  %v2586_v40 = vld [vmem:[#allocation11 + $0xb00] sm:$0xff] }
 0x1e9   :  { %2195 = vmatprep.subr.bf16.mxu1 %v17069_v43  ;;  %v20853_v43 = vld [vmem:[#allocation10] sm:$0xff]  ;;  %v17430_v63 = vcombine.low %v2586_v40, %v2594_v41 }
 0x1eb   :  { %2155 = vmatpush2.bf16.msra.mxu0 %v16940_v44  ;;  %v17190_v44 = vcombine.low %v2346_v28, %v2354_v29  ;;  %v17383_v28 = vcombine.high %v2538_v12, %v2546_v15  ;;  %v2530_v29 = vld [vmem:[#allocation11 + $0x940] sm:$0xff] }
 0x1ec   :  { %2196 = vmatpush2.bf16.msra.mxu1 %v17068_v47  ;;  %2156 = vmatprep.subr.bf16.mxu0 %v16933_v49  ;;  %v17175_v47 = vcombine.high %v2330_v36, %v2338_v37  ;;  %v17446_v49 = vcombine.low %v2602_v32, %v2610_v33  ;;  %v2258_v32 = vld [vmem:[#allocation11 + $0xc0] sm:$0xff]  ;;  %v17111_v33 = vcombine.high %v2266_v19, %v2274_v21 }
 0x1ed   :  { %2197 = vmatprep.subr.bf16.mxu1 %v17061_v54  ;;  %v577_v54 = vrot.slane %v20853_v43, %v20822_v24 }
 0x1ef   :  { %2157 = vmatpush2.bf16.msra.mxu0 %v16932_v55  ;;  %v17431_v55 = vcombine.high %v2586_v40, %v2594_v41  ;;  %v2242_v40 = vld [vmem:[#allocation11 + $0x40] sm:$0xff] }
 0x1f0   :  { %2198 = vmatpush2.bf16.msra.mxu1 %v17060_v57  ;;  %2158 = vmatprep.subr.bf16.mxu0 %v16925_v58  ;;  %v17174_v57 = vcombine.low %v2330_v36, %v2338_v37  ;;  %v2298_v58 = vld [vmem:[#allocation11 + $0x200] sm:$0xff] }
 0x1f1   :  { %2199 = vmatprep.subr.bf16.mxu1 %v17053_v61  ;;  %v2514_v36 = vld [vmem:[#allocation11 + $0x8c0] sm:$0xff] }
 0x1f3   :  { %2159 = vmatpush2.bf16.msra.mxu0 %v16924_v62  ;;  %v17159_v62 = vcombine.high %v2314_v45, %v2322_v46 }
 0x1f4   :  { %2200 = vmatpush2.bf16.msra.mxu1 %v17052_v1  ;;  %2160 = vmatprep.subr.bf16.mxu0 %v16917_v2  ;;  %v2562_v1 = vld [vmem:[#allocation11 + $0xa40] sm:$0xff] }
 0x1f5   :  { %2201 = vmatprep.subr.bf16.mxu1 %v17045_v5 }
 0x1f7   :  { %2161 = vmatpush2.bf16.msra.mxu0 %v16916_v6  ;;  %v2282_v6 = vld [vmem:[#allocation11 + $0x180] sm:$0xff] }
 0x1f8   :  { %2202 = vmatpush2.bf16.msra.mxu1 %v17044_v9  ;;  %2162 = vmatprep.subr.bf16.mxu0 %v16909_v10  ;;  %v17143_v9 = vcombine.high %v2298_v58, %v2306_v59  ;;  %v2290_v10 = vld [vmem:[#allocation11 + $0x1c0] sm:$0xff] }
 0x1f9   :  { %2203 = vmatprep.subr.bf16.mxu1 %v17037_v13 }
 0x1fb   :  { %2163 = vmatpush2.bf16.msra.mxu0 %v16908_v14  ;;  %v17399_v14 = vcombine.high %v2554_v0, %v2562_v1 }
 0x1fc   :  { %2204 = vmatpush2.bf16.msra.mxu1 %v17036_v17  ;;  %2164 = vmatprep.subr.bf16.mxu0 %v16901_v18  ;;  %v17142_v17 = vcombine.low %v2298_v58, %v2306_v59  ;;  %v17127_v18 = vcombine.high %v2282_v6, %v2290_v10 }
 0x1fd   :  { %2205 = vmatprep.subr.bf16.mxu1 %v17029_v26  ;;  %v17398_v26 = vcombine.low %v2554_v0, %v2562_v1  ;;  %v2714_v0 = vld [vmem:[#allocation11 + $0xf00] sm:$0xff] }
 0x1fe   :  { %v2722_v1 = vld [vmem:[#allocation11 + $0xf40] sm:$0xff] }
 0x1ff   :  { %2165 = vmatpush2.bf16.msra.mxu0 %v16900_v27  ;;  %v2522_v27 = vld [vmem:[#allocation11 + $0x900] sm:$0xff] }
 0x200   :  { %2206 = vmatpush2.bf16.msra.mxu1 %v17028_v30  ;;  %2166 = vmatprep.subr.bf16.mxu0 %v16893_v31  ;;  %v17126_v30 = vcombine.low %v2282_v6, %v2290_v10  ;;  %v2250_v31 = vld [vmem:[#allocation11 + $0x80] sm:$0xff]  ;;  %v17367_v37 = vcombine.high %v2522_v27, %v2530_v29 }
 0x201   :  { %2207 = vmatprep.subr.bf16.mxu1 %v17021_v34  ;;  %v17382_v34 = vcombine.low %v2538_v12, %v2546_v15  ;;  %v17095_v41 = vcombine.high %v2250_v31, %v2258_v32  ;;  %v2698_v6 = vld [vmem:[#allocation11 + $0xe80] sm:$0xff] }
 0x202   :  { %v2426_v10 = vld [vmem:[#allocation11 + $0x600] sm:$0xff] }
 0x203   :  { %2167 = vmatpush2.bf16.msra.mxu0 %v16892_v35  ;;  %v2506_v35 = vld [vmem:[#allocation11 + $0x880] sm:$0xff] }
 0x204   :  { %2208 = vmatpush2.bf16.msra.mxu1 %v17020_v38  ;;  %8462 = vmatprep.subr.bf16.mxu0 %v17191_v39  ;;  %v17110_v38 = vcombine.low %v2266_v19, %v2274_v21  ;;  %v2234_v39 = vld [vmem:[#allocation11] sm:$0xff] }
 0x205   :  { %8503 = vmatprep.subr.bf16.mxu1 %v17447_v42  ;;  %v17366_v42 = vcombine.low %v2522_v27, %v2530_v29  ;;  %v17078_v59 = vcombine.low %v2234_v39, %v2242_v40  ;;  %v2690_v15 = vld [vmem:[#allocation11 + $0xe40] sm:$0xff] }
 0x206   :  { %2169 = vmatmul.mubr.bf16.vlgmr.msra.gmra.mxu0 %v20837_v53  ;;  %v20858_v56 = vpop.f32.mrf.mxu0  ;;  %v17415_v53 = vcombine.high %v2570_v50, %v2578_v51  ;;  %v2482_v50 = vld [vmem:[#allocation11 + $0x7c0] sm:$0xff]  ;;  %v17079_v51 = vcombine.high %v2234_v39, %v2242_v40 }
 0x207   :  { %v20860_v52 = vpop.f32.mrf.mxu1  ;;  %2210 = vmatmul.mubr.bf16.vlgmr.msra.gmra.mxu1 %v20831_v48  ;;  %8463 = vmatpush1.bf16.msra.mxu0 %v17190_v44  ;;  %v17158_v48 = vcombine.low %v2314_v45, %v2322_v46  ;;  %v2490_v44 = vld [vmem:[#allocation11 + $0x800] sm:$0xff]  ;;  %v17351_v46 = vcombine.high %v2506_v35, %v2514_v36 }
 0x208   :  { %v1926_v60 = vpop.f32.mrf.mxu0  ;;  %8464 = vmatprep.subr.bf16.mxu0 %v17175_v47  ;;  %8504 = vmatpush1.bf16.msra.mxu1 %v17446_v49  ;;  %v2498_v45 = vld [vmem:[#allocation11 + $0x840] sm:$0xff]  ;;  %v17094_v47 = vcombine.low %v2250_v31, %v2258_v32 }
 0x209   :  { %v1967_v61 = vpop.f32.mrf.mxu1  ;;  %v1927_v2 = vadd.f32 %v1926_v60, %v577_v54  ;;  %8505 = vmatprep.subr.bf16.mxu1 %v17431_v55  ;;  %v2474_v49 = vld [vmem:[#allocation11 + $0x780] sm:$0xff]  ;;  %v17350_v54 = vcombine.low %v2506_v35, %v2514_v36  ;;  %v17335_v58 = vcombine.high %v2490_v44, %v2498_v45 }
 0x20a   :  { %v1928_v3 = vpop.f32.mrf.mxu0  ;;  %v2730_v55 = vld [vmem:[#allocation11 + $0xf80] sm:$0xff] }
 0x20b   :  { %v1969_v4 = vpop.f32.mrf.mxu1  ;;  %v1968_v5 = vadd.f32 %v1967_v61, %v1927_v2  ;;  %8465 = vmatpush1.bf16.msra.mxu0 %v17174_v57  ;;  %v2738_v57 = vld [vmem:[#allocation11 + $0xfc0] sm:$0xff] }
 0x20c   :  { %v1929_v7 = vpop.f32.mrf.mxu0  ;;  %8466 = vmatprep.subr.bf16.mxu0 %v17159_v62  ;;  %8506 = vmatpush1.bf16.msra.mxu1 %v17430_v63  ;;  %v2458_v60 = vld [vmem:[#allocation11 + $0x700] sm:$0xff]  ;;  %v17319_v62 = vcombine.high %v2474_v49, %v2482_v50  ;;  %v17334_v63 = vcombine.low %v2490_v44, %v2498_v45  ;;  %v17575_v2 = vcombine.high %v2730_v55, %v2738_v57 }
 0x20d   :  { %v1970_v8 = vpop.f32.mrf.mxu1  ;;  %v2219_v13 = vmax.f32 %v1968_v5, 0.0  ;;  %8507 = vmatprep.subr.bf16.mxu1 %v17415_v53  ;;  %v2466_v61 = vld [vmem:[#allocation11 + $0x740] sm:$0xff]  ;;  %v17318_v53 = vcombine.low %v2474_v49, %v2482_v50 }
 0x20e   :  { %v2442_v3 = vld [vmem:[#allocation11 + $0x680] sm:$0xff]  ;;  %v17303_v5 = vcombine.high %v2458_v60, %v2466_v61  ;;  %v17559_v8 = vcombine.high %v2714_v0, %v2722_v1 }
 0x20f   :  { %v20863_v16 = vpack.c.bf16 %v2219_v13, %v2219_v13  ;;  %8467 = vmatpush1.bf16.msra.mxu0 %v17158_v48  ;;  %v2450_v4 = vld [vmem:[#allocation11 + $0x6c0] sm:$0xff]  ;;  %v17574_v48 = vcombine.low %v2730_v55, %v2738_v57  ;;  %v17558_v13 = vcombine.low %v2714_v0, %v2722_v1 }
 0x210   :  { %8468 = vmatprep.subr.bf16.mxu0 %v17143_v9  ;;  %8508 = vmatpush1.bf16.msra.mxu1 %v17414_v11  ;;  %v2706_v7 = vld [vmem:[#allocation11 + $0xec0] sm:$0xff]  ;;  %v17302_v9 = vcombine.low %v2458_v60, %v2466_v61  ;;  %v17287_v12 = vcombine.high %v2442_v3, %v2450_v4 }
 0x211   :  { %8494 = vmatprep.mubr.bf16.mxu0 %v20863_v16  ;;  %8509 = vmatprep.subr.bf16.mxu1 %v17399_v14  ;;  %v2434_v11 = vld [vmem:[#allocation11 + $0x640] sm:$0xff]  ;;  %v17542_v27 = vcombine.low %v2698_v6, %v2706_v7 }
 0x212   :  { %v2682_v14 = vld [vmem:[#allocation11 + $0xe00] sm:$0xff]  ;;  %v17270_v31 = vcombine.low %v2426_v10, %v2434_v11 }
 0x213   :  { %8469 = vmatpush1.bf16.msra.mxu0 %v17142_v17  ;;  %v17543_v17 = vcombine.high %v2698_v6, %v2706_v7  ;;  %v2410_v19 = vld [vmem:[#allocation11 + $0x580] sm:$0xff]  ;;  %v17526_v35 = vcombine.low %v2682_v14, %v2690_v15 }
 0x214   :  { %8470 = vmatprep.subr.bf16.mxu0 %v17127_v18  ;;  %8510 = vmatpush1.bf16.msra.mxu1 %v17398_v26  ;;  %v17286_v18 = vcombine.low %v2442_v3, %v2450_v4  ;;  %v2418_v21 = vld [vmem:[#allocation11 + $0x5c0] sm:$0xff]  ;;  %v17271_v26 = vcombine.high %v2426_v10, %v2434_v11  ;;  %v581_v10 = vrot.slane %v20853_v43, %v20819_v23 }
 0x215   :  { %8511 = vmatprep.subr.bf16.mxu1 %v17383_v28  ;;  %v2666_v28 = vld [vmem:[#allocation11 + $0xd80] sm:$0xff]  ;;  %v17254_v39 = vcombine.low %v2410_v19, %v2418_v21 }
 0x216   :  { %v2674_v29 = vld [vmem:[#allocation11 + $0xdc0] sm:$0xff] }
 0x217   :  { %8471 = vmatpush1.bf16.msra.mxu0 %v17126_v30  ;;  %v17527_v30 = vcombine.high %v2682_v14, %v2690_v15  ;;  %v2394_v32 = vld [vmem:[#allocation11 + $0x500] sm:$0xff]  ;;  %v17510_v45 = vcombine.low %v2666_v28, %v2674_v29 }
 0x218   :  { %8472 = vmatprep.subr.bf16.mxu0 %v17111_v33  ;;  %8512 = vmatpush1.bf16.msra.mxu1 %v17382_v34  ;;  %v2402_v33 = vld [vmem:[#allocation11 + $0x540] sm:$0xff]  ;;  %v17255_v34 = vcombine.high %v2410_v19, %v2418_v21 }
 0x219   :  { %8513 = vmatprep.subr.bf16.mxu1 %v17367_v37  ;;  %v2650_v36 = vld [vmem:[#allocation11 + $0xd00] sm:$0xff]  ;;  %v17239_v44 = vcombine.high %v2394_v32, %v2402_v33  ;;  %v17238_v50 = vcombine.low %v2394_v32, %v2402_v33 }
 0x21a   :  { %v2658_v37 = vld [vmem:[#allocation11 + $0xd40] sm:$0xff] }
 0x21b   :  { %8473 = vmatpush1.bf16.msra.mxu0 %v17110_v38  ;;  %v17511_v38 = vcombine.high %v2666_v28, %v2674_v29  ;;  %v2378_v40 = vld [vmem:[#allocation11 + $0x480] sm:$0xff]  ;;  %v17495_v49 = vcombine.high %v2650_v36, %v2658_v37 }
 0x21c   :  { %8474 = vmatprep.subr.bf16.mxu0 %v17095_v41  ;;  %8514 = vmatpush1.bf16.msra.mxu1 %v17366_v42  ;;  %v2386_v41 = vld [vmem:[#allocation11 + $0x4c0] sm:$0xff]  ;;  %v573_v42 = vrot.slane %v20853_v43, %v20816_v22 }
 0x21d   :  { %8515 = vmatprep.subr.bf16.mxu1 %v17351_v46  ;;  %v2634_v46 = vld [vmem:[#allocation11 + $0xc80] sm:$0xff]  ;;  %v17223_v57 = vcombine.high %v2378_v40, %v2386_v41 }
 0x21e   :  { %v1925_v55 = vadd.f32 %v20858_v56, %v573_v42  ;;  %v2626_v60 = vld [vmem:[#allocation11 + $0xc40] sm:$0xff] }
 0x21f   :  { %8475 = vmatpush1.bf16.msra.mxu0 %v17094_v47  ;;  %v2642_v47 = vld [vmem:[#allocation11 + $0xcc0] sm:$0xff] }
 0x220   :  { %8476 = vmatprep.subr.bf16.mxu0 %v17079_v51  ;;  %8516 = vmatpush1.bf16.msra.mxu1 %v17350_v54  ;;  %v2362_v51 = vld [vmem:[#allocation11 + $0x400] sm:$0xff]  ;;  %v17479_v61 = vcombine.high %v2634_v46, %v2642_v47  ;;  %v1966_v1 = vadd.f32 %v20860_v52, %v1925_v55 }
 0x221   :  { %8517 = vmatprep.subr.bf16.mxu1 %v17335_v58  ;;  %v2370_v54 = vld [vmem:[#allocation11 + $0x440] sm:$0xff]  ;;  %v17494_v58 = vcombine.low %v2650_v36, %v2658_v37 }
 0x222   :  { %v2866_v0 = vld [vmem:[#allocation11 + $0x13c0] sm:$0xff]  ;;  %v2218_v6 = vmax.f32 %v1966_v1, 0.0 }
 0x223   :  { %8477 = vmatpush1.bf16.msra.mxu0 %v17078_v59  ;;  %v2618_v59 = vld [vmem:[#allocation11 + $0xc00] sm:$0xff] }
 0x224   :  { %8478 = vmatprep.subr.bf16.mxu0 %v17319_v62  ;;  %8518 = vmatpush1.bf16.msra.mxu1 %v17334_v63  ;;  %v17222_v62 = vcombine.low %v2378_v40, %v2386_v41  ;;  %v2858_v63 = vld [vmem:[#allocation11 + $0x1380] sm:$0xff]  ;;  %v17463_v4 = vcombine.high %v2618_v59, %v2626_v60  ;;  %v17462_v7 = vcombine.low %v2618_v59, %v2626_v60  ;;  %v20889_v60 = vld [vmem:[#allocation11 + $0xb88] sm:$0xff] }
 0x225   :  { %8519 = vmatprep.subr.bf16.mxu1 %v17575_v2  ;;  %v17207_v2 = vcombine.high %v2362_v51, %v2370_v54  ;;  %v20870_v3 = vld [vmem:[#allocation11 + $0x1b80] sm:$0xff]  ;;  %v17702_v11 = vcombine.low %v2858_v63, %v2866_v0 }
 0x226   :  { %v20872_v56 = vld [vmem:[#allocation11 + $0x1bc0] sm:$0xff] }
 0x227   :  { %8479 = vmatpush2.bf16.msra.mxu0 %v17318_v53  ;;  %v17478_v53 = vcombine.low %v2634_v46, %v2642_v47  ;;  %v17959_v52 = vcombine.high %v20870_v3, %v20872_v56  ;;  %v2834_v15 = vld [vmem:[#allocation11 + $0x12c0] sm:$0xff] }
 0x228   :  { %8480 = vmatprep.subr.bf16.mxu0 %v17303_v5  ;;  %8520 = vmatpush2.bf16.msra.mxu1 %v17574_v48  ;;  %v17206_v5 = vcombine.low %v2362_v51, %v2370_v54  ;;  %v2842_v48 = vld [vmem:[#allocation11 + $0x1300] sm:$0xff]  ;;  %v17958_v54 = vcombine.low %v20870_v3, %v20872_v56 }
 0x229   :  { %8521 = vmatprep.subr.bf16.mxu1 %v17559_v8  ;;  %v17703_v8 = vcombine.high %v2858_v63, %v2866_v0  ;;  %v2818_v33 = vld [vmem:[#allocation11 + $0x1240] sm:$0xff] }
 0x22a   :  { %v2794_v41 = vld [vmem:[#allocation11 + $0x1180] sm:$0xff] }
 0x22b   :  { %8481 = vmatpush2.bf16.msra.mxu0 %v17302_v9  ;;  %v2850_v9 = vld [vmem:[#allocation11 + $0x1340] sm:$0xff] }
 0x22c   :  { %8482 = vmatprep.subr.bf16.mxu0 %v17287_v12  ;;  %8522 = vmatpush2.bf16.msra.mxu1 %v17558_v13  ;;  %v2826_v12 = vld [vmem:[#allocation11 + $0x1280] sm:$0xff]  ;;  %v20878_v13 = vpack.c.bf16 %v2218_v6, %v2218_v6  ;;  %v17687_v14 = vcombine.high %v2842_v48, %v2850_v9 }
 0x22d   :  { %8523 = vmatprep.subr.bf16.mxu1 %v17543_v17  ;;  %v585_v17 = vrot.slane %v20853_v43, %v20825_v25  ;;  %v17671_v29 = vcombine.high %v2826_v12, %v2834_v15  ;;  %v17670_v43 = vcombine.low %v2826_v12, %v2834_v15  ;;  %v2802_v42 = vld [vmem:[#allocation11 + $0x11c0] sm:$0xff] }
 0x22e   :  { %v3106_v46 = vld [vmem:[#allocation11 + $0x1b40] sm:$0xff]  ;;  %v17638_v0 = vcombine.low %v2794_v41, %v2802_v42 }
 0x22f   :  { %8483 = vmatpush2.bf16.msra.mxu0 %v17286_v18  ;;  %v2786_v51 = vld [vmem:[#allocation11 + $0x1140] sm:$0xff] }
 0x230   :  { %8484 = vmatprep.subr.bf16.mxu0 %v17271_v26  ;;  %8524 = vmatpush2.bf16.msra.mxu1 %v17542_v27  ;;  %v17686_v26 = vcombine.low %v2842_v48, %v2850_v9  ;;  %v3082_v59 = vld [vmem:[#allocation11 + $0x1a80] sm:$0xff] }
 0x231   :  { %8525 = vmatprep.subr.bf16.mxu1 %v17527_v30  ;;  %v2810_v30 = vld [vmem:[#allocation11 + $0x1200] sm:$0xff] }
 0x232   :  { %v17655_v40 = vcombine.high %v2810_v30, %v2818_v33  ;;  %v2770_v3 = vld [vmem:[#allocation11 + $0x10c0] sm:$0xff] }
 0x233   :  { %8485 = vmatpush2.bf16.msra.mxu0 %v17270_v31  ;;  %v2746_v6 = vld [vmem:[#allocation11 + $0x1000] sm:$0xff] }
 0x234   :  { %8486 = vmatprep.subr.bf16.mxu0 %v17255_v34  ;;  %8526 = vmatpush2.bf16.msra.mxu1 %v17526_v35  ;;  %v2994_v15 = vld [vmem:[#allocation11 + $0x17c0] sm:$0xff] }
 0x235   :  { %8527 = vmatprep.subr.bf16.mxu1 %v17511_v38 }
 0x237   :  { %8487 = vmatpush2.bf16.msra.mxu0 %v17254_v39 }
 0x238   :  { %8488 = vmatprep.subr.bf16.mxu0 %v17239_v44  ;;  %8528 = vmatpush2.bf16.msra.mxu1 %v17510_v45  ;;  %v3098_v44 = vld [vmem:[#allocation11 + $0x1b00] sm:$0xff] }
 0x239   :  { %8529 = vmatprep.subr.bf16.mxu1 %v17495_v49  ;;  %v17654_v49 = vcombine.low %v2810_v30, %v2818_v33  ;;  %v17942_v1 = vcombine.low %v3098_v44, %v3106_v46  ;;  %v2970_v30 = vld [vmem:[#allocation11 + $0x1700] sm:$0xff] }
 0x23a   :  { %v3018_v33 = vld [vmem:[#allocation11 + $0x1880] sm:$0xff] }
 0x23b   :  { %8489 = vmatpush2.bf16.msra.mxu0 %v17238_v50  ;;  %v2778_v50 = vld [vmem:[#allocation11 + $0x1100] sm:$0xff] }
 0x23c   :  { %8490 = vmatprep.subr.bf16.mxu0 %v17223_v57  ;;  %8530 = vmatpush2.bf16.msra.mxu1 %v17494_v58  ;;  %v17639_v57 = vcombine.high %v2794_v41, %v2802_v42  ;;  %v17943_v58 = vcombine.high %v3098_v44, %v3106_v46  ;;  %v17622_v48 = vcombine.low %v2778_v50, %v2786_v51  ;;  %v3010_v41 = vld [vmem:[#allocation11 + $0x1840] sm:$0xff] }
 0x23d   :  { %8531 = vmatprep.subr.bf16.mxu1 %v17479_v61  ;;  %v20891_v61 = vld [vmem:[#allocation11 + $0xbc8] sm:$0xff]  ;;  %v2938_v46 = vld [vmem:[#allocation11 + $0x1600] sm:$0xff] }
 0x23e   :  { %v17448_v63 = vcombine.low %v20889_v60, %v20891_v61 }
 0x23f   :  { %8491 = vmatpush2.bf16.msra.mxu0 %v17222_v62  ;;  %v3090_v62 = vld [vmem:[#allocation11 + $0x1ac0] sm:$0xff] }
 0x240   :  { %8492 = vmatprep.subr.bf16.mxu0 %v17207_v2  ;;  %8532 = vmatpush2.bf16.msra.mxu1 %v17478_v53  ;;  %v17623_v2 = vcombine.high %v2778_v50, %v2786_v51  ;;  %v2762_v53 = vld [vmem:[#allocation11 + $0x1080] sm:$0xff]  ;;  %v17927_v56 = vcombine.high %v3082_v59, %v3090_v62 }
 0x241   :  { %8533 = vmatprep.subr.bf16.mxu1 %v17463_v4  ;;  %v3066_v4 = vld [vmem:[#allocation11 + $0x1a00] sm:$0xff]  ;;  %v17607_v9 = vcombine.high %v2762_v53, %v2770_v3  ;;  %v17606_v12 = vcombine.low %v2762_v53, %v2770_v3 }
 0x242   :  { %v2946_v50 = vld [vmem:[#allocation11 + $0x1640] sm:$0xff] }
 0x243   :  { %8493 = vmatpush2.bf16.msra.mxu0 %v17206_v5  ;;  %v3074_v5 = vld [vmem:[#allocation11 + $0x1a40] sm:$0xff]  ;;  %v17782_v3 = vcombine.low %v2938_v46, %v2946_v50 }
 0x244   :  { %8534 = vmatpush2.bf16.msra.mxu1 %v17462_v7  ;;  %8544 = vmatprep.subr.bf16.mxu0 %v17703_v8  ;;  %v2754_v7 = vld [vmem:[#allocation11 + $0x1040] sm:$0xff]  ;;  %v17926_v8 = vcombine.low %v3082_v59, %v3090_v62  ;;  %v17783_v59 = vcombine.high %v2938_v46, %v2946_v50 }
 0x245   :  { %8585 = vmatprep.subr.bf16.mxu1 %v17959_v52  ;;  %v17911_v52 = vcombine.high %v3066_v4, %v3074_v5  ;;  %v3242_v51 = vld [vmem:[#allocation11 + $0x1f80] sm:$0xff] }
 0x246   :  { %v2006_v18 = vpop.f32.mrf.mxu0  ;;  %8495 = vmatmul.mubr.bf16.vlgmr.msra.gmra.mxu0 %v20878_v13  ;;  %v2922_v62 = vld [vmem:[#allocation11 + $0x1580] sm:$0xff] }
 0x247   :  { %v2047_v19 = vpop.f32.mrf.mxu1  ;;  %v2007_v21 = vadd.f32 %v2006_v18, %v581_v10  ;;  %8545 = vmatpush1.bf16.msra.mxu0 %v17702_v11  ;;  %v3050_v10 = vld [vmem:[#allocation11 + $0x1980] sm:$0xff]  ;;  %v17591_v18 = vcombine.high %v2746_v6, %v2754_v7 }
 0x248   :  { %v2008_v27 = vpop.f32.mrf.mxu0  ;;  %8546 = vmatprep.subr.bf16.mxu0 %v17687_v14  ;;  %v3058_v11 = vld [vmem:[#allocation11 + $0x19c0] sm:$0xff] }
 0x249   :  { %v2049_v28 = vpop.f32.mrf.mxu1  ;;  %v2048_v31 = vadd.f32 %v2047_v19, %v2007_v21  ;;  %v2009_v32 = vadd.f32 %v2008_v27, %v585_v17  ;;  %v2986_v14 = vld [vmem:[#allocation11 + $0x1780] sm:$0xff]  ;;  %v17910_v17 = vcombine.low %v3066_v4, %v3074_v5  ;;  %v17895_v19 = vcombine.high %v3050_v10, %v3058_v11 }
 0x24a   :  { %v2010_v34 = vpop.f32.mrf.mxu0  ;;  %v3034_v21 = vld [vmem:[#allocation11 + $0x1900] sm:$0xff]  ;;  %v17590_v27 = vcombine.low %v2746_v6, %v2754_v7 }
 0x24b   :  { %v2051_v35 = vpop.f32.mrf.mxu1  ;;  %v2050_v36 = vadd.f32 %v2049_v28, %v2009_v32  ;;  %8547 = vmatpush1.bf16.msra.mxu0 %v17686_v26  ;;  %v2220_v37 = vmax.f32 %v2048_v31, 0.0  ;;  %v3042_v26 = vld [vmem:[#allocation11 + $0x1940] sm:$0xff]  ;;  %v17894_v28 = vcombine.low %v3050_v10, %v3058_v11 }
 0x24c   :  { %v2011_v38 = vpop.f32.mrf.mxu0  ;;  %8548 = vmatprep.subr.bf16.mxu0 %v17671_v29  ;;  %v17831_v29 = vcombine.high %v2986_v14, %v2994_v15  ;;  %v17879_v31 = vcombine.high %v3034_v21, %v3042_v26  ;;  %v2978_v32 = vld [vmem:[#allocation11 + $0x1740] sm:$0xff]  ;;  %v17830_v35 = vcombine.low %v2986_v14, %v2994_v15 }
 0x24d   :  { %v2052_v39 = vpop.f32.mrf.mxu1  ;;  %v2221_v45 = vmax.f32 %v2050_v36, 0.0  ;;  %v20887_v55 = vpack.c.bf16 %v2220_v37, %v2220_v37  ;;  %v3026_v34 = vld [vmem:[#allocation11 + $0x18c0] sm:$0xff]  ;;  %v17878_v36 = vcombine.low %v3034_v21, %v3042_v26  ;;  %v17814_v42 = vcombine.low %v2970_v30, %v2978_v32 }
 0x24e   :  { %v2954_v37 = vld [vmem:[#allocation11 + $0x1680] sm:$0xff]  ;;  %v17863_v38 = vcombine.high %v3018_v33, %v3026_v34  ;;  %v17862_v44 = vcombine.low %v3018_v33, %v3026_v34  ;;  %v20897_v34 = vld [vmem:[#allocation11 + $0x388] sm:$0xff] }
 0x24f   :  { %v20883_v47 = vpack.c.bf16 %v2221_v45, %v2221_v45  ;;  %8549 = vmatpush1.bf16.msra.mxu0 %v17670_v43  ;;  %v17815_v43 = vcombine.high %v2970_v30, %v2978_v32  ;;  %v2962_v39 = vld [vmem:[#allocation11 + $0x16c0] sm:$0xff] }
 0x250   :  { %8550 = vmatprep.subr.bf16.mxu0 %v17655_v40  ;;  %v3002_v40 = vld [vmem:[#allocation11 + $0x1800] sm:$0xff]  ;;  %v17799_v45 = vcombine.high %v2954_v37, %v2962_v39 }
 0x251   :  { %8535 = vmatprep.mubr.bf16.mxu1 %v20883_v47  ;;  %v3234_v53 = vld [vmem:[#allocation11 + $0x1f40] sm:$0xff] }
 0x252   :  { %8536 = vmatmul.mubr.bf16.vlgmr.msra.gmra.mxu1 %v20887_v55  ;;  %v2906_v5 = vld [vmem:[#allocation11 + $0x1500] sm:$0xff] }
 0x253   :  { %8551 = vmatpush1.bf16.msra.mxu0 %v17654_v49  ;;  %8586 = vmatpush1.bf16.msra.mxu1 %v17958_v54  ;;  %v17847_v49 = vcombine.high %v3002_v40, %v3010_v41  ;;  %v3250_v54 = vld [vmem:[#allocation11 + $0x1fc0] sm:$0xff] }
 0x254   :  { %8552 = vmatprep.subr.bf16.mxu0 %v17639_v57  ;;  %8587 = vmatprep.subr.bf16.mxu1 %v17943_v58  ;;  %v17798_v57 = vcombine.low %v2954_v37, %v2962_v39  ;;  %v17846_v58 = vcombine.low %v3002_v40, %v3010_v41  ;;  %v2914_v6 = vld [vmem:[#allocation11 + $0x1540] sm:$0xff] }
 0x255   :  { %v3210_v7 = vld [vmem:[#allocation11 + $0x1e80] sm:$0xff]  ;;  %v17751_v10 = vcombine.high %v2906_v5, %v2914_v6 }
 0x256   :  { %v2890_v11 = vld [vmem:[#allocation11 + $0x1480] sm:$0xff] }
 0x257   :  { %8553 = vmatpush1.bf16.msra.mxu0 %v17638_v0  ;;  %8588 = vmatpush1.bf16.msra.mxu1 %v17942_v1  ;;  %v18087_v0 = vcombine.high %v3242_v51, %v3250_v54  ;;  %v2930_v1 = vld [vmem:[#allocation11 + $0x15c0] sm:$0xff] }
 0x258   :  { %8554 = vmatprep.subr.bf16.mxu0 %v17623_v2  ;;  %8589 = vmatprep.subr.bf16.mxu1 %v17927_v56  ;;  %v3226_v2 = vld [vmem:[#allocation11 + $0x1f00] sm:$0xff]  ;;  %v18086_v56 = vcombine.low %v3242_v51, %v3250_v54  ;;  %v17767_v4 = vcombine.high %v2922_v62, %v2930_v1 }
 0x259   :  { %v2898_v14 = vld [vmem:[#allocation11 + $0x14c0] sm:$0xff] }
 0x25a   :  { %v3194_v15 = vld [vmem:[#allocation11 + $0x1e00] sm:$0xff]  ;;  %v17735_v21 = vcombine.high %v2890_v11, %v2898_v14 }
 0x25b   :  { %8555 = vmatpush1.bf16.msra.mxu0 %v17622_v48  ;;  %8590 = vmatpush1.bf16.msra.mxu1 %v17926_v8  ;;  %v18071_v48 = vcombine.high %v3226_v2, %v3234_v53  ;;  %v3218_v8 = vld [vmem:[#allocation11 + $0x1ec0] sm:$0xff] }
 0x25c   :  { %8556 = vmatprep.subr.bf16.mxu0 %v17607_v9  ;;  %8591 = vmatprep.subr.bf16.mxu1 %v17911_v52  ;;  %v17766_v9 = vcombine.low %v2922_v62, %v2930_v1  ;;  %v18070_v52 = vcombine.low %v3226_v2, %v3234_v53  ;;  %v2874_v26 = vld [vmem:[#allocation11 + $0x1400] sm:$0xff] }
 0x25d   :  { %v3186_v30 = vld [vmem:[#allocation11 + $0x1dc0] sm:$0xff] }
 0x25e   :  { %v3170_v37 = vld [vmem:[#allocation11 + $0x1d40] sm:$0xff] }
 0x25f   :  { %8557 = vmatpush1.bf16.msra.mxu0 %v17606_v12  ;;  %8592 = vmatpush1.bf16.msra.mxu1 %v17910_v17  ;;  %v18055_v12 = vcombine.high %v3210_v7, %v3218_v8  ;;  %v3202_v17 = vld [vmem:[#allocation11 + $0x1e40] sm:$0xff] }
 0x260   :  { %8558 = vmatprep.subr.bf16.mxu0 %v17591_v18  ;;  %8593 = vmatprep.subr.bf16.mxu1 %v17895_v19  ;;  %v17750_v18 = vcombine.low %v2906_v5, %v2914_v6  ;;  %v18054_v19 = vcombine.low %v3210_v7, %v3218_v8  ;;  %v18038_v32 = vcombine.low %v3194_v15, %v3202_v17  ;;  %v3154_v46 = vld [vmem:[#allocation11 + $0x1cc0] sm:$0xff] }
 0x263   :  { %8559 = vmatpush1.bf16.msra.mxu0 %v17590_v27  ;;  %8594 = vmatpush1.bf16.msra.mxu1 %v17894_v28  ;;  %v18039_v27 = vcombine.high %v3194_v15, %v3202_v17  ;;  %v2882_v28 = vld [vmem:[#allocation11 + $0x1440] sm:$0xff]  ;;  %v2339_v15 = vld [vmem:[#allocation11 + $0x348] sm:$0xff] }
 0x264   :  { %8560 = vmatprep.subr.bf16.mxu0 %v17831_v29  ;;  %8595 = vmatprep.subr.bf16.mxu1 %v17879_v31  ;;  %v3178_v29 = vld [vmem:[#allocation11 + $0x1d80] sm:$0xff]  ;;  %v17734_v31 = vcombine.low %v2890_v11, %v2898_v14  ;;  %v17719_v33 = vcombine.high %v2874_v26, %v2882_v28  ;;  %v17718_v39 = vcombine.low %v2874_v26, %v2882_v28  ;;  %v2331_v14 = vld [vmem:[#allocation11 + $0x308] sm:$0xff] }
 0x265   :  { %v18022_v40 = vcombine.low %v3178_v29, %v3186_v30  ;;  %v2315_v26 = vld [vmem:[#allocation11 + $0x288] sm:$0xff]  ;;  %v17176_v28 = vcombine.low %v2331_v14, %v2339_v15 }
 0x267   :  { %8561 = vmatpush2.bf16.msra.mxu0 %v17830_v35  ;;  %8596 = vmatpush1.bf16.msra.mxu1 %v17878_v36  ;;  %v18023_v35 = vcombine.high %v3178_v29, %v3186_v30  ;;  %v2355_v36 = vld [vmem:[#allocation11 + $0x3c8] sm:$0xff] }
 0x268   :  { %8562 = vmatprep.subr.bf16.mxu0 %v17815_v43  ;;  %8597 = vmatprep.subr.bf16.mxu1 %v17863_v38  ;;  %v3162_v43 = vld [vmem:[#allocation11 + $0x1d00] sm:$0xff]  ;;  %v20900_v38 = vsub.s32 4, %v20813_v20  ;;  %v17193_v41 = vcombine.high %v20897_v34, %v2355_v36  ;;  %v2299_v30 = vld [vmem:[#allocation11 + $0x208] sm:$0xff] }
 0x269   :  { %v18006_v51 = vcombine.low %v3162_v43, %v3170_v37 }
 0x26b   :  { %8563 = vmatpush2.bf16.msra.mxu0 %v17814_v42  ;;  %8598 = vmatpush1.bf16.msra.mxu1 %v17862_v44  ;;  %v18007_v42 = vcombine.high %v3162_v43, %v3170_v37  ;;  %v20904_v44 = vsub.s32 5, %v20813_v20  ;;  %v2267_v37 = vld [vmem:[#allocation11 + $0x108] sm:$0xff] }
 0x26c   :  { %8564 = vmatprep.subr.bf16.mxu0 %v17799_v45  ;;  %8599 = vmatprep.subr.bf16.mxu1 %v17847_v49  ;;  %v3146_v45 = vld [vmem:[#allocation11 + $0x1c80] sm:$0xff]  ;;  %v20906_v49 = vld [vmem:[#allocation10] sm:$0xff] }
 0x26d   :  { %v589_v50 = vrot.slane %v20906_v49, %v20900_v38  ;;  %v17991_v54 = vcombine.high %v3146_v45, %v3154_v46  ;;  %v17990_v2 = vcombine.low %v3146_v45, %v3154_v46  ;;  %v2259_v45 = vld [vmem:[#allocation11 + $0xc8] sm:$0xff] }
 0x26f   :  { %8565 = vmatpush2.bf16.msra.mxu0 %v17798_v57  ;;  %8600 = vmatpush1.bf16.msra.mxu1 %v17846_v58  ;;  %v593_v57 = vrot.slane %v20906_v49, %v20904_v44  ;;  %v3130_v58 = vld [vmem:[#allocation11 + $0x1c00] sm:$0xff] }
 0x270   :  { %8566 = vmatprep.subr.bf16.mxu0 %v17783_v59  ;;  %8601 = vmatprep.subr.bf16.mxu1 %v18087_v0  ;;  %v3138_v59 = vld [vmem:[#allocation11 + $0x1c40] sm:$0xff] }
 0x271   :  { %v17974_v8 = vcombine.low %v3130_v58, %v3138_v59 }
 0x273   :  { %8567 = vmatpush2.bf16.msra.mxu0 %v17782_v3  ;;  %8602 = vmatpush2.bf16.msra.mxu1 %v18086_v56  ;;  %v17975_v3 = vcombine.high %v3130_v58, %v3138_v59  ;;  %v2475_v59 = vld [vmem:[#allocation11 + $0x788] sm:$0xff] }
 0x274   :  { %8568 = vmatprep.subr.bf16.mxu0 %v17767_v4  ;;  %8603 = vmatprep.subr.bf16.mxu1 %v18071_v48 }
 0x277   :  { %8569 = vmatpush2.bf16.msra.mxu0 %v17766_v9  ;;  %8604 = vmatpush2.bf16.msra.mxu1 %v18070_v52 }
 0x278   :  { %8570 = vmatprep.subr.bf16.mxu0 %v17751_v10  ;;  %8605 = vmatprep.subr.bf16.mxu1 %v18055_v12  ;;  %v17449_v10 = vcombine.high %v20889_v60, %v20891_v61 }
 0x27b   :  { %8571 = vmatpush2.bf16.msra.mxu0 %v17750_v18  ;;  %8606 = vmatpush2.bf16.msra.mxu1 %v18054_v19  ;;  %v17192_v18 = vcombine.low %v20897_v34, %v2355_v36  ;;  %v2283_v34 = vld [vmem:[#allocation11 + $0x188] sm:$0xff] }
 0x27c   :  { %8572 = vmatprep.subr.bf16.mxu0 %v17735_v21  ;;  %8607 = vmatprep.subr.bf16.mxu1 %v18039_v27  ;;  %v17177_v21 = vcombine.high %v2331_v14, %v2339_v15  ;;  %v2323_v27 = vld [vmem:[#allocation11 + $0x2c8] sm:$0xff] }
 0x27d   :  { %v17161_v29 = vcombine.high %v2315_v26, %v2323_v27  ;;  %v2395_v15 = vld [vmem:[#allocation11 + $0x508] sm:$0xff] }
 0x27f   :  { %8573 = vmatpush2.bf16.msra.mxu0 %v17734_v31  ;;  %8608 = vmatpush2.bf16.msra.mxu1 %v18038_v32  ;;  %v2307_v31 = vld [vmem:[#allocation11 + $0x248] sm:$0xff]  ;;  %v17160_v32 = vcombine.low %v2315_v26, %v2323_v27  ;;  %v20923_v26 = vsub.s32 6, %v20813_v20 }
 0x280   :  { %8574 = vmatprep.subr.bf16.mxu0 %v17719_v33  ;;  %8609 = vmatprep.subr.bf16.mxu1 %v18023_v35  ;;  %v17145_v33 = vcombine.high %v2299_v30, %v2307_v31  ;;  %v2291_v35 = vld [vmem:[#allocation11 + $0x1c8] sm:$0xff]  ;;  %v17144_v36 = vcombine.low %v2299_v30, %v2307_v31 }
 0x281   :  { %v17129_v43 = vcombine.high %v2283_v34, %v2291_v35  ;;  %v2387_v30 = vld [vmem:[#allocation11 + $0x4c8] sm:$0xff] }
 0x283   :  { %8575 = vmatpush2.bf16.msra.mxu0 %v17718_v39  ;;  %8610 = vmatpush2.bf16.msra.mxu1 %v18022_v40  ;;  %v2275_v39 = vld [vmem:[#allocation11 + $0x148] sm:$0xff]  ;;  %v17128_v40 = vcombine.low %v2283_v34, %v2291_v35 }
 0x284   :  { %8626 = vmatprep.subr.bf16.mxu0 %v17193_v41  ;;  %8611 = vmatprep.subr.bf16.mxu1 %v18007_v42  ;;  %v17113_v41 = vcombine.high %v2267_v37, %v2275_v39  ;;  %v2251_v42 = vld [vmem:[#allocation11 + $0x88] sm:$0xff]  ;;  %v17112_v46 = vcombine.low %v2267_v37, %v2275_v39 }
 0x285   :  { %v2363_v35 = vld [vmem:[#allocation11 + $0x408] sm:$0xff] }
 0x286   :  { %v2088_v62 = vpop.f32.mrf.mxu0 }
 0x287   :  { %v2089_v0 = vadd.f32 %v2088_v62, %v589_v50  ;;  %v2129_v1 = vpop.f32.mrf.mxu1  ;;  %8612 = vmatpush2.bf16.msra.mxu1 %v18006_v51  ;;  %v17097_v50 = vcombine.high %v2251_v42, %v2259_v45  ;;  %v2235_v51 = vld [vmem:[#allocation11 + $0x8] sm:$0xff] }
 0x288   :  { %v2090_v53 = vpop.f32.mrf.mxu0  ;;  %8613 = vmatprep.subr.bf16.mxu1 %v17991_v54  ;;  %v2243_v54 = vld [vmem:[#allocation11 + $0x48] sm:$0xff] }
 0x289   :  { %v2130_v56 = vadd.f32 %v2129_v1, %v2089_v0  ;;  %v2091_v4 = vadd.f32 %v2090_v53, %v593_v57  ;;  %v2131_v5 = vpop.f32.mrf.mxu1  ;;  %v17096_v57 = vcombine.low %v2251_v42, %v2259_v45  ;;  %v17081_v58 = vcombine.high %v2235_v51, %v2243_v54  ;;  %v2483_v62 = vld [vmem:[#allocation11 + $0x7c8] sm:$0xff] }
 0x28a   :  { %v2092_v48 = vpop.f32.mrf.mxu0  ;;  %v17080_v0 = vcombine.low %v2235_v51, %v2243_v54  ;;  %v17321_v1 = vcombine.high %v2475_v59, %v2483_v62  ;;  %v2467_v53 = vld [vmem:[#allocation11 + $0x748] sm:$0xff] }
 0x28b   :  { %v2132_v6 = vadd.f32 %v2131_v5, %v2091_v4  ;;  %v2133_v7 = vpop.f32.mrf.mxu1  ;;  %8614 = vmatpush2.bf16.msra.mxu1 %v17990_v2  ;;  %v2222_v9 = vmax.f32 %v2130_v56, 0.0  ;;  %v2459_v2 = vld [vmem:[#allocation11 + $0x708] sm:$0xff] }
 0x28c   :  { %v2093_v52 = vpop.f32.mrf.mxu0  ;;  %8615 = vmatprep.subr.bf16.mxu1 %v17975_v3  ;;  %v17320_v3 = vcombine.low %v2475_v59, %v2483_v62  ;;  %v17305_v56 = vcombine.high %v2459_v2, %v2467_v53  ;;  %v2443_v4 = vld [vmem:[#allocation11 + $0x688] sm:$0xff]  ;;  %v17304_v48 = vcombine.low %v2459_v2, %v2467_v53 }
 0x28d   :  { %v2223_v11 = vmax.f32 %v2132_v6, 0.0  ;;  %v2134_v12 = vpop.f32.mrf.mxu1  ;;  %v20917_v19 = vpack.c.bf16 %v2222_v9, %v2222_v9  ;;  %v2451_v5 = vld [vmem:[#allocation11 + $0x6c8] sm:$0xff] }
 0x28e   :  { %v17289_v6 = vcombine.high %v2443_v4, %v2451_v5  ;;  %v2427_v7 = vld [vmem:[#allocation11 + $0x608] sm:$0xff]  ;;  %v17288_v9 = vcombine.low %v2443_v4, %v2451_v5 }
 0x28f   :  { %v20914_v17 = vpack.c.bf16 %v2223_v11, %v2223_v11  ;;  %8616 = vmatpush2.bf16.msra.mxu1 %v17974_v8  ;;  %v2435_v8 = vld [vmem:[#allocation11 + $0x648] sm:$0xff] }
 0x290   :  { %8667 = vmatprep.subr.bf16.mxu1 %v17449_v10  ;;  %v17273_v52 = vcombine.high %v2427_v7, %v2435_v8  ;;  %v2411_v10 = vld [vmem:[#allocation11 + $0x588] sm:$0xff]  ;;  %v17272_v12 = vcombine.low %v2427_v7, %v2435_v8 }
 0x291   :  { %8576 = vmatprep.mubr.bf16.mxu0 %v20914_v17  ;;  %v2419_v11 = vld [vmem:[#allocation11 + $0x5c8] sm:$0xff] }
 0x292   :  { %8577 = vmatmul.mubr.bf16.vlgmr.msra.gmra.mxu0 %v20917_v19  ;;  %v17257_v14 = vcombine.high %v2411_v10, %v2419_v11  ;;  %v2867_v51 = vld [vmem:[#allocation11 + $0x13c8] sm:$0xff] }
 0x293   :  { %8627 = vmatpush1.bf16.msra.mxu0 %v17192_v18  ;;  %8658 = vmatprep.mubr.bf16.mxu0 %v20863_v16  ;;  %v2403_v18 = vld [vmem:[#allocation11 + $0x548] sm:$0xff] }
 0x294   :  { %8628 = vmatprep.subr.bf16.mxu0 %v17177_v21  ;;  %v17256_v21 = vcombine.low %v2411_v10, %v2419_v11  ;;  %v17241_v27 = vcombine.high %v2395_v15, %v2403_v18  ;;  %v17240_v31 = vcombine.low %v2395_v15, %v2403_v18  ;;  %v2587_v53 = vld [vmem:[#allocation11 + $0xb08] sm:$0xff] }
 0x295   :  { %v2851_v4 = vld [vmem:[#allocation11 + $0x1348] sm:$0xff] }
 0x296   :  { %v2571_v7 = vld [vmem:[#allocation11 + $0xa88] sm:$0xff] }
 0x297   :  { %8629 = vmatpush1.bf16.msra.mxu0 %v17176_v28  ;;  %v20926_v28 = vsub.s32 7, %v20813_v20  ;;  %v2827_v10 = vld [vmem:[#allocation11 + $0x1288] sm:$0xff] }
 0x298   :  { %8630 = vmatprep.subr.bf16.mxu0 %v17161_v29  ;;  %v2379_v29 = vld [vmem:[#allocation11 + $0x488] sm:$0xff] }
 0x299   :  { %v601_v34 = vrot.slane %v20906_v49, %v20926_v28  ;;  %v17224_v20 = vcombine.low %v2379_v29, %v2387_v30  ;;  %v2835_v11 = vld [vmem:[#allocation11 + $0x12c8] sm:$0xff] }
 0x29a   :  { %v17673_v18 = vcombine.high %v2827_v10, %v2835_v11  ;;  %v17672_v60 = vcombine.low %v2827_v10, %v2835_v11  ;;  %v2987_v10 = vld [vmem:[#allocation11 + $0x1788] sm:$0xff] }
 0x29b   :  { %8631 = vmatpush1.bf16.msra.mxu0 %v17160_v32  ;;  %v597_v32 = vrot.slane %v20906_v49, %v20923_v26  ;;  %v2995_v11 = vld [vmem:[#allocation11 + $0x17c8] sm:$0xff] }
 0x29c   :  { %8632 = vmatprep.subr.bf16.mxu0 %v17145_v33  ;;  %v17225_v33 = vcombine.high %v2379_v29, %v2387_v30  ;;  %v2811_v29 = vld [vmem:[#allocation11 + $0x1208] sm:$0xff] }
 0x29d   :  { %v2819_v30 = vld [vmem:[#allocation11 + $0x1248] sm:$0xff] }
 0x29f   :  { %8633 = vmatpush1.bf16.msra.mxu0 %v17144_v36  ;;  %v2371_v36 = vld [vmem:[#allocation11 + $0x448] sm:$0xff] }
 0x2a0   :  { %8634 = vmatprep.subr.bf16.mxu0 %v17129_v43  ;;  %v17208_v49 = vcombine.low %v2363_v35, %v2371_v36 }
 0x2a3   :  { %8635 = vmatpush1.bf16.msra.mxu0 %v17128_v40 }
 0x2a4   :  { %8636 = vmatprep.subr.bf16.mxu0 %v17113_v41  ;;  %v17209_v41 = vcombine.high %v2363_v35, %v2371_v36  ;;  %v2803_v35 = vld [vmem:[#allocation11 + $0x11c8] sm:$0xff] }
 0x2a7   :  { %8637 = vmatpush1.bf16.msra.mxu0 %v17112_v46 }
 0x2a8   :  { %8638 = vmatprep.subr.bf16.mxu0 %v17097_v50  ;;  %v2859_v50 = vld [vmem:[#allocation11 + $0x1388] sm:$0xff] }
 0x2ab   :  { %8639 = vmatpush1.bf16.msra.mxu0 %v17096_v57 }
 0x2ac   :  { %8640 = vmatprep.subr.bf16.mxu0 %v17081_v58 }
 0x2af   :  { %8641 = vmatpush1.bf16.msra.mxu0 %v17080_v0  ;;  %v17705_v0 = vcombine.high %v2859_v50, %v2867_v51 }
 0x2b0   :  { %8642 = vmatprep.subr.bf16.mxu0 %v17321_v1 }
 0x2b3   :  { %8643 = vmatpush2.bf16.msra.mxu0 %v17320_v3  ;;  %v2595_v3 = vld [vmem:[#allocation11 + $0xb48] sm:$0xff] }
 0x2b4   :  { %8644 = vmatprep.subr.bf16.mxu0 %v17305_v56  ;;  %v2843_v56 = vld [vmem:[#allocation11 + $0x1308] sm:$0xff]  ;;  %v17433_v8 = vcombine.high %v2587_v53, %v2595_v3 }
 0x2b7   :  { %8645 = vmatpush2.bf16.msra.mxu0 %v17304_v48  ;;  %v17704_v48 = vcombine.low %v2859_v50, %v2867_v51 }
 0x2b8   :  { %8646 = vmatprep.subr.bf16.mxu0 %v17289_v6 }
 0x2bb   :  { %8647 = vmatpush2.bf16.msra.mxu0 %v17288_v9  ;;  %v17689_v9 = vcombine.high %v2843_v56, %v2851_v4 }
 0x2bc   :  { %8648 = vmatprep.subr.bf16.mxu0 %v17273_v52  ;;  %v2579_v52 = vld [vmem:[#allocation11 + $0xac8] sm:$0xff] }
 0x2bd   :  { %v17417_v15 = vcombine.high %v2571_v7, %v2579_v52 }
 0x2bf   :  { %8649 = vmatpush2.bf16.msra.mxu0 %v17272_v12  ;;  %v17432_v12 = vcombine.low %v2587_v53, %v2595_v3  ;;  %v2499_v53 = vld [vmem:[#allocation11 + $0x848] sm:$0xff] }
 0x2c0   :  { %8650 = vmatprep.subr.bf16.mxu0 %v17257_v14  ;;  %v17688_v14 = vcombine.low %v2843_v56, %v2851_v4  ;;  %v2747_v3 = vld [vmem:[#allocation11 + $0x1008] sm:$0xff] }
 0x2c1   :  { %v2755_v56 = vld [vmem:[#allocation11 + $0x1048] sm:$0xff] }
 0x2c3   :  { %8651 = vmatpush2.bf16.msra.mxu0 %v17256_v21  ;;  %v2555_v21 = vld [vmem:[#allocation11 + $0xa08] sm:$0xff] }
 0x2c4   :  { %8652 = vmatprep.subr.bf16.mxu0 %v17241_v27  ;;  %v2563_v27 = vld [vmem:[#allocation11 + $0xa48] sm:$0xff] }
 0x2c5   :  { %v17401_v61 = vcombine.high %v2555_v21, %v2563_v27  ;;  %v17400_v36 = vcombine.low %v2555_v21, %v2563_v27  ;;  %v2715_v21 = vld [vmem:[#allocation11 + $0xf08] sm:$0xff] }
 0x2c6   :  { %v2170_v43 = vpop.f32.mrf.mxu0  ;;  %v2723_v27 = vld [vmem:[#allocation11 + $0xf48] sm:$0xff] }
 0x2c7   :  { %v2171_v37 = vadd.f32 %v2170_v43, %v597_v32  ;;  %v2211_v39 = vpop.f32.mrf.mxu1  ;;  %8653 = vmatpush2.bf16.msra.mxu0 %v17240_v31  ;;  %v17416_v31 = vcombine.low %v2571_v7, %v2579_v52  ;;  %v2539_v32 = vld [vmem:[#allocation11 + $0x988] sm:$0xff]  ;;  %v17656_v43 = vcombine.low %v2811_v29, %v2819_v30 }
 0x2c8   :  { %v2172_v40 = vpop.f32.mrf.mxu0  ;;  %8654 = vmatprep.subr.bf16.mxu0 %v17225_v33  ;;  %v2547_v33 = vld [vmem:[#allocation11 + $0x9c8] sm:$0xff] }
 0x2c9   :  { %v2212_v42 = vadd.f32 %v2211_v39, %v2171_v37  ;;  %v2173_v45 = vadd.f32 %v2172_v40, %v601_v34  ;;  %v2213_v46 = vpop.f32.mrf.mxu1  ;;  %v2795_v34 = vld [vmem:[#allocation11 + $0x1188] sm:$0xff]  ;;  %v17385_v37 = vcombine.high %v2539_v32, %v2547_v33 }
 0x2ca   :  { %v2174_v54 = vpop.f32.mrf.mxu0  ;;  %v17641_v39 = vcombine.high %v2795_v34, %v2803_v35  ;;  %v2531_v40 = vld [vmem:[#allocation11 + $0x948] sm:$0xff] }
 0x2cb   :  { %v2214_v57 = vadd.f32 %v2213_v46, %v2173_v45  ;;  %v2215_v58 = vpop.f32.mrf.mxu1  ;;  %8655 = vmatpush2.bf16.msra.mxu0 %v17224_v20  ;;  %v2224_v59 = vmax.f32 %v2212_v42, 0.0  ;;  %v2523_v20 = vld [vmem:[#allocation11 + $0x908] sm:$0xff]  ;;  %v17384_v45 = vcombine.low %v2539_v32, %v2547_v33  ;;  %v17640_v46 = vcombine.low %v2795_v34, %v2803_v35 }
 0x2cc   :  { %v2175_v62 = vpop.f32.mrf.mxu0  ;;  %8656 = vmatprep.subr.bf16.mxu0 %v17209_v41  ;;  %v2779_v41 = vld [vmem:[#allocation11 + $0x1108] sm:$0xff]  ;;  %v17369_v50 = vcombine.high %v2523_v20, %v2531_v40 }
 0x2cd   :  { %v2225_v1 = vmax.f32 %v2214_v57, 0.0  ;;  %v2216_v2 = vpop.f32.mrf.mxu1  ;;  %v20934_v6 = vpack.c.bf16 %v2224_v59, %v2224_v59  ;;  %v2787_v42 = vld [vmem:[#allocation11 + $0x1148] sm:$0xff]  ;;  %v17368_v59 = vcombine.low %v2523_v20, %v2531_v40 }
 0x2ce   :  { %v17625_v51 = vcombine.high %v2779_v41, %v2787_v42  ;;  %v2507_v54 = vld [vmem:[#allocation11 + $0x888] sm:$0xff]  ;;  %v17624_v62 = vcombine.low %v2779_v41, %v2787_v42 }
 0x2cf   :  { %v20932_v5 = vpack.c.bf16 %v2225_v1, %v2225_v1  ;;  %8657 = vmatpush2.bf16.msra.mxu0 %v17208_v49  ;;  %v2515_v57 = vld [vmem:[#allocation11 + $0x8c8] sm:$0xff] }
 0x2d0   :  { %8708 = vmatprep.subr.bf16.mxu0 %v17705_v0  ;;  %v2763_v58 = vld [vmem:[#allocation11 + $0x1088] sm:$0xff]  ;;  %v17353_v0 = vcombine.high %v2507_v54, %v2515_v57  ;;  %v17352_v4 = vcombine.low %v2507_v54, %v2515_v57 }
 0x2d1   :  { %8617 = vmatprep.mubr.bf16.mxu1 %v20932_v5  ;;  %v2771_v49 = vld [vmem:[#allocation11 + $0x10c8] sm:$0xff] }
 0x2d2   :  { %8659 = vmatmul.mubr.bf16.vlgmr.msra.gmra.mxu0 %v20878_v13  ;;  %8618 = vmatmul.mubr.bf16.vlgmr.msra.gmra.mxu1 %v20934_v6  ;;  %v17609_v1 = vcombine.high %v2763_v58, %v2771_v49  ;;  %v2491_v2 = vld [vmem:[#allocation11 + $0x808] sm:$0xff] }
 0x2d3   :  { %8668 = vmatpush1.bf16.msra.mxu1 %v17448_v63  ;;  %8709 = vmatpush1.bf16.msra.mxu0 %v17704_v48  ;;  %v17657_v63 = vcombine.high %v2811_v29, %v2819_v30  ;;  %v17608_v48 = vcombine.low %v2763_v58, %v2771_v49  ;;  %v17337_v7 = vcombine.high %v2491_v2, %v2499_v53  ;;  %v2739_v52 = vld [vmem:[#allocation11 + $0xfc8] sm:$0xff] }
 0x2d4   :  { %8740 = vmatprep.mubr.bf16.mxu0 %v20914_v17  ;;  %8699 = vmatprep.mubr.bf16.mxu1 %v20883_v47  ;;  %v2971_v29 = vld [vmem:[#allocation11 + $0x1708] sm:$0xff] }
 0x2d5   :  { %8669 = vmatprep.subr.bf16.mxu1 %v17433_v8  ;;  %8710 = vmatprep.subr.bf16.mxu0 %v17689_v9  ;;  %v17593_v8 = vcombine.high %v2747_v3, %v2755_v56  ;;  %v2731_v9 = vld [vmem:[#allocation11 + $0xf88] sm:$0xff] }
 0x2d6   :  { %v2979_v30 = vld [vmem:[#allocation11 + $0x1748] sm:$0xff] }
 0x2d7   :  { %8670 = vmatpush1.bf16.msra.mxu1 %v17432_v12  ;;  %8711 = vmatpush1.bf16.msra.mxu0 %v17688_v14  ;;  %v17336_v12 = vcombine.low %v2491_v2, %v2499_v53  ;;  %v17592_v14 = vcombine.low %v2747_v3, %v2755_v56  ;;  %v2699_v32 = vld [vmem:[#allocation11 + $0xe88] sm:$0xff] }
 0x2d8   :  { %8671 = vmatprep.subr.bf16.mxu1 %v17417_v15  ;;  %8712 = vmatprep.subr.bf16.mxu0 %v17673_v18  ;;  %v17577_v15 = vcombine.high %v2731_v9, %v2739_v52  ;;  %v17833_v18 = vcombine.high %v2987_v10, %v2995_v11  ;;  %v2707_v33 = vld [vmem:[#allocation11 + $0xec8] sm:$0xff] }
 0x2d9   :  { %v2955_v34 = vld [vmem:[#allocation11 + $0x1688] sm:$0xff] }
 0x2da   :  { %v2963_v35 = vld [vmem:[#allocation11 + $0x16c8] sm:$0xff] }
 0x2db   :  { %8672 = vmatpush1.bf16.msra.mxu1 %v17416_v31  ;;  %8713 = vmatpush1.bf16.msra.mxu0 %v17672_v60  ;;  %v17576_v31 = vcombine.low %v2731_v9, %v2739_v52  ;;  %v17832_v60 = vcombine.low %v2987_v10, %v2995_v11  ;;  %v2683_v20 = vld [vmem:[#allocation11 + $0xe08] sm:$0xff] }
 0x2dc   :  { %8673 = vmatprep.subr.bf16.mxu1 %v17401_v61  ;;  %8714 = vmatprep.subr.bf16.mxu0 %v17657_v63  ;;  %v17561_v61 = vcombine.high %v2715_v21, %v2723_v27  ;;  %v17817_v63 = vcombine.high %v2971_v29, %v2979_v30  ;;  %v2691_v40 = vld [vmem:[#allocation11 + $0xe48] sm:$0xff] }
 0x2dd   :  { %v2939_v41 = vld [vmem:[#allocation11 + $0x1608] sm:$0xff] }
 0x2de   :  { %v2947_v42 = vld [vmem:[#allocation11 + $0x1648] sm:$0xff] }
 0x2df   :  { %8674 = vmatpush1.bf16.msra.mxu1 %v17400_v36  ;;  %8715 = vmatpush1.bf16.msra.mxu0 %v17656_v43  ;;  %v17560_v36 = vcombine.low %v2715_v21, %v2723_v27  ;;  %v17816_v43 = vcombine.low %v2971_v29, %v2979_v30  ;;  %v2667_v54 = vld [vmem:[#allocation11 + $0xd88] sm:$0xff] }
 0x2e0   :  { %8675 = vmatprep.subr.bf16.mxu1 %v17385_v37  ;;  %8716 = vmatprep.subr.bf16.mxu0 %v17641_v39  ;;  %v17545_v37 = vcombine.high %v2699_v32, %v2707_v33  ;;  %v17801_v39 = vcombine.high %v2955_v34, %v2963_v35  ;;  %v2675_v57 = vld [vmem:[#allocation11 + $0xdc8] sm:$0xff] }
 0x2e1   :  { %v2923_v58 = vld [vmem:[#allocation11 + $0x1588] sm:$0xff] }
 0x2e2   :  { %v2931_v49 = vld [vmem:[#allocation11 + $0x15c8] sm:$0xff] }
 0x2e3   :  { %8676 = vmatpush1.bf16.msra.mxu1 %v17384_v45  ;;  %8717 = vmatpush1.bf16.msra.mxu0 %v17640_v46  ;;  %v17544_v45 = vcombine.low %v2699_v32, %v2707_v33  ;;  %v17800_v46 = vcombine.low %v2955_v34, %v2963_v35  ;;  %v2651_v2 = vld [vmem:[#allocation11 + $0xd08] sm:$0xff] }
 0x2e4   :  { %8677 = vmatprep.subr.bf16.mxu1 %v17369_v50  ;;  %8718 = vmatprep.subr.bf16.mxu0 %v17625_v51  ;;  %v17529_v50 = vcombine.high %v2683_v20, %v2691_v40  ;;  %v17785_v51 = vcombine.high %v2939_v41, %v2947_v42  ;;  %v2659_v53 = vld [vmem:[#allocation11 + $0xd48] sm:$0xff] }
 0x2e5   :  { %v2907_v3 = vld [vmem:[#allocation11 + $0x1508] sm:$0xff] }
 0x2e6   :  { %v2915_v56 = vld [vmem:[#allocation11 + $0x1548] sm:$0xff] }
 0x2e7   :  { %8678 = vmatpush1.bf16.msra.mxu1 %v17368_v59  ;;  %8719 = vmatpush1.bf16.msra.mxu0 %v17624_v62  ;;  %v17528_v59 = vcombine.low %v2683_v20, %v2691_v40  ;;  %v17784_v62 = vcombine.low %v2939_v41, %v2947_v42  ;;  %v2635_v9 = vld [vmem:[#allocation11 + $0xc88] sm:$0xff] }
 0x2e8   :  { %8679 = vmatprep.subr.bf16.mxu1 %v17353_v0  ;;  %8720 = vmatprep.subr.bf16.mxu0 %v17609_v1  ;;  %v17513_v0 = vcombine.high %v2667_v54, %v2675_v57  ;;  %v17769_v1 = vcombine.high %v2923_v58, %v2931_v49  ;;  %v2643_v52 = vld [vmem:[#allocation11 + $0xcc8] sm:$0xff] }
 0x2e9   :  { %v2891_v10 = vld [vmem:[#allocation11 + $0x1488] sm:$0xff] }
 0x2ea   :  { %v2899_v11 = vld [vmem:[#allocation11 + $0x14c8] sm:$0xff] }
 0x2eb   :  { %8680 = vmatpush1.bf16.msra.mxu1 %v17352_v4  ;;  %8721 = vmatpush1.bf16.msra.mxu0 %v17608_v48  ;;  %v17512_v4 = vcombine.low %v2667_v54, %v2675_v57  ;;  %v17768_v48 = vcombine.low %v2923_v58, %v2931_v49  ;;  %v2619_v21 = vld [vmem:[#allocation11 + $0xc08] sm:$0xff]  ;;  %v2332_v54 = vld [vmem:[#allocation11 + $0x310] sm:$0xff] }
 0x2ec   :  { %8681 = vmatprep.subr.bf16.mxu1 %v17337_v7  ;;  %8722 = vmatprep.subr.bf16.mxu0 %v17593_v8  ;;  %v17497_v7 = vcombine.high %v2651_v2, %v2659_v53  ;;  %v17753_v8 = vcombine.high %v2907_v3, %v2915_v56  ;;  %v2627_v27 = vld [vmem:[#allocation11 + $0xc48] sm:$0xff]  ;;  %v2340_v57 = vld [vmem:[#allocation11 + $0x350] sm:$0xff] }
 0x2ed   :  { %v2875_v29 = vld [vmem:[#allocation11 + $0x1408] sm:$0xff]  ;;  %v17465_v32 = vcombine.high %v2619_v21, %v2627_v27  ;;  %v17464_v20 = vcombine.low %v2619_v21, %v2627_v27  ;;  %v2300_v21 = vld [vmem:[#allocation11 + $0x210] sm:$0xff] }
 0x2ee   :  { %v2883_v30 = vld [vmem:[#allocation11 + $0x1448] sm:$0xff]  ;;  %v2308_v27 = vld [vmem:[#allocation11 + $0x250] sm:$0xff] }
 0x2ef   :  { %8682 = vmatpush1.bf16.msra.mxu1 %v17336_v12  ;;  %8723 = vmatpush1.bf16.msra.mxu0 %v17592_v14  ;;  %v17496_v12 = vcombine.low %v2651_v2, %v2659_v53  ;;  %v17752_v14 = vcombine.low %v2907_v3, %v2915_v56  ;;  %v17721_v33 = vcombine.high %v2875_v29, %v2883_v30  ;;  %v3115_v34 = vld [vmem:[#allocation11 + $0x1b88] sm:$0xff]  ;;  %v2316_v56 = vld [vmem:[#allocation11 + $0x290] sm:$0xff] }
 0x2f0   :  { %8683 = vmatprep.subr.bf16.mxu1 %v17577_v15  ;;  %8724 = vmatprep.subr.bf16.mxu0 %v17833_v18  ;;  %v17481_v15 = vcombine.high %v2635_v9, %v2643_v52  ;;  %v17737_v18 = vcombine.high %v2891_v10, %v2899_v11  ;;  %v3123_v35 = vld [vmem:[#allocation11 + $0x1bc8] sm:$0xff]  ;;  %v17720_v40 = vcombine.low %v2875_v29, %v2883_v30 }
 0x2f1   :  { %v17961_v42 = vcombine.high %v3115_v34, %v3123_v35  ;;  %v17960_v49 = vcombine.low %v3115_v34, %v3123_v35  ;;  %v3083_v2 = vld [vmem:[#allocation11 + $0x1a88] sm:$0xff]  ;;  %v2292_v34 = vld [vmem:[#allocation11 + $0x1d0] sm:$0xff] }
 0x2f2   :  { %v3091_v53 = vld [vmem:[#allocation11 + $0x1ac8] sm:$0xff] }
 0x2f3   :  { %8684 = vmatpush2.bf16.msra.mxu1 %v17576_v31  ;;  %8725 = vmatpush2.bf16.msra.mxu0 %v17832_v60  ;;  %v17480_v60 = vcombine.low %v2635_v9, %v2643_v52  ;;  %v17178_v52 = vcombine.low %v2332_v54, %v2340_v57  ;;  %v17928_v29 = vcombine.low %v3083_v2, %v3091_v53 }
 0x2f4   :  { %8685 = vmatprep.subr.bf16.mxu1 %v17561_v61  ;;  %8726 = vmatprep.subr.bf16.mxu0 %v17817_v63  ;;  %v17736_v61 = vcombine.low %v2891_v10, %v2899_v11  ;;  %v17929_v10 = vcombine.high %v3083_v2, %v3091_v53  ;;  %v3011_v2 = vld [vmem:[#allocation11 + $0x1848] sm:$0xff]  ;;  %v2236_v53 = vld [vmem:[#allocation11 + $0x10] sm:$0xff] }
 0x2f7   :  { %8686 = vmatpush2.bf16.msra.mxu1 %v17560_v36  ;;  %8727 = vmatpush2.bf16.msra.mxu0 %v17816_v43  ;;  %v2348_v36 = vld [vmem:[#allocation11 + $0x390] sm:$0xff] }
 0x2f8   :  { %8687 = vmatprep.subr.bf16.mxu1 %v17545_v37  ;;  %8728 = vmatprep.subr.bf16.mxu0 %v17801_v39  ;;  %v2356_v43 = vld [vmem:[#allocation11 + $0x3d0] sm:$0xff]  ;;  %v3258_v37 = vld [vmem:[#allocation13] sm:$0xff] }
 0x2f9   :  { %v3269_v58 = vrot.slane %v3258_v37, %v20822_v24 }
 0x2fb   :  { %8688 = vmatpush2.bf16.msra.mxu1 %v17544_v45  ;;  %8729 = vmatpush2.bf16.msra.mxu0 %v17800_v46  ;;  %v17195_v45 = vcombine.high %v2348_v36, %v2356_v43  ;;  %v3265_v46 = vrot.slane %v3258_v37, %v20816_v22 }
 0x2fc   :  { %8689 = vmatprep.subr.bf16.mxu1 %v17529_v50  ;;  %8730 = vmatprep.subr.bf16.mxu0 %v17785_v51  ;;  %v3099_v50 = vld [vmem:[#allocation11 + $0x1b08] sm:$0xff] }
 0x2fd   :  { %v3107_v51 = vld [vmem:[#allocation11 + $0x1b48] sm:$0xff] }
 0x2ff   :  { %8690 = vmatpush2.bf16.msra.mxu1 %v17528_v59  ;;  %8731 = vmatpush2.bf16.msra.mxu0 %v17784_v62  ;;  %v17194_v59 = vcombine.low %v2348_v36, %v2356_v43  ;;  %v17146_v36 = vcombine.low %v2300_v21, %v2308_v27 }
 0x300   :  { %8691 = vmatprep.subr.bf16.mxu1 %v17513_v0  ;;  %8732 = vmatprep.subr.bf16.mxu0 %v17769_v1  ;;  %v17945_v0 = vcombine.high %v3099_v50, %v3107_v51  ;;  %v17179_v1 = vcombine.high %v2332_v54, %v2340_v57  ;;  %v3027_v54 = vld [vmem:[#allocation11 + $0x18c8] sm:$0xff]  ;;  %v2252_v57 = vld [vmem:[#allocation11 + $0x90] sm:$0xff] }
 0x303   :  { %8692 = vmatpush2.bf16.msra.mxu1 %v17512_v4  ;;  %8733 = vmatpush2.bf16.msra.mxu0 %v17768_v48  ;;  %v2324_v4 = vld [vmem:[#allocation11 + $0x2d0] sm:$0xff] }
 0x304   :  { %8693 = vmatprep.subr.bf16.mxu1 %v17497_v7  ;;  %8734 = vmatprep.subr.bf16.mxu0 %v17753_v8  ;;  %v17944_v8 = vcombine.low %v3099_v50, %v3107_v51  ;;  %v3019_v51 = vld [vmem:[#allocation11 + $0x1888] sm:$0xff] }
 0x306   :  { %v8496_v31 = vpop.f32.mrf.mxu0 }
 0x307   :  { %8694 = vmatpush2.bf16.msra.mxu1 %v17496_v12  ;;  %8735 = vmatpush2.bf16.msra.mxu0 %v17752_v14  ;;  %v8497_v62 = vadd.f32 %v8496_v31, %v3265_v46  ;;  %v17163_v12 = vcombine.high %v2316_v56, %v2324_v4  ;;  %v3067_v14 = vld [vmem:[#allocation11 + $0x1a08] sm:$0xff]  ;;  %v17162_v31 = vcombine.low %v2316_v56, %v2324_v4 }
 0x308   :  { %v8498_v63 = vpop.f32.mrf.mxu0  ;;  %8695 = vmatprep.subr.bf16.mxu1 %v17481_v15  ;;  %8736 = vmatprep.subr.bf16.mxu0 %v17737_v18  ;;  %v3075_v15 = vld [vmem:[#allocation11 + $0x1a48] sm:$0xff]  ;;  %v17864_v56 = vcombine.low %v3019_v51, %v3027_v54 }
 0x309   :  { %v8499_v48 = vadd.f32 %v8498_v63, %v3269_v58  ;;  %v3051_v63 = vld [vmem:[#allocation11 + $0x1988] sm:$0xff]  ;;  %v17912_v35 = vcombine.low %v3067_v14, %v3075_v15  ;;  %v2260_v58 = vld [vmem:[#allocation11 + $0xd0] sm:$0xff] }
 0x30a   :  { %v8500_v39 = vpop.f32.mrf.mxu0  ;;  %v17098_v4 = vcombine.low %v2252_v57, %v2260_v58 }
 0x30b   :  { %8696 = vmatpush2.bf16.msra.mxu1 %v17480_v60  ;;  %8737 = vmatpush2.bf16.msra.mxu0 %v17736_v61  ;;  %v17913_v60 = vcombine.high %v3067_v14, %v3075_v15  ;;  %v17147_v61 = vcombine.high %v2300_v21, %v2308_v27  ;;  %v3035_v39 = vld [vmem:[#allocation11 + $0x1908] sm:$0xff] }
 0x30c   :  { %v8501_v41 = vpop.f32.mrf.mxu0  ;;  %8697 = vmatprep.subr.bf16.mxu1 %v17465_v32  ;;  %8738 = vmatprep.subr.bf16.mxu0 %v17721_v33  ;;  %v3059_v32 = vld [vmem:[#allocation11 + $0x19c8] sm:$0xff]  ;;  %v2284_v33 = vld [vmem:[#allocation11 + $0x190] sm:$0xff] }
 0x30d   :  { %v17897_v43 = vcombine.high %v3051_v63, %v3059_v32  ;;  %v17131_v37 = vcombine.high %v2284_v33, %v2292_v34  ;;  %v2276_v41 = vld [vmem:[#allocation11 + $0x150] sm:$0xff]  ;;  %v3227_v27 = vld [vmem:[#allocation11 + $0x1f08] sm:$0xff] }
 0x30f   :  { %8698 = vmatpush2.bf16.msra.mxu1 %v17464_v20  ;;  %8739 = vmatpush2.bf16.msra.mxu0 %v17720_v40  ;;  %v3043_v20 = vld [vmem:[#allocation11 + $0x1948] sm:$0xff]  ;;  %v2268_v40 = vld [vmem:[#allocation11 + $0x110] sm:$0xff] }
 0x310   :  { %8749 = vmatprep.subr.bf16.mxu1 %v17961_v42  ;;  %8790 = vmatprep.subr.bf16.mxu0 %v17195_v45  ;;  %v17896_v42 = vcombine.low %v3051_v63, %v3059_v32  ;;  %v17130_v45 = vcombine.low %v2284_v33, %v2292_v34  ;;  %v17881_v46 = vcombine.high %v3035_v39, %v3043_v20  ;;  %v3211_v33 = vld [vmem:[#allocation11 + $0x1e88] sm:$0xff] }
 0x311   :  { %v17115_v50 = vcombine.high %v2268_v40, %v2276_v41  ;;  %v3219_v34 = vld [vmem:[#allocation11 + $0x1ec8] sm:$0xff] }
 0x312   :  { %8700 = vmatmul.mubr.bf16.vlgmr.msra.gmra.mxu1 %v20887_v55  ;;  %8741 = vmatmul.mubr.bf16.vlgmr.msra.gmra.mxu0 %v20917_v19  ;;  %v8537_v3 = vpop.f32.mrf.mxu1 }
 0x313   :  { %v20948_v7 = vadd.f32 %v8537_v3, %v8497_v62  ;;  %8750 = vmatpush1.bf16.msra.mxu1 %v17960_v49  ;;  %8781 = vmatprep.mubr.bf16.mxu1 %v20932_v5  ;;  %v17880_v49 = vcombine.low %v3035_v39, %v3043_v20  ;;  %v17865_v62 = vcombine.high %v3019_v51, %v3027_v54  ;;  %v2244_v3 = vld [vmem:[#allocation11 + $0x50] sm:$0xff] }
 0x314   :  { %8791 = vmatpush1.bf16.msra.mxu0 %v17194_v59  ;;  %8822 = vmatprep.mubr.bf16.mxu0 %v20863_v16  ;;  %v8539_v9 = vpop.f32.mrf.mxu1  ;;  %v17114_v59 = vcombine.low %v2268_v40, %v2276_v41  ;;  %v17082_v15 = vcombine.low %v2236_v53, %v2244_v3  ;;  %v18057_v39 = vcombine.high %v3211_v33, %v3219_v34  ;;  %v3195_v40 = vld [vmem:[#allocation11 + $0x1e08] sm:$0xff] }
 0x315   :  { %v20952_v11 = vadd.f32 %v8539_v9, %v8499_v48  ;;  %8751 = vmatprep.subr.bf16.mxu1 %v17945_v0  ;;  %8792 = vmatprep.subr.bf16.mxu0 %v17179_v1  ;;  %v17099_v0 = vcombine.high %v2252_v57, %v2260_v58  ;;  %v3003_v1 = vld [vmem:[#allocation11 + $0x1808] sm:$0xff] }
 0x316   :  { %v8541_v18 = vpop.f32.mrf.mxu1  ;;  %v17849_v48 = vcombine.high %v3003_v1, %v3011_v2  ;;  %v3243_v9 = vld [vmem:[#allocation11 + $0x1f88] sm:$0xff]  ;;  %v17848_v14 = vcombine.low %v3003_v1, %v3011_v2 }
 0x317   :  { %8752 = vmatpush1.bf16.msra.mxu1 %v17944_v8  ;;  %v17083_v8 = vcombine.high %v2236_v53, %v2244_v3  ;;  %v3203_v41 = vld [vmem:[#allocation11 + $0x1e48] sm:$0xff] }
 0x318   :  { %8793 = vmatpush1.bf16.msra.mxu0 %v17178_v52  ;;  %v8542_v30 = vpop.f32.mrf.mxu1  ;;  %8753 = vmatprep.subr.bf16.mxu1 %v17929_v10  ;;  %v3251_v52 = vld [vmem:[#allocation11 + $0x1fc8] sm:$0xff]  ;;  %v2476_v10 = vld [vmem:[#allocation11 + $0x790] sm:$0xff]  ;;  %v18041_v51 = vcombine.high %v3195_v40, %v3203_v41 }
 0x319   :  { %8794 = vmatprep.subr.bf16.mxu0 %v17163_v12  ;;  %v2484_v12 = vld [vmem:[#allocation11 + $0x7d0] sm:$0xff]  ;;  %v18089_v18 = vcombine.high %v3243_v9, %v3251_v52  ;;  %v3179_v57 = vld [vmem:[#allocation11 + $0x1d88] sm:$0xff] }
 0x31a   :  { %v17323_v21 = vcombine.high %v2476_v10, %v2484_v12  ;;  %v2460_v30 = vld [vmem:[#allocation11 + $0x710] sm:$0xff]  ;;  %v3187_v58 = vld [vmem:[#allocation11 + $0x1dc8] sm:$0xff] }
 0x31b   :  { %8754 = vmatpush1.bf16.msra.mxu1 %v17928_v29  ;;  %v3235_v29 = vld [vmem:[#allocation11 + $0x1f48] sm:$0xff]  ;;  %v18025_v1 = vcombine.high %v3179_v57, %v3187_v58 }
 0x31c   :  { %8795 = vmatpush1.bf16.msra.mxu0 %v17162_v31  ;;  %8755 = vmatprep.subr.bf16.mxu1 %v17913_v60  ;;  %v2468_v31 = vld [vmem:[#allocation11 + $0x750] sm:$0xff]  ;;  %v18088_v60 = vcombine.low %v3243_v9, %v3251_v52  ;;  %v18073_v63 = vcombine.high %v3227_v27, %v3235_v29  ;;  %v3163_v53 = vld [vmem:[#allocation11 + $0x1d08] sm:$0xff] }
 0x31d   :  { %8796 = vmatprep.subr.bf16.mxu0 %v17147_v61  ;;  %v17322_v61 = vcombine.low %v2476_v10, %v2484_v12  ;;  %v17307_v32 = vcombine.high %v2460_v30, %v2468_v31  ;;  %v3171_v3 = vld [vmem:[#allocation11 + $0x1d48] sm:$0xff] }
 0x31e   :  { %v18009_v9 = vcombine.high %v3163_v53, %v3171_v3  ;;  %v3147_v10 = vld [vmem:[#allocation11 + $0x1c88] sm:$0xff] }
 0x31f   :  { %8756 = vmatpush1.bf16.msra.mxu1 %v17912_v35  ;;  %v2444_v35 = vld [vmem:[#allocation11 + $0x690] sm:$0xff]  ;;  %v3155_v12 = vld [vmem:[#allocation11 + $0x1cc8] sm:$0xff] }
 0x320   :  { %8797 = vmatpush1.bf16.msra.mxu0 %v17146_v36  ;;  %8757 = vmatprep.subr.bf16.mxu1 %v17897_v43  ;;  %v2452_v36 = vld [vmem:[#allocation11 + $0x6d0] sm:$0xff]  ;;  %v18072_v43 = vcombine.low %v3227_v27, %v3235_v29  ;;  %v17993_v27 = vcombine.high %v3147_v10, %v3155_v12 }
 0x321   :  { %8798 = vmatprep.subr.bf16.mxu0 %v17131_v37  ;;  %v17306_v37 = vcombine.low %v2460_v30, %v2468_v31  ;;  %v17291_v20 = vcombine.high %v2444_v35, %v2452_v36  ;;  %v3131_v30 = vld [vmem:[#allocation11 + $0x1c08] sm:$0xff] }
 0x322   :  { %v3139_v31 = vld [vmem:[#allocation11 + $0x1c48] sm:$0xff] }
 0x323   :  { %8758 = vmatpush1.bf16.msra.mxu1 %v17896_v42  ;;  %v2428_v42 = vld [vmem:[#allocation11 + $0x610] sm:$0xff] }
 0x324   :  { %8799 = vmatpush1.bf16.msra.mxu0 %v17130_v45  ;;  %8759 = vmatprep.subr.bf16.mxu1 %v17881_v46  ;;  %v2436_v45 = vld [vmem:[#allocation11 + $0x650] sm:$0xff]  ;;  %v18056_v46 = vcombine.low %v3211_v33, %v3219_v34  ;;  %v17977_v33 = vcombine.high %v3131_v30, %v3139_v31 }
 0x325   :  { %8800 = vmatprep.subr.bf16.mxu0 %v17115_v50  ;;  %v17290_v50 = vcombine.low %v2444_v35, %v2452_v36  ;;  %v17275_v54 = vcombine.high %v2428_v42, %v2436_v45  ;;  %v2604_v35 = vld [vmem:[#allocation11 + $0xb90] sm:$0xff] }
 0x326   :  { %v2612_v36 = vld [vmem:[#allocation11 + $0xbd0] sm:$0xff] }
 0x327   :  { %8760 = vmatpush1.bf16.msra.mxu1 %v17880_v49  ;;  %v2412_v49 = vld [vmem:[#allocation11 + $0x590] sm:$0xff] }
 0x328   :  { %8801 = vmatpush1.bf16.msra.mxu0 %v17114_v59  ;;  %8761 = vmatprep.subr.bf16.mxu1 %v17865_v62  ;;  %v2420_v59 = vld [vmem:[#allocation11 + $0x5d0] sm:$0xff]  ;;  %v18040_v62 = vcombine.low %v3195_v40, %v3203_v41  ;;  %v17451_v40 = vcombine.high %v2604_v35, %v2612_v36 }
 0x329   :  { %8802 = vmatprep.subr.bf16.mxu0 %v17099_v0  ;;  %v17274_v0 = vcombine.low %v2428_v42, %v2436_v45  ;;  %v17259_v2 = vcombine.high %v2412_v49, %v2420_v59  ;;  %v2588_v42 = vld [vmem:[#allocation11 + $0xb10] sm:$0xff] }
 0x32a   :  { %v2596_v45 = vld [vmem:[#allocation11 + $0xb50] sm:$0xff] }
 0x32b   :  { %8762 = vmatpush1.bf16.msra.mxu1 %v17864_v56  ;;  %v2396_v56 = vld [vmem:[#allocation11 + $0x510] sm:$0xff] }
 0x32c   :  { %8803 = vmatpush1.bf16.msra.mxu0 %v17098_v4  ;;  %8763 = vmatprep.subr.bf16.mxu1 %v17849_v48  ;;  %v2404_v4 = vld [vmem:[#allocation11 + $0x550] sm:$0xff]  ;;  %v18024_v48 = vcombine.low %v3179_v57, %v3187_v58  ;;  %v17435_v57 = vcombine.high %v2588_v42, %v2596_v45 }
 0x32d   :  { %8804 = vmatprep.subr.bf16.mxu0 %v17083_v8  ;;  %v17258_v8 = vcombine.low %v2412_v49, %v2420_v59  ;;  %v17243_v52 = vcombine.high %v2396_v56, %v2404_v4  ;;  %v2572_v58 = vld [vmem:[#allocation11 + $0xa90] sm:$0xff] }
 0x32e   :  { %v2580_v49 = vld [vmem:[#allocation11 + $0xad0] sm:$0xff] }
 0x32f   :  { %8764 = vmatpush1.bf16.msra.mxu1 %v17848_v14  ;;  %v2380_v14 = vld [vmem:[#allocation11 + $0x490] sm:$0xff] }
 0x330   :  { %8805 = vmatpush1.bf16.msra.mxu0 %v17082_v15  ;;  %8765 = vmatprep.subr.bf16.mxu1 %v18089_v18  ;;  %v2388_v15 = vld [vmem:[#allocation11 + $0x4d0] sm:$0xff]  ;;  %v18008_v18 = vcombine.low %v3163_v53, %v3171_v3  ;;  %v17434_v53 = vcombine.low %v2588_v42, %v2596_v45 }
 0x331   :  { %8806 = vmatprep.subr.bf16.mxu0 %v17323_v21  ;;  %v17242_v21 = vcombine.low %v2396_v56, %v2404_v4  ;;  %v17227_v29 = vcombine.high %v2380_v14, %v2388_v15  ;;  %v17419_v4 = vcombine.high %v2572_v58, %v2580_v49  ;;  %v2764_v42 = vld [vmem:[#allocation11 + $0x1090] sm:$0xff] }
 0x332   :  { %v2772_v45 = vld [vmem:[#allocation11 + $0x10d0] sm:$0xff] }
 0x333   :  { %8766 = vmatpush2.bf16.msra.mxu1 %v18088_v60  ;;  %v2364_v60 = vld [vmem:[#allocation11 + $0x410] sm:$0xff] }
 0x334   :  { %8807 = vmatpush2.bf16.msra.mxu0 %v17322_v61  ;;  %8767 = vmatprep.subr.bf16.mxu1 %v18073_v63  ;;  %v2372_v61 = vld [vmem:[#allocation11 + $0x450] sm:$0xff]  ;;  %v17992_v63 = vcombine.low %v3147_v10, %v3155_v12 }
 0x335   :  { %8808 = vmatprep.subr.bf16.mxu0 %v17307_v32  ;;  %v17226_v32 = vcombine.low %v2380_v14, %v2388_v15  ;;  %v17211_v34 = vcombine.high %v2364_v60, %v2372_v61  ;;  %v2812_v10 = vld [vmem:[#allocation11 + $0x1210] sm:$0xff]  ;;  %v17418_v14 = vcombine.low %v2572_v58, %v2580_v49 }
 0x336   :  { %v2820_v12 = vld [vmem:[#allocation11 + $0x1250] sm:$0xff] }
 0x337   :  { %8768 = vmatpush2.bf16.msra.mxu1 %v18072_v43  ;;  %v2860_v43 = vld [vmem:[#allocation11 + $0x1390] sm:$0xff] }
 0x338   :  { %8809 = vmatpush2.bf16.msra.mxu0 %v17306_v37  ;;  %8769 = vmatprep.subr.bf16.mxu1 %v18057_v39  ;;  %v2868_v37 = vld [vmem:[#allocation11 + $0x13d0] sm:$0xff]  ;;  %v17976_v39 = vcombine.low %v3131_v30, %v3139_v31 }
 0x339   :  { %8810 = vmatprep.subr.bf16.mxu0 %v17291_v20  ;;  %v17210_v20 = vcombine.low %v2364_v60, %v2372_v61  ;;  %v17707_v41 = vcombine.high %v2860_v43, %v2868_v37  ;;  %v2796_v30 = vld [vmem:[#allocation11 + $0x1190] sm:$0xff]  ;;  %v17658_v61 = vcombine.low %v2812_v10, %v2820_v12 }
 0x33a   :  { %v2804_v31 = vld [vmem:[#allocation11 + $0x11d0] sm:$0xff] }
 0x33b   :  { %8770 = vmatpush2.bf16.msra.mxu1 %v18056_v46  ;;  %v17450_v46 = vcombine.low %v2604_v35, %v2612_v36  ;;  %v2780_v35 = vld [vmem:[#allocation11 + $0x1110] sm:$0xff] }
 0x33c   :  { %8811 = vmatpush2.bf16.msra.mxu0 %v17290_v50  ;;  %8771 = vmatprep.subr.bf16.mxu1 %v18041_v51  ;;  %v2844_v50 = vld [vmem:[#allocation11 + $0x1310] sm:$0xff] }
 0x33d   :  { %8812 = vmatprep.subr.bf16.mxu0 %v17275_v54  ;;  %v2852_v51 = vld [vmem:[#allocation11 + $0x1350] sm:$0xff]  ;;  %v17706_v54 = vcombine.low %v2860_v43, %v2868_v37  ;;  %v17642_v37 = vcombine.low %v2796_v30, %v2804_v31 }
 0x33e   :  { %v17690_v56 = vcombine.low %v2844_v50, %v2852_v51  ;;  %v2788_v36 = vld [vmem:[#allocation11 + $0x1150] sm:$0xff] }
 0x33f   :  { %8772 = vmatpush2.bf16.msra.mxu1 %v18040_v62  ;;  %v17691_v62 = vcombine.high %v2844_v50, %v2852_v51  ;;  %v17626_v50 = vcombine.low %v2780_v35, %v2788_v36  ;;  %v2500_v58 = vld [vmem:[#allocation11 + $0x850] sm:$0xff] }
 0x340   :  { %8813 = vmatpush2.bf16.msra.mxu0 %v17274_v0  ;;  %8773 = vmatprep.subr.bf16.mxu1 %v18025_v1  ;;  %v2828_v0 = vld [vmem:[#allocation11 + $0x1290] sm:$0xff] }
 0x341   :  { %8814 = vmatprep.subr.bf16.mxu0 %v17259_v2  ;;  %v2836_v1 = vld [vmem:[#allocation11 + $0x12d0] sm:$0xff] }
 0x342   :  { %v2748_v49 = vld [vmem:[#allocation11 + $0x1010] sm:$0xff] }
 0x343   :  { %8774 = vmatpush2.bf16.msra.mxu1 %v18024_v48 }
 0x344   :  { %8815 = vmatpush2.bf16.msra.mxu0 %v17258_v8  ;;  %8775 = vmatprep.subr.bf16.mxu1 %v18009_v9  ;;  %v17675_v8 = vcombine.high %v2828_v0, %v2836_v1  ;;  %v2556_v9 = vld [vmem:[#allocation11 + $0xa10] sm:$0xff] }
 0x345   :  { %8816 = vmatprep.subr.bf16.mxu0 %v17243_v52  ;;  %v2564_v52 = vld [vmem:[#allocation11 + $0xa50] sm:$0xff] }
 0x346   :  { %v17402_v60 = vcombine.low %v2556_v9, %v2564_v52 }
 0x347   :  { %8776 = vmatpush2.bf16.msra.mxu1 %v18008_v18  ;;  %v17674_v18 = vcombine.low %v2828_v0, %v2836_v1  ;;  %v17610_v0 = vcombine.low %v2764_v42, %v2772_v45 }
 0x348   :  { %8817 = vmatpush2.bf16.msra.mxu0 %v17242_v21  ;;  %8777 = vmatprep.subr.bf16.mxu1 %v17993_v27  ;;  %v17403_v21 = vcombine.high %v2556_v9, %v2564_v52  ;;  %v17659_v27 = vcombine.high %v2812_v10, %v2820_v12  ;;  %v2716_v12 = vld [vmem:[#allocation11 + $0xf10] sm:$0xff] }
 0x349   :  { %8818 = vmatprep.subr.bf16.mxu0 %v17227_v29  ;;  %v2540_v29 = vld [vmem:[#allocation11 + $0x990] sm:$0xff] }
 0x34b   :  { %8778 = vmatpush2.bf16.msra.mxu1 %v17992_v63 }
 0x34c   :  { %8819 = vmatpush2.bf16.msra.mxu0 %v17226_v32  ;;  %8779 = vmatprep.subr.bf16.mxu1 %v17977_v33  ;;  %v17643_v32 = vcombine.high %v2796_v30, %v2804_v31  ;;  %v2524_v33 = vld [vmem:[#allocation11 + $0x910] sm:$0xff] }
 0x34d   :  { %8820 = vmatprep.subr.bf16.mxu0 %v17211_v34  ;;  %v2532_v34 = vld [vmem:[#allocation11 + $0x950] sm:$0xff] }
 0x34e   :  { %v2700_v30 = vld [vmem:[#allocation11 + $0xe90] sm:$0xff] }
 0x34f   :  { %8780 = vmatpush2.bf16.msra.mxu1 %v17976_v39  ;;  %v17371_v39 = vcombine.high %v2524_v33, %v2532_v34  ;;  %v2708_v31 = vld [vmem:[#allocation11 + $0xed0] sm:$0xff] }
 0x350   :  { %8821 = vmatpush2.bf16.msra.mxu0 %v17210_v20  ;;  %8831 = vmatprep.subr.bf16.mxu1 %v17451_v40  ;;  %v17627_v20 = vcombine.high %v2780_v35, %v2788_v36  ;;  %v2508_v40 = vld [vmem:[#allocation11 + $0x890] sm:$0xff] }
 0x351   :  { %8872 = vmatprep.subr.bf16.mxu0 %v17707_v41  ;;  %v2516_v41 = vld [vmem:[#allocation11 + $0x8d0] sm:$0xff] }
 0x352   :  { %8782 = vmatmul.mubr.bf16.vlgmr.msra.gmra.mxu1 %v20934_v6  ;;  %v8578_v59 = vpop.f32.mrf.mxu0  ;;  %v17355_v51 = vcombine.high %v2508_v40, %v2516_v41  ;;  %v2684_v35 = vld [vmem:[#allocation11 + $0xe10] sm:$0xff] }
 0x353   :  { %8823 = vmatmul.mubr.bf16.vlgmr.msra.gmra.mxu0 %v20878_v13  ;;  %v20957_v2 = vadd.f32 %v8578_v59, %v20948_v7  ;;  %8832 = vmatpush1.bf16.msra.mxu1 %v17450_v46  ;;  %v17370_v46 = vcombine.low %v2524_v33, %v2532_v34  ;;  %v2756_v59 = vld [vmem:[#allocation11 + $0x1050] sm:$0xff]  ;;  %v17547_v33 = vcombine.high %v2700_v30, %v2708_v31 }
 0x354   :  { %8863 = vmatprep.mubr.bf16.mxu1 %v20883_v47  ;;  %8873 = vmatpush1.bf16.msra.mxu0 %v17706_v54  ;;  %v8580_v3 = vpop.f32.mrf.mxu0  ;;  %v17611_v54 = vcombine.high %v2764_v42, %v2772_v45  ;;  %v17594_v52 = vcombine.low %v2748_v49, %v2756_v59  ;;  %v2692_v36 = vld [vmem:[#allocation11 + $0xe50] sm:$0xff] }
 0x355   :  { %8904 = vmatprep.mubr.bf16.mxu0 %v20914_v17  ;;  %v20962_v48 = vadd.f32 %v8580_v3, %v20952_v11  ;;  %8833 = vmatprep.subr.bf16.mxu1 %v17435_v57  ;;  %v2548_v11 = vld [vmem:[#allocation11 + $0x9d0] sm:$0xff] }
 0x356   :  { %8874 = vmatprep.subr.bf16.mxu0 %v17691_v62  ;;  %v8582_v7 = vpop.f32.mrf.mxu0  ;;  %v17387_v63 = vcombine.high %v2540_v29, %v2548_v11  ;;  %v17386_v43 = vcombine.low %v2540_v29, %v2548_v11  ;;  %v2492_v57 = vld [vmem:[#allocation11 + $0x810] sm:$0xff]  ;;  %v17354_v62 = vcombine.low %v2508_v40, %v2516_v41  ;;  %v17531_v40 = vcombine.high %v2684_v35, %v2692_v36 }
 0x357   :  { %8834 = vmatpush1.bf16.msra.mxu1 %v17434_v53  ;;  %v17339_v1 = vcombine.high %v2492_v57, %v2500_v58  ;;  %v17595_v53 = vcombine.high %v2748_v49, %v2756_v59  ;;  %v2732_v3 = vld [vmem:[#allocation11 + $0xf90] sm:$0xff]  ;;  %v17338_v9 = vcombine.low %v2492_v57, %v2500_v58 }
 0x358   :  { %8875 = vmatpush1.bf16.msra.mxu0 %v17690_v56  ;;  %v8583_v15 = vpop.f32.mrf.mxu0  ;;  %8835 = vmatprep.subr.bf16.mxu1 %v17419_v4  ;;  %v2740_v56 = vld [vmem:[#allocation11 + $0xfd0] sm:$0xff] }
 0x359   :  { %8876 = vmatprep.subr.bf16.mxu0 %v17675_v8  ;;  %v2988_v4 = vld [vmem:[#allocation11 + $0x1790] sm:$0xff]  ;;  %v17579_v7 = vcombine.high %v2732_v3, %v2740_v56 }
 0x35a   :  { %v2996_v8 = vld [vmem:[#allocation11 + $0x17d0] sm:$0xff] }
 0x35b   :  { %8836 = vmatpush1.bf16.msra.mxu1 %v17418_v14  ;;  %v17835_v10 = vcombine.high %v2988_v4, %v2996_v8  ;;  %v2724_v14 = vld [vmem:[#allocation11 + $0xf50] sm:$0xff] }
 0x35c   :  { %8877 = vmatpush1.bf16.msra.mxu0 %v17674_v18  ;;  %8837 = vmatprep.subr.bf16.mxu1 %v17403_v21  ;;  %v2972_v15 = vld [vmem:[#allocation11 + $0x1710] sm:$0xff]  ;;  %v17578_v21 = vcombine.low %v2732_v3, %v2740_v56  ;;  %v17563_v29 = vcombine.high %v2716_v12, %v2724_v14 }
 0x35d   :  { %8878 = vmatprep.subr.bf16.mxu0 %v17659_v27  ;;  %v2980_v18 = vld [vmem:[#allocation11 + $0x1750] sm:$0xff]  ;;  %v17834_v27 = vcombine.low %v2988_v4, %v2996_v8 }
 0x35e   :  { %v17819_v11 = vcombine.high %v2972_v15, %v2980_v18  ;;  %v2668_v42 = vld [vmem:[#allocation11 + $0xd90] sm:$0xff] }
 0x35f   :  { %8838 = vmatpush1.bf16.msra.mxu1 %v17402_v60  ;;  %v2956_v60 = vld [vmem:[#allocation11 + $0x1690] sm:$0xff] }
 0x360   :  { %8879 = vmatpush1.bf16.msra.mxu0 %v17658_v61  ;;  %8839 = vmatprep.subr.bf16.mxu1 %v17387_v63  ;;  %v2964_v61 = vld [vmem:[#allocation11 + $0x16d0] sm:$0xff]  ;;  %v17562_v63 = vcombine.low %v2716_v12, %v2724_v14 }
 0x361   :  { %8880 = vmatprep.subr.bf16.mxu0 %v17643_v32  ;;  %v17818_v32 = vcombine.low %v2972_v15, %v2980_v18  ;;  %v17803_v34 = vcombine.high %v2956_v60, %v2964_v61  ;;  %v2676_v45 = vld [vmem:[#allocation11 + $0xdd0] sm:$0xff] }
 0x362   :  { %v17515_v57 = vcombine.high %v2668_v42, %v2676_v45  ;;  %v2652_v49 = vld [vmem:[#allocation11 + $0xd10] sm:$0xff] }
 0x363   :  { %8840 = vmatpush1.bf16.msra.mxu1 %v17386_v43  ;;  %v2940_v43 = vld [vmem:[#allocation11 + $0x1610] sm:$0xff] }
 0x364   :  { %8881 = vmatpush1.bf16.msra.mxu0 %v17642_v37  ;;  %8841 = vmatprep.subr.bf16.mxu1 %v17371_v39  ;;  %v2948_v37 = vld [vmem:[#allocation11 + $0x1650] sm:$0xff]  ;;  %v17546_v39 = vcombine.low %v2700_v30, %v2708_v31 }
 0x365   :  { %8882 = vmatprep.subr.bf16.mxu0 %v17627_v20  ;;  %v17802_v20 = vcombine.low %v2956_v60, %v2964_v61  ;;  %v17787_v41 = vcombine.high %v2940_v43, %v2948_v37  ;;  %v2660_v59 = vld [vmem:[#allocation11 + $0xd50] sm:$0xff] }
 0x366   :  { %v17499_v3 = vcombine.high %v2652_v49, %v2660_v59  ;;  %v2636_v4 = vld [vmem:[#allocation11 + $0xc90] sm:$0xff] }
 0x367   :  { %8842 = vmatpush1.bf16.msra.mxu1 %v17370_v46  ;;  %v2924_v46 = vld [vmem:[#allocation11 + $0x1590] sm:$0xff] }
 0x368   :  { %8883 = vmatpush1.bf16.msra.mxu0 %v17626_v50  ;;  %8843 = vmatprep.subr.bf16.mxu1 %v17355_v51  ;;  %v2932_v50 = vld [vmem:[#allocation11 + $0x15d0] sm:$0xff]  ;;  %v17530_v51 = vcombine.low %v2684_v35, %v2692_v36 }
 0x369   :  { %8884 = vmatprep.subr.bf16.mxu0 %v17611_v54  ;;  %v17786_v54 = vcombine.low %v2940_v43, %v2948_v37  ;;  %v17771_v58 = vcombine.high %v2924_v46, %v2932_v50  ;;  %v2644_v8 = vld [vmem:[#allocation11 + $0xcd0] sm:$0xff] }
 0x36a   :  { %v17483_v12 = vcombine.high %v2636_v4, %v2644_v8  ;;  %v2620_v15 = vld [vmem:[#allocation11 + $0xc10] sm:$0xff] }
 0x36b   :  { %8844 = vmatpush1.bf16.msra.mxu1 %v17354_v62  ;;  %v2908_v62 = vld [vmem:[#allocation11 + $0x1510] sm:$0xff] }
 0x36c   :  { %8885 = vmatpush1.bf16.msra.mxu0 %v17610_v0  ;;  %8845 = vmatprep.subr.bf16.mxu1 %v17339_v1  ;;  %v2916_v0 = vld [vmem:[#allocation11 + $0x1550] sm:$0xff]  ;;  %v17514_v1 = vcombine.low %v2668_v42, %v2676_v45 }
 0x36d   :  { %8886 = vmatprep.subr.bf16.mxu0 %v17595_v53  ;;  %v17770_v53 = vcombine.low %v2924_v46, %v2932_v50  ;;  %v17755_v56 = vcombine.high %v2908_v62, %v2916_v0  ;;  %v2628_v18 = vld [vmem:[#allocation11 + $0xc50] sm:$0xff] }
 0x36e   :  { %v17467_v30 = vcombine.high %v2620_v15, %v2628_v18  ;;  %v3116_v60 = vld [vmem:[#allocation11 + $0x1b90] sm:$0xff] }
 0x36f   :  { %8846 = vmatpush1.bf16.msra.mxu1 %v17338_v9  ;;  %v2892_v9 = vld [vmem:[#allocation11 + $0x1490] sm:$0xff] }
 0x370   :  { %8887 = vmatpush1.bf16.msra.mxu0 %v17594_v52  ;;  %8847 = vmatprep.subr.bf16.mxu1 %v17579_v7  ;;  %v2900_v52 = vld [vmem:[#allocation11 + $0x14d0] sm:$0xff]  ;;  %v17498_v7 = vcombine.low %v2652_v49, %v2660_v59 }
 0x371   :  { %8888 = vmatprep.subr.bf16.mxu0 %v17835_v10  ;;  %v17754_v10 = vcombine.low %v2908_v62, %v2916_v0  ;;  %v17739_v14 = vcombine.high %v2892_v9, %v2900_v52  ;;  %v3124_v61 = vld [vmem:[#allocation11 + $0x1bd0] sm:$0xff] }
 0x372   :  { %v17963_v35 = vcombine.high %v3116_v60, %v3124_v61  ;;  %v3100_v43 = vld [vmem:[#allocation11 + $0x1b10] sm:$0xff] }
 0x373   :  { %8848 = vmatpush2.bf16.msra.mxu1 %v17578_v21  ;;  %v2876_v21 = vld [vmem:[#allocation11 + $0x1410] sm:$0xff] }
 0x374   :  { %8889 = vmatpush2.bf16.msra.mxu0 %v17834_v27  ;;  %8849 = vmatprep.subr.bf16.mxu1 %v17563_v29  ;;  %v2884_v27 = vld [vmem:[#allocation11 + $0x1450] sm:$0xff]  ;;  %v17482_v29 = vcombine.low %v2636_v4, %v2644_v8 }
 0x375   :  { %8890 = vmatprep.subr.bf16.mxu0 %v17819_v11  ;;  %v17738_v11 = vcombine.low %v2892_v9, %v2900_v52  ;;  %v17723_v31 = vcombine.high %v2876_v21, %v2884_v27  ;;  %v3108_v37 = vld [vmem:[#allocation11 + $0x1b50] sm:$0xff]  ;;  %v2301_v52 = vld [vmem:[#allocation11 + $0x218] sm:$0xff] }
 0x376   :  { %v17947_v42 = vcombine.high %v3100_v43, %v3108_v37  ;;  %v3084_v45 = vld [vmem:[#allocation11 + $0x1a90] sm:$0xff]  ;;  %v17946_v59 = vcombine.low %v3100_v43, %v3108_v37 }
 0x377   :  { %8850 = vmatpush2.bf16.msra.mxu1 %v17562_v63  ;;  %v2349_v63 = vld [vmem:[#allocation11 + $0x398] sm:$0xff]  ;;  %v3092_v46 = vld [vmem:[#allocation11 + $0x1ad0] sm:$0xff] }
 0x378   :  { %8891 = vmatpush2.bf16.msra.mxu0 %v17818_v32  ;;  %8851 = vmatprep.subr.bf16.mxu1 %v17547_v33  ;;  %v2357_v32 = vld [vmem:[#allocation11 + $0x3d8] sm:$0xff]  ;;  %v17466_v33 = vcombine.low %v2620_v15, %v2628_v18  ;;  %v3068_v4 = vld [vmem:[#allocation11 + $0x1a10] sm:$0xff] }
 0x379   :  { %8892 = vmatprep.subr.bf16.mxu0 %v17803_v34  ;;  %v17722_v34 = vcombine.low %v2876_v21, %v2884_v27  ;;  %v17197_v36 = vcombine.high %v2349_v63, %v2357_v32  ;;  %v3052_v21 = vld [vmem:[#allocation11 + $0x1990] sm:$0xff] }
 0x37a   :  { %v3060_v27 = vld [vmem:[#allocation11 + $0x19d0] sm:$0xff] }
 0x37b   :  { %8852 = vmatpush2.bf16.msra.mxu1 %v17546_v39  ;;  %v17962_v39 = vcombine.low %v3116_v60, %v3124_v61  ;;  %v17899_v60 = vcombine.high %v3052_v21, %v3060_v27 }
 0x37c   :  { %8893 = vmatpush2.bf16.msra.mxu0 %v17802_v20  ;;  %8853 = vmatprep.subr.bf16.mxu1 %v17531_v40  ;;  %v2333_v20 = vld [vmem:[#allocation11 + $0x318] sm:$0xff] }
 0x37d   :  { %8894 = vmatprep.subr.bf16.mxu0 %v17787_v41  ;;  %v2341_v40 = vld [vmem:[#allocation11 + $0x358] sm:$0xff]  ;;  %v17196_v41 = vcombine.low %v2349_v63, %v2357_v32  ;;  %v3036_v63 = vld [vmem:[#allocation11 + $0x1910] sm:$0xff] }
 0x37e   :  { %v3044_v32 = vld [vmem:[#allocation11 + $0x1950] sm:$0xff] }
 0x37f   :  { %8854 = vmatpush2.bf16.msra.mxu1 %v17530_v51  ;;  %v17883_v43 = vcombine.high %v3036_v63, %v3044_v32 }
 0x380   :  { %8895 = vmatpush2.bf16.msra.mxu0 %v17786_v54  ;;  %8855 = vmatprep.subr.bf16.mxu1 %v17515_v57  ;;  %v17181_v54 = vcombine.high %v2333_v20, %v2341_v40  ;;  %v2317_v57 = vld [vmem:[#allocation11 + $0x298] sm:$0xff] }
 0x381   :  { %8896 = vmatprep.subr.bf16.mxu0 %v17771_v58  ;;  %v2325_v58 = vld [vmem:[#allocation11 + $0x2d8] sm:$0xff] }
 0x382   :  { %v17164_v15 = vcombine.low %v2317_v57, %v2325_v58 }
 0x383   :  { %8856 = vmatpush2.bf16.msra.mxu1 %v17514_v1  ;;  %v17180_v1 = vcombine.low %v2333_v20, %v2341_v40  ;;  %v3028_v20 = vld [vmem:[#allocation11 + $0x18d0] sm:$0xff]  ;;  %v2253_v40 = vld [vmem:[#allocation11 + $0x98] sm:$0xff] }
 0x384   :  { %8897 = vmatpush2.bf16.msra.mxu0 %v17770_v53  ;;  %8857 = vmatprep.subr.bf16.mxu1 %v17499_v3  ;;  %v17931_v53 = vcombine.high %v3084_v45, %v3092_v46 }
 0x385   :  { %8898 = vmatprep.subr.bf16.mxu0 %v17755_v56  ;;  %v17165_v56 = vcombine.high %v2317_v57, %v2325_v58  ;;  %v3012_v57 = vld [vmem:[#allocation11 + $0x1850] sm:$0xff]  ;;  %v2237_v58 = vld [vmem:[#allocation11 + $0x18] sm:$0xff] }
 0x387   :  { %8858 = vmatpush2.bf16.msra.mxu1 %v17498_v7  ;;  %v2309_v7 = vld [vmem:[#allocation11 + $0x258] sm:$0xff] }
 0x388   :  { %8899 = vmatpush2.bf16.msra.mxu0 %v17754_v10  ;;  %8859 = vmatprep.subr.bf16.mxu1 %v17483_v12  ;;  %v17930_v10 = vcombine.low %v3084_v45, %v3092_v46 }
 0x389   :  { %8900 = vmatprep.subr.bf16.mxu0 %v17739_v14 }
 0x38b   :  { %8860 = vmatpush2.bf16.msra.mxu1 %v17482_v29  ;;  %v2285_v29 = vld [vmem:[#allocation11 + $0x198] sm:$0xff] }
 0x38c   :  { %8901 = vmatpush2.bf16.msra.mxu0 %v17738_v11  ;;  %8861 = vmatprep.subr.bf16.mxu1 %v17467_v30  ;;  %v2293_v11 = vld [vmem:[#allocation11 + $0x1d8] sm:$0xff] }
 0x38d   :  { %8902 = vmatprep.subr.bf16.mxu0 %v17723_v31  ;;  %v17148_v31 = vcombine.low %v2301_v52, %v2309_v7  ;;  %v17133_v61 = vcombine.high %v2285_v29, %v2293_v11 }
 0x38f   :  { %8862 = vmatpush2.bf16.msra.mxu1 %v17466_v33  ;;  %v2269_v33 = vld [vmem:[#allocation11 + $0x118] sm:$0xff] }
 0x390   :  { %8903 = vmatpush2.bf16.msra.mxu0 %v17722_v34  ;;  %8913 = vmatprep.subr.bf16.mxu1 %v17963_v35  ;;  %v2277_v34 = vld [vmem:[#allocation11 + $0x158] sm:$0xff]  ;;  %v17898_v35 = vcombine.low %v3052_v21, %v3060_v27 }
 0x391   :  { %8954 = vmatprep.subr.bf16.mxu0 %v17197_v36  ;;  %v17132_v36 = vcombine.low %v2285_v29, %v2293_v11  ;;  %v17117_v37 = vcombine.high %v2269_v33, %v2277_v34  ;;  %v17116_v45 = vcombine.low %v2269_v33, %v2277_v34 }
 0x392   :  { %v20964_v50 = vpop.f32.mrf.mxu0  ;;  %8864 = vmatmul.mubr.bf16.vlgmr.msra.gmra.mxu1 %v20887_v55  ;;  %v8619_v51 = vpop.f32.mrf.mxu1 }
 0x393   :  { %8905 = vmatmul.mubr.bf16.vlgmr.msra.gmra.mxu0 %v20917_v19  ;;  %v20969_v49 = vadd.f32 %v8619_v51, %v20957_v2  ;;  %8914 = vmatpush1.bf16.msra.mxu1 %v17962_v39  ;;  %v3076_v2 = vld [vmem:[#allocation11 + $0x1a50] sm:$0xff] }
 0x394   :  { %8945 = vmatprep.mubr.bf16.mxu1 %v20932_v5  ;;  %8955 = vmatpush1.bf16.msra.mxu0 %v17196_v41  ;;  %v20972_v62 = vpop.f32.mrf.mxu0  ;;  %v8621_v0 = vpop.f32.mrf.mxu1  ;;  %v17915_v18 = vcombine.high %v3068_v4, %v3076_v2  ;;  %v17914_v30 = vcombine.low %v3068_v4, %v3076_v2  ;;  %v3020_v39 = vld [vmem:[#allocation11 + $0x1890] sm:$0xff]  ;;  %v2261_v41 = vld [vmem:[#allocation11 + $0xd8] sm:$0xff] }
 0x395   :  { %8986 = vmatprep.mubr.bf16.mxu0 %v20863_v16  ;;  %v20976_v3 = vadd.f32 %v8621_v0, %v20962_v48  ;;  %8915 = vmatprep.subr.bf16.mxu1 %v17947_v42  ;;  %v17149_v48 = vcombine.high %v2301_v52, %v2309_v7  ;;  %v17882_v42 = vcombine.low %v3036_v63, %v3044_v32  ;;  %v3244_v4 = vld [vmem:[#allocation11 + $0x1f90] sm:$0xff] }
 0x396   :  { %v8664_v8 = vpop.f32.mrf.mxu0  ;;  %8956 = vmatprep.subr.bf16.mxu0 %v17181_v54  ;;  %v8623_v9 = vpop.f32.mrf.mxu1  ;;  %v17867_v46 = vcombine.high %v3020_v39, %v3028_v20  ;;  %v17101_v51 = vcombine.high %v2253_v40, %v2261_v41  ;;  %v3004_v54 = vld [vmem:[#allocation11 + $0x1810] sm:$0xff]  ;;  %v17866_v0 = vcombine.low %v3020_v39, %v3028_v20 }
 0x397   :  { %8916 = vmatpush1.bf16.msra.mxu1 %v17946_v59  ;;  %v2245_v59 = vld [vmem:[#allocation11 + $0x58] sm:$0xff]  ;;  %v3252_v2 = vld [vmem:[#allocation11 + $0x1fd0] sm:$0xff]  ;;  %v17850_v52 = vcombine.low %v3004_v54, %v3012_v57 }
 0x398   :  { %8957 = vmatpush1.bf16.msra.mxu0 %v17180_v1  ;;  %v8665_v12 = vpop.f32.mrf.mxu0  ;;  %v8624_v14 = vpop.f32.mrf.mxu1  ;;  %8917 = vmatprep.subr.bf16.mxu1 %v17931_v53  ;;  %v17100_v1 = vcombine.low %v2253_v40, %v2261_v41  ;;  %v17851_v53 = vcombine.high %v3004_v54, %v3012_v57  ;;  %v2477_v8 = vld [vmem:[#allocation11 + $0x798] sm:$0xff]  ;;  %v17084_v7 = vcombine.low %v2237_v58, %v2245_v59 }
 0x399   :  { %8958 = vmatprep.subr.bf16.mxu0 %v17165_v56  ;;  %v17085_v56 = vcombine.high %v2237_v58, %v2245_v59  ;;  %v2485_v9 = vld [vmem:[#allocation11 + $0x7d8] sm:$0xff]  ;;  %v3228_v14 = vld [vmem:[#allocation11 + $0x1f10] sm:$0xff]  ;;  %v18090_v21 = vcombine.low %v3244_v4, %v3252_v2 }
 0x39a   :  { %v17325_v12 = vcombine.high %v2477_v8, %v2485_v9  ;;  %v17324_v27 = vcombine.low %v2477_v8, %v2485_v9 }
 0x39b   :  { %8918 = vmatpush1.bf16.msra.mxu1 %v17930_v10  ;;  %v18091_v10 = vcombine.high %v3244_v4, %v3252_v2 }
 0x39c   :  { %8959 = vmatpush1.bf16.msra.mxu0 %v17164_v15  ;;  %8919 = vmatprep.subr.bf16.mxu1 %v17915_v18  ;;  %v3236_v15 = vld [vmem:[#allocation11 + $0x1f50] sm:$0xff]  ;;  %v2461_v18 = vld [vmem:[#allocation11 + $0x718] sm:$0xff] }
 0x39d   :  { %8960 = vmatprep.subr.bf16.mxu0 %v17149_v48  ;;  %v2469_v48 = vld [vmem:[#allocation11 + $0x758] sm:$0xff]  ;;  %v18075_v29 = vcombine.high %v3228_v14, %v3236_v15  ;;  %v18074_v63 = vcombine.low %v3228_v14, %v3236_v15 }
 0x39e   :  { %v17309_v11 = vcombine.high %v2461_v18, %v2469_v48  ;;  %v17308_v32 = vcombine.low %v2461_v18, %v2469_v48 }
 0x39f   :  { %8920 = vmatpush1.bf16.msra.mxu1 %v17914_v30  ;;  %v3212_v30 = vld [vmem:[#allocation11 + $0x1e90] sm:$0xff] }
 0x3a0   :  { %8961 = vmatpush1.bf16.msra.mxu0 %v17148_v31  ;;  %8921 = vmatprep.subr.bf16.mxu1 %v17899_v60  ;;  %v3220_v31 = vld [vmem:[#allocation11 + $0x1ed0] sm:$0xff]  ;;  %v2445_v60 = vld [vmem:[#allocation11 + $0x698] sm:$0xff] }
 0x3a1   :  { %8962 = vmatprep.subr.bf16.mxu0 %v17133_v61  ;;  %v2453_v61 = vld [vmem:[#allocation11 + $0x6d8] sm:$0xff]  ;;  %v18059_v33 = vcombine.high %v3212_v30, %v3220_v31  ;;  %v18058_v39 = vcombine.low %v3212_v30, %v3220_v31 }
 0x3a2   :  { %v17293_v34 = vcombine.high %v2445_v60, %v2453_v61  ;;  %v17292_v20 = vcombine.low %v2445_v60, %v2453_v61 }
 0x3a3   :  { %8922 = vmatpush1.bf16.msra.mxu1 %v17898_v35  ;;  %v3196_v35 = vld [vmem:[#allocation11 + $0x1e10] sm:$0xff] }
 0x3a4   :  { %8963 = vmatpush1.bf16.msra.mxu0 %v17132_v36  ;;  %8923 = vmatprep.subr.bf16.mxu1 %v17883_v43  ;;  %v3204_v36 = vld [vmem:[#allocation11 + $0x1e50] sm:$0xff]  ;;  %v2429_v43 = vld [vmem:[#allocation11 + $0x618] sm:$0xff] }
 0x3a5   :  { %8964 = vmatprep.subr.bf16.mxu0 %v17117_v37  ;;  %v2437_v37 = vld [vmem:[#allocation11 + $0x658] sm:$0xff]  ;;  %v18043_v40 = vcombine.high %v3196_v35, %v3204_v36  ;;  %v18042_v54 = vcombine.low %v3196_v35, %v3204_v36 }
 0x3a6   :  { %v17277_v41 = vcombine.high %v2429_v43, %v2437_v37  ;;  %v17276_v57 = vcombine.low %v2429_v43, %v2437_v37  ;;  %v20978_v37 = vld [vmem:[#allocation13] sm:$0xff] }
 0x3a7   :  { %8924 = vmatpush1.bf16.msra.mxu1 %v17882_v42  ;;  %v3180_v42 = vld [vmem:[#allocation11 + $0x1d90] sm:$0xff] }
 0x3a8   :  { %8965 = vmatpush1.bf16.msra.mxu0 %v17116_v45  ;;  %8925 = vmatprep.subr.bf16.mxu1 %v17867_v46  ;;  %v3188_v45 = vld [vmem:[#allocation11 + $0x1dd0] sm:$0xff]  ;;  %v2413_v46 = vld [vmem:[#allocation11 + $0x598] sm:$0xff] }
 0x3a9   :  { %8966 = vmatprep.subr.bf16.mxu0 %v17101_v51  ;;  %v2421_v51 = vld [vmem:[#allocation11 + $0x5d8] sm:$0xff]  ;;  %v18027_v58 = vcombine.high %v3180_v42, %v3188_v45  ;;  %v18026_v4 = vcombine.low %v3180_v42, %v3188_v45  ;;  %v3277_v42 = vrot.slane %v20978_v37, %v20825_v25 }
 0x3aa   :  { %v17261_v59 = vcombine.high %v2413_v46, %v2421_v51  ;;  %v17260_v2 = vcombine.low %v2413_v46, %v2421_v51  ;;  %v2845_v46 = vld [vmem:[#allocation11 + $0x1318] sm:$0xff] }
 0x3ab   :  { %8926 = vmatpush1.bf16.msra.mxu1 %v17866_v0  ;;  %v3164_v0 = vld [vmem:[#allocation11 + $0x1d10] sm:$0xff]  ;;  %v2853_v51 = vld [vmem:[#allocation11 + $0x1358] sm:$0xff] }
 0x3ac   :  { %8967 = vmatpush1.bf16.msra.mxu0 %v17100_v1  ;;  %8927 = vmatprep.subr.bf16.mxu1 %v17851_v53  ;;  %v3172_v1 = vld [vmem:[#allocation11 + $0x1d50] sm:$0xff]  ;;  %v2397_v53 = vld [vmem:[#allocation11 + $0x518] sm:$0xff] }
 0x3ad   :  { %8968 = vmatprep.subr.bf16.mxu0 %v17085_v56  ;;  %v2405_v56 = vld [vmem:[#allocation11 + $0x558] sm:$0xff]  ;;  %v18011_v8 = vcombine.high %v3164_v0, %v3172_v1  ;;  %v18010_v14 = vcombine.low %v3164_v0, %v3172_v1 }
 0x3ae   :  { %v17245_v9 = vcombine.high %v2397_v53, %v2405_v56  ;;  %v17244_v15 = vcombine.low %v2397_v53, %v2405_v56  ;;  %v2581_v0 = vld [vmem:[#allocation11 + $0xad8] sm:$0xff]  ;;  %v17693_v56 = vcombine.high %v2845_v46, %v2853_v51 }
 0x3af   :  { %8928 = vmatpush1.bf16.msra.mxu1 %v17850_v52  ;;  %v3148_v52 = vld [vmem:[#allocation11 + $0x1c90] sm:$0xff] }
 0x3b0   :  { %8969 = vmatpush1.bf16.msra.mxu0 %v17084_v7  ;;  %8929 = vmatprep.subr.bf16.mxu1 %v18091_v10  ;;  %v3156_v7 = vld [vmem:[#allocation11 + $0x1cd0] sm:$0xff]  ;;  %v2381_v10 = vld [vmem:[#allocation11 + $0x498] sm:$0xff] }
 0x3b1   :  { %8970 = vmatprep.subr.bf16.mxu0 %v17325_v12  ;;  %v2389_v12 = vld [vmem:[#allocation11 + $0x4d8] sm:$0xff]  ;;  %v17995_v18 = vcombine.high %v3148_v52, %v3156_v7  ;;  %v17994_v30 = vcombine.low %v3148_v52, %v3156_v7 }
 0x3b2   :  { %v17229_v48 = vcombine.high %v2381_v10, %v2389_v12  ;;  %v17228_v31 = vcombine.low %v2381_v10, %v2389_v12  ;;  %v17692_v10 = vcombine.low %v2845_v46, %v2853_v51  ;;  %v2781_v46 = vld [vmem:[#allocation11 + $0x1118] sm:$0xff] }
 0x3b3   :  { %8930 = vmatpush2.bf16.msra.mxu1 %v18090_v21  ;;  %v3132_v21 = vld [vmem:[#allocation11 + $0x1c10] sm:$0xff]  ;;  %v2789_v51 = vld [vmem:[#allocation11 + $0x1158] sm:$0xff] }
 0x3b4   :  { %8971 = vmatpush2.bf16.msra.mxu0 %v17324_v27  ;;  %8931 = vmatprep.subr.bf16.mxu1 %v18075_v29  ;;  %v3140_v27 = vld [vmem:[#allocation11 + $0x1c50] sm:$0xff]  ;;  %v2365_v29 = vld [vmem:[#allocation11 + $0x418] sm:$0xff] }
 0x3b5   :  { %8972 = vmatprep.subr.bf16.mxu0 %v17309_v11  ;;  %v2373_v11 = vld [vmem:[#allocation11 + $0x458] sm:$0xff]  ;;  %v17979_v60 = vcombine.high %v3132_v21, %v3140_v27  ;;  %v17978_v35 = vcombine.low %v3132_v21, %v3140_v27 }
 0x3b6   :  { %v17213_v61 = vcombine.high %v2365_v29, %v2373_v11  ;;  %v17212_v36 = vcombine.low %v2365_v29, %v2373_v11  ;;  %v2813_v29 = vld [vmem:[#allocation11 + $0x1218] sm:$0xff] }
 0x3b7   :  { %8932 = vmatpush2.bf16.msra.mxu1 %v18074_v63  ;;  %v2605_v63 = vld [vmem:[#allocation11 + $0xb98] sm:$0xff] }
 0x3b8   :  { %8973 = vmatpush2.bf16.msra.mxu0 %v17308_v32  ;;  %8933 = vmatprep.subr.bf16.mxu1 %v18059_v33  ;;  %v2613_v32 = vld [vmem:[#allocation11 + $0xbd8] sm:$0xff] }
 0x3b9   :  { %8974 = vmatprep.subr.bf16.mxu0 %v17293_v34  ;;  %v2861_v33 = vld [vmem:[#allocation11 + $0x1398] sm:$0xff]  ;;  %v17453_v43 = vcombine.high %v2605_v63, %v2613_v32  ;;  %v17452_v45 = vcombine.low %v2605_v63, %v2613_v32 }
 0x3ba   :  { %v2869_v34 = vld [vmem:[#allocation11 + $0x13d8] sm:$0xff] }
 0x3bb   :  { %8934 = vmatpush2.bf16.msra.mxu1 %v18058_v39  ;;  %v3273_v39 = vrot.slane %v20978_v37, %v20819_v23  ;;  %v2821_v11 = vld [vmem:[#allocation11 + $0x1258] sm:$0xff] }
 0x3bc   :  { %8975 = vmatpush2.bf16.msra.mxu0 %v17292_v20  ;;  %8935 = vmatprep.subr.bf16.mxu1 %v18043_v40  ;;  %v17709_v20 = vcombine.high %v2861_v33, %v2869_v34  ;;  %v2589_v40 = vld [vmem:[#allocation11 + $0xb18] sm:$0xff] }
 0x3bd   :  { %8976 = vmatprep.subr.bf16.mxu0 %v17277_v41  ;;  %v2597_v41 = vld [vmem:[#allocation11 + $0xb58] sm:$0xff] }
 0x3be   :  { %v17436_v52 = vcombine.low %v2589_v40, %v2597_v41 }
 0x3bf   :  { %8936 = vmatpush2.bf16.msra.mxu1 %v18042_v54  ;;  %v17708_v54 = vcombine.low %v2861_v33, %v2869_v34  ;;  %v17661_v33 = vcombine.high %v2813_v29, %v2821_v11  ;;  %v2541_v34 = vld [vmem:[#allocation11 + $0x998] sm:$0xff] }
 0x3c0   :  { %8977 = vmatpush2.bf16.msra.mxu0 %v17276_v57  ;;  %8937 = vmatprep.subr.bf16.mxu1 %v18027_v58  ;;  %v8661_v57 = vadd.f32 %v20964_v50, %v3273_v39  ;;  %v17437_v58 = vcombine.high %v2589_v40, %v2597_v41 }
 0x3c1   :  { %8978 = vmatprep.subr.bf16.mxu0 %v17261_v59  ;;  %v2573_v59 = vld [vmem:[#allocation11 + $0xa98] sm:$0xff] }
 0x3c2   :  { %v17421_v12 = vcombine.high %v2573_v59, %v2581_v0 }
 0x3c3   :  { %8938 = vmatpush2.bf16.msra.mxu1 %v18026_v4  ;;  %v2829_v4 = vld [vmem:[#allocation11 + $0x1298] sm:$0xff] }
 0x3c4   :  { %8979 = vmatpush2.bf16.msra.mxu0 %v17260_v2  ;;  %8939 = vmatprep.subr.bf16.mxu1 %v18011_v8  ;;  %v2837_v2 = vld [vmem:[#allocation11 + $0x12d8] sm:$0xff]  ;;  %v8663_v8 = vadd.f32 %v20972_v62, %v3277_v42 }
 0x3c5   :  { %8980 = vmatprep.subr.bf16.mxu0 %v17245_v9  ;;  %v2557_v62 = vld [vmem:[#allocation11 + $0xa18] sm:$0xff]  ;;  %v17676_v63 = vcombine.low %v2829_v4, %v2837_v2 }
 0x3c6   :  { %v2525_v42 = vld [vmem:[#allocation11 + $0x918] sm:$0xff] }
 0x3c7   :  { %8940 = vmatpush2.bf16.msra.mxu1 %v18010_v14 }
 0x3c8   :  { %8981 = vmatpush2.bf16.msra.mxu0 %v17244_v15  ;;  %8941 = vmatprep.subr.bf16.mxu1 %v17995_v18  ;;  %v17677_v18 = vcombine.high %v2829_v4, %v2837_v2  ;;  %v17628_v2 = vcombine.low %v2781_v46, %v2789_v51 }
 0x3c9   :  { %8982 = vmatprep.subr.bf16.mxu0 %v17229_v48  ;;  %v2565_v48 = vld [vmem:[#allocation11 + $0xa58] sm:$0xff] }
 0x3ca   :  { %v17405_v32 = vcombine.high %v2557_v62, %v2565_v48  ;;  %v17404_v39 = vcombine.low %v2557_v62, %v2565_v48  ;;  %v2733_v48 = vld [vmem:[#allocation11 + $0xf98] sm:$0xff] }
 0x3cb   :  { %8942 = vmatpush2.bf16.msra.mxu1 %v17994_v30 }
 0x3cc   :  { %8983 = vmatpush2.bf16.msra.mxu0 %v17228_v31  ;;  %8943 = vmatprep.subr.bf16.mxu1 %v17979_v60  ;;  %v17420_v31 = vcombine.low %v2573_v59, %v2581_v0  ;;  %v17629_v59 = vcombine.high %v2781_v46, %v2789_v51  ;;  %v2509_v0 = vld [vmem:[#allocation11 + $0x898] sm:$0xff] }
 0x3cd   :  { %8984 = vmatprep.subr.bf16.mxu0 %v17213_v61 }
 0x3cf   :  { %8944 = vmatpush2.bf16.msra.mxu1 %v17978_v35  ;;  %v2549_v35 = vld [vmem:[#allocation11 + $0x9d8] sm:$0xff] }
 0x3d0   :  { %8985 = vmatpush2.bf16.msra.mxu0 %v17212_v36  ;;  %8995 = vmatprep.subr.bf16.mxu1 %v17453_v43  ;;  %v2797_v36 = vld [vmem:[#allocation11 + $0x1198] sm:$0xff]  ;;  %v17389_v40 = vcombine.high %v2541_v34, %v2549_v35 }
 0x3d1   :  { %9036 = vmatprep.subr.bf16.mxu0 %v17709_v20  ;;  %v2805_v43 = vld [vmem:[#allocation11 + $0x11d8] sm:$0xff]  ;;  %v17660_v20 = vcombine.low %v2813_v29, %v2821_v11 }
 0x3d2   :  { %v8701_v1 = vpop.f32.mrf.mxu1  ;;  %v8742_v53 = vpop.f32.mrf.mxu0  ;;  %8946 = vmatmul.mubr.bf16.vlgmr.msra.gmra.mxu1 %v20934_v6  ;;  %v17645_v41 = vcombine.high %v2797_v36, %v2805_v43  ;;  %v2997_v29 = vld [vmem:[#allocation11 + $0x17d8] sm:$0xff] }
 0x3d3   :  { %v8702_v9 = vadd.f32 %v8701_v1, %v8661_v57  ;;  %8987 = vmatmul.mubr.bf16.vlgmr.msra.gmra.mxu0 %v20878_v13  ;;  %8996 = vmatpush1.bf16.msra.mxu1 %v17452_v45  ;;  %v2533_v45 = vld [vmem:[#allocation11 + $0x958] sm:$0xff]  ;;  %v17644_v57 = vcombine.low %v2797_v36, %v2805_v43 }
 0x3d4   :  { %9027 = vmatprep.mubr.bf16.mxu1 %v20883_v47  ;;  %9037 = vmatpush1.bf16.msra.mxu0 %v17708_v54  ;;  %v8703_v50 = vpop.f32.mrf.mxu1  ;;  %v8744_v7 = vpop.f32.mrf.mxu0  ;;  %v17388_v54 = vcombine.low %v2541_v34, %v2549_v35  ;;  %v2517_v1 = vld [vmem:[#allocation11 + $0x8d8] sm:$0xff]  ;;  %v17372_v4 = vcombine.low %v2525_v42, %v2533_v45 }
 0x3d5   :  { %v20989_v14 = vadd.f32 %v8742_v53, %v8702_v9  ;;  %9068 = vmatprep.mubr.bf16.mxu0 %v20914_v17  ;;  %v8704_v15 = vadd.f32 %v8703_v50, %v8663_v8  ;;  %8997 = vmatprep.subr.bf16.mxu1 %v17437_v58  ;;  %v17373_v58 = vcombine.high %v2525_v42, %v2533_v45  ;;  %v2765_v53 = vld [vmem:[#allocation11 + $0x1098] sm:$0xff] }
 0x3d6   :  { %v8705_v21 = vpop.f32.mrf.mxu1  ;;  %v8746_v27 = vpop.f32.mrf.mxu0  ;;  %9038 = vmatprep.subr.bf16.mxu0 %v17693_v56  ;;  %v2773_v56 = vld [vmem:[#allocation11 + $0x10d8] sm:$0xff]  ;;  %v17357_v8 = vcombine.high %v2509_v0, %v2517_v1 }
 0x3d7   :  { %v20992_v30 = vadd.f32 %v8744_v7, %v8704_v15  ;;  %8998 = vmatpush1.bf16.msra.mxu1 %v17436_v52  ;;  %v17613_v9 = vcombine.high %v2765_v53, %v2773_v56  ;;  %v2493_v52 = vld [vmem:[#allocation11 + $0x818] sm:$0xff]  ;;  %v17612_v15 = vcombine.low %v2765_v53, %v2773_v56 }
 0x3d8   :  { %9039 = vmatpush1.bf16.msra.mxu0 %v17692_v10  ;;  %v8706_v60 = vpop.f32.mrf.mxu1  ;;  %v8747_v61 = vpop.f32.mrf.mxu0  ;;  %8999 = vmatprep.subr.bf16.mxu1 %v17421_v12  ;;  %v2501_v50 = vld [vmem:[#allocation11 + $0x858] sm:$0xff]  ;;  %v17356_v12 = vcombine.low %v2509_v0, %v2517_v1 }
 0x3d9   :  { %9040 = vmatprep.subr.bf16.mxu0 %v17677_v18  ;;  %v2749_v7 = vld [vmem:[#allocation11 + $0x1018] sm:$0xff]  ;;  %v17341_v18 = vcombine.high %v2493_v52, %v2501_v50  ;;  %v17340_v11 = vcombine.low %v2493_v52, %v2501_v50 }
 0x3da   :  { %v2757_v10 = vld [vmem:[#allocation11 + $0x1058] sm:$0xff] }
 0x3db   :  { %9000 = vmatpush1.bf16.msra.mxu1 %v17420_v31  ;;  %v17597_v62 = vcombine.high %v2749_v7, %v2757_v10  ;;  %v2741_v21 = vld [vmem:[#allocation11 + $0xfd8] sm:$0xff]  ;;  %v17596_v31 = vcombine.low %v2749_v7, %v2757_v10 }
 0x3dc   :  { %9041 = vmatpush1.bf16.msra.mxu0 %v17676_v63  ;;  %9001 = vmatprep.subr.bf16.mxu1 %v17405_v32  ;;  %v2989_v27 = vld [vmem:[#allocation11 + $0x1798] sm:$0xff]  ;;  %v17581_v60 = vcombine.high %v2733_v48, %v2741_v21  ;;  %v17580_v35 = vcombine.low %v2733_v48, %v2741_v21 }
 0x3dd   :  { %9042 = vmatprep.subr.bf16.mxu0 %v17661_v33  ;;  %v17837_v61 = vcombine.high %v2989_v27, %v2997_v29  ;;  %v2717_v63 = vld [vmem:[#allocation11 + $0xf18] sm:$0xff]  ;;  %v17836_v36 = vcombine.low %v2989_v27, %v2997_v29 }
 0x3de   :  { %v2725_v32 = vld [vmem:[#allocation11 + $0xf58] sm:$0xff] }
 0x3df   :  { %9002 = vmatpush1.bf16.msra.mxu1 %v17404_v39  ;;  %v2973_v33 = vld [vmem:[#allocation11 + $0x1718] sm:$0xff]  ;;  %v17565_v43 = vcombine.high %v2717_v63, %v2725_v32  ;;  %v17564_v45 = vcombine.low %v2717_v63, %v2725_v32 }
 0x3e0   :  { %9043 = vmatpush1.bf16.msra.mxu0 %v17660_v20  ;;  %9003 = vmatprep.subr.bf16.mxu1 %v17389_v40  ;;  %v2981_v34 = vld [vmem:[#allocation11 + $0x1758] sm:$0xff] }
 0x3e1   :  { %9044 = vmatprep.subr.bf16.mxu0 %v17645_v41  ;;  %v17821_v39 = vcombine.high %v2973_v33, %v2981_v34  ;;  %v2701_v20 = vld [vmem:[#allocation11 + $0xe98] sm:$0xff]  ;;  %v17820_v46 = vcombine.low %v2973_v33, %v2981_v34 }
 0x3e2   :  { %v2709_v40 = vld [vmem:[#allocation11 + $0xed8] sm:$0xff] }
 0x3e3   :  { %9004 = vmatpush1.bf16.msra.mxu1 %v17388_v54  ;;  %v2957_v41 = vld [vmem:[#allocation11 + $0x1698] sm:$0xff]  ;;  %v17549_v51 = vcombine.high %v2701_v20, %v2709_v40  ;;  %v17548_v1 = vcombine.low %v2701_v20, %v2709_v40 }
 0x3e4   :  { %9045 = vmatpush1.bf16.msra.mxu0 %v17644_v57  ;;  %9005 = vmatprep.subr.bf16.mxu1 %v17373_v58  ;;  %v2965_v42 = vld [vmem:[#allocation11 + $0x16d8] sm:$0xff] }
 0x3e5   :  { %9046 = vmatprep.subr.bf16.mxu0 %v17629_v59  ;;  %v17805_v54 = vcombine.high %v2957_v41, %v2965_v42  ;;  %v2685_v57 = vld [vmem:[#allocation11 + $0xe18] sm:$0xff]  ;;  %v17804_v53 = vcombine.low %v2957_v41, %v2965_v42 }
 0x3e6   :  { %v2693_v58 = vld [vmem:[#allocation11 + $0xe58] sm:$0xff] }
 0x3e7   :  { %9006 = vmatpush1.bf16.msra.mxu1 %v17372_v4  ;;  %v2941_v59 = vld [vmem:[#allocation11 + $0x1618] sm:$0xff]  ;;  %v17533_v56 = vcombine.high %v2685_v57, %v2693_v58  ;;  %v17532_v50 = vcombine.low %v2685_v57, %v2693_v58  ;;  %v2358_v57 = vld [vmem:[#allocation11 + $0x3e0] sm:$0xff] }
 0x3e8   :  { %9047 = vmatpush1.bf16.msra.mxu0 %v17628_v2  ;;  %9007 = vmatprep.subr.bf16.mxu1 %v17357_v8  ;;  %v2949_v0 = vld [vmem:[#allocation11 + $0x1658] sm:$0xff] }
 0x3e9   :  { %9048 = vmatprep.subr.bf16.mxu0 %v17613_v9  ;;  %v17789_v4 = vcombine.high %v2941_v59, %v2949_v0  ;;  %v2669_v2 = vld [vmem:[#allocation11 + $0xd98] sm:$0xff]  ;;  %v17788_v7 = vcombine.low %v2941_v59, %v2949_v0 }
 0x3ea   :  { %v2677_v8 = vld [vmem:[#allocation11 + $0xdd8] sm:$0xff] }
 0x3eb   :  { %9008 = vmatpush1.bf16.msra.mxu1 %v17356_v12  ;;  %v2925_v9 = vld [vmem:[#allocation11 + $0x1598] sm:$0xff]  ;;  %v17517_v10 = vcombine.high %v2669_v2, %v2677_v8  ;;  %v17516_v21 = vcombine.low %v2669_v2, %v2677_v8  ;;  %v2334_v2 = vld [vmem:[#allocation11 + $0x320] sm:$0xff] }
 0x3ec   :  { %9049 = vmatpush1.bf16.msra.mxu0 %v17612_v15  ;;  %9009 = vmatprep.subr.bf16.mxu1 %v17341_v18  ;;  %v2933_v52 = vld [vmem:[#allocation11 + $0x15d8] sm:$0xff]  ;;  %v2342_v8 = vld [vmem:[#allocation11 + $0x360] sm:$0xff] }
 0x3ed   :  { %9050 = vmatprep.subr.bf16.mxu0 %v17597_v62  ;;  %v17773_v12 = vcombine.high %v2925_v9, %v2933_v52  ;;  %v2653_v15 = vld [vmem:[#allocation11 + $0xd18] sm:$0xff]  ;;  %v17772_v27 = vcombine.low %v2925_v9, %v2933_v52 }
 0x3ee   :  { %v2661_v18 = vld [vmem:[#allocation11 + $0xd58] sm:$0xff] }
 0x3ef   :  { %9010 = vmatpush1.bf16.msra.mxu1 %v17340_v11  ;;  %v2909_v62 = vld [vmem:[#allocation11 + $0x1518] sm:$0xff]  ;;  %v17501_v29 = vcombine.high %v2653_v15, %v2661_v18  ;;  %v17500_v32 = vcombine.low %v2653_v15, %v2661_v18  ;;  %v2318_v15 = vld [vmem:[#allocation11 + $0x2a0] sm:$0xff] }
 0x3f0   :  { %9051 = vmatpush1.bf16.msra.mxu0 %v17596_v31  ;;  %9011 = vmatprep.subr.bf16.mxu1 %v17581_v60  ;;  %v2917_v48 = vld [vmem:[#allocation11 + $0x1558] sm:$0xff]  ;;  %v2326_v18 = vld [vmem:[#allocation11 + $0x2e0] sm:$0xff] }
 0x3f1   :  { %9052 = vmatprep.subr.bf16.mxu0 %v17837_v61  ;;  %v17757_v11 = vcombine.high %v2909_v62, %v2917_v48  ;;  %v2637_v31 = vld [vmem:[#allocation11 + $0xc98] sm:$0xff]  ;;  %v17756_v33 = vcombine.low %v2909_v62, %v2917_v48 }
 0x3f2   :  { %v2645_v60 = vld [vmem:[#allocation11 + $0xcd8] sm:$0xff] }
 0x3f3   :  { %9012 = vmatpush2.bf16.msra.mxu1 %v17580_v35  ;;  %v2893_v61 = vld [vmem:[#allocation11 + $0x1498] sm:$0xff]  ;;  %v17485_v34 = vcombine.high %v2637_v31, %v2645_v60  ;;  %v17484_v40 = vcombine.low %v2637_v31, %v2645_v60 }
 0x3f4   :  { %9053 = vmatpush2.bf16.msra.mxu0 %v17836_v36  ;;  %9013 = vmatprep.subr.bf16.mxu1 %v17565_v43  ;;  %v2901_v63 = vld [vmem:[#allocation11 + $0x14d8] sm:$0xff] }
 0x3f5   :  { %9054 = vmatprep.subr.bf16.mxu0 %v17821_v39  ;;  %v17741_v35 = vcombine.high %v2893_v61, %v2901_v63  ;;  %v2621_v36 = vld [vmem:[#allocation11 + $0xc18] sm:$0xff]  ;;  %v17740_v41 = vcombine.low %v2893_v61, %v2901_v63 }
 0x3f6   :  { %v2629_v43 = vld [vmem:[#allocation11 + $0xc58] sm:$0xff] }
 0x3f7   :  { %9014 = vmatpush2.bf16.msra.mxu1 %v17564_v45  ;;  %v2877_v39 = vld [vmem:[#allocation11 + $0x1418] sm:$0xff]  ;;  %v17469_v42 = vcombine.high %v2621_v36, %v2629_v43  ;;  %v17468_v58 = vcombine.low %v2621_v36, %v2629_v43 }
 0x3f8   :  { %9055 = vmatpush2.bf16.msra.mxu0 %v17820_v46  ;;  %9015 = vmatprep.subr.bf16.mxu1 %v17549_v51  ;;  %v2885_v20 = vld [vmem:[#allocation11 + $0x1458] sm:$0xff] }
 0x3f9   :  { %9056 = vmatprep.subr.bf16.mxu0 %v17805_v54  ;;  %v17725_v45 = vcombine.high %v2877_v39, %v2885_v20  ;;  %v3117_v46 = vld [vmem:[#allocation11 + $0x1b98] sm:$0xff]  ;;  %v2350_v54 = vld [vmem:[#allocation11 + $0x3a0] sm:$0xff]  ;;  %v17724_v59 = vcombine.low %v2877_v39, %v2885_v20  ;;  %v17166_v39 = vcombine.low %v2318_v15, %v2326_v18 }
 0x3fa   :  { %v3125_v51 = vld [vmem:[#allocation11 + $0x1bd8] sm:$0xff]  ;;  %v17198_v9 = vcombine.low %v2350_v54, %v2358_v57 }
 0x3fb   :  { %9016 = vmatpush2.bf16.msra.mxu1 %v17548_v1  ;;  %v17965_v0 = vcombine.high %v3117_v46, %v3125_v51  ;;  %v17199_v1 = vcombine.high %v2350_v54, %v2358_v57  ;;  %v3069_v61 = vld [vmem:[#allocation11 + $0x1a18] sm:$0xff] }
 0x3fc   :  { %9057 = vmatpush2.bf16.msra.mxu0 %v17804_v53  ;;  %9017 = vmatprep.subr.bf16.mxu1 %v17533_v56  ;;  %v3101_v53 = vld [vmem:[#allocation11 + $0x1b18] sm:$0xff] }
 0x3fd   :  { %9058 = vmatprep.subr.bf16.mxu0 %v17789_v4  ;;  %v3109_v56 = vld [vmem:[#allocation11 + $0x1b58] sm:$0xff]  ;;  %v17964_v4 = vcombine.low %v3117_v46, %v3125_v51  ;;  %v2294_v46 = vld [vmem:[#allocation11 + $0x1e0] sm:$0xff] }
 0x3fe   :  { %v17949_v52 = vcombine.high %v3101_v53, %v3109_v56  ;;  %v3077_v63 = vld [vmem:[#allocation11 + $0x1a58] sm:$0xff] }
 0x3ff   :  { %9018 = vmatpush2.bf16.msra.mxu1 %v17532_v50  ;;  %v3085_v50 = vld [vmem:[#allocation11 + $0x1a98] sm:$0xff]  ;;  %v17917_v20 = vcombine.high %v3069_v61, %v3077_v63  ;;  %v17916_v51 = vcombine.low %v3069_v61, %v3077_v63 }
 0x400   :  { %9059 = vmatpush2.bf16.msra.mxu0 %v17788_v7  ;;  %9019 = vmatprep.subr.bf16.mxu1 %v17517_v10  ;;  %v3093_v7 = vld [vmem:[#allocation11 + $0x1ad8] sm:$0xff] }
 0x401   :  { %9060 = vmatprep.subr.bf16.mxu0 %v17773_v12  ;;  %v17183_v12 = vcombine.high %v2334_v2, %v2342_v8  ;;  %v17932_v36 = vcombine.low %v3085_v50, %v3093_v7 }
 0x403   :  { %9020 = vmatpush2.bf16.msra.mxu1 %v17516_v21  ;;  %v17948_v21 = vcombine.low %v3101_v53, %v3109_v56  ;;  %v2278_v53 = vld [vmem:[#allocation11 + $0x160] sm:$0xff] }
 0x404   :  { %9061 = vmatpush2.bf16.msra.mxu0 %v17772_v27  ;;  %9021 = vmatprep.subr.bf16.mxu1 %v17501_v29  ;;  %v17182_v29 = vcombine.low %v2334_v2, %v2342_v8 }
 0x405   :  { %9062 = vmatprep.subr.bf16.mxu0 %v17757_v11  ;;  %v17933_v11 = vcombine.high %v3085_v50, %v3093_v7  ;;  %v2254_v50 = vld [vmem:[#allocation11 + $0xa0] sm:$0xff] }
 0x406   :  { %v2262_v7 = vld [vmem:[#allocation11 + $0xe0] sm:$0xff] }
 0x407   :  { %9022 = vmatpush2.bf16.msra.mxu1 %v17500_v32  ;;  %v17102_v61 = vcombine.low %v2254_v50, %v2262_v7 }
 0x408   :  { %9063 = vmatpush2.bf16.msra.mxu0 %v17756_v33  ;;  %9023 = vmatprep.subr.bf16.mxu1 %v17485_v34  ;;  %v2302_v33 = vld [vmem:[#allocation11 + $0x220] sm:$0xff] }
 0x409   :  { %9064 = vmatprep.subr.bf16.mxu0 %v17741_v35  ;;  %v2310_v34 = vld [vmem:[#allocation11 + $0x260] sm:$0xff] }
 0x40a   :  { %v17150_v54 = vcombine.low %v2302_v33, %v2310_v34 }
 0x40b   :  { %9024 = vmatpush2.bf16.msra.mxu1 %v17484_v40  ;;  %v17151_v40 = vcombine.high %v2302_v33, %v2310_v34  ;;  %v3245_v33 = vld [vmem:[#allocation11 + $0x1f98] sm:$0xff] }
 0x40c   :  { %9065 = vmatpush2.bf16.msra.mxu0 %v17740_v41  ;;  %9025 = vmatprep.subr.bf16.mxu1 %v17469_v42  ;;  %v3053_v41 = vld [vmem:[#allocation11 + $0x1998] sm:$0xff] }
 0x40d   :  { %9066 = vmatprep.subr.bf16.mxu0 %v17725_v45  ;;  %v3061_v42 = vld [vmem:[#allocation11 + $0x19d8] sm:$0xff]  ;;  %v2286_v45 = vld [vmem:[#allocation11 + $0x1a0] sm:$0xff] }
 0x40e   :  { %v17901_v57 = vcombine.high %v3053_v41, %v3061_v42  ;;  %v17900_v56 = vcombine.low %v3053_v41, %v3061_v42  ;;  %v3253_v34 = vld [vmem:[#allocation11 + $0x1fd8] sm:$0xff]  ;;  %v2462_v42 = vld [vmem:[#allocation11 + $0x720] sm:$0xff] }
 0x40f   :  { %9026 = vmatpush2.bf16.msra.mxu1 %v17468_v58  ;;  %v17135_v58 = vcombine.high %v2286_v45, %v2294_v46  ;;  %v3237_v41 = vld [vmem:[#allocation11 + $0x1f58] sm:$0xff] }
 0x410   :  { %9067 = vmatpush2.bf16.msra.mxu0 %v17724_v59  ;;  %9077 = vmatprep.subr.bf16.mxu1 %v17965_v0  ;;  %v3037_v59 = vld [vmem:[#allocation11 + $0x1918] sm:$0xff] }
 0x411   :  { %9118 = vmatprep.subr.bf16.mxu0 %v17199_v1  ;;  %v3045_v0 = vld [vmem:[#allocation11 + $0x1958] sm:$0xff]  ;;  %v2270_v1 = vld [vmem:[#allocation11 + $0x120] sm:$0xff] }
 0x412   :  { %v8783_v10 = vpop.f32.mrf.mxu1  ;;  %9028 = vmatmul.mubr.bf16.vlgmr.msra.gmra.mxu1 %v20887_v55  ;;  %v17885_v2 = vcombine.high %v3037_v59, %v3045_v0  ;;  %v17119_v8 = vcombine.high %v2270_v1, %v2278_v53 }
 0x413   :  { %v20996_v62 = vadd.f32 %v8783_v10, %v20989_v14  ;;  %v20998_v48 = vpop.f32.mrf.mxu0  ;;  %9069 = vmatmul.mubr.bf16.vlgmr.msra.gmra.mxu0 %v20917_v19  ;;  %9078 = vmatpush1.bf16.msra.mxu1 %v17964_v4  ;;  %v17167_v14 = vcombine.high %v2318_v15, %v2326_v18  ;;  %v17134_v4 = vcombine.low %v2286_v45, %v2294_v46  ;;  %v2470_v45 = vld [vmem:[#allocation11 + $0x760] sm:$0xff] }
 0x414   :  { %9109 = vmatprep.mubr.bf16.mxu1 %v20932_v5  ;;  %9119 = vmatpush1.bf16.msra.mxu0 %v17198_v9  ;;  %v8785_v27 = vpop.f32.mrf.mxu1  ;;  %v3021_v9 = vld [vmem:[#allocation11 + $0x1898] sm:$0xff]  ;;  %v17884_v10 = vcombine.low %v3037_v59, %v3045_v0  ;;  %v17103_v18 = vcombine.high %v2254_v50, %v2262_v7  ;;  %v18092_v46 = vcombine.low %v3245_v33, %v3253_v34  ;;  %v2446_v0 = vld [vmem:[#allocation11 + $0x6a0] sm:$0xff] }
 0x415   :  { %9150 = vmatprep.mubr.bf16.mxu0 %v20863_v16  ;;  %v21004_v31 = vadd.f32 %v8785_v27, %v20992_v30  ;;  %v21006_v60 = vpop.f32.mrf.mxu0  ;;  %9079 = vmatprep.subr.bf16.mxu1 %v17949_v52  ;;  %v3029_v52 = vld [vmem:[#allocation11 + $0x18d8] sm:$0xff]  ;;  %v2438_v50 = vld [vmem:[#allocation11 + $0x660] sm:$0xff] }
 0x416   :  { %v8787_v32 = vpop.f32.mrf.mxu1  ;;  %9120 = vmatprep.subr.bf16.mxu0 %v17183_v12  ;;  %v17118_v12 = vcombine.low %v2270_v1, %v2278_v53  ;;  %v17869_v15 = vcombine.high %v3021_v9, %v3029_v52  ;;  %v3013_v27 = vld [vmem:[#allocation11 + $0x1858] sm:$0xff]  ;;  %v2454_v1 = vld [vmem:[#allocation11 + $0x6e0] sm:$0xff] }
 0x417   :  { %v8828_v35 = vpop.f32.mrf.mxu0  ;;  %9080 = vmatpush1.bf16.msra.mxu1 %v17948_v21  ;;  %v3005_v21 = vld [vmem:[#allocation11 + $0x1818] sm:$0xff] }
 0x418   :  { %9121 = vmatpush1.bf16.msra.mxu0 %v17182_v29  ;;  %v8788_v43 = vpop.f32.mrf.mxu1  ;;  %9081 = vmatprep.subr.bf16.mxu1 %v17933_v11  ;;  %v2238_v29 = vld [vmem:[#allocation11 + $0x20] sm:$0xff]  ;;  %v17853_v63 = vcombine.high %v3005_v21, %v3013_v27  ;;  %v3221_v59 = vld [vmem:[#allocation11 + $0x1ed8] sm:$0xff] }
 0x419   :  { %v8829_v30 = vpop.f32.mrf.mxu0  ;;  %9122 = vmatprep.subr.bf16.mxu0 %v17167_v14  ;;  %v2246_v11 = vld [vmem:[#allocation11 + $0x60] sm:$0xff]  ;;  %v17868_v14 = vcombine.low %v3021_v9, %v3029_v52  ;;  %v17852_v43 = vcombine.low %v3005_v21, %v3013_v27  ;;  %v3205_v9 = vld [vmem:[#allocation11 + $0x1e58] sm:$0xff] }
 0x41a   :  { %v17087_v32 = vcombine.high %v2238_v29, %v2246_v11  ;;  %v2478_v35 = vld [vmem:[#allocation11 + $0x7a0] sm:$0xff]  ;;  %v3189_v21 = vld [vmem:[#allocation11 + $0x1dd8] sm:$0xff] }
 0x41b   :  { %9082 = vmatpush1.bf16.msra.mxu1 %v17932_v36  ;;  %v2486_v36 = vld [vmem:[#allocation11 + $0x7e0] sm:$0xff] }
 0x41c   :  { %9123 = vmatpush1.bf16.msra.mxu0 %v17166_v39  ;;  %9083 = vmatprep.subr.bf16.mxu1 %v17917_v20  ;;  %v17086_v39 = vcombine.low %v2238_v29, %v2246_v11  ;;  %v18093_v20 = vcombine.high %v3245_v33, %v3253_v34  ;;  %v17327_v30 = vcombine.high %v2478_v35, %v2486_v36  ;;  %v2430_v52 = vld [vmem:[#allocation11 + $0x620] sm:$0xff]  ;;  %v3173_v33 = vld [vmem:[#allocation11 + $0x1d58] sm:$0xff] }
 0x41d   :  { %9124 = vmatprep.subr.bf16.mxu0 %v17151_v40  ;;  %v3229_v40 = vld [vmem:[#allocation11 + $0x1f18] sm:$0xff]  ;;  %v2414_v27 = vld [vmem:[#allocation11 + $0x5a0] sm:$0xff] }
 0x41e   :  { %v18076_v53 = vcombine.low %v3229_v40, %v3237_v41  ;;  %v2422_v29 = vld [vmem:[#allocation11 + $0x5e0] sm:$0xff] }
 0x41f   :  { %9084 = vmatpush1.bf16.msra.mxu1 %v17916_v51  ;;  %v17326_v51 = vcombine.low %v2478_v35, %v2486_v36  ;;  %v2398_v34 = vld [vmem:[#allocation11 + $0x520] sm:$0xff] }
 0x420   :  { %9125 = vmatpush1.bf16.msra.mxu0 %v17150_v54  ;;  %9085 = vmatprep.subr.bf16.mxu1 %v17901_v57  ;;  %v18077_v54 = vcombine.high %v3229_v40, %v3237_v41  ;;  %v17311_v57 = vcombine.high %v2462_v42, %v2470_v45  ;;  %v2406_v35 = vld [vmem:[#allocation11 + $0x560] sm:$0xff]  ;;  %v3157_v40 = vld [vmem:[#allocation11 + $0x1cd8] sm:$0xff] }
 0x421   :  { %9126 = vmatprep.subr.bf16.mxu0 %v17135_v58  ;;  %v3213_v58 = vld [vmem:[#allocation11 + $0x1e98] sm:$0xff]  ;;  %v2382_v41 = vld [vmem:[#allocation11 + $0x4a0] sm:$0xff] }
 0x422   :  { %v18060_v7 = vcombine.low %v3213_v58, %v3221_v59 }
 0x423   :  { %9086 = vmatpush1.bf16.msra.mxu1 %v17900_v56  ;;  %v17310_v56 = vcombine.low %v2462_v42, %v2470_v45  ;;  %v2390_v42 = vld [vmem:[#allocation11 + $0x4e0] sm:$0xff] }
 0x424   :  { %9127 = vmatpush1.bf16.msra.mxu0 %v17134_v4  ;;  %9087 = vmatprep.subr.bf16.mxu1 %v17885_v2  ;;  %v18061_v4 = vcombine.high %v3213_v58, %v3221_v59  ;;  %v17295_v2 = vcombine.high %v2446_v0, %v2454_v1  ;;  %v3141_v58 = vld [vmem:[#allocation11 + $0x1c58] sm:$0xff]  ;;  %v2366_v59 = vld [vmem:[#allocation11 + $0x420] sm:$0xff] }
 0x425   :  { %9128 = vmatprep.subr.bf16.mxu0 %v17119_v8  ;;  %v3197_v8 = vld [vmem:[#allocation11 + $0x1e18] sm:$0xff] }
 0x426   :  { %v18044_v11 = vcombine.low %v3197_v8, %v3205_v9 }
 0x427   :  { %9088 = vmatpush1.bf16.msra.mxu1 %v17884_v10  ;;  %v17294_v10 = vcombine.low %v2446_v0, %v2454_v1  ;;  %v2374_v0 = vld [vmem:[#allocation11 + $0x460] sm:$0xff] }
 0x428   :  { %9129 = vmatpush1.bf16.msra.mxu0 %v17118_v12  ;;  %9089 = vmatprep.subr.bf16.mxu1 %v17869_v15  ;;  %v18045_v12 = vcombine.high %v3197_v8, %v3205_v9  ;;  %v17279_v15 = vcombine.high %v2430_v52, %v2438_v50  ;;  %v2614_v8 = vld [vmem:[#allocation11 + $0xbe0] sm:$0xff] }
 0x429   :  { %9130 = vmatprep.subr.bf16.mxu0 %v17103_v18  ;;  %v3181_v18 = vld [vmem:[#allocation11 + $0x1d98] sm:$0xff]  ;;  %v2862_v9 = vld [vmem:[#allocation11 + $0x13a0] sm:$0xff] }
 0x42a   :  { %v18028_v36 = vcombine.low %v3181_v18, %v3189_v21 }
 0x42b   :  { %9090 = vmatpush1.bf16.msra.mxu1 %v17868_v14  ;;  %v17278_v14 = vcombine.low %v2430_v52, %v2438_v50  ;;  %v2870_v52 = vld [vmem:[#allocation11 + $0x13e0] sm:$0xff] }
 0x42c   :  { %9131 = vmatpush1.bf16.msra.mxu0 %v17102_v61  ;;  %9091 = vmatprep.subr.bf16.mxu1 %v17853_v63  ;;  %v18029_v61 = vcombine.high %v3181_v18, %v3189_v21  ;;  %v17263_v63 = vcombine.high %v2414_v27, %v2422_v29  ;;  %v2590_v18 = vld [vmem:[#allocation11 + $0xb20] sm:$0xff] }
 0x42d   :  { %9132 = vmatprep.subr.bf16.mxu0 %v17087_v32  ;;  %v3165_v32 = vld [vmem:[#allocation11 + $0x1d18] sm:$0xff]  ;;  %v2598_v21 = vld [vmem:[#allocation11 + $0xb60] sm:$0xff] }
 0x42e   :  { %v18012_v45 = vcombine.low %v3165_v32, %v3173_v33 }
 0x42f   :  { %9092 = vmatpush1.bf16.msra.mxu1 %v17852_v43  ;;  %v17262_v43 = vcombine.low %v2414_v27, %v2422_v29  ;;  %v3285_v27 = vrot.slane %v20978_v37, %v20904_v44 }
 0x430   :  { %9133 = vmatpush1.bf16.msra.mxu0 %v17086_v39  ;;  %9093 = vmatprep.subr.bf16.mxu1 %v18093_v20  ;;  %v18013_v39 = vcombine.high %v3165_v32, %v3173_v33  ;;  %v17247_v20 = vcombine.high %v2398_v34, %v2406_v35  ;;  %v17439_v32 = vcombine.high %v2590_v18, %v2598_v21  ;;  %v2574_v33 = vld [vmem:[#allocation11 + $0xaa0] sm:$0xff] }
 0x431   :  { %9134 = vmatprep.subr.bf16.mxu0 %v17327_v30  ;;  %v3149_v30 = vld [vmem:[#allocation11 + $0x1c98] sm:$0xff] }
 0x432   :  { %v17996_v1 = vcombine.low %v3149_v30, %v3157_v40 }
 0x433   :  { %9094 = vmatpush2.bf16.msra.mxu1 %v18092_v46  ;;  %v17246_v46 = vcombine.low %v2398_v34, %v2406_v35  ;;  %v2582_v34 = vld [vmem:[#allocation11 + $0xae0] sm:$0xff] }
 0x434   :  { %9135 = vmatpush2.bf16.msra.mxu0 %v17326_v51  ;;  %9095 = vmatprep.subr.bf16.mxu1 %v18077_v54  ;;  %v17997_v51 = vcombine.high %v3149_v30, %v3157_v40  ;;  %v17231_v54 = vcombine.high %v2382_v41, %v2390_v42  ;;  %v17438_v40 = vcombine.low %v2590_v18, %v2598_v21 }
 0x435   :  { %9136 = vmatprep.subr.bf16.mxu0 %v17311_v57  ;;  %v3133_v57 = vld [vmem:[#allocation11 + $0x1c18] sm:$0xff] }
 0x436   :  { %v17980_v50 = vcombine.low %v3133_v57, %v3141_v58 }
 0x437   :  { %9096 = vmatpush2.bf16.msra.mxu1 %v18076_v53  ;;  %v17230_v53 = vcombine.low %v2382_v41, %v2390_v42  ;;  %v17423_v42 = vcombine.high %v2574_v33, %v2582_v34 }
 0x438   :  { %9137 = vmatpush2.bf16.msra.mxu0 %v17310_v56  ;;  %9097 = vmatprep.subr.bf16.mxu1 %v18061_v4  ;;  %v17981_v56 = vcombine.high %v3133_v57, %v3141_v58  ;;  %v17215_v4 = vcombine.high %v2366_v59, %v2374_v0  ;;  %v2566_v57 = vld [vmem:[#allocation11 + $0xa60] sm:$0xff] }
 0x439   :  { %9138 = vmatprep.subr.bf16.mxu0 %v17295_v2  ;;  %v2606_v2 = vld [vmem:[#allocation11 + $0xba0] sm:$0xff] }
 0x43a   :  { %v17454_v29 = vcombine.low %v2606_v2, %v2614_v8 }
 0x43b   :  { %9098 = vmatpush2.bf16.msra.mxu1 %v18060_v7  ;;  %v17214_v7 = vcombine.low %v2366_v59, %v2374_v0  ;;  %v2814_v59 = vld [vmem:[#allocation11 + $0x1220] sm:$0xff] }
 0x43c   :  { %9139 = vmatpush2.bf16.msra.mxu0 %v17294_v10  ;;  %9099 = vmatprep.subr.bf16.mxu1 %v18045_v12  ;;  %v17455_v10 = vcombine.high %v2606_v2, %v2614_v8  ;;  %v3281_v12 = vrot.slane %v20978_v37, %v20900_v38  ;;  %v8827_v37 = vadd.f32 %v21006_v60, %v3285_v27  ;;  %v2822_v0 = vld [vmem:[#allocation11 + $0x1260] sm:$0xff] }
 0x43d   :  { %9140 = vmatprep.subr.bf16.mxu0 %v17279_v15  ;;  %v17711_v15 = vcombine.high %v2862_v9, %v2870_v52  ;;  %v17662_v18 = vcombine.low %v2814_v59, %v2822_v0 }
 0x43f   :  { %9100 = vmatpush2.bf16.msra.mxu1 %v18044_v11  ;;  %v2846_v11 = vld [vmem:[#allocation11 + $0x1320] sm:$0xff] }
 0x440   :  { %9141 = vmatpush2.bf16.msra.mxu0 %v17278_v14  ;;  %9101 = vmatprep.subr.bf16.mxu1 %v18029_v61  ;;  %v2854_v14 = vld [vmem:[#allocation11 + $0x1360] sm:$0xff]  ;;  %v17710_v61 = vcombine.low %v2862_v9, %v2870_v52  ;;  %v17663_v52 = vcombine.high %v2814_v59, %v2822_v0 }
 0x441   :  { %9142 = vmatprep.subr.bf16.mxu0 %v17263_v63  ;;  %v8825_v63 = vadd.f32 %v20998_v48, %v3281_v12  ;;  %v17694_v41 = vcombine.low %v2846_v11, %v2854_v14  ;;  %v2806_v12 = vld [vmem:[#allocation11 + $0x11e0] sm:$0xff] }
 0x442   :  { %v2742_v59 = vld [vmem:[#allocation11 + $0xfe0] sm:$0xff] }
 0x443   :  { %9102 = vmatpush2.bf16.msra.mxu1 %v18028_v36  ;;  %v17695_v36 = vcombine.high %v2846_v11, %v2854_v14  ;;  %v2534_v11 = vld [vmem:[#allocation11 + $0x960] sm:$0xff] }
 0x444   :  { %9143 = vmatpush2.bf16.msra.mxu0 %v17262_v43  ;;  %9103 = vmatprep.subr.bf16.mxu1 %v18013_v39  ;;  %v2830_v43 = vld [vmem:[#allocation11 + $0x12a0] sm:$0xff] }
 0x445   :  { %9144 = vmatprep.subr.bf16.mxu0 %v17247_v20  ;;  %v2838_v39 = vld [vmem:[#allocation11 + $0x12e0] sm:$0xff] }
 0x446   :  { %v17679_v60 = vcombine.high %v2830_v43, %v2838_v39  ;;  %v17678_v2 = vcombine.low %v2830_v43, %v2838_v39  ;;  %v2782_v14 = vld [vmem:[#allocation11 + $0x1120] sm:$0xff] }
 0x447   :  { %9104 = vmatpush2.bf16.msra.mxu1 %v18012_v45  ;;  %v2766_v43 = vld [vmem:[#allocation11 + $0x10a0] sm:$0xff] }
 0x448   :  { %9145 = vmatpush2.bf16.msra.mxu0 %v17246_v46  ;;  %9105 = vmatprep.subr.bf16.mxu1 %v17997_v51  ;;  %v2774_v39 = vld [vmem:[#allocation11 + $0x10e0] sm:$0xff] }
 0x449   :  { %9146 = vmatprep.subr.bf16.mxu0 %v17231_v54  ;;  %v2558_v54 = vld [vmem:[#allocation11 + $0xa20] sm:$0xff] }
 0x44a   :  { %v17407_v8 = vcombine.high %v2558_v54, %v2566_v57  ;;  %v2990_v0 = vld [vmem:[#allocation11 + $0x17a0] sm:$0xff] }
 0x44b   :  { %9106 = vmatpush2.bf16.msra.mxu1 %v17996_v1 }
 0x44c   :  { %9147 = vmatpush2.bf16.msra.mxu0 %v17230_v53  ;;  %9107 = vmatprep.subr.bf16.mxu1 %v17981_v56  ;;  %v17422_v56 = vcombine.low %v2574_v33, %v2582_v34 }
 0x44d   :  { %9148 = vmatprep.subr.bf16.mxu0 %v17215_v4 }
 0x44f   :  { %9108 = vmatpush2.bf16.msra.mxu1 %v17980_v50  ;;  %v2542_v50 = vld [vmem:[#allocation11 + $0x9a0] sm:$0xff] }
 0x450   :  { %9149 = vmatpush2.bf16.msra.mxu0 %v17214_v7  ;;  %9159 = vmatprep.subr.bf16.mxu1 %v17455_v10  ;;  %v2550_v7 = vld [vmem:[#allocation11 + $0x9e0] sm:$0xff] }
 0x451   :  { %9200 = vmatprep.subr.bf16.mxu0 %v17711_v15  ;;  %v2798_v10 = vld [vmem:[#allocation11 + $0x11a0] sm:$0xff]  ;;  %v17406_v15 = vcombine.low %v2558_v54, %v2566_v57  ;;  %v17391_v21 = vcombine.high %v2542_v50, %v2550_v7 }
 0x452   :  { %v8865_v35 = vpop.f32.mrf.mxu1  ;;  %9110 = vmatmul.mubr.bf16.vlgmr.msra.gmra.mxu1 %v20934_v6  ;;  %v17647_v27 = vcombine.high %v2798_v10, %v2806_v12 }
 0x453   :  { %v8866_v20 = vadd.f32 %v8865_v35, %v8825_v63  ;;  %v8906_v30 = vpop.f32.mrf.mxu0  ;;  %9151 = vmatmul.mubr.bf16.vlgmr.msra.gmra.mxu0 %v20878_v13  ;;  %9160 = vmatpush1.bf16.msra.mxu1 %v17454_v29  ;;  %v2526_v29 = vld [vmem:[#allocation11 + $0x920] sm:$0xff]  ;;  %v17390_v63 = vcombine.low %v2542_v50, %v2550_v7 }
 0x454   :  { %9191 = vmatprep.mubr.bf16.mxu1 %v20883_v47  ;;  %9201 = vmatpush1.bf16.msra.mxu0 %v17710_v61  ;;  %v8867_v48 = vpop.f32.mrf.mxu1  ;;  %v2790_v61 = vld [vmem:[#allocation11 + $0x1160] sm:$0xff]  ;;  %v17375_v33 = vcombine.high %v2526_v29, %v2534_v11 }
 0x455   :  { %v21017_v45 = vadd.f32 %v8906_v30, %v8866_v20  ;;  %9232 = vmatprep.mubr.bf16.mxu0 %v20914_v17  ;;  %v8868_v46 = vadd.f32 %v8867_v48, %v8827_v37  ;;  %v8908_v51 = vpop.f32.mrf.mxu0  ;;  %9161 = vmatprep.subr.bf16.mxu1 %v17439_v32  ;;  %v17646_v32 = vcombine.low %v2798_v10, %v2806_v12  ;;  %v2510_v35 = vld [vmem:[#allocation11 + $0x8a0] sm:$0xff] }
 0x456   :  { %v8869_v58 = vpop.f32.mrf.mxu1  ;;  %9202 = vmatprep.subr.bf16.mxu0 %v17695_v36  ;;  %v17631_v34 = vcombine.high %v2782_v14, %v2790_v61  ;;  %v2518_v36 = vld [vmem:[#allocation11 + $0x8e0] sm:$0xff]  ;;  %v17374_v37 = vcombine.low %v2526_v29, %v2534_v11  ;;  %v17630_v20 = vcombine.low %v2782_v14, %v2790_v61 }
 0x457   :  { %v21020_v1 = vadd.f32 %v8908_v51, %v8868_v46  ;;  %v8910_v53 = vpop.f32.mrf.mxu0  ;;  %9162 = vmatpush1.bf16.msra.mxu1 %v17438_v40  ;;  %v17359_v30 = vcombine.high %v2510_v35, %v2518_v36  ;;  %v17615_v40 = vcombine.high %v2766_v43, %v2774_v39  ;;  %v2494_v48 = vld [vmem:[#allocation11 + $0x820] sm:$0xff]  ;;  %v17358_v51 = vcombine.low %v2510_v35, %v2518_v36 }
 0x458   :  { %9203 = vmatpush1.bf16.msra.mxu0 %v17694_v41  ;;  %v8870_v4 = vpop.f32.mrf.mxu1  ;;  %9163 = vmatprep.subr.bf16.mxu1 %v17423_v42  ;;  %v2502_v41 = vld [vmem:[#allocation11 + $0x860] sm:$0xff] }
 0x459   :  { %v8911_v9 = vpop.f32.mrf.mxu0  ;;  %9204 = vmatprep.subr.bf16.mxu0 %v17679_v60  ;;  %v2750_v42 = vld [vmem:[#allocation11 + $0x1020] sm:$0xff]  ;;  %v17614_v60 = vcombine.low %v2766_v43, %v2774_v39  ;;  %v17343_v54 = vcombine.high %v2494_v48, %v2502_v41 }
 0x45a   :  { %v2758_v46 = vld [vmem:[#allocation11 + $0x1060] sm:$0xff] }
 0x45b   :  { %9164 = vmatpush1.bf16.msra.mxu1 %v17422_v56  ;;  %v17599_v57 = vcombine.high %v2750_v42, %v2758_v46  ;;  %v2734_v58 = vld [vmem:[#allocation11 + $0xfa0] sm:$0xff]  ;;  %v17342_v56 = vcombine.low %v2494_v48, %v2502_v41  ;;  %v17598_v4 = vcombine.low %v2750_v42, %v2758_v46 }
 0x45c   :  { %9205 = vmatpush1.bf16.msra.mxu0 %v17678_v2  ;;  %9165 = vmatprep.subr.bf16.mxu1 %v17407_v8  ;;  %v2998_v53 = vld [vmem:[#allocation11 + $0x17e0] sm:$0xff]  ;;  %v17583_v2 = vcombine.high %v2734_v58, %v2742_v59  ;;  %v17582_v10 = vcombine.low %v2734_v58, %v2742_v59 }
 0x45d   :  { %9206 = vmatprep.subr.bf16.mxu0 %v17663_v52  ;;  %v17839_v8 = vcombine.high %v2990_v0, %v2998_v53  ;;  %v2718_v9 = vld [vmem:[#allocation11 + $0xf20] sm:$0xff]  ;;  %v17838_v12 = vcombine.low %v2990_v0, %v2998_v53 }
 0x45e   :  { %v2726_v52 = vld [vmem:[#allocation11 + $0xf60] sm:$0xff] }
 0x45f   :  { %9166 = vmatpush1.bf16.msra.mxu1 %v17406_v15  ;;  %v2974_v50 = vld [vmem:[#allocation11 + $0x1720] sm:$0xff]  ;;  %v17567_v15 = vcombine.high %v2718_v9, %v2726_v52  ;;  %v17566_v14 = vcombine.low %v2718_v9, %v2726_v52 }
 0x460   :  { %9207 = vmatpush1.bf16.msra.mxu0 %v17662_v18  ;;  %9167 = vmatprep.subr.bf16.mxu1 %v17391_v21  ;;  %v2982_v7 = vld [vmem:[#allocation11 + $0x1760] sm:$0xff] }
 0x461   :  { %9208 = vmatprep.subr.bf16.mxu0 %v17647_v27  ;;  %v17823_v18 = vcombine.high %v2974_v50, %v2982_v7  ;;  %v2702_v21 = vld [vmem:[#allocation11 + $0xea0] sm:$0xff]  ;;  %v17822_v61 = vcombine.low %v2974_v50, %v2982_v7 }
 0x462   :  { %v2710_v27 = vld [vmem:[#allocation11 + $0xee0] sm:$0xff] }
 0x463   :  { %9168 = vmatpush1.bf16.msra.mxu1 %v17390_v63  ;;  %v2958_v29 = vld [vmem:[#allocation11 + $0x16a0] sm:$0xff]  ;;  %v17551_v63 = vcombine.high %v2702_v21, %v2710_v27  ;;  %v17550_v43 = vcombine.low %v2702_v21, %v2710_v27 }
 0x464   :  { %9209 = vmatpush1.bf16.msra.mxu0 %v17646_v32  ;;  %9169 = vmatprep.subr.bf16.mxu1 %v17375_v33  ;;  %v2966_v11 = vld [vmem:[#allocation11 + $0x16e0] sm:$0xff] }
 0x465   :  { %9210 = vmatprep.subr.bf16.mxu0 %v17631_v34  ;;  %v17807_v32 = vcombine.high %v2958_v29, %v2966_v11  ;;  %v2686_v33 = vld [vmem:[#allocation11 + $0xe20] sm:$0xff]  ;;  %v17806_v39 = vcombine.low %v2958_v29, %v2966_v11 }
 0x466   :  { %v2694_v34 = vld [vmem:[#allocation11 + $0xe60] sm:$0xff] }
 0x467   :  { %9170 = vmatpush1.bf16.msra.mxu1 %v17374_v37  ;;  %v2942_v35 = vld [vmem:[#allocation11 + $0x1620] sm:$0xff]  ;;  %v17535_v37 = vcombine.high %v2686_v33, %v2694_v34  ;;  %v17534_v42 = vcombine.low %v2686_v33, %v2694_v34  ;;  %v2351_v33 = vld [vmem:[#allocation11 + $0x3a8] sm:$0xff] }
 0x468   :  { %9211 = vmatpush1.bf16.msra.mxu0 %v17630_v20  ;;  %9171 = vmatprep.subr.bf16.mxu1 %v17359_v30  ;;  %v2950_v36 = vld [vmem:[#allocation11 + $0x1660] sm:$0xff]  ;;  %v2359_v34 = vld [vmem:[#allocation11 + $0x3e8] sm:$0xff] }
 0x469   :  { %9212 = vmatprep.subr.bf16.mxu0 %v17615_v40  ;;  %v17791_v20 = vcombine.high %v2942_v35, %v2950_v36  ;;  %v2670_v30 = vld [vmem:[#allocation11 + $0xda0] sm:$0xff]  ;;  %v17790_v46 = vcombine.low %v2942_v35, %v2950_v36 }
 0x46a   :  { %v2678_v40 = vld [vmem:[#allocation11 + $0xde0] sm:$0xff] }
 0x46b   :  { %9172 = vmatpush1.bf16.msra.mxu1 %v17358_v51  ;;  %v2926_v48 = vld [vmem:[#allocation11 + $0x15a0] sm:$0xff]  ;;  %v17519_v51 = vcombine.high %v2670_v30, %v2678_v40  ;;  %v17518_v0 = vcombine.low %v2670_v30, %v2678_v40  ;;  %v2335_v40 = vld [vmem:[#allocation11 + $0x328] sm:$0xff] }
 0x46c   :  { %9213 = vmatpush1.bf16.msra.mxu0 %v17614_v60  ;;  %9173 = vmatprep.subr.bf16.mxu1 %v17343_v54  ;;  %v2934_v41 = vld [vmem:[#allocation11 + $0x15e0] sm:$0xff] }
 0x46d   :  { %9214 = vmatprep.subr.bf16.mxu0 %v17599_v57  ;;  %v17775_v60 = vcombine.high %v2926_v48, %v2934_v41  ;;  %v2654_v54 = vld [vmem:[#allocation11 + $0xd20] sm:$0xff]  ;;  %v17774_v53 = vcombine.low %v2926_v48, %v2934_v41  ;;  %v2343_v48 = vld [vmem:[#allocation11 + $0x368] sm:$0xff]  ;;  %v17200_v41 = vcombine.low %v2351_v33, %v2359_v34 }
 0x46e   :  { %v2662_v57 = vld [vmem:[#allocation11 + $0xd60] sm:$0xff] }
 0x46f   :  { %9174 = vmatpush1.bf16.msra.mxu1 %v17342_v56  ;;  %v2910_v58 = vld [vmem:[#allocation11 + $0x1520] sm:$0xff]  ;;  %v17503_v56 = vcombine.high %v2654_v54, %v2662_v57  ;;  %v17502_v50 = vcombine.low %v2654_v54, %v2662_v57  ;;  %v17185_v54 = vcombine.high %v2335_v40, %v2343_v48  ;;  %v2319_v57 = vld [vmem:[#allocation11 + $0x2a8] sm:$0xff] }
 0x470   :  { %9215 = vmatpush1.bf16.msra.mxu0 %v17598_v4  ;;  %9175 = vmatprep.subr.bf16.mxu1 %v17583_v2  ;;  %v2918_v59 = vld [vmem:[#allocation11 + $0x1560] sm:$0xff] }
 0x471   :  { %9216 = vmatprep.subr.bf16.mxu0 %v17839_v8  ;;  %v17759_v4 = vcombine.high %v2910_v58, %v2918_v59  ;;  %v2638_v2 = vld [vmem:[#allocation11 + $0xca0] sm:$0xff]  ;;  %v17758_v7 = vcombine.low %v2910_v58, %v2918_v59  ;;  %v2327_v58 = vld [vmem:[#allocation11 + $0x2e8] sm:$0xff] }
 0x472   :  { %v2646_v8 = vld [vmem:[#allocation11 + $0xce0] sm:$0xff] }
 0x473   :  { %9176 = vmatpush2.bf16.msra.mxu1 %v17582_v10  ;;  %v2894_v9 = vld [vmem:[#allocation11 + $0x14a0] sm:$0xff]  ;;  %v17487_v10 = vcombine.high %v2638_v2, %v2646_v8  ;;  %v17486_v29 = vcombine.low %v2638_v2, %v2646_v8 }
 0x474   :  { %9217 = vmatpush2.bf16.msra.mxu0 %v17838_v12  ;;  %9177 = vmatprep.subr.bf16.mxu1 %v17567_v15  ;;  %v2902_v52 = vld [vmem:[#allocation11 + $0x14e0] sm:$0xff] }
 0x475   :  { %9218 = vmatprep.subr.bf16.mxu0 %v17823_v18  ;;  %v17743_v12 = vcombine.high %v2894_v9, %v2902_v52  ;;  %v2622_v15 = vld [vmem:[#allocation11 + $0xc20] sm:$0xff]  ;;  %v17742_v11 = vcombine.low %v2894_v9, %v2902_v52 }
 0x476   :  { %v2630_v18 = vld [vmem:[#allocation11 + $0xc60] sm:$0xff] }
 0x477   :  { %9178 = vmatpush2.bf16.msra.mxu1 %v17566_v14  ;;  %v2878_v21 = vld [vmem:[#allocation11 + $0x1420] sm:$0xff]  ;;  %v17471_v14 = vcombine.high %v2622_v15, %v2630_v18  ;;  %v17470_v35 = vcombine.low %v2622_v15, %v2630_v18 }
 0x478   :  { %9219 = vmatpush2.bf16.msra.mxu0 %v17822_v61  ;;  %9179 = vmatprep.subr.bf16.mxu1 %v17551_v63  ;;  %v2886_v27 = vld [vmem:[#allocation11 + $0x1460] sm:$0xff] }
 0x479   :  { %9220 = vmatprep.subr.bf16.mxu0 %v17807_v32  ;;  %v17727_v61 = vcombine.high %v2878_v21, %v2886_v27  ;;  %v3118_v63 = vld [vmem:[#allocation11 + $0x1ba0] sm:$0xff]  ;;  %v17726_v36 = vcombine.low %v2878_v21, %v2886_v27  ;;  %v17168_v27 = vcombine.low %v2319_v57, %v2327_v58 }
 0x47a   :  { %v3126_v32 = vld [vmem:[#allocation11 + $0x1be0] sm:$0xff] }
 0x47b   :  { %9180 = vmatpush2.bf16.msra.mxu1 %v17550_v43  ;;  %v17967_v43 = vcombine.high %v3118_v63, %v3126_v32  ;;  %v17966_v30 = vcombine.low %v3118_v63, %v3126_v32  ;;  %v3070_v52 = vld [vmem:[#allocation11 + $0x1a20] sm:$0xff]  ;;  %v2287_v63 = vld [vmem:[#allocation11 + $0x1a8] sm:$0xff] }
 0x47c   :  { %9221 = vmatpush2.bf16.msra.mxu0 %v17806_v39  ;;  %9181 = vmatprep.subr.bf16.mxu1 %v17535_v37  ;;  %v17201_v39 = vcombine.high %v2351_v33, %v2359_v34  ;;  %v3102_v37 = vld [vmem:[#allocation11 + $0x1b20] sm:$0xff]  ;;  %v2295_v32 = vld [vmem:[#allocation11 + $0x1e8] sm:$0xff] }
 0x47d   :  { %9222 = vmatprep.subr.bf16.mxu0 %v17791_v20  ;;  %v3110_v20 = vld [vmem:[#allocation11 + $0x1b60] sm:$0xff] }
 0x47f   :  { %9182 = vmatpush2.bf16.msra.mxu1 %v17534_v42  ;;  %v17951_v42 = vcombine.high %v3102_v37, %v3110_v20 }
 0x480   :  { %9223 = vmatpush2.bf16.msra.mxu0 %v17790_v46  ;;  %9183 = vmatprep.subr.bf16.mxu1 %v17519_v51  ;;  %v3086_v46 = vld [vmem:[#allocation11 + $0x1aa0] sm:$0xff] }
 0x481   :  { %9224 = vmatprep.subr.bf16.mxu0 %v17775_v60  ;;  %v3094_v51 = vld [vmem:[#allocation11 + $0x1ae0] sm:$0xff] }
 0x482   :  { %v17935_v2 = vcombine.high %v3086_v46, %v3094_v51  ;;  %v17934_v18 = vcombine.low %v3086_v46, %v3094_v51  ;;  %v3030_v46 = vld [vmem:[#allocation11 + $0x18e0] sm:$0xff]  ;;  %v2255_v51 = vld [vmem:[#allocation11 + $0xa8] sm:$0xff] }
 0x483   :  { %9184 = vmatpush2.bf16.msra.mxu1 %v17518_v0 }
 0x484   :  { %9225 = vmatpush2.bf16.msra.mxu0 %v17774_v53  ;;  %9185 = vmatprep.subr.bf16.mxu1 %v17503_v56  ;;  %v17950_v53 = vcombine.low %v3102_v37, %v3110_v20  ;;  %v2271_v37 = vld [vmem:[#allocation11 + $0x128] sm:$0xff] }
 0x485   :  { %9226 = vmatprep.subr.bf16.mxu0 %v17759_v4  ;;  %v17184_v4 = vcombine.low %v2335_v40, %v2343_v48  ;;  %v2279_v20 = vld [vmem:[#allocation11 + $0x168] sm:$0xff]  ;;  %v17136_v40 = vcombine.low %v2287_v63, %v2295_v32 }
 0x487   :  { %9186 = vmatpush2.bf16.msra.mxu1 %v17502_v50  ;;  %v3078_v50 = vld [vmem:[#allocation11 + $0x1a60] sm:$0xff] }
 0x488   :  { %9227 = vmatpush2.bf16.msra.mxu0 %v17758_v7  ;;  %9187 = vmatprep.subr.bf16.mxu1 %v17487_v10  ;;  %v2303_v10 = vld [vmem:[#allocation11 + $0x228] sm:$0xff]  ;;  %v17918_v33 = vcombine.low %v3070_v52, %v3078_v50 }
 0x489   :  { %9228 = vmatprep.subr.bf16.mxu0 %v17743_v12  ;;  %v2311_v12 = vld [vmem:[#allocation11 + $0x268] sm:$0xff] }
 0x48a   :  { %v17152_v34 = vcombine.low %v2303_v10, %v2311_v12 }
 0x48b   :  { %9188 = vmatpush2.bf16.msra.mxu1 %v17486_v29  ;;  %v17919_v29 = vcombine.high %v3070_v52, %v3078_v50 }
 0x48c   :  { %9229 = vmatpush2.bf16.msra.mxu0 %v17742_v11  ;;  %9189 = vmatprep.subr.bf16.mxu1 %v17471_v14  ;;  %v17153_v11 = vcombine.high %v2303_v10, %v2311_v12  ;;  %v3054_v14 = vld [vmem:[#allocation11 + $0x19a0] sm:$0xff] }
 0x48d   :  { %9230 = vmatprep.subr.bf16.mxu0 %v17727_v61  ;;  %v3062_v61 = vld [vmem:[#allocation11 + $0x19e0] sm:$0xff] }
 0x48e   :  { %v3246_v12 = vld [vmem:[#allocation11 + $0x1fa0] sm:$0xff] }
 0x48f   :  { %9190 = vmatpush2.bf16.msra.mxu1 %v17470_v35  ;;  %v17903_v35 = vcombine.high %v3054_v14, %v3062_v61 }
 0x490   :  { %9231 = vmatpush2.bf16.msra.mxu0 %v17726_v36  ;;  %9241 = vmatprep.subr.bf16.mxu1 %v17967_v43  ;;  %v17137_v36 = vcombine.high %v2287_v63, %v2295_v32  ;;  %v3038_v43 = vld [vmem:[#allocation11 + $0x1920] sm:$0xff]  ;;  %v2463_v63 = vld [vmem:[#allocation11 + $0x728] sm:$0xff] }
 0x491   :  { %9282 = vmatprep.subr.bf16.mxu0 %v17201_v39  ;;  %v3046_v39 = vld [vmem:[#allocation11 + $0x1960] sm:$0xff]  ;;  %v2471_v32 = vld [vmem:[#allocation11 + $0x768] sm:$0xff] }
 0x492   :  { %v8947_v60 = vpop.f32.mrf.mxu1  ;;  %9192 = vmatmul.mubr.bf16.vlgmr.msra.gmra.mxu1 %v20887_v55  ;;  %v17887_v48 = vcombine.high %v3038_v43, %v3046_v39 }
 0x493   :  { %v21024_v59 = vadd.f32 %v8947_v60, %v21017_v45  ;;  %v21026_v0 = vpop.f32.mrf.mxu0  ;;  %9233 = vmatmul.mubr.bf16.vlgmr.msra.gmra.mxu0 %v20917_v19  ;;  %9242 = vmatpush1.bf16.msra.mxu1 %v17966_v30  ;;  %v17169_v45 = vcombine.high %v2319_v57, %v2327_v58  ;;  %v17902_v30 = vcombine.low %v3054_v14, %v3062_v61  ;;  %v2263_v60 = vld [vmem:[#allocation11 + $0xe8] sm:$0xff]  ;;  %v3230_v14 = vld [vmem:[#allocation11 + $0x1f20] sm:$0xff] }
 0x494   :  { %9273 = vmatprep.mubr.bf16.mxu1 %v20932_v5  ;;  %9283 = vmatpush1.bf16.msra.mxu0 %v17200_v41  ;;  %v8949_v56 = vpop.f32.mrf.mxu1  ;;  %v17121_v41 = vcombine.high %v2271_v37, %v2279_v20  ;;  %v17120_v57 = vcombine.low %v2271_v37, %v2279_v20  ;;  %v17104_v50 = vcombine.low %v2255_v51, %v2263_v60  ;;  %v3238_v61 = vld [vmem:[#allocation11 + $0x1f60] sm:$0xff]  ;;  %v2447_v37 = vld [vmem:[#allocation11 + $0x6a8] sm:$0xff] }
 0x495   :  { %9314 = vmatprep.mubr.bf16.mxu0 %v20863_v16  ;;  %v21032_v8 = vadd.f32 %v8949_v56, %v21020_v1  ;;  %v21034_v9 = vpop.f32.mrf.mxu0  ;;  %9243 = vmatprep.subr.bf16.mxu1 %v17951_v42  ;;  %v3022_v42 = vld [vmem:[#allocation11 + $0x18a0] sm:$0xff]  ;;  %v2455_v20 = vld [vmem:[#allocation11 + $0x6e8] sm:$0xff] }
 0x496   :  { %v8951_v7 = vpop.f32.mrf.mxu1  ;;  %9284 = vmatprep.subr.bf16.mxu0 %v17185_v54  ;;  %v17886_v54 = vcombine.low %v3038_v43, %v3046_v39  ;;  %v17871_v58 = vcombine.high %v3022_v42, %v3030_v46  ;;  %v3006_v56 = vld [vmem:[#allocation11 + $0x1820] sm:$0xff]  ;;  %v17870_v52 = vcombine.low %v3022_v42, %v3030_v46 }
 0x497   :  { %v8992_v15 = vpop.f32.mrf.mxu0  ;;  %9244 = vmatpush1.bf16.msra.mxu1 %v17950_v53  ;;  %v17105_v53 = vcombine.high %v2255_v51, %v2263_v60  ;;  %v3214_v43 = vld [vmem:[#allocation11 + $0x1ea0] sm:$0xff]  ;;  %v2431_v51 = vld [vmem:[#allocation11 + $0x628] sm:$0xff] }
 0x498   :  { %9285 = vmatpush1.bf16.msra.mxu0 %v17184_v4  ;;  %v8952_v21 = vpop.f32.mrf.mxu1  ;;  %9245 = vmatprep.subr.bf16.mxu1 %v17935_v2  ;;  %v3014_v4 = vld [vmem:[#allocation11 + $0x1860] sm:$0xff]  ;;  %v2239_v2 = vld [vmem:[#allocation11 + $0x28] sm:$0xff] }
 0x499   :  { %v8993_v1 = vpop.f32.mrf.mxu0  ;;  %9286 = vmatprep.subr.bf16.mxu0 %v17169_v45  ;;  %v2247_v45 = vld [vmem:[#allocation11 + $0x68] sm:$0xff]  ;;  %v17855_v7 = vcombine.high %v3006_v56, %v3014_v4  ;;  %v3254_v15 = vld [vmem:[#allocation11 + $0x1fe0] sm:$0xff] }
 0x49a   :  { %v17089_v10 = vcombine.high %v2239_v2, %v2247_v45  ;;  %v2487_v21 = vld [vmem:[#allocation11 + $0x7e8] sm:$0xff]  ;;  %v18095_v1 = vcombine.high %v3246_v12, %v3254_v15  ;;  %v3222_v39 = vld [vmem:[#allocation11 + $0x1ee0] sm:$0xff] }
 0x49b   :  { %9246 = vmatpush1.bf16.msra.mxu1 %v17934_v18  ;;  %v2479_v18 = vld [vmem:[#allocation11 + $0x7a8] sm:$0xff]  ;;  %v3198_v42 = vld [vmem:[#allocation11 + $0x1e20] sm:$0xff] }
 0x49c   :  { %9287 = vmatpush1.bf16.msra.mxu0 %v17168_v27  ;;  %9247 = vmatprep.subr.bf16.mxu1 %v17919_v29  ;;  %v17854_v27 = vcombine.low %v3006_v56, %v3014_v4  ;;  %v17088_v29 = vcombine.low %v2239_v2, %v2247_v45  ;;  %v3206_v46 = vld [vmem:[#allocation11 + $0x1e60] sm:$0xff]  ;;  %v2439_v60 = vld [vmem:[#allocation11 + $0x668] sm:$0xff] }
 0x49d   :  { %9288 = vmatprep.subr.bf16.mxu0 %v17153_v11  ;;  %v17329_v11 = vcombine.high %v2479_v18, %v2487_v21  ;;  %v3182_v56 = vld [vmem:[#allocation11 + $0x1da0] sm:$0xff]  ;;  %v2415_v2 = vld [vmem:[#allocation11 + $0x5a8] sm:$0xff] }
 0x49e   :  { %v3190_v4 = vld [vmem:[#allocation11 + $0x1de0] sm:$0xff]  ;;  %v2423_v45 = vld [vmem:[#allocation11 + $0x5e8] sm:$0xff] }
 0x49f   :  { %9248 = vmatpush1.bf16.msra.mxu1 %v17918_v33  ;;  %v18094_v33 = vcombine.low %v3246_v12, %v3254_v15  ;;  %v3166_v12 = vld [vmem:[#allocation11 + $0x1d20] sm:$0xff] }
 0x4a0   :  { %9289 = vmatpush1.bf16.msra.mxu0 %v17152_v34  ;;  %9249 = vmatprep.subr.bf16.mxu1 %v17903_v35  ;;  %v17328_v34 = vcombine.low %v2479_v18, %v2487_v21  ;;  %v18079_v35 = vcombine.high %v3230_v14, %v3238_v61  ;;  %v3174_v15 = vld [vmem:[#allocation11 + $0x1d60] sm:$0xff]  ;;  %v2399_v18 = vld [vmem:[#allocation11 + $0x528] sm:$0xff] }
 0x4a1   :  { %9290 = vmatprep.subr.bf16.mxu0 %v17137_v36  ;;  %v17313_v36 = vcombine.high %v2463_v63, %v2471_v32  ;;  %v2407_v21 = vld [vmem:[#allocation11 + $0x568] sm:$0xff] }
 0x4a3   :  { %9250 = vmatpush1.bf16.msra.mxu1 %v17902_v30  ;;  %v18078_v30 = vcombine.low %v3230_v14, %v3238_v61  ;;  %v3150_v14 = vld [vmem:[#allocation11 + $0x1ca0] sm:$0xff] }
 0x4a4   :  { %9291 = vmatpush1.bf16.msra.mxu0 %v17136_v40  ;;  %9251 = vmatprep.subr.bf16.mxu1 %v17887_v48  ;;  %v17312_v40 = vcombine.low %v2463_v63, %v2471_v32  ;;  %v18063_v48 = vcombine.high %v3214_v43, %v3222_v39  ;;  %v3158_v61 = vld [vmem:[#allocation11 + $0x1ce0] sm:$0xff]  ;;  %v2383_v63 = vld [vmem:[#allocation11 + $0x4a8] sm:$0xff] }
 0x4a5   :  { %9292 = vmatprep.subr.bf16.mxu0 %v17121_v41  ;;  %v17297_v41 = vcombine.high %v2447_v37, %v2455_v20  ;;  %v2391_v32 = vld [vmem:[#allocation11 + $0x4e8] sm:$0xff] }
 0x4a7   :  { %9252 = vmatpush1.bf16.msra.mxu1 %v17886_v54  ;;  %v18062_v54 = vcombine.low %v3214_v43, %v3222_v39  ;;  %v3134_v43 = vld [vmem:[#allocation11 + $0x1c20] sm:$0xff] }
 0x4a8   :  { %9293 = vmatpush1.bf16.msra.mxu0 %v17120_v57  ;;  %9253 = vmatprep.subr.bf16.mxu1 %v17871_v58  ;;  %v17296_v57 = vcombine.low %v2447_v37, %v2455_v20  ;;  %v18047_v58 = vcombine.high %v3198_v42, %v3206_v46  ;;  %v3142_v39 = vld [vmem:[#allocation11 + $0x1c60] sm:$0xff]  ;;  %v2367_v37 = vld [vmem:[#allocation11 + $0x428] sm:$0xff] }
 0x4a9   :  { %9294 = vmatprep.subr.bf16.mxu0 %v17105_v53  ;;  %v17281_v53 = vcombine.high %v2431_v51, %v2439_v60  ;;  %v2375_v20 = vld [vmem:[#allocation11 + $0x468] sm:$0xff] }
 0x4ab   :  { %9254 = vmatpush1.bf16.msra.mxu1 %v17870_v52  ;;  %v18046_v52 = vcombine.low %v3198_v42, %v3206_v46  ;;  %v2607_v42 = vld [vmem:[#allocation11 + $0xba8] sm:$0xff] }
 0x4ac   :  { %9295 = vmatpush1.bf16.msra.mxu0 %v17104_v50  ;;  %9255 = vmatprep.subr.bf16.mxu1 %v17855_v7  ;;  %v17280_v50 = vcombine.low %v2431_v51, %v2439_v60  ;;  %v18031_v7 = vcombine.high %v3182_v56, %v3190_v4  ;;  %v2615_v46 = vld [vmem:[#allocation11 + $0xbe8] sm:$0xff] }
 0x4ad   :  { %9296 = vmatprep.subr.bf16.mxu0 %v17089_v10  ;;  %v17265_v10 = vcombine.high %v2415_v2, %v2423_v45  ;;  %v2863_v51 = vld [vmem:[#allocation11 + $0x13a8] sm:$0xff] }
 0x4ae   :  { %v2871_v60 = vld [vmem:[#allocation11 + $0x13e8] sm:$0xff] }
 0x4af   :  { %9256 = vmatpush1.bf16.msra.mxu1 %v17854_v27  ;;  %v18030_v27 = vcombine.low %v3182_v56, %v3190_v4  ;;  %v17713_v4 = vcombine.high %v2863_v51, %v2871_v60 }
 0x4b0   :  { %9297 = vmatpush1.bf16.msra.mxu0 %v17088_v29  ;;  %9257 = vmatprep.subr.bf16.mxu1 %v18095_v1  ;;  %v17264_v29 = vcombine.low %v2415_v2, %v2423_v45  ;;  %v18015_v1 = vcombine.high %v3166_v12, %v3174_v15  ;;  %v2591_v2 = vld [vmem:[#allocation11 + $0xb28] sm:$0xff] }
 0x4b1   :  { %9298 = vmatprep.subr.bf16.mxu0 %v17329_v11  ;;  %v17249_v11 = vcombine.high %v2399_v18, %v2407_v21  ;;  %v2599_v45 = vld [vmem:[#allocation11 + $0xb68] sm:$0xff] }
 0x4b3   :  { %9258 = vmatpush2.bf16.msra.mxu1 %v18094_v33  ;;  %v18014_v33 = vcombine.low %v3166_v12, %v3174_v15  ;;  %v17712_v12 = vcombine.low %v2863_v51, %v2871_v60 }
 0x4b4   :  { %9299 = vmatpush2.bf16.msra.mxu0 %v17328_v34  ;;  %9259 = vmatprep.subr.bf16.mxu1 %v18079_v35  ;;  %v17248_v34 = vcombine.low %v2399_v18, %v2407_v21  ;;  %v17999_v35 = vcombine.high %v3150_v14, %v3158_v61  ;;  %v17441_v18 = vcombine.high %v2591_v2, %v2599_v45  ;;  %v2575_v21 = vld [vmem:[#allocation11 + $0xaa8] sm:$0xff] }
 0x4b5   :  { %9300 = vmatprep.subr.bf16.mxu0 %v17313_v36  ;;  %v17233_v36 = vcombine.high %v2383_v63, %v2391_v32 }
 0x4b7   :  { %9260 = vmatpush2.bf16.msra.mxu1 %v18078_v30  ;;  %v17998_v30 = vcombine.low %v3150_v14, %v3158_v61  ;;  %v2839_v14 = vld [vmem:[#allocation11 + $0x12e8] sm:$0xff] }
 0x4b8   :  { %9301 = vmatpush2.bf16.msra.mxu0 %v17312_v40  ;;  %9261 = vmatprep.subr.bf16.mxu1 %v18063_v48  ;;  %v17232_v40 = vcombine.low %v2383_v63, %v2391_v32  ;;  %v17983_v48 = vcombine.high %v3134_v43, %v3142_v39 }
 0x4b9   :  { %9302 = vmatprep.subr.bf16.mxu0 %v17297_v41  ;;  %v17217_v41 = vcombine.high %v2367_v37, %v2375_v20 }
 0x4bb   :  { %9262 = vmatpush2.bf16.msra.mxu1 %v18062_v54  ;;  %v17982_v54 = vcombine.low %v3134_v43, %v3142_v39 }
 0x4bc   :  { %9303 = vmatpush2.bf16.msra.mxu0 %v17296_v57  ;;  %9263 = vmatprep.subr.bf16.mxu1 %v18047_v58  ;;  %v17216_v57 = vcombine.low %v2367_v37, %v2375_v20  ;;  %v17457_v58 = vcombine.high %v2607_v42, %v2615_v46  ;;  %v2559_v37 = vld [vmem:[#allocation11 + $0xa28] sm:$0xff] }
 0x4bd   :  { %9304 = vmatprep.subr.bf16.mxu0 %v17281_v53  ;;  %v20501_v53 = vld [vmem:[#allocation13] sm:$0xff]  ;;  %v2567_v20 = vld [vmem:[#allocation11 + $0xa68] sm:$0xff] }
 0x4be   :  { %v3289_v56 = vrot.slane %v20501_v53, %v20923_v26 }
 0x4bf   :  { %9264 = vmatpush2.bf16.msra.mxu1 %v18046_v52  ;;  %v3293_v52 = vrot.slane %v20501_v53, %v20926_v28  ;;  %v2543_v53 = vld [vmem:[#allocation11 + $0x9a8] sm:$0xff] }
 0x4c0   :  { %9305 = vmatpush2.bf16.msra.mxu0 %v17280_v50  ;;  %9265 = vmatprep.subr.bf16.mxu1 %v18031_v7  ;;  %v17456_v50 = vcombine.low %v2607_v42, %v2615_v46  ;;  %v2847_v7 = vld [vmem:[#allocation11 + $0x1328] sm:$0xff]  ;;  %v8989_v15 = vadd.f32 %v21026_v0, %v3289_v56 }
 0x4c1   :  { %9306 = vmatprep.subr.bf16.mxu0 %v17265_v10  ;;  %v2855_v10 = vld [vmem:[#allocation11 + $0x1368] sm:$0xff]  ;;  %v8991_v61 = vadd.f32 %v21034_v9, %v3293_v52 }
 0x4c2   :  { %v2551_v56 = vld [vmem:[#allocation11 + $0x9e8] sm:$0xff] }
 0x4c3   :  { %9266 = vmatpush2.bf16.msra.mxu1 %v18030_v27  ;;  %v2583_v27 = vld [vmem:[#allocation11 + $0xae8] sm:$0xff] }
 0x4c4   :  { %9307 = vmatpush2.bf16.msra.mxu0 %v17264_v29  ;;  %9267 = vmatprep.subr.bf16.mxu1 %v18015_v1  ;;  %v17697_v1 = vcombine.high %v2847_v7, %v2855_v10  ;;  %v17424_v46 = vcombine.low %v2575_v21, %v2583_v27 }
 0x4c5   :  { %9308 = vmatprep.subr.bf16.mxu0 %v17249_v11  ;;  %v2831_v11 = vld [vmem:[#allocation11 + $0x12a8] sm:$0xff] }
 0x4c6   :  { %v17681_v9 = vcombine.high %v2831_v11, %v2839_v14  ;;  %v17680_v60 = vcombine.low %v2831_v11, %v2839_v14  ;;  %v2511_v11 = vld [vmem:[#allocation11 + $0x8a8] sm:$0xff] }
 0x4c7   :  { %9268 = vmatpush2.bf16.msra.mxu1 %v18014_v33  ;;  %v17440_v33 = vcombine.low %v2591_v2, %v2599_v45  ;;  %v2807_v2 = vld [vmem:[#allocation11 + $0x11e8] sm:$0xff]  ;;  %v17408_v45 = vcombine.low %v2559_v37, %v2567_v20 }
 0x4c8   :  { %9309 = vmatpush2.bf16.msra.mxu0 %v17248_v34  ;;  %9269 = vmatprep.subr.bf16.mxu1 %v17999_v35  ;;  %v17696_v34 = vcombine.low %v2847_v7, %v2855_v10  ;;  %v17425_v35 = vcombine.high %v2575_v21, %v2583_v27  ;;  %v2527_v10 = vld [vmem:[#allocation11 + $0x928] sm:$0xff]  ;;  %v17392_v21 = vcombine.low %v2543_v53, %v2551_v56 }
 0x4c9   :  { %9310 = vmatprep.subr.bf16.mxu0 %v17233_v36  ;;  %v2519_v14 = vld [vmem:[#allocation11 + $0x8e8] sm:$0xff] }
 0x4cb   :  { %9270 = vmatpush2.bf16.msra.mxu1 %v17998_v30 }
 0x4cc   :  { %9311 = vmatpush2.bf16.msra.mxu0 %v17232_v40  ;;  %9271 = vmatprep.subr.bf16.mxu1 %v17983_v48  ;;  %v2815_v40 = vld [vmem:[#allocation11 + $0x1228] sm:$0xff] }
 0x4cd   :  { %9312 = vmatprep.subr.bf16.mxu0 %v17217_v41  ;;  %v2823_v48 = vld [vmem:[#allocation11 + $0x1268] sm:$0xff] }
 0x4ce   :  { %v17664_v52 = vcombine.low %v2815_v40, %v2823_v48 }
 0x4cf   :  { %9272 = vmatpush2.bf16.msra.mxu1 %v17982_v54  ;;  %v17409_v54 = vcombine.high %v2559_v37, %v2567_v20  ;;  %v17360_v37 = vcombine.low %v2511_v11, %v2519_v14 }
 0x4d0   :  { %9313 = vmatpush2.bf16.msra.mxu0 %v17216_v57  ;;  %9323 = vmatprep.subr.bf16.mxu1 %v17457_v58  ;;  %v17665_v58 = vcombine.high %v2815_v40, %v2823_v48  ;;  %v2735_v48 = vld [vmem:[#allocation11 + $0xfa8] sm:$0xff] }
 0x4d1   :  { %9364 = vmatprep.subr.bf16.mxu0 %v17713_v4  ;;  %v2799_v4 = vld [vmem:[#allocation11 + $0x11a8] sm:$0xff] }
 0x4d2   :  { %v9029_v29 = vpop.f32.mrf.mxu1  ;;  %9274 = vmatmul.mubr.bf16.vlgmr.msra.gmra.mxu1 %v20934_v6  ;;  %v17649_v7 = vcombine.high %v2799_v4, %v2807_v2  ;;  %v17648_v27 = vcombine.low %v2799_v4, %v2807_v2  ;;  %v2975_v4 = vld [vmem:[#allocation11 + $0x1728] sm:$0xff] }
 0x4d3   :  { %v9030_v63 = vadd.f32 %v9029_v29, %v8989_v15  ;;  %v9070_v32 = vpop.f32.mrf.mxu0  ;;  %9315 = vmatmul.mubr.bf16.vlgmr.msra.gmra.mxu0 %v20878_v13  ;;  %9324 = vmatpush1.bf16.msra.mxu1 %v17456_v50  ;;  %v17393_v50 = vcombine.high %v2543_v53, %v2551_v56  ;;  %v2783_v15 = vld [vmem:[#allocation11 + $0x1128] sm:$0xff] }
 0x4d4   :  { %9355 = vmatprep.mubr.bf16.mxu1 %v20883_v47  ;;  %9365 = vmatpush1.bf16.msra.mxu0 %v17712_v12  ;;  %v9031_v0 = vpop.f32.mrf.mxu1  ;;  %v2535_v12 = vld [vmem:[#allocation11 + $0x968] sm:$0xff] }
 0x4d5   :  { %v21043_v36 = vadd.f32 %v9070_v32, %v9030_v63  ;;  %9396 = vmatprep.mubr.bf16.mxu0 %v20914_v17  ;;  %v9032_v43 = vadd.f32 %v9031_v0, %v8991_v61  ;;  %v9072_v39 = vpop.f32.mrf.mxu0  ;;  %9325 = vmatprep.subr.bf16.mxu1 %v17441_v18  ;;  %v2791_v18 = vld [vmem:[#allocation11 + $0x1168] sm:$0xff]  ;;  %v17377_v29 = vcombine.high %v2527_v10, %v2535_v12 }
 0x4d6   :  { %v9033_v30 = vpop.f32.mrf.mxu1  ;;  %9366 = vmatprep.subr.bf16.mxu0 %v17697_v1  ;;  %v17633_v1 = vcombine.high %v2783_v15, %v2791_v18  ;;  %v2767_v61 = vld [vmem:[#allocation11 + $0x10a8] sm:$0xff]  ;;  %v17376_v32 = vcombine.low %v2527_v10, %v2535_v12  ;;  %v17361_v0 = vcombine.high %v2511_v11, %v2519_v14 }
 0x4d7   :  { %v21046_v41 = vadd.f32 %v9072_v39, %v9032_v43  ;;  %v9074_v42 = vpop.f32.mrf.mxu0  ;;  %9326 = vmatpush1.bf16.msra.mxu1 %v17440_v33  ;;  %v2775_v63 = vld [vmem:[#allocation11 + $0x10e8] sm:$0xff]  ;;  %v17632_v33 = vcombine.low %v2783_v15, %v2791_v18 }
 0x4d8   :  { %9367 = vmatpush1.bf16.msra.mxu0 %v17696_v34  ;;  %v9034_v51 = vpop.f32.mrf.mxu1  ;;  %9327 = vmatprep.subr.bf16.mxu1 %v17425_v35  ;;  %v17617_v34 = vcombine.high %v2767_v61, %v2775_v63  ;;  %v2495_v35 = vld [vmem:[#allocation11 + $0x828] sm:$0xff]  ;;  %v17616_v20 = vcombine.low %v2767_v61, %v2775_v63 }
 0x4d9   :  { %v9075_v57 = vpop.f32.mrf.mxu0  ;;  %9368 = vmatprep.subr.bf16.mxu0 %v17681_v9  ;;  %v2503_v43 = vld [vmem:[#allocation11 + $0x868] sm:$0xff] }
 0x4da   :  { %v2751_v39 = vld [vmem:[#allocation11 + $0x1028] sm:$0xff]  ;;  %v17345_v30 = vcombine.high %v2495_v35, %v2503_v43 }
 0x4db   :  { %9328 = vmatpush1.bf16.msra.mxu1 %v17424_v46  ;;  %v2759_v9 = vld [vmem:[#allocation11 + $0x1068] sm:$0xff] }
 0x4dc   :  { %9369 = vmatpush1.bf16.msra.mxu0 %v17680_v60  ;;  %9329 = vmatprep.subr.bf16.mxu1 %v17409_v54  ;;  %v17601_v40 = vcombine.high %v2751_v39, %v2759_v9  ;;  %v2743_v42 = vld [vmem:[#allocation11 + $0xfe8] sm:$0xff]  ;;  %v17344_v60 = vcombine.low %v2495_v35, %v2503_v43  ;;  %v17600_v54 = vcombine.low %v2751_v39, %v2759_v9 }
 0x4dd   :  { %9370 = vmatprep.subr.bf16.mxu0 %v17665_v58  ;;  %v2991_v46 = vld [vmem:[#allocation11 + $0x17a8] sm:$0xff]  ;;  %v17585_v57 = vcombine.high %v2735_v48, %v2743_v42 }
 0x4de   :  { %v2999_v51 = vld [vmem:[#allocation11 + $0x17e8] sm:$0xff] }
 0x4df   :  { %9330 = vmatpush1.bf16.msra.mxu1 %v17408_v45  ;;  %v17841_v58 = vcombine.high %v2991_v46, %v2999_v51  ;;  %v2719_v53 = vld [vmem:[#allocation11 + $0xf28] sm:$0xff]  ;;  %v17584_v45 = vcombine.low %v2735_v48, %v2743_v42 }
 0x4e0   :  { %9371 = vmatpush1.bf16.msra.mxu0 %v17664_v52  ;;  %9331 = vmatprep.subr.bf16.mxu1 %v17393_v50  ;;  %v2727_v56 = vld [vmem:[#allocation11 + $0xf68] sm:$0xff]  ;;  %v17840_v52 = vcombine.low %v2991_v46, %v2999_v51 }
 0x4e1   :  { %9372 = vmatprep.subr.bf16.mxu0 %v17649_v7  ;;  %v2983_v2 = vld [vmem:[#allocation11 + $0x1768] sm:$0xff]  ;;  %v17569_v50 = vcombine.high %v2719_v53, %v2727_v56 }
 0x4e2   :  { %v17825_v7 = vcombine.high %v2975_v4, %v2983_v2  ;;  %v2703_v10 = vld [vmem:[#allocation11 + $0xea8] sm:$0xff] }
 0x4e3   :  { %9332 = vmatpush1.bf16.msra.mxu1 %v17392_v21  ;;  %v2711_v12 = vld [vmem:[#allocation11 + $0xee8] sm:$0xff]  ;;  %v17568_v21 = vcombine.low %v2719_v53, %v2727_v56 }
 0x4e4   :  { %9373 = vmatpush1.bf16.msra.mxu0 %v17648_v27  ;;  %9333 = vmatprep.subr.bf16.mxu1 %v17377_v29  ;;  %v2959_v15 = vld [vmem:[#allocation11 + $0x16a8] sm:$0xff]  ;;  %v17824_v27 = vcombine.low %v2975_v4, %v2983_v2  ;;  %v17553_v29 = vcombine.high %v2703_v10, %v2711_v12 }
 0x4e5   :  { %9374 = vmatprep.subr.bf16.mxu0 %v17633_v1  ;;  %v2967_v18 = vld [vmem:[#allocation11 + $0x16e8] sm:$0xff] }
 0x4e6   :  { %v17809_v1 = vcombine.high %v2959_v15, %v2967_v18  ;;  %v2687_v11 = vld [vmem:[#allocation11 + $0xe28] sm:$0xff] }
 0x4e7   :  { %9334 = vmatpush1.bf16.msra.mxu1 %v17376_v32  ;;  %v2695_v14 = vld [vmem:[#allocation11 + $0xe68] sm:$0xff]  ;;  %v17552_v32 = vcombine.low %v2703_v10, %v2711_v12 }
 0x4e8   :  { %9375 = vmatpush1.bf16.msra.mxu0 %v17632_v33  ;;  %9335 = vmatprep.subr.bf16.mxu1 %v17361_v0  ;;  %v2943_v61 = vld [vmem:[#allocation11 + $0x1628] sm:$0xff]  ;;  %v17808_v33 = vcombine.low %v2959_v15, %v2967_v18  ;;  %v17537_v0 = vcombine.high %v2687_v11, %v2695_v14 }
 0x4e9   :  { %9376 = vmatprep.subr.bf16.mxu0 %v17617_v34  ;;  %v2951_v63 = vld [vmem:[#allocation11 + $0x1668] sm:$0xff] }
 0x4ea   :  { %v17793_v34 = vcombine.high %v2943_v61, %v2951_v63  ;;  %v2671_v35 = vld [vmem:[#allocation11 + $0xda8] sm:$0xff] }
 0x4eb   :  { %9336 = vmatpush1.bf16.msra.mxu1 %v17360_v37  ;;  %v2679_v43 = vld [vmem:[#allocation11 + $0xde8] sm:$0xff]  ;;  %v17536_v37 = vcombine.low %v2687_v11, %v2695_v14 }
 0x4ec   :  { %9377 = vmatpush1.bf16.msra.mxu0 %v17616_v20  ;;  %9337 = vmatprep.subr.bf16.mxu1 %v17345_v30  ;;  %v2927_v39 = vld [vmem:[#allocation11 + $0x15a8] sm:$0xff]  ;;  %v17792_v20 = vcombine.low %v2943_v61, %v2951_v63  ;;  %v17521_v30 = vcombine.high %v2671_v35, %v2679_v43  ;;  %v2352_v61 = vld [vmem:[#allocation11 + $0x3b0] sm:$0xff] }
 0x4ed   :  { %9378 = vmatprep.subr.bf16.mxu0 %v17601_v40  ;;  %v2935_v9 = vld [vmem:[#allocation11 + $0x15e8] sm:$0xff]  ;;  %v2360_v63 = vld [vmem:[#allocation11 + $0x3f0] sm:$0xff] }
 0x4ee   :  { %v17777_v40 = vcombine.high %v2927_v39, %v2935_v9  ;;  %v2655_v48 = vld [vmem:[#allocation11 + $0xd28] sm:$0xff] }
 0x4ef   :  { %9338 = vmatpush1.bf16.msra.mxu1 %v17344_v60  ;;  %v2663_v42 = vld [vmem:[#allocation11 + $0xd68] sm:$0xff]  ;;  %v17520_v60 = vcombine.low %v2671_v35, %v2679_v43 }
 0x4f0   :  { %9379 = vmatpush1.bf16.msra.mxu0 %v17600_v54  ;;  %9339 = vmatprep.subr.bf16.mxu1 %v17585_v57  ;;  %v2911_v46 = vld [vmem:[#allocation11 + $0x1528] sm:$0xff]  ;;  %v17776_v54 = vcombine.low %v2927_v39, %v2935_v9  ;;  %v17505_v57 = vcombine.high %v2655_v48, %v2663_v42  ;;  %v2336_v9 = vld [vmem:[#allocation11 + $0x330] sm:$0xff] }
 0x4f1   :  { %9380 = vmatprep.subr.bf16.mxu0 %v17841_v58  ;;  %v2919_v51 = vld [vmem:[#allocation11 + $0x1568] sm:$0xff] }
 0x4f2   :  { %v17761_v58 = vcombine.high %v2911_v46, %v2919_v51  ;;  %v2639_v53 = vld [vmem:[#allocation11 + $0xca8] sm:$0xff] }
 0x4f3   :  { %9340 = vmatpush2.bf16.msra.mxu1 %v17584_v45  ;;  %v2647_v56 = vld [vmem:[#allocation11 + $0xce8] sm:$0xff]  ;;  %v17504_v45 = vcombine.low %v2655_v48, %v2663_v42 }
 0x4f4   :  { %9381 = vmatpush2.bf16.msra.mxu0 %v17840_v52  ;;  %9341 = vmatprep.subr.bf16.mxu1 %v17569_v50  ;;  %v2895_v4 = vld [vmem:[#allocation11 + $0x14a8] sm:$0xff]  ;;  %v17760_v52 = vcombine.low %v2911_v46, %v2919_v51  ;;  %v17489_v50 = vcombine.high %v2639_v53, %v2647_v56  ;;  %v2320_v51 = vld [vmem:[#allocation11 + $0x2b0] sm:$0xff] }
 0x4f5   :  { %9382 = vmatprep.subr.bf16.mxu0 %v17825_v7  ;;  %v2903_v2 = vld [vmem:[#allocation11 + $0x14e8] sm:$0xff] }
 0x4f6   :  { %v17745_v7 = vcombine.high %v2895_v4, %v2903_v2  ;;  %v2623_v10 = vld [vmem:[#allocation11 + $0xc28] sm:$0xff] }
 0x4f7   :  { %9342 = vmatpush2.bf16.msra.mxu1 %v17568_v21  ;;  %v2631_v12 = vld [vmem:[#allocation11 + $0xc68] sm:$0xff]  ;;  %v17488_v21 = vcombine.low %v2639_v53, %v2647_v56 }
 0x4f8   :  { %9383 = vmatpush2.bf16.msra.mxu0 %v17824_v27  ;;  %9343 = vmatprep.subr.bf16.mxu1 %v17553_v29  ;;  %v2879_v15 = vld [vmem:[#allocation11 + $0x1428] sm:$0xff]  ;;  %v17744_v27 = vcombine.low %v2895_v4, %v2903_v2  ;;  %v17473_v29 = vcombine.high %v2623_v10, %v2631_v12 }
 0x4f9   :  { %9384 = vmatprep.subr.bf16.mxu0 %v17809_v1  ;;  %v2887_v18 = vld [vmem:[#allocation11 + $0x1468] sm:$0xff] }
 0x4fa   :  { %v17729_v1 = vcombine.high %v2879_v15, %v2887_v18  ;;  %v3119_v11 = vld [vmem:[#allocation11 + $0x1ba8] sm:$0xff] }
 0x4fb   :  { %9344 = vmatpush2.bf16.msra.mxu1 %v17552_v32  ;;  %v3127_v14 = vld [vmem:[#allocation11 + $0x1be8] sm:$0xff]  ;;  %v17472_v32 = vcombine.low %v2623_v10, %v2631_v12  ;;  %v2304_v10 = vld [vmem:[#allocation11 + $0x230] sm:$0xff] }
 0x4fc   :  { %9385 = vmatpush2.bf16.msra.mxu0 %v17808_v33  ;;  %9345 = vmatprep.subr.bf16.mxu1 %v17537_v0  ;;  %v17728_v33 = vcombine.low %v2879_v15, %v2887_v18  ;;  %v17969_v0 = vcombine.high %v3119_v11, %v3127_v14  ;;  %v3103_v35 = vld [vmem:[#allocation11 + $0x1b28] sm:$0xff]  ;;  %v17968_v39 = vcombine.low %v3119_v11, %v3127_v14  ;;  %v2312_v12 = vld [vmem:[#allocation11 + $0x270] sm:$0xff] }
 0x4fd   :  { %9386 = vmatprep.subr.bf16.mxu0 %v17793_v34  ;;  %v17203_v34 = vcombine.high %v2352_v61, %v2360_v63  ;;  %v3111_v43 = vld [vmem:[#allocation11 + $0x1b68] sm:$0xff] }
 0x4fe   :  { %v3095_v48 = vld [vmem:[#allocation11 + $0x1ae8] sm:$0xff] }
 0x4ff   :  { %9346 = vmatpush2.bf16.msra.mxu1 %v17536_v37  ;;  %v2344_v37 = vld [vmem:[#allocation11 + $0x370] sm:$0xff]  ;;  %v3055_v11 = vld [vmem:[#allocation11 + $0x19a8] sm:$0xff] }
 0x500   :  { %9387 = vmatpush2.bf16.msra.mxu0 %v17792_v20  ;;  %9347 = vmatprep.subr.bf16.mxu1 %v17521_v30  ;;  %v17202_v20 = vcombine.low %v2352_v61, %v2360_v63  ;;  %v17953_v30 = vcombine.high %v3103_v35, %v3111_v43  ;;  %v17187_v46 = vcombine.high %v2336_v9, %v2344_v37  ;;  %v3063_v14 = vld [vmem:[#allocation11 + $0x19e8] sm:$0xff]  ;;  %v2288_v61 = vld [vmem:[#allocation11 + $0x1b0] sm:$0xff] }
 0x501   :  { %9388 = vmatprep.subr.bf16.mxu0 %v17777_v40  ;;  %v3087_v40 = vld [vmem:[#allocation11 + $0x1aa8] sm:$0xff]  ;;  %v17186_v56 = vcombine.low %v2336_v9, %v2344_v37  ;;  %v2296_v63 = vld [vmem:[#allocation11 + $0x1f0] sm:$0xff]  ;;  %v17904_v37 = vcombine.low %v3055_v11, %v3063_v14 }
 0x502   :  { %v17937_v4 = vcombine.high %v3087_v40, %v3095_v48  ;;  %v17936_v18 = vcombine.low %v3087_v40, %v3095_v48  ;;  %v2280_v9 = vld [vmem:[#allocation11 + $0x170] sm:$0xff]  ;;  %v3023_v48 = vld [vmem:[#allocation11 + $0x18a8] sm:$0xff] }
 0x503   :  { %9348 = vmatpush2.bf16.msra.mxu1 %v17520_v60  ;;  %v2328_v60 = vld [vmem:[#allocation11 + $0x2f0] sm:$0xff] }
 0x504   :  { %9389 = vmatpush2.bf16.msra.mxu0 %v17776_v54  ;;  %9349 = vmatprep.subr.bf16.mxu1 %v17505_v57 }
 0x505   :  { %9390 = vmatprep.subr.bf16.mxu0 %v17761_v58  ;;  %v17952_v58 = vcombine.low %v3103_v35, %v3111_v43  ;;  %v3039_v35 = vld [vmem:[#allocation11 + $0x1928] sm:$0xff] }
 0x506   :  { %v3047_v43 = vld [vmem:[#allocation11 + $0x1968] sm:$0xff] }
 0x507   :  { %9350 = vmatpush2.bf16.msra.mxu1 %v17504_v45 }
 0x508   :  { %9391 = vmatpush2.bf16.msra.mxu0 %v17760_v52  ;;  %9351 = vmatprep.subr.bf16.mxu1 %v17489_v50  ;;  %v3071_v52 = vld [vmem:[#allocation11 + $0x1a28] sm:$0xff] }
 0x509   :  { %9392 = vmatprep.subr.bf16.mxu0 %v17745_v7  ;;  %v3079_v50 = vld [vmem:[#allocation11 + $0x1a68] sm:$0xff] }
 0x50b   :  { %9352 = vmatpush2.bf16.msra.mxu1 %v17488_v21 }
 0x50c   :  { %9393 = vmatpush2.bf16.msra.mxu0 %v17744_v27  ;;  %9353 = vmatprep.subr.bf16.mxu1 %v17473_v29  ;;  %v17170_v27 = vcombine.low %v2320_v51, %v2328_v60  ;;  %v17921_v29 = vcombine.high %v3071_v52, %v3079_v50 }
 0x50d   :  { %9394 = vmatprep.subr.bf16.mxu0 %v17729_v1  ;;  %v17155_v1 = vcombine.high %v2304_v10, %v2312_v12 }
 0x50f   :  { %9354 = vmatpush2.bf16.msra.mxu1 %v17472_v32  ;;  %v17920_v32 = vcombine.low %v3071_v52, %v3079_v50  ;;  %v2240_v52 = vld [vmem:[#allocation11 + $0x30] sm:$0xff] }
 0x510   :  { %9395 = vmatpush2.bf16.msra.mxu0 %v17728_v33  ;;  %9405 = vmatprep.subr.bf16.mxu1 %v17969_v0  ;;  %v17154_v33 = vcombine.low %v2304_v10, %v2312_v12  ;;  %v17905_v0 = vcombine.high %v3055_v11, %v3063_v14  ;;  %v2248_v50 = vld [vmem:[#allocation11 + $0x70] sm:$0xff] }
 0x511   :  { %9446 = vmatprep.subr.bf16.mxu0 %v17203_v34  ;;  %v17139_v34 = vcombine.high %v2288_v61, %v2296_v63 }
 0x512   :  { %v9111_v42 = vpop.f32.mrf.mxu1  ;;  %9356 = vmatmul.mubr.bf16.vlgmr.msra.gmra.mxu1 %v20887_v55 }
 0x513   :  { %v21050_v54 = vadd.f32 %v9111_v42, %v21043_v36  ;;  %v21052_v57 = vpop.f32.mrf.mxu0  ;;  %9397 = vmatmul.mubr.bf16.vlgmr.msra.gmra.mxu0 %v20917_v19  ;;  %9406 = vmatpush1.bf16.msra.mxu1 %v17968_v39  ;;  %v17171_v36 = vcombine.high %v2320_v51, %v2328_v60  ;;  %v2272_v39 = vld [vmem:[#allocation11 + $0x130] sm:$0xff]  ;;  %v3031_v42 = vld [vmem:[#allocation11 + $0x18e8] sm:$0xff]  ;;  %v17888_v60 = vcombine.low %v3039_v35, %v3047_v43 }
 0x514   :  { %9437 = vmatprep.mubr.bf16.mxu1 %v20932_v5  ;;  %9447 = vmatpush1.bf16.msra.mxu0 %v17202_v20  ;;  %v9113_v53 = vpop.f32.mrf.mxu1  ;;  %v17138_v20 = vcombine.low %v2288_v61, %v2296_v63  ;;  %v17123_v40 = vcombine.high %v2272_v39, %v2280_v9  ;;  %v2264_v51 = vld [vmem:[#allocation11 + $0xf0] sm:$0xff]  ;;  %v3231_v61 = vld [vmem:[#allocation11 + $0x1f28] sm:$0xff] }
 0x515   :  { %9478 = vmatprep.mubr.bf16.mxu0 %v20863_v16  ;;  %v21058_v2 = vadd.f32 %v9113_v53, %v21046_v41  ;;  %v21060_v45 = vpop.f32.mrf.mxu0  ;;  %9407 = vmatprep.subr.bf16.mxu1 %v17953_v30  ;;  %v17889_v30 = vcombine.high %v3039_v35, %v3047_v43  ;;  %v17873_v53 = vcombine.high %v3023_v48, %v3031_v42  ;;  %v3239_v63 = vld [vmem:[#allocation11 + $0x1f68] sm:$0xff] }
 0x516   :  { %v9115_v7 = vpop.f32.mrf.mxu1  ;;  %9448 = vmatprep.subr.bf16.mxu0 %v17187_v46  ;;  %v2256_v46 = vld [vmem:[#allocation11 + $0xb0] sm:$0xff]  ;;  %v18081_v35 = vcombine.high %v3231_v61, %v3239_v63 }
 0x517   :  { %v9156_v15 = vpop.f32.mrf.mxu0  ;;  %9408 = vmatpush1.bf16.msra.mxu1 %v17952_v58  ;;  %v17122_v58 = vcombine.low %v2272_v39, %v2280_v9  ;;  %v17872_v7 = vcombine.low %v3023_v48, %v3031_v42  ;;  %v17106_v10 = vcombine.low %v2256_v46, %v2264_v51  ;;  %v3215_v39 = vld [vmem:[#allocation11 + $0x1ea8] sm:$0xff] }
 0x518   :  { %9449 = vmatpush1.bf16.msra.mxu0 %v17186_v56  ;;  %v9116_v21 = vpop.f32.mrf.mxu1  ;;  %9409 = vmatprep.subr.bf16.mxu1 %v17937_v4  ;;  %v17107_v56 = vcombine.high %v2256_v46, %v2264_v51  ;;  %v3007_v4 = vld [vmem:[#allocation11 + $0x1828] sm:$0xff]  ;;  %v17091_v15 = vcombine.high %v2240_v52, %v2248_v50 }
 0x519   :  { %v9157_v41 = vpop.f32.mrf.mxu0  ;;  %9450 = vmatprep.subr.bf16.mxu0 %v17171_v36  ;;  %v3015_v36 = vld [vmem:[#allocation11 + $0x1868] sm:$0xff] }
 0x51a   :  { %v17857_v12 = vcombine.high %v3007_v4, %v3015_v36  ;;  %v3255_v21 = vld [vmem:[#allocation11 + $0x1fe8] sm:$0xff]  ;;  %v17856_v41 = vcombine.low %v3007_v4, %v3015_v36 }
 0x51b   :  { %9410 = vmatpush1.bf16.msra.mxu1 %v17936_v18  ;;  %v3247_v18 = vld [vmem:[#allocation11 + $0x1fa8] sm:$0xff] }
 0x51c   :  { %9451 = vmatpush1.bf16.msra.mxu0 %v17170_v27  ;;  %9411 = vmatprep.subr.bf16.mxu1 %v17921_v29  ;;  %v2480_v27 = vld [vmem:[#allocation11 + $0x7b0] sm:$0xff]  ;;  %v18097_v11 = vcombine.high %v3247_v18, %v3255_v21  ;;  %v3223_v9 = vld [vmem:[#allocation11 + $0x1ee8] sm:$0xff] }
 0x51d   :  { %9452 = vmatprep.subr.bf16.mxu0 %v17155_v1  ;;  %v2488_v29 = vld [vmem:[#allocation11 + $0x7f0] sm:$0xff]  ;;  %v17090_v1 = vcombine.low %v2240_v52, %v2248_v50  ;;  %v18065_v48 = vcombine.high %v3215_v39, %v3223_v9  ;;  %v3199_v46 = vld [vmem:[#allocation11 + $0x1e28] sm:$0xff] }
 0x51e   :  { %v17331_v14 = vcombine.high %v2480_v27, %v2488_v29  ;;  %v3207_v51 = vld [vmem:[#allocation11 + $0x1e68] sm:$0xff] }
 0x51f   :  { %9412 = vmatpush1.bf16.msra.mxu1 %v17920_v32  ;;  %v2464_v32 = vld [vmem:[#allocation11 + $0x730] sm:$0xff]  ;;  %v18049_v4 = vcombine.high %v3199_v46, %v3207_v51  ;;  %v3183_v52 = vld [vmem:[#allocation11 + $0x1da8] sm:$0xff] }
 0x520   :  { %9453 = vmatpush1.bf16.msra.mxu0 %v17154_v33  ;;  %9413 = vmatprep.subr.bf16.mxu1 %v17905_v0  ;;  %v2472_v33 = vld [vmem:[#allocation11 + $0x770] sm:$0xff]  ;;  %v18096_v0 = vcombine.low %v3247_v18, %v3255_v21  ;;  %v3191_v50 = vld [vmem:[#allocation11 + $0x1de8] sm:$0xff] }
 0x521   :  { %9454 = vmatprep.subr.bf16.mxu0 %v17139_v34  ;;  %v17330_v34 = vcombine.low %v2480_v27, %v2488_v29  ;;  %v17315_v43 = vcombine.high %v2464_v32, %v2472_v33  ;;  %v18033_v18 = vcombine.high %v3183_v52, %v3191_v50  ;;  %v3167_v27 = vld [vmem:[#allocation11 + $0x1d28] sm:$0xff] }
 0x522   :  { %v3175_v29 = vld [vmem:[#allocation11 + $0x1d68] sm:$0xff] }
 0x523   :  { %9414 = vmatpush1.bf16.msra.mxu1 %v17904_v37  ;;  %v2448_v37 = vld [vmem:[#allocation11 + $0x6b0] sm:$0xff] }
 0x524   :  { %9455 = vmatpush1.bf16.msra.mxu0 %v17138_v20  ;;  %9415 = vmatprep.subr.bf16.mxu1 %v17889_v30  ;;  %v2456_v20 = vld [vmem:[#allocation11 + $0x6f0] sm:$0xff]  ;;  %v18080_v30 = vcombine.low %v3231_v61, %v3239_v63  ;;  %v18017_v61 = vcombine.high %v3167_v27, %v3175_v29 }
 0x525   :  { %9456 = vmatprep.subr.bf16.mxu0 %v17123_v40  ;;  %v17314_v40 = vcombine.low %v2464_v32, %v2472_v33  ;;  %v17299_v42 = vcombine.high %v2448_v37, %v2456_v20  ;;  %v3151_v32 = vld [vmem:[#allocation11 + $0x1ca8] sm:$0xff] }
 0x526   :  { %v3159_v33 = vld [vmem:[#allocation11 + $0x1ce8] sm:$0xff] }
 0x527   :  { %9416 = vmatpush1.bf16.msra.mxu1 %v17888_v60  ;;  %v2432_v60 = vld [vmem:[#allocation11 + $0x630] sm:$0xff] }
 0x528   :  { %9457 = vmatpush1.bf16.msra.mxu0 %v17122_v58  ;;  %9417 = vmatprep.subr.bf16.mxu1 %v17873_v53  ;;  %v2440_v58 = vld [vmem:[#allocation11 + $0x670] sm:$0xff]  ;;  %v18064_v53 = vcombine.low %v3215_v39, %v3223_v9  ;;  %v18001_v39 = vcombine.high %v3151_v32, %v3159_v33 }
 0x529   :  { %9458 = vmatprep.subr.bf16.mxu0 %v17107_v56  ;;  %v17298_v56 = vcombine.low %v2448_v37, %v2456_v20  ;;  %v17283_v36 = vcombine.high %v2432_v60, %v2440_v58  ;;  %v3135_v37 = vld [vmem:[#allocation11 + $0x1c28] sm:$0xff] }
 0x52a   :  { %v3143_v20 = vld [vmem:[#allocation11 + $0x1c68] sm:$0xff] }
 0x52b   :  { %9418 = vmatpush1.bf16.msra.mxu1 %v17872_v7  ;;  %v2416_v7 = vld [vmem:[#allocation11 + $0x5b0] sm:$0xff] }
 0x52c   :  { %9459 = vmatpush1.bf16.msra.mxu0 %v17106_v10  ;;  %9419 = vmatprep.subr.bf16.mxu1 %v17857_v12  ;;  %v2424_v10 = vld [vmem:[#allocation11 + $0x5f0] sm:$0xff]  ;;  %v18048_v12 = vcombine.low %v3199_v46, %v3207_v51  ;;  %v17985_v46 = vcombine.high %v3135_v37, %v3143_v20 }
 0x52d   :  { %9460 = vmatprep.subr.bf16.mxu0 %v17091_v15  ;;  %v17282_v15 = vcombine.low %v2432_v60, %v2440_v58  ;;  %v17267_v21 = vcombine.high %v2416_v7, %v2424_v10  ;;  %v2608_v60 = vld [vmem:[#allocation11 + $0xbb0] sm:$0xff] }
 0x52e   :  { %v2616_v58 = vld [vmem:[#allocation11 + $0xbf0] sm:$0xff] }
 0x52f   :  { %9420 = vmatpush1.bf16.msra.mxu1 %v17856_v41  ;;  %v2400_v41 = vld [vmem:[#allocation11 + $0x530] sm:$0xff] }
 0x530   :  { %9461 = vmatpush1.bf16.msra.mxu0 %v17090_v1  ;;  %9421 = vmatprep.subr.bf16.mxu1 %v18097_v11  ;;  %v2408_v1 = vld [vmem:[#allocation11 + $0x570] sm:$0xff]  ;;  %v18032_v11 = vcombine.low %v3183_v52, %v3191_v50  ;;  %v17459_v50 = vcombine.high %v2608_v60, %v2616_v58 }
 0x531   :  { %9462 = vmatprep.subr.bf16.mxu0 %v17331_v14  ;;  %v17266_v14 = vcombine.low %v2416_v7, %v2424_v10  ;;  %v17251_v63 = vcombine.high %v2400_v41, %v2408_v1 }
 0x533   :  { %9422 = vmatpush2.bf16.msra.mxu1 %v18096_v0  ;;  %v2384_v0 = vld [vmem:[#allocation11 + $0x4b0] sm:$0xff] }
 0x534   :  { %9463 = vmatpush2.bf16.msra.mxu0 %v17330_v34  ;;  %9423 = vmatprep.subr.bf16.mxu1 %v18081_v35  ;;  %v2392_v34 = vld [vmem:[#allocation11 + $0x4f0] sm:$0xff]  ;;  %v18016_v35 = vcombine.low %v3167_v27, %v3175_v29 }
 0x535   :  { %9464 = vmatprep.subr.bf16.mxu0 %v17315_v43  ;;  %v17250_v43 = vcombine.low %v2400_v41, %v2408_v1  ;;  %v17235_v9 = vcombine.high %v2384_v0, %v2392_v34  ;;  %v2848_v27 = vld [vmem:[#allocation11 + $0x1330] sm:$0xff] }
 0x536   :  { %v2856_v29 = vld [vmem:[#allocation11 + $0x1370] sm:$0xff] }
 0x537   :  { %9424 = vmatpush2.bf16.msra.mxu1 %v18080_v30  ;;  %v2368_v30 = vld [vmem:[#allocation11 + $0x430] sm:$0xff] }
 0x538   :  { %9465 = vmatpush2.bf16.msra.mxu0 %v17314_v40  ;;  %9425 = vmatprep.subr.bf16.mxu1 %v18065_v48  ;;  %v2376_v40 = vld [vmem:[#allocation11 + $0x470] sm:$0xff]  ;;  %v18000_v48 = vcombine.low %v3151_v32, %v3159_v33  ;;  %v17699_v32 = vcombine.high %v2848_v27, %v2856_v29 }
 0x539   :  { %9466 = vmatprep.subr.bf16.mxu0 %v17299_v42  ;;  %v17234_v42 = vcombine.low %v2384_v0, %v2392_v34  ;;  %v17219_v51 = vcombine.high %v2368_v30, %v2376_v40  ;;  %v17218_v52 = vcombine.low %v2368_v30, %v2376_v40  ;;  %v2832_v33 = vld [vmem:[#allocation11 + $0x12b0] sm:$0xff] }
 0x53a   :  { %v2840_v0 = vld [vmem:[#allocation11 + $0x12f0] sm:$0xff] }
 0x53b   :  { %9426 = vmatpush2.bf16.msra.mxu1 %v18064_v53  ;;  %v21062_v53 = vld [vmem:[#allocation13 + $0x8] sm:$0xff] }
 0x53c   :  { %9467 = vmatpush2.bf16.msra.mxu0 %v17298_v56  ;;  %9427 = vmatprep.subr.bf16.mxu1 %v18049_v4  ;;  %v2864_v56 = vld [vmem:[#allocation11 + $0x13b0] sm:$0xff]  ;;  %v3297_v7 = vrot.slane %v21062_v53, %v20816_v22 }
 0x53d   :  { %9468 = vmatprep.subr.bf16.mxu0 %v17283_v36  ;;  %v2872_v4 = vld [vmem:[#allocation11 + $0x13f0] sm:$0xff]  ;;  %v17984_v36 = vcombine.low %v3135_v37, %v3143_v20 }
 0x53e   :  { %v17715_v10 = vcombine.high %v2864_v56, %v2872_v4  ;;  %v17714_v41 = vcombine.low %v2864_v56, %v2872_v4  ;;  %v9153_v1 = vadd.f32 %v21052_v57, %v3297_v7 }
 0x53f   :  { %9428 = vmatpush2.bf16.msra.mxu1 %v18048_v12  ;;  %v2592_v12 = vld [vmem:[#allocation11 + $0xb30] sm:$0xff] }
 0x540   :  { %9469 = vmatpush2.bf16.msra.mxu0 %v17282_v15  ;;  %9429 = vmatprep.subr.bf16.mxu1 %v18033_v18  ;;  %v2600_v15 = vld [vmem:[#allocation11 + $0xb70] sm:$0xff]  ;;  %v3301_v18 = vrot.slane %v21062_v53, %v20822_v24 }
 0x541   :  { %9470 = vmatprep.subr.bf16.mxu0 %v17267_v21  ;;  %v17458_v21 = vcombine.low %v2608_v60, %v2616_v58  ;;  %v2824_v60 = vld [vmem:[#allocation11 + $0x1270] sm:$0xff] }
 0x542   :  { %v9155_v34 = vadd.f32 %v21060_v45, %v3301_v18  ;;  %v17683_v45 = vcombine.high %v2832_v33, %v2840_v0  ;;  %v2800_v18 = vld [vmem:[#allocation11 + $0x11b0] sm:$0xff] }
 0x543   :  { %9430 = vmatpush2.bf16.msra.mxu1 %v18032_v11  ;;  %v17443_v11 = vcombine.high %v2592_v12, %v2600_v15 }
 0x544   :  { %9471 = vmatpush2.bf16.msra.mxu0 %v17266_v14  ;;  %9431 = vmatprep.subr.bf16.mxu1 %v18017_v61  ;;  %v2576_v14 = vld [vmem:[#allocation11 + $0xab0] sm:$0xff] }
 0x545   :  { %9472 = vmatprep.subr.bf16.mxu0 %v17251_v63  ;;  %v2584_v61 = vld [vmem:[#allocation11 + $0xaf0] sm:$0xff] }
 0x546   :  { %v17427_v37 = vcombine.high %v2576_v14, %v2584_v61  ;;  %v17426_v4 = vcombine.low %v2576_v14, %v2584_v61  ;;  %v2536_v14 = vld [vmem:[#allocation11 + $0x970] sm:$0xff] }
 0x547   :  { %9432 = vmatpush2.bf16.msra.mxu1 %v18016_v35  ;;  %v2784_v61 = vld [vmem:[#allocation11 + $0x1130] sm:$0xff] }
 0x548   :  { %9473 = vmatpush2.bf16.msra.mxu0 %v17250_v43  ;;  %9433 = vmatprep.subr.bf16.mxu1 %v18001_v39  ;;  %v17442_v39 = vcombine.low %v2592_v12, %v2600_v15  ;;  %v2544_v12 = vld [vmem:[#allocation11 + $0x9b0] sm:$0xff] }
 0x549   :  { %9474 = vmatprep.subr.bf16.mxu0 %v17235_v9  ;;  %v17698_v9 = vcombine.low %v2848_v27, %v2856_v29  ;;  %v2552_v15 = vld [vmem:[#allocation11 + $0x9f0] sm:$0xff] }
 0x54b   :  { %9434 = vmatpush2.bf16.msra.mxu1 %v18000_v48  ;;  %v2560_v48 = vld [vmem:[#allocation11 + $0xa30] sm:$0xff] }
 0x54c   :  { %9475 = vmatpush2.bf16.msra.mxu0 %v17234_v42  ;;  %9435 = vmatprep.subr.bf16.mxu1 %v17985_v46  ;;  %v2568_v42 = vld [vmem:[#allocation11 + $0xa70] sm:$0xff] }
 0x54d   :  { %9476 = vmatprep.subr.bf16.mxu0 %v17219_v51  ;;  %v2816_v51 = vld [vmem:[#allocation11 + $0x1230] sm:$0xff]  ;;  %v17410_v27 = vcombine.low %v2560_v48, %v2568_v42 }
 0x54e   :  { %v17666_v29 = vcombine.low %v2816_v51, %v2824_v60 }
 0x54f   :  { %9436 = vmatpush2.bf16.msra.mxu1 %v17984_v36 }
 0x550   :  { %9477 = vmatpush2.bf16.msra.mxu0 %v17218_v52  ;;  %9487 = vmatprep.subr.bf16.mxu1 %v17459_v50  ;;  %v17682_v52 = vcombine.low %v2832_v33, %v2840_v0  ;;  %v17411_v50 = vcombine.high %v2560_v48, %v2568_v42  ;;  %v2504_v48 = vld [vmem:[#allocation11 + $0x870] sm:$0xff] }
 0x551   :  { %9528 = vmatprep.subr.bf16.mxu0 %v17715_v10  ;;  %v17667_v10 = vcombine.high %v2816_v51, %v2824_v60  ;;  %v2752_v42 = vld [vmem:[#allocation11 + $0x1030] sm:$0xff] }
 0x552   :  { %v9193_v63 = vpop.f32.mrf.mxu1  ;;  %9438 = vmatmul.mubr.bf16.vlgmr.msra.gmra.mxu1 %v20934_v6 }
 0x553   :  { %v9194_v35 = vadd.f32 %v9193_v63, %v9153_v1  ;;  %v9234_v43 = vpop.f32.mrf.mxu0  ;;  %9479 = vmatmul.mubr.bf16.vlgmr.msra.gmra.mxu0 %v20878_v13  ;;  %9488 = vmatpush1.bf16.msra.mxu1 %v17458_v21  ;;  %v2808_v21 = vld [vmem:[#allocation11 + $0x11f0] sm:$0xff] }
 0x554   :  { %9519 = vmatprep.mubr.bf16.mxu1 %v20883_v47  ;;  %9529 = vmatpush1.bf16.msra.mxu0 %v17714_v41  ;;  %v9195_v57 = vpop.f32.mrf.mxu1  ;;  %v17395_v41 = vcombine.high %v2544_v12, %v2552_v15  ;;  %v17651_v1 = vcombine.high %v2800_v18, %v2808_v21  ;;  %v2792_v63 = vld [vmem:[#allocation11 + $0x1170] sm:$0xff]  ;;  %v17650_v33 = vcombine.low %v2800_v18, %v2808_v21 }
 0x555   :  { %v21073_v20 = vadd.f32 %v9234_v43, %v9194_v35  ;;  %9560 = vmatprep.mubr.bf16.mxu0 %v20914_v17  ;;  %v9196_v30 = vadd.f32 %v9195_v57, %v9155_v34  ;;  %v9236_v40 = vpop.f32.mrf.mxu0  ;;  %9489 = vmatprep.subr.bf16.mxu1 %v17443_v11  ;;  %v2528_v11 = vld [vmem:[#allocation11 + $0x930] sm:$0xff]  ;;  %v17635_v34 = vcombine.high %v2784_v61, %v2792_v63 }
 0x556   :  { %v9197_v46 = vpop.f32.mrf.mxu1  ;;  %9530 = vmatprep.subr.bf16.mxu0 %v17699_v32  ;;  %v17394_v32 = vcombine.low %v2544_v12, %v2552_v15  ;;  %v17379_v0 = vcombine.high %v2528_v11, %v2536_v14  ;;  %v2512_v35 = vld [vmem:[#allocation11 + $0x8b0] sm:$0xff] }
 0x557   :  { %v21076_v58 = vadd.f32 %v9236_v40, %v9196_v30  ;;  %v9238_v56 = vpop.f32.mrf.mxu0  ;;  %9490 = vmatpush1.bf16.msra.mxu1 %v17442_v39  ;;  %v2520_v43 = vld [vmem:[#allocation11 + $0x8f0] sm:$0xff] }
 0x558   :  { %9531 = vmatpush1.bf16.msra.mxu0 %v17698_v9  ;;  %v9198_v36 = vpop.f32.mrf.mxu1  ;;  %9491 = vmatprep.subr.bf16.mxu1 %v17427_v37  ;;  %v2768_v39 = vld [vmem:[#allocation11 + $0x10b0] sm:$0xff]  ;;  %v17378_v9 = vcombine.low %v2528_v11, %v2536_v14  ;;  %v17634_v37 = vcombine.low %v2784_v61, %v2792_v63  ;;  %v17363_v30 = vcombine.high %v2512_v35, %v2520_v43 }
 0x559   :  { %v9239_v7 = vpop.f32.mrf.mxu0  ;;  %9532 = vmatprep.subr.bf16.mxu0 %v17683_v45  ;;  %v2776_v57 = vld [vmem:[#allocation11 + $0x10f0] sm:$0xff]  ;;  %v17362_v51 = vcombine.low %v2512_v35, %v2520_v43 }
 0x55a   :  { %v17619_v40 = vcombine.high %v2768_v39, %v2776_v57  ;;  %v2496_v45 = vld [vmem:[#allocation11 + $0x830] sm:$0xff]  ;;  %v17618_v60 = vcombine.low %v2768_v39, %v2776_v57 }
 0x55b   :  { %9492 = vmatpush1.bf16.msra.mxu1 %v17426_v4  ;;  %v2760_v46 = vld [vmem:[#allocation11 + $0x1070] sm:$0xff]  ;;  %v17347_v56 = vcombine.high %v2496_v45, %v2504_v48 }
 0x55c   :  { %9533 = vmatpush1.bf16.msra.mxu0 %v17682_v52  ;;  %9493 = vmatprep.subr.bf16.mxu1 %v17411_v50  ;;  %v17603_v4 = vcombine.high %v2752_v42, %v2760_v46  ;;  %v2736_v36 = vld [vmem:[#allocation11 + $0xfb0] sm:$0xff]  ;;  %v17602_v12 = vcombine.low %v2752_v42, %v2760_v46 }
 0x55d   :  { %9534 = vmatprep.subr.bf16.mxu0 %v17667_v10  ;;  %v2744_v52 = vld [vmem:[#allocation11 + $0xff0] sm:$0xff]  ;;  %v17346_v10 = vcombine.low %v2496_v45, %v2504_v48 }
 0x55e   :  { %v2992_v50 = vld [vmem:[#allocation11 + $0x17b0] sm:$0xff]  ;;  %v17587_v15 = vcombine.high %v2736_v36, %v2744_v52 }
 0x55f   :  { %9494 = vmatpush1.bf16.msra.mxu1 %v17410_v27  ;;  %v3000_v7 = vld [vmem:[#allocation11 + $0x17f0] sm:$0xff] }
 0x560   :  { %9535 = vmatpush1.bf16.msra.mxu0 %v17666_v29  ;;  %9495 = vmatprep.subr.bf16.mxu1 %v17395_v41  ;;  %v17843_v18 = vcombine.high %v2992_v50, %v3000_v7  ;;  %v2720_v21 = vld [vmem:[#allocation11 + $0xf30] sm:$0xff]  ;;  %v17842_v11 = vcombine.low %v2992_v50, %v3000_v7 }
 0x561   :  { %9536 = vmatprep.subr.bf16.mxu0 %v17651_v1  ;;  %v2728_v27 = vld [vmem:[#allocation11 + $0xf70] sm:$0xff]  ;;  %v17586_v1 = vcombine.low %v2736_v36, %v2744_v52 }
 0x562   :  { %v2976_v29 = vld [vmem:[#allocation11 + $0x1730] sm:$0xff]  ;;  %v17571_v14 = vcombine.high %v2720_v21, %v2728_v27 }
 0x563   :  { %9496 = vmatpush1.bf16.msra.mxu1 %v17394_v32  ;;  %v2984_v41 = vld [vmem:[#allocation11 + $0x1770] sm:$0xff] }
 0x564   :  { %9537 = vmatpush1.bf16.msra.mxu0 %v17650_v33  ;;  %9497 = vmatprep.subr.bf16.mxu1 %v17379_v0  ;;  %v17827_v61 = vcombine.high %v2976_v29, %v2984_v41  ;;  %v2704_v63 = vld [vmem:[#allocation11 + $0xeb0] sm:$0xff]  ;;  %v17826_v35 = vcombine.low %v2976_v29, %v2984_v41 }
 0x565   :  { %9538 = vmatprep.subr.bf16.mxu0 %v17635_v34  ;;  %v2712_v32 = vld [vmem:[#allocation11 + $0xef0] sm:$0xff]  ;;  %v17570_v34 = vcombine.low %v2720_v21, %v2728_v27 }
 0x566   :  { %v2960_v33 = vld [vmem:[#allocation11 + $0x16b0] sm:$0xff]  ;;  %v17555_v43 = vcombine.high %v2704_v63, %v2712_v32 }
 0x567   :  { %9498 = vmatpush1.bf16.msra.mxu1 %v17378_v9  ;;  %v2968_v0 = vld [vmem:[#allocation11 + $0x16f0] sm:$0xff] }
 0x568   :  { %9539 = vmatpush1.bf16.msra.mxu0 %v17634_v37  ;;  %9499 = vmatprep.subr.bf16.mxu1 %v17363_v30  ;;  %v17811_v39 = vcombine.high %v2960_v33, %v2968_v0  ;;  %v2688_v57 = vld [vmem:[#allocation11 + $0xe30] sm:$0xff]  ;;  %v17810_v45 = vcombine.low %v2960_v33, %v2968_v0 }
 0x569   :  { %9540 = vmatprep.subr.bf16.mxu0 %v17619_v40  ;;  %v2696_v9 = vld [vmem:[#allocation11 + $0xe70] sm:$0xff]  ;;  %v17554_v40 = vcombine.low %v2704_v63, %v2712_v32 }
 0x56a   :  { %v2944_v37 = vld [vmem:[#allocation11 + $0x1630] sm:$0xff]  ;;  %v17539_v48 = vcombine.high %v2688_v57, %v2696_v9 }
 0x56b   :  { %9500 = vmatpush1.bf16.msra.mxu1 %v17362_v51  ;;  %v2952_v30 = vld [vmem:[#allocation11 + $0x1670] sm:$0xff] }
 0x56c   :  { %9541 = vmatpush1.bf16.msra.mxu0 %v17618_v60  ;;  %9501 = vmatprep.subr.bf16.mxu1 %v17347_v56  ;;  %v17795_v42 = vcombine.high %v2944_v37, %v2952_v30  ;;  %v2672_v46 = vld [vmem:[#allocation11 + $0xdb0] sm:$0xff]  ;;  %v17794_v36 = vcombine.low %v2944_v37, %v2952_v30 }
 0x56d   :  { %9542 = vmatprep.subr.bf16.mxu0 %v17603_v4  ;;  %v2680_v51 = vld [vmem:[#allocation11 + $0xdf0] sm:$0xff]  ;;  %v17538_v4 = vcombine.low %v2688_v57, %v2696_v9 }
 0x56e   :  { %v2928_v60 = vld [vmem:[#allocation11 + $0x15b0] sm:$0xff]  ;;  %v17523_v52 = vcombine.high %v2672_v46, %v2680_v51 }
 0x56f   :  { %9502 = vmatpush1.bf16.msra.mxu1 %v17346_v10  ;;  %v2936_v56 = vld [vmem:[#allocation11 + $0x15f0] sm:$0xff] }
 0x570   :  { %9543 = vmatpush1.bf16.msra.mxu0 %v17602_v12  ;;  %9503 = vmatprep.subr.bf16.mxu1 %v17587_v15  ;;  %v17779_v50 = vcombine.high %v2928_v60, %v2936_v56  ;;  %v2656_v7 = vld [vmem:[#allocation11 + $0xd30] sm:$0xff]  ;;  %v17778_v21 = vcombine.low %v2928_v60, %v2936_v56 }
 0x571   :  { %9544 = vmatprep.subr.bf16.mxu0 %v17843_v18  ;;  %v2664_v10 = vld [vmem:[#allocation11 + $0xd70] sm:$0xff]  ;;  %v17522_v18 = vcombine.low %v2672_v46, %v2680_v51 }
 0x572   :  { %v2912_v12 = vld [vmem:[#allocation11 + $0x1530] sm:$0xff]  ;;  %v17507_v27 = vcombine.high %v2656_v7, %v2664_v10 }
 0x573   :  { %9504 = vmatpush2.bf16.msra.mxu1 %v17586_v1  ;;  %v2920_v15 = vld [vmem:[#allocation11 + $0x1570] sm:$0xff] }
 0x574   :  { %9545 = vmatpush2.bf16.msra.mxu0 %v17842_v11  ;;  %9505 = vmatprep.subr.bf16.mxu1 %v17571_v14  ;;  %v17763_v29 = vcombine.high %v2912_v12, %v2920_v15  ;;  %v2640_v41 = vld [vmem:[#allocation11 + $0xcb0] sm:$0xff]  ;;  %v17762_v63 = vcombine.low %v2912_v12, %v2920_v15 }
 0x575   :  { %9546 = vmatprep.subr.bf16.mxu0 %v17827_v61  ;;  %v2648_v1 = vld [vmem:[#allocation11 + $0xcf0] sm:$0xff]  ;;  %v17506_v61 = vcombine.low %v2656_v7, %v2664_v10 }
 0x576   :  { %v2896_v11 = vld [vmem:[#allocation11 + $0x14b0] sm:$0xff]  ;;  %v17491_v32 = vcombine.high %v2640_v41, %v2648_v1 }
 0x577   :  { %9506 = vmatpush2.bf16.msra.mxu1 %v17570_v34  ;;  %v2904_v14 = vld [vmem:[#allocation11 + $0x14f0] sm:$0xff] }
 0x578   :  { %9547 = vmatpush2.bf16.msra.mxu0 %v17826_v35  ;;  %9507 = vmatprep.subr.bf16.mxu1 %v17555_v43  ;;  %v17747_v33 = vcombine.high %v2896_v11, %v2904_v14  ;;  %v2624_v0 = vld [vmem:[#allocation11 + $0xc30] sm:$0xff]  ;;  %v17746_v57 = vcombine.low %v2896_v11, %v2904_v14 }
 0x579   :  { %9548 = vmatprep.subr.bf16.mxu0 %v17811_v39  ;;  %v2632_v34 = vld [vmem:[#allocation11 + $0xc70] sm:$0xff]  ;;  %v17490_v39 = vcombine.low %v2640_v41, %v2648_v1 }
 0x57a   :  { %v2880_v35 = vld [vmem:[#allocation11 + $0x1430] sm:$0xff]  ;;  %v17475_v9 = vcombine.high %v2624_v0, %v2632_v34 }
 0x57b   :  { %9508 = vmatpush2.bf16.msra.mxu1 %v17554_v40  ;;  %v2888_v43 = vld [vmem:[#allocation11 + $0x1470] sm:$0xff] }
 0x57c   :  { %9549 = vmatpush2.bf16.msra.mxu0 %v17810_v45  ;;  %9509 = vmatprep.subr.bf16.mxu1 %v17539_v48  ;;  %v17731_v37 = vcombine.high %v2880_v35, %v2888_v43  ;;  %v3120_v30 = vld [vmem:[#allocation11 + $0x1bb0] sm:$0xff]  ;;  %v2353_v45 = vld [vmem:[#allocation11 + $0x3b8] sm:$0xff]  ;;  %v17730_v46 = vcombine.low %v2880_v35, %v2888_v43 }
 0x57d   :  { %9550 = vmatprep.subr.bf16.mxu0 %v17795_v42  ;;  %v3128_v40 = vld [vmem:[#allocation11 + $0x1bf0] sm:$0xff]  ;;  %v2361_v48 = vld [vmem:[#allocation11 + $0x3f8] sm:$0xff]  ;;  %v17474_v42 = vcombine.low %v2624_v0, %v2632_v34 }
 0x57e   :  { %v17971_v51 = vcombine.high %v3120_v30, %v3128_v40  ;;  %v17205_v60 = vcombine.high %v2353_v45, %v2361_v48  ;;  %v3104_v56 = vld [vmem:[#allocation11 + $0x1b30] sm:$0xff]  ;;  %v17204_v7 = vcombine.low %v2353_v45, %v2361_v48  ;;  %v2305_v43 = vld [vmem:[#allocation11 + $0x238] sm:$0xff] }
 0x57f   :  { %9510 = vmatpush2.bf16.msra.mxu1 %v17538_v4  ;;  %v3112_v4 = vld [vmem:[#allocation11 + $0x1b70] sm:$0xff] }
 0x580   :  { %9551 = vmatpush2.bf16.msra.mxu0 %v17794_v36  ;;  %9511 = vmatprep.subr.bf16.mxu1 %v17523_v52  ;;  %v17970_v36 = vcombine.low %v3120_v30, %v3128_v40  ;;  %v2337_v52 = vld [vmem:[#allocation11 + $0x338] sm:$0xff]  ;;  %v17955_v10 = vcombine.high %v3104_v56, %v3112_v4  ;;  %v3088_v12 = vld [vmem:[#allocation11 + $0x1ab0] sm:$0xff]  ;;  %v17954_v11 = vcombine.low %v3104_v56, %v3112_v4 }
 0x581   :  { %9552 = vmatprep.subr.bf16.mxu0 %v17779_v50  ;;  %v2345_v50 = vld [vmem:[#allocation11 + $0x378] sm:$0xff]  ;;  %v3096_v15 = vld [vmem:[#allocation11 + $0x1af0] sm:$0xff] }
 0x582   :  { %v3072_v0 = vld [vmem:[#allocation11 + $0x1a30] sm:$0xff] }
 0x583   :  { %9512 = vmatpush2.bf16.msra.mxu1 %v17522_v18  ;;  %v3080_v34 = vld [vmem:[#allocation11 + $0x1a70] sm:$0xff] }
 0x584   :  { %9553 = vmatpush2.bf16.msra.mxu0 %v17778_v21  ;;  %9513 = vmatprep.subr.bf16.mxu1 %v17507_v27  ;;  %v17189_v21 = vcombine.high %v2337_v52, %v2345_v50  ;;  %v2321_v27 = vld [vmem:[#allocation11 + $0x2b8] sm:$0xff]  ;;  %v17923_v30 = vcombine.high %v3072_v0, %v3080_v34  ;;  %v3056_v45 = vld [vmem:[#allocation11 + $0x19b0] sm:$0xff] }
 0x585   :  { %9554 = vmatprep.subr.bf16.mxu0 %v17763_v29  ;;  %v2329_v29 = vld [vmem:[#allocation11 + $0x2f8] sm:$0xff]  ;;  %v3064_v48 = vld [vmem:[#allocation11 + $0x19f0] sm:$0xff] }
 0x586   :  { %v17907_v56 = vcombine.high %v3056_v45, %v3064_v48 }
 0x587   :  { %9514 = vmatpush2.bf16.msra.mxu1 %v17506_v61  ;;  %v17188_v61 = vcombine.low %v2337_v52, %v2345_v50  ;;  %v3048_v52 = vld [vmem:[#allocation11 + $0x1970] sm:$0xff]  ;;  %v2273_v50 = vld [vmem:[#allocation11 + $0x138] sm:$0xff] }
 0x588   :  { %9555 = vmatpush2.bf16.msra.mxu0 %v17762_v63  ;;  %9515 = vmatprep.subr.bf16.mxu1 %v17491_v32  ;;  %v17939_v63 = vcombine.high %v3088_v12, %v3096_v15 }
 0x589   :  { %9556 = vmatprep.subr.bf16.mxu0 %v17747_v33 }
 0x58b   :  { %9516 = vmatpush2.bf16.msra.mxu1 %v17490_v39  ;;  %v2313_v39 = vld [vmem:[#allocation11 + $0x278] sm:$0xff] }
 0x58c   :  { %9557 = vmatpush2.bf16.msra.mxu0 %v17746_v57  ;;  %9517 = vmatprep.subr.bf16.mxu1 %v17475_v9  ;;  %v17938_v9 = vcombine.low %v3088_v12, %v3096_v15  ;;  %v17157_v40 = vcombine.high %v2305_v43, %v2313_v39 }
 0x58d   :  { %9558 = vmatprep.subr.bf16.mxu0 %v17731_v37 }
 0x58f   :  { %9518 = vmatpush2.bf16.msra.mxu1 %v17474_v42  ;;  %v2289_v42 = vld [vmem:[#allocation11 + $0x1b8] sm:$0xff] }
 0x590   :  { %9559 = vmatpush2.bf16.msra.mxu0 %v17730_v46  ;;  %9569 = vmatprep.subr.bf16.mxu1 %v17971_v51  ;;  %v2297_v46 = vld [vmem:[#allocation11 + $0x1f8] sm:$0xff]  ;;  %v17922_v51 = vcombine.low %v3072_v0, %v3080_v34  ;;  %v3008_v0 = vld [vmem:[#allocation11 + $0x1830] sm:$0xff] }
 0x591   :  { %9610 = vmatprep.subr.bf16.mxu0 %v17205_v60  ;;  %v17156_v60 = vcombine.low %v2305_v43, %v2313_v39  ;;  %v17141_v4 = vcombine.high %v2289_v42, %v2297_v46  ;;  %v17140_v12 = vcombine.low %v2289_v42, %v2297_v46  ;;  %v3016_v34 = vld [vmem:[#allocation11 + $0x1870] sm:$0xff]  ;;  %v2249_v43 = vld [vmem:[#allocation11 + $0x78] sm:$0xff] }
 0x592   :  { %v9275_v18 = vpop.f32.mrf.mxu1  ;;  %9520 = vmatmul.mubr.bf16.vlgmr.msra.gmra.mxu1 %v20887_v55 }
 0x593   :  { %v21080_v41 = vadd.f32 %v9275_v18, %v21073_v20  ;;  %v21082_v1 = vpop.f32.mrf.mxu0  ;;  %9561 = vmatmul.mubr.bf16.vlgmr.msra.gmra.mxu0 %v20917_v19  ;;  %9570 = vmatpush1.bf16.msra.mxu1 %v17970_v36  ;;  %v17173_v20 = vcombine.high %v2321_v27, %v2329_v29  ;;  %v3040_v36 = vld [vmem:[#allocation11 + $0x1930] sm:$0xff] }
 0x594   :  { %9601 = vmatprep.mubr.bf16.mxu1 %v20932_v5  ;;  %9611 = vmatpush1.bf16.msra.mxu0 %v17204_v7  ;;  %v9277_v14 = vpop.f32.mrf.mxu1  ;;  %v2281_v7 = vld [vmem:[#allocation11 + $0x178] sm:$0xff]  ;;  %v17891_v15 = vcombine.high %v3040_v36, %v3048_v52 }
 0x595   :  { %9642 = vmatprep.mubr.bf16.mxu0 %v20863_v16  ;;  %v21088_v32 = vadd.f32 %v9277_v14, %v21076_v58  ;;  %v21090_v33 = vpop.f32.mrf.mxu0  ;;  %9571 = vmatprep.subr.bf16.mxu1 %v17955_v10  ;;  %v17172_v16 = vcombine.low %v2321_v27, %v2329_v29  ;;  %v17906_v10 = vcombine.low %v3056_v45, %v3064_v48  ;;  %v3032_v27 = vld [vmem:[#allocation11 + $0x18f0] sm:$0xff]  ;;  %v2257_v29 = vld [vmem:[#allocation11 + $0xb8] sm:$0xff] }
 0x596   :  { %v9279_v35 = vpop.f32.mrf.mxu1  ;;  %9612 = vmatprep.subr.bf16.mxu0 %v17189_v21  ;;  %v17125_v18 = vcombine.high %v2273_v50, %v2281_v7  ;;  %v3024_v21 = vld [vmem:[#allocation11 + $0x18b0] sm:$0xff]  ;;  %v17890_v14 = vcombine.low %v3040_v36, %v3048_v52  ;;  %v17858_v45 = vcombine.low %v3008_v0, %v3016_v34 }
 0x597   :  { %v9320_v57 = vpop.f32.mrf.mxu0  ;;  %9572 = vmatpush1.bf16.msra.mxu1 %v17954_v11  ;;  %v2265_v11 = vld [vmem:[#allocation11 + $0xf8] sm:$0xff]  ;;  %v17874_v39 = vcombine.low %v3024_v21, %v3032_v27 }
 0x598   :  { %9613 = vmatpush1.bf16.msra.mxu0 %v17188_v61  ;;  %v9280_v37 = vpop.f32.mrf.mxu1  ;;  %9573 = vmatprep.subr.bf16.mxu1 %v17939_v63  ;;  %v17124_v61 = vcombine.low %v2273_v50, %v2281_v7  ;;  %v17875_v63 = vcombine.high %v3024_v21, %v3032_v27  ;;  %v2241_v35 = vld [vmem:[#allocation11 + $0x38] sm:$0xff]  ;;  %v17108_v57 = vcombine.low %v2257_v29, %v2265_v11 }
 0x599   :  { %v9321_v58 = vpop.f32.mrf.mxu0  ;;  %9614 = vmatprep.subr.bf16.mxu0 %v17173_v20  ;;  %v17109_v20 = vcombine.high %v2257_v29, %v2265_v11  ;;  %v17093_v37 = vcombine.high %v2241_v35, %v2249_v43  ;;  %v17092_v48 = vcombine.low %v2241_v35, %v2249_v43 }
 0x59a   :  { %v2481_v58 = vld [vmem:[#allocation11 + $0x7b8] sm:$0xff] }
 0x59b   :  { %9574 = vmatpush1.bf16.msra.mxu1 %v17938_v9  ;;  %v17859_v9 = vcombine.high %v3008_v0, %v3016_v34 }
 0x59c   :  { %9615 = vmatpush1.bf16.msra.mxu0 %v17172_v16  ;;  %9575 = vmatprep.subr.bf16.mxu1 %v17923_v30  ;;  %v3248_v16 = vld [vmem:[#allocation11 + $0x1fb0] sm:$0xff] }
 0x59d   :  { %9616 = vmatprep.subr.bf16.mxu0 %v17157_v40  ;;  %v3256_v30 = vld [vmem:[#allocation11 + $0x1ff0] sm:$0xff]  ;;  %v2489_v40 = vld [vmem:[#allocation11 + $0x7f8] sm:$0xff] }
 0x59e   :  { %v18099_v42 = vcombine.high %v3248_v16, %v3256_v30  ;;  %v17333_v46 = vcombine.high %v2481_v58, %v2489_v40  ;;  %v18098_v36 = vcombine.low %v3248_v16, %v3256_v30  ;;  %v17332_v52 = vcombine.low %v2481_v58, %v2489_v40 }
 0x59f   :  { %9576 = vmatpush1.bf16.msra.mxu1 %v17922_v51  ;;  %v3232_v51 = vld [vmem:[#allocation11 + $0x1f30] sm:$0xff] }
 0x5a0   :  { %9617 = vmatpush1.bf16.msra.mxu0 %v17156_v60  ;;  %9577 = vmatprep.subr.bf16.mxu1 %v17907_v56  ;;  %v3240_v60 = vld [vmem:[#allocation11 + $0x1f70] sm:$0xff]  ;;  %v2465_v56 = vld [vmem:[#allocation11 + $0x738] sm:$0xff] }
 0x5a1   :  { %9618 = vmatprep.subr.bf16.mxu0 %v17141_v4  ;;  %v2473_v4 = vld [vmem:[#allocation11 + $0x778] sm:$0xff]  ;;  %v18083_v50 = vcombine.high %v3232_v51, %v3240_v60  ;;  %v18082_v21 = vcombine.low %v3232_v51, %v3240_v60 }
 0x5a2   :  { %v17317_v7 = vcombine.high %v2465_v56, %v2473_v4  ;;  %v17316_v27 = vcombine.low %v2465_v56, %v2473_v4 }
 0x5a3   :  { %9578 = vmatpush1.bf16.msra.mxu1 %v17906_v10  ;;  %v3216_v10 = vld [vmem:[#allocation11 + $0x1eb0] sm:$0xff] }
 0x5a4   :  { %9619 = vmatpush1.bf16.msra.mxu0 %v17140_v12  ;;  %9579 = vmatprep.subr.bf16.mxu1 %v17891_v15  ;;  %v3224_v12 = vld [vmem:[#allocation11 + $0x1ef0] sm:$0xff]  ;;  %v2449_v15 = vld [vmem:[#allocation11 + $0x6b8] sm:$0xff] }
 0x5a5   :  { %9620 = vmatprep.subr.bf16.mxu0 %v17125_v18  ;;  %v2457_v18 = vld [vmem:[#allocation11 + $0x6f8] sm:$0xff]  ;;  %v18067_v29 = vcombine.high %v3216_v10, %v3224_v12  ;;  %v18066_v0 = vcombine.low %v3216_v10, %v3224_v12 }
 0x5a6   :  { %v17301_v11 = vcombine.high %v2449_v15, %v2457_v18  ;;  %v17300_v34 = vcombine.low %v2449_v15, %v2457_v18 }
 0x5a7   :  { %9580 = vmatpush1.bf16.msra.mxu1 %v17890_v14  ;;  %v3200_v14 = vld [vmem:[#allocation11 + $0x1e30] sm:$0xff] }
 0x5a8   :  { %9621 = vmatpush1.bf16.msra.mxu0 %v17124_v61  ;;  %9581 = vmatprep.subr.bf16.mxu1 %v17875_v63  ;;  %v3208_v61 = vld [vmem:[#allocation11 + $0x1e70] sm:$0xff]  ;;  %v2433_v63 = vld [vmem:[#allocation11 + $0x638] sm:$0xff] }
 0x5a9   :  { %9622 = vmatprep.subr.bf16.mxu0 %v17109_v20  ;;  %v2441_v20 = vld [vmem:[#allocation11 + $0x678] sm:$0xff]  ;;  %v18051_v35 = vcombine.high %v3200_v14, %v3208_v61  ;;  %v18050_v16 = vcombine.low %v3200_v14, %v3208_v61 }
 0x5aa   :  { %v17285_v43 = vcombine.high %v2433_v63, %v2441_v20  ;;  %v17284_v30 = vcombine.low %v2433_v63, %v2441_v20 }
 0x5ab   :  { %9582 = vmatpush1.bf16.msra.mxu1 %v17874_v39  ;;  %v3184_v39 = vld [vmem:[#allocation11 + $0x1db0] sm:$0xff] }
 0x5ac   :  { %9623 = vmatpush1.bf16.msra.mxu0 %v17108_v57  ;;  %9583 = vmatprep.subr.bf16.mxu1 %v17859_v9  ;;  %v3192_v57 = vld [vmem:[#allocation11 + $0x1df0] sm:$0xff]  ;;  %v2417_v9 = vld [vmem:[#allocation11 + $0x5b8] sm:$0xff] }
 0x5ad   :  { %9624 = vmatprep.subr.bf16.mxu0 %v17093_v37  ;;  %v2425_v37 = vld [vmem:[#allocation11 + $0x5f8] sm:$0xff]  ;;  %v18035_v58 = vcombine.high %v3184_v39, %v3192_v57  ;;  %v18034_v51 = vcombine.low %v3184_v39, %v3192_v57 }
 0x5ae   :  { %v17269_v40 = vcombine.high %v2417_v9, %v2425_v37  ;;  %v17268_v60 = vcombine.low %v2417_v9, %v2425_v37  ;;  %v3305_v37 = vrot.slane %v21062_v53, %v20819_v23 }
 0x5af   :  { %9584 = vmatpush1.bf16.msra.mxu1 %v17858_v45  ;;  %v3168_v45 = vld [vmem:[#allocation11 + $0x1d30] sm:$0xff] }
 0x5b0   :  { %9625 = vmatpush1.bf16.msra.mxu0 %v17092_v48  ;;  %9585 = vmatprep.subr.bf16.mxu1 %v18099_v42  ;;  %v3176_v48 = vld [vmem:[#allocation11 + $0x1d70] sm:$0xff]  ;;  %v2401_v42 = vld [vmem:[#allocation11 + $0x538] sm:$0xff] }
 0x5b1   :  { %9626 = vmatprep.subr.bf16.mxu0 %v17333_v46  ;;  %v2409_v46 = vld [vmem:[#allocation11 + $0x578] sm:$0xff]  ;;  %v18019_v56 = vcombine.high %v3168_v45, %v3176_v48  ;;  %v18018_v10 = vcombine.low %v3168_v45, %v3176_v48 }
 0x5b2   :  { %v17253_v4 = vcombine.high %v2401_v42, %v2409_v46  ;;  %v17252_v12 = vcombine.low %v2401_v42, %v2409_v46  ;;  %v2849_v48 = vld [vmem:[#allocation11 + $0x1338] sm:$0xff] }
 0x5b3   :  { %9586 = vmatpush2.bf16.msra.mxu1 %v18098_v36  ;;  %v3152_v36 = vld [vmem:[#allocation11 + $0x1cb0] sm:$0xff]  ;;  %v2857_v42 = vld [vmem:[#allocation11 + $0x1378] sm:$0xff] }
 0x5b4   :  { %9627 = vmatpush2.bf16.msra.mxu0 %v17332_v52  ;;  %9587 = vmatprep.subr.bf16.mxu1 %v18083_v50  ;;  %v3160_v52 = vld [vmem:[#allocation11 + $0x1cf0] sm:$0xff]  ;;  %v2385_v50 = vld [vmem:[#allocation11 + $0x4b8] sm:$0xff] }
 0x5b5   :  { %9628 = vmatprep.subr.bf16.mxu0 %v17317_v7  ;;  %v2393_v7 = vld [vmem:[#allocation11 + $0x4f8] sm:$0xff]  ;;  %v18003_v15 = vcombine.high %v3152_v36, %v3160_v52  ;;  %v18002_v14 = vcombine.low %v3152_v36, %v3160_v52  ;;  %v17701_v52 = vcombine.high %v2849_v48, %v2857_v42 }
 0x5b6   :  { %v17237_v18 = vcombine.high %v2385_v50, %v2393_v7  ;;  %v17236_v61 = vcombine.low %v2385_v50, %v2393_v7  ;;  %v2833_v50 = vld [vmem:[#allocation11 + $0x12b8] sm:$0xff] }
 0x5b7   :  { %9588 = vmatpush2.bf16.msra.mxu1 %v18082_v21  ;;  %v3136_v21 = vld [vmem:[#allocation11 + $0x1c30] sm:$0xff]  ;;  %v2841_v7 = vld [vmem:[#allocation11 + $0x12f8] sm:$0xff] }
 0x5b8   :  { %9629 = vmatpush2.bf16.msra.mxu0 %v17316_v27  ;;  %9589 = vmatprep.subr.bf16.mxu1 %v18067_v29  ;;  %v3144_v27 = vld [vmem:[#allocation11 + $0x1c70] sm:$0xff]  ;;  %v2369_v29 = vld [vmem:[#allocation11 + $0x438] sm:$0xff] }
 0x5b9   :  { %9630 = vmatprep.subr.bf16.mxu0 %v17301_v11  ;;  %v2377_v11 = vld [vmem:[#allocation11 + $0x478] sm:$0xff]  ;;  %v17987_v63 = vcombine.high %v3136_v21, %v3144_v27  ;;  %v17986_v39 = vcombine.low %v3136_v21, %v3144_v27 }
 0x5ba   :  { %v17221_v20 = vcombine.high %v2369_v29, %v2377_v11  ;;  %v17220_v57 = vcombine.low %v2369_v29, %v2377_v11 }
 0x5bb   :  { %9590 = vmatpush2.bf16.msra.mxu1 %v18066_v0  ;;  %v2609_v0 = vld [vmem:[#allocation11 + $0xbb8] sm:$0xff] }
 0x5bc   :  { %9631 = vmatpush2.bf16.msra.mxu0 %v17300_v34  ;;  %9591 = vmatprep.subr.bf16.mxu1 %v18051_v35  ;;  %v2617_v34 = vld [vmem:[#allocation11 + $0xbf8] sm:$0xff] }
 0x5bd   :  { %9632 = vmatprep.subr.bf16.mxu0 %v17285_v43  ;;  %v2865_v35 = vld [vmem:[#allocation11 + $0x13b8] sm:$0xff]  ;;  %v17461_v9 = vcombine.high %v2609_v0, %v2617_v34  ;;  %v17460_v45 = vcombine.low %v2609_v0, %v2617_v34 }
 0x5be   :  { %v2873_v43 = vld [vmem:[#allocation11 + $0x13f8] sm:$0xff] }
 0x5bf   :  { %9592 = vmatpush2.bf16.msra.mxu1 %v18050_v16  ;;  %v17717_v16 = vcombine.high %v2865_v35, %v2873_v43  ;;  %v17716_v46 = vcombine.low %v2865_v35, %v2873_v43  ;;  %v17684_v43 = vcombine.low %v2833_v50, %v2841_v7 }
 0x5c0   :  { %9633 = vmatpush2.bf16.msra.mxu0 %v17284_v30  ;;  %9593 = vmatprep.subr.bf16.mxu1 %v18035_v58  ;;  %v2593_v30 = vld [vmem:[#allocation11 + $0xb38] sm:$0xff] }
 0x5c1   :  { %9634 = vmatprep.subr.bf16.mxu0 %v17269_v40  ;;  %v2601_v58 = vld [vmem:[#allocation11 + $0xb78] sm:$0xff]  ;;  %v3309_v40 = vrot.slane %v21062_v53, %v20825_v25 }
 0x5c3   :  { %9594 = vmatpush2.bf16.msra.mxu1 %v18034_v51  ;;  %v9317_v51 = vadd.f32 %v21082_v1, %v3305_v37  ;;  %v9319_v53 = vadd.f32 %v21090_v33, %v3309_v40  ;;  %v17685_v33 = vcombine.high %v2833_v50, %v2841_v7  ;;  %v2553_v37 = vld [vmem:[#allocation11 + $0x9f8] sm:$0xff] }
 0x5c4   :  { %9635 = vmatpush2.bf16.msra.mxu0 %v17268_v60  ;;  %9595 = vmatprep.subr.bf16.mxu1 %v18019_v56  ;;  %v17445_v60 = vcombine.high %v2593_v30, %v2601_v58  ;;  %v2577_v56 = vld [vmem:[#allocation11 + $0xab8] sm:$0xff] }
 0x5c5   :  { %9636 = vmatprep.subr.bf16.mxu0 %v17253_v4  ;;  %v2585_v4 = vld [vmem:[#allocation11 + $0xaf8] sm:$0xff] }
 0x5c6   :  { %v17429_v21 = vcombine.high %v2577_v56, %v2585_v4  ;;  %v17428_v34 = vcombine.low %v2577_v56, %v2585_v4  ;;  %v2513_v50 = vld [vmem:[#allocation11 + $0x8b8] sm:$0xff] }
 0x5c7   :  { %9596 = vmatpush2.bf16.msra.mxu1 %v18018_v10  ;;  %v2521_v7 = vld [vmem:[#allocation11 + $0x8f8] sm:$0xff] }
 0x5c8   :  { %9637 = vmatpush2.bf16.msra.mxu0 %v17252_v12  ;;  %9597 = vmatprep.subr.bf16.mxu1 %v18003_v15  ;;  %v17444_v15 = vcombine.low %v2593_v30, %v2601_v58  ;;  %v2809_v30 = vld [vmem:[#allocation11 + $0x11f8] sm:$0xff] }
 0x5c9   :  { %9638 = vmatprep.subr.bf16.mxu0 %v17237_v18  ;;  %v17700_v18 = vcombine.low %v2849_v48, %v2857_v42  ;;  %v2529_v42 = vld [vmem:[#allocation11 + $0x938] sm:$0xff] }
 0x5cb   :  { %9598 = vmatpush2.bf16.msra.mxu1 %v18002_v14  ;;  %v2561_v14 = vld [vmem:[#allocation11 + $0xa38] sm:$0xff] }
 0x5cc   :  { %9639 = vmatpush2.bf16.msra.mxu0 %v17236_v61  ;;  %9599 = vmatprep.subr.bf16.mxu1 %v17987_v63  ;;  %v2569_v61 = vld [vmem:[#allocation11 + $0xa78] sm:$0xff] }
 0x5cd   :  { %9640 = vmatprep.subr.bf16.mxu0 %v17221_v20  ;;  %v2825_v20 = vld [vmem:[#allocation11 + $0x1278] sm:$0xff]  ;;  %v17412_v58 = vcombine.low %v2561_v14, %v2569_v61 }
 0x5cf   :  { %9600 = vmatpush2.bf16.msra.mxu1 %v17986_v39 }
 0x5d0   :  { %9641 = vmatpush2.bf16.msra.mxu0 %v17220_v57  ;;  %9651 = vmatprep.subr.bf16.mxu1 %v17461_v9  ;;  %v2545_v9 = vld [vmem:[#allocation11 + $0x9b8] sm:$0xff] }
 0x5d1   :  { %9692 = vmatprep.subr.bf16.mxu0 %v17717_v16  ;;  %v2801_v16 = vld [vmem:[#allocation11 + $0x11b8] sm:$0xff]  ;;  %v17396_v56 = vcombine.low %v2545_v9, %v2553_v37 }
 0x5d2   :  { %v9357_v36 = vpop.f32.mrf.mxu1  ;;  %9602 = vmatmul.mubr.bf16.vlgmr.msra.gmra.mxu1 %v20934_v6  ;;  %v17653_v48 = vcombine.high %v2801_v16, %v2809_v30  ;;  %v17652_v4 = vcombine.low %v2801_v16, %v2809_v30  ;;  %v2977_v16 = vld [vmem:[#allocation11 + $0x1738] sm:$0xff] }
 0x5d3   :  { %v9358_v10 = vadd.f32 %v9357_v36, %v9317_v51  ;;  %v9398_v12 = vpop.f32.mrf.mxu0  ;;  %9643 = vmatmul.mubr.bf16.vlgmr.msra.gmra.mxu0 %v20878_v13  ;;  %9652 = vmatpush1.bf16.msra.mxu1 %v17460_v45  ;;  %v2817_v13 = vld [vmem:[#allocation11 + $0x1238] sm:$0xff]  ;;  %v17397_v45 = vcombine.high %v2545_v9, %v2553_v37 }
 0x5d4   :  { %9683 = vmatprep.mubr.bf16.mxu1 %v20883_v47  ;;  %9693 = vmatpush1.bf16.msra.mxu0 %v17716_v46  ;;  %v9359_v1 = vpop.f32.mrf.mxu1  ;;  %v17669_v57 = vcombine.high %v2817_v13, %v2825_v20  ;;  %v17668_v40 = vcombine.low %v2817_v13, %v2825_v20  ;;  %v2537_v46 = vld [vmem:[#allocation11 + $0x978] sm:$0xff] }
 0x5d5   :  { %v21101_v27 = vadd.f32 %v9398_v12, %v9358_v10  ;;  %9724 = vmatprep.mubr.bf16.mxu0 %v20914_v17  ;;  %v9360_v29 = vadd.f32 %v9359_v1, %v9319_v53  ;;  %v9400_v11 = vpop.f32.mrf.mxu0  ;;  %9653 = vmatprep.subr.bf16.mxu1 %v17445_v60  ;;  %v17413_v17 = vcombine.high %v2561_v14, %v2569_v61  ;;  %v2785_v51 = vld [vmem:[#allocation11 + $0x1138] sm:$0xff] }
 0x5d6   :  { %v9361_v63 = vpop.f32.mrf.mxu1  ;;  %9694 = vmatprep.subr.bf16.mxu0 %v17701_v52  ;;  %v2793_v60 = vld [vmem:[#allocation11 + $0x1178] sm:$0xff]  ;;  %v17381_v36 = vcombine.high %v2529_v42, %v2537_v46  ;;  %v17380_v12 = vcombine.low %v2529_v42, %v2537_v46  ;;  %v17365_v1 = vcombine.high %v2513_v50, %v2521_v7  ;;  %v17364_v14 = vcombine.low %v2513_v50, %v2521_v7 }
 0x5d7   :  { %v21104_v0 = vadd.f32 %v9400_v11, %v9360_v29  ;;  %v9402_v47 = vpop.f32.mrf.mxu0  ;;  %9654 = vmatpush1.bf16.msra.mxu1 %v17444_v15  ;;  %v17637_v52 = vcombine.high %v2785_v51, %v2793_v60  ;;  %v2769_v53 = vld [vmem:[#allocation11 + $0x10b8] sm:$0xff]  ;;  %v17636_v15 = vcombine.low %v2785_v51, %v2793_v60 }
 0x5d8   :  { %9695 = vmatpush1.bf16.msra.mxu0 %v17700_v18  ;;  %v9362_v35 = vpop.f32.mrf.mxu1  ;;  %9655 = vmatprep.subr.bf16.mxu1 %v17429_v21  ;;  %v2777_v10 = vld [vmem:[#allocation11 + $0x10f8] sm:$0xff] }
 0x5d9   :  { %v9403_v39 = vpop.f32.mrf.mxu0  ;;  %9696 = vmatprep.subr.bf16.mxu0 %v17685_v33  ;;  %v17621_v18 = vcombine.high %v2769_v53, %v2777_v10  ;;  %v2497_v21 = vld [vmem:[#allocation11 + $0x838] sm:$0xff]  ;;  %v17620_v61 = vcombine.low %v2769_v53, %v2777_v10 }
 0x5da   :  { %v2505_v29 = vld [vmem:[#allocation11 + $0x878] sm:$0xff] }
 0x5db   :  { %9656 = vmatpush1.bf16.msra.mxu1 %v17428_v34  ;;  %v2753_v11 = vld [vmem:[#allocation11 + $0x1038] sm:$0xff]  ;;  %v17349_v63 = vcombine.high %v2497_v21, %v2505_v29 }
 0x5dc   :  { %9697 = vmatpush1.bf16.msra.mxu0 %v17684_v43  ;;  %9657 = vmatprep.subr.bf16.mxu1 %v17413_v17  ;;  %v2761_v33 = vld [vmem:[#allocation11 + $0x1078] sm:$0xff]  ;;  %v17348_v43 = vcombine.low %v2497_v21, %v2505_v29 }
 0x5dd   :  { %9698 = vmatprep.subr.bf16.mxu0 %v17669_v57  ;;  %v17605_v13 = vcombine.high %v2753_v11, %v2761_v33  ;;  %v2737_v20 = vld [vmem:[#allocation11 + $0xfb8] sm:$0xff]  ;;  %v17604_v17 = vcombine.low %v2753_v11, %v2761_v33 }
 0x5de   :  { %v2745_v47 = vld [vmem:[#allocation11 + $0xff8] sm:$0xff] }
 0x5df   :  { %9658 = vmatpush1.bf16.msra.mxu1 %v17412_v58  ;;  %v2993_v34 = vld [vmem:[#allocation11 + $0x17b8] sm:$0xff]  ;;  %v17589_v39 = vcombine.high %v2737_v20, %v2745_v47  ;;  %v17588_v58 = vcombine.low %v2737_v20, %v2745_v47 }
 0x5e0   :  { %9699 = vmatpush1.bf16.msra.mxu0 %v17668_v40  ;;  %9659 = vmatprep.subr.bf16.mxu1 %v17397_v45  ;;  %v3001_v35 = vld [vmem:[#allocation11 + $0x17f8] sm:$0xff] }
 0x5e1   :  { %9700 = vmatprep.subr.bf16.mxu0 %v17653_v48  ;;  %v17845_v57 = vcombine.high %v2993_v34, %v3001_v35  ;;  %v2721_v9 = vld [vmem:[#allocation11 + $0xf38] sm:$0xff]  ;;  %v17844_v40 = vcombine.low %v2993_v34, %v3001_v35 }
 0x5e2   :  { %v2729_v37 = vld [vmem:[#allocation11 + $0xf78] sm:$0xff] }
 0x5e3   :  { %9660 = vmatpush1.bf16.msra.mxu1 %v17396_v56  ;;  %v2985_v30 = vld [vmem:[#allocation11 + $0x1778] sm:$0xff]  ;;  %v17573_v45 = vcombine.high %v2721_v9, %v2729_v37  ;;  %v17572_v56 = vcombine.low %v2721_v9, %v2729_v37 }
 0x5e4   :  { %9701 = vmatpush1.bf16.msra.mxu0 %v17652_v4  ;;  %9661 = vmatprep.subr.bf16.mxu1 %v17381_v36  ;;  %v17829_v48 = vcombine.high %v2977_v16, %v2985_v30  ;;  %v2705_v42 = vld [vmem:[#allocation11 + $0xeb8] sm:$0xff]  ;;  %v17828_v4 = vcombine.low %v2977_v16, %v2985_v30 }
 0x5e5   :  { %9702 = vmatprep.subr.bf16.mxu0 %v17637_v52  ;;  %v2713_v46 = vld [vmem:[#allocation11 + $0xef8] sm:$0xff] }
 0x5e6   :  { %v2961_v51 = vld [vmem:[#allocation11 + $0x16b8] sm:$0xff]  ;;  %v17557_v36 = vcombine.high %v2705_v42, %v2713_v46 }
 0x5e7   :  { %9662 = vmatpush1.bf16.msra.mxu1 %v17380_v12  ;;  %v2969_v60 = vld [vmem:[#allocation11 + $0x16f8] sm:$0xff]  ;;  %v17556_v12 = vcombine.low %v2705_v42, %v2713_v46 }
 0x5e8   :  { %9703 = vmatpush1.bf16.msra.mxu0 %v17636_v15  ;;  %9663 = vmatprep.subr.bf16.mxu1 %v17365_v1  ;;  %v17813_v52 = vcombine.high %v2961_v51, %v2969_v60  ;;  %v2689_v50 = vld [vmem:[#allocation11 + $0xe38] sm:$0xff]  ;;  %v17812_v15 = vcombine.low %v2961_v51, %v2969_v60 }
 0x5e9   :  { %9704 = vmatprep.subr.bf16.mxu0 %v17621_v18  ;;  %v2697_v7 = vld [vmem:[#allocation11 + $0xe78] sm:$0xff] }
 0x5ea   :  { %v2945_v53 = vld [vmem:[#allocation11 + $0x1638] sm:$0xff]  ;;  %v17541_v1 = vcombine.high %v2689_v50, %v2697_v7 }
 0x5eb   :  { %9664 = vmatpush1.bf16.msra.mxu1 %v17364_v14  ;;  %v2953_v10 = vld [vmem:[#allocation11 + $0x1678] sm:$0xff]  ;;  %v17540_v14 = vcombine.low %v2689_v50, %v2697_v7 }
 0x5ec   :  { %9705 = vmatpush1.bf16.msra.mxu0 %v17620_v61  ;;  %9665 = vmatprep.subr.bf16.mxu1 %v17349_v63  ;;  %v17797_v18 = vcombine.high %v2945_v53, %v2953_v10  ;;  %v2673_v21 = vld [vmem:[#allocation11 + $0xdb8] sm:$0xff]  ;;  %v17796_v61 = vcombine.low %v2945_v53, %v2953_v10 }
 0x5ed   :  { %9706 = vmatprep.subr.bf16.mxu0 %v17605_v13  ;;  %v2681_v29 = vld [vmem:[#allocation11 + $0xdf8] sm:$0xff] }
 0x5ee   :  { %v2929_v11 = vld [vmem:[#allocation11 + $0x15b8] sm:$0xff]  ;;  %v17525_v63 = vcombine.high %v2673_v21, %v2681_v29 }
 0x5ef   :  { %9666 = vmatpush1.bf16.msra.mxu1 %v17348_v43  ;;  %v2937_v33 = vld [vmem:[#allocation11 + $0x15f8] sm:$0xff]  ;;  %v17524_v43 = vcombine.low %v2673_v21, %v2681_v29  ;;  %v9775_v21 = vmax.f32 %v20976_v3, 0.0 }
 0x5f0   :  { %9707 = vmatpush1.bf16.msra.mxu0 %v17604_v17  ;;  %9667 = vmatprep.subr.bf16.mxu1 %v17589_v39  ;;  %v17781_v13 = vcombine.high %v2929_v11, %v2937_v33  ;;  %v2657_v20 = vld [vmem:[#allocation11 + $0xd38] sm:$0xff]  ;;  %v17780_v17 = vcombine.low %v2929_v11, %v2937_v33 }
 0x5f1   :  { %9708 = vmatprep.subr.bf16.mxu0 %v17845_v57  ;;  %v2665_v47 = vld [vmem:[#allocation11 + $0xd78] sm:$0xff] }
 0x5f2   :  { %v2913_v34 = vld [vmem:[#allocation11 + $0x1538] sm:$0xff]  ;;  %v17509_v39 = vcombine.high %v2657_v20, %v2665_v47 }
 0x5f3   :  { %9668 = vmatpush2.bf16.msra.mxu1 %v17588_v58  ;;  %v2921_v35 = vld [vmem:[#allocation11 + $0x1578] sm:$0xff]  ;;  %v17508_v58 = vcombine.low %v2657_v20, %v2665_v47  ;;  %v21108_v20 = vpack.c.bf16 %v9775_v21, %v9775_v21 }
 0x5f4   :  { %9709 = vmatpush2.bf16.msra.mxu0 %v17844_v40  ;;  %9669 = vmatprep.subr.bf16.mxu1 %v17573_v45  ;;  %v17765_v57 = vcombine.high %v2913_v34, %v2921_v35  ;;  %v2641_v9 = vld [vmem:[#allocation11 + $0xcb8] sm:$0xff]  ;;  %v17764_v40 = vcombine.low %v2913_v34, %v2921_v35 }
 0x5f5   :  { %9710 = vmatprep.subr.bf16.mxu0 %v17829_v48  ;;  %v2649_v37 = vld [vmem:[#allocation11 + $0xcf8] sm:$0xff] }
 0x5f6   :  { %v2897_v16 = vld [vmem:[#allocation11 + $0x14b8] sm:$0xff]  ;;  %v17493_v45 = vcombine.high %v2641_v9, %v2649_v37 }
 0x5f7   :  { %9670 = vmatpush2.bf16.msra.mxu1 %v17572_v56  ;;  %v2905_v30 = vld [vmem:[#allocation11 + $0x14f8] sm:$0xff]  ;;  %v17492_v56 = vcombine.low %v2641_v9, %v2649_v37 }
 0x5f8   :  { %9711 = vmatpush2.bf16.msra.mxu0 %v17828_v4  ;;  %9671 = vmatprep.subr.bf16.mxu1 %v17557_v36  ;;  %v17749_v48 = vcombine.high %v2897_v16, %v2905_v30  ;;  %v2625_v42 = vld [vmem:[#allocation11 + $0xc38] sm:$0xff]  ;;  %v17748_v4 = vcombine.low %v2897_v16, %v2905_v30  ;;  %v19211_v30 = vld [vmem:[#allocation14 + $0x118] ss:$28 sps:$4 sm:$0xff]  }
 0x5f9   :  { %9712 = vmatprep.subr.bf16.mxu0 %v17813_v52  ;;  %v2633_v46 = vld [vmem:[#allocation11 + $0xc78] sm:$0xff] }
 0x5fa   :  { %v2881_v51 = vld [vmem:[#allocation11 + $0x1438] sm:$0xff]  ;;  %v17477_v36 = vcombine.high %v2625_v42, %v2633_v46  ;;  %v17476_v53 = vcombine.low %v2625_v42, %v2633_v46  ;;  %v19214_v46 = vld [vmem:[#allocation14 + $0xe0] ss:$28 sps:$4 sm:$0xff]  }
 0x5fb   :  { %9672 = vmatpush2.bf16.msra.mxu1 %v17556_v12  ;;  %v2889_v60 = vld [vmem:[#allocation11 + $0x1478] sm:$0xff] }
 0x5fc   :  { %9713 = vmatpush2.bf16.msra.mxu0 %v17812_v15  ;;  %9673 = vmatprep.subr.bf16.mxu1 %v17541_v1  ;;  %v17733_v52 = vcombine.high %v2881_v51, %v2889_v60  ;;  %v3121_v50 = vld [vmem:[#allocation11 + $0x1bb8] sm:$0xff]  ;;  %v17732_v10 = vcombine.low %v2881_v51, %v2889_v60 }
 0x5fd   :  { %9714 = vmatprep.subr.bf16.mxu0 %v17797_v18  ;;  %v3129_v7 = vld [vmem:[#allocation11 + $0x1bf8] sm:$0xff] }
 0x5fe   :  { %v17973_v12 = vcombine.high %v3121_v50, %v3129_v7  ;;  %v19207_v15 = vld [vmem:[#allocation14 + $0x18c] ss:$28 sps:$4 sm:$0xff]   ;;  %v17972_v29 = vcombine.low %v3121_v50, %v3129_v7  ;;  %v19222_v7 = vld [vmem:[#allocation14 + $0x74] ss:$28 sps:$4 sm:$0xff]  }
 0x5ff   :  { %9674 = vmatpush2.bf16.msra.mxu1 %v17540_v14  ;;  %v3105_v1 = vld [vmem:[#allocation11 + $0x1b38] sm:$0xff] }
 0x600   :  { %9715 = vmatpush2.bf16.msra.mxu0 %v17796_v61  ;;  %9675 = vmatprep.subr.bf16.mxu1 %v17525_v63  ;;  %v3113_v18 = vld [vmem:[#allocation11 + $0x1b78] sm:$0xff] }
 0x601   :  { %9716 = vmatprep.subr.bf16.mxu0 %v17781_v13  ;;  %v19205_v11 = vld [vmem:[#allocation14 + $0x188] ss:$28 sps:$4 sm:$0xff]   ;;  %v17957_v33 = vcombine.high %v3105_v1, %v3113_v18  ;;  %v19210_v13 = vld [vmem:[#allocation14 + $0x154] ss:$28 sps:$4 sm:$0xff]   ;;  %v17956_v3 = vcombine.low %v3105_v1, %v3113_v18  ;;  %v19225_v18 = vld [vmem:[#allocation14 + $0x3c] ss:$28 sps:$4 sm:$0xff]  }
 0x602   :  { %v3089_v14 = vld [vmem:[#allocation11 + $0x1ab8] sm:$0xff] }
 0x603   :  { %9676 = vmatpush2.bf16.msra.mxu1 %v17524_v43  ;;  %v3097_v61 = vld [vmem:[#allocation11 + $0x1af8] sm:$0xff] }
 0x604   :  { %9717 = vmatpush2.bf16.msra.mxu0 %v17780_v17  ;;  %9677 = vmatprep.subr.bf16.mxu1 %v17509_v39  ;;  %v19208_v43 = vld [vmem:[#allocation14 + $0x150] ss:$28 sps:$4 sm:$0xff]   ;;  %v17941_v17 = vcombine.high %v3089_v14, %v3097_v61 }
 0x605   :  { %9718 = vmatprep.subr.bf16.mxu0 %v17765_v57  ;;  %v3073_v57 = vld [vmem:[#allocation11 + $0x1a38] sm:$0xff] }
 0x606   :  { %v3081_v9 = vld [vmem:[#allocation11 + $0x1a78] sm:$0xff] }
 0x607   :  { %9678 = vmatpush2.bf16.msra.mxu1 %v17508_v58  ;;  %v17925_v58 = vcombine.high %v3073_v57, %v3081_v9  ;;  %v17924_v42 = vcombine.low %v3073_v57, %v3081_v9  ;;  %v19219_v60 = vld [vmem:[#allocation14 + $0xac] ss:$28 sps:$4 sm:$0xff]  }
 0x608   :  { %9719 = vmatpush2.bf16.msra.mxu0 %v17764_v40  ;;  %9679 = vmatprep.subr.bf16.mxu1 %v17493_v45  ;;  %v3057_v45 = vld [vmem:[#allocation11 + $0x19b8] sm:$0xff] }
 0x609   :  { %9720 = vmatprep.subr.bf16.mxu0 %v17749_v48  ;;  %v3065_v48 = vld [vmem:[#allocation11 + $0x19f8] sm:$0xff] }
 0x60a   :  { %v17909_v51 = vcombine.high %v3057_v45, %v3065_v48  ;;  %v3009_v21 = vld [vmem:[#allocation11 + $0x1838] sm:$0xff] }
 0x60b   :  { %9680 = vmatpush2.bf16.msra.mxu1 %v17492_v56  ;;  %v3041_v56 = vld [vmem:[#allocation11 + $0x1938] sm:$0xff] }
 0x60c   :  { %9721 = vmatpush2.bf16.msra.mxu0 %v17748_v4  ;;  %9681 = vmatprep.subr.bf16.mxu1 %v17477_v36  ;;  %v3049_v4 = vld [vmem:[#allocation11 + $0x1978] sm:$0xff]  ;;  %v17908_v36 = vcombine.low %v3057_v45, %v3065_v48  ;;  %v19237_v45 = vld [vmem:[#allocation14 + $0x2dc] ss:$28 sps:$4 sm:$0xff]  }
 0x60d   :  { %9722 = vmatprep.subr.bf16.mxu0 %v17733_v52  ;;  %v19217_v52 = vld [vmem:[#allocation14 + $0xa8] ss:$28 sps:$4 sm:$0xff]   ;;  %v17893_v50 = vcombine.high %v3041_v56, %v3049_v4 }
 0x60e   :  { %v3241_v57 = vld [vmem:[#allocation11 + $0x1f78] sm:$0xff] }
 0x60f   :  { %9682 = vmatpush2.bf16.msra.mxu1 %v17476_v53  ;;  %v3025_v53 = vld [vmem:[#allocation11 + $0x18b8] sm:$0xff] }
 0x610   :  { %9723 = vmatpush2.bf16.msra.mxu0 %v17732_v10  ;;  %9733 = vmatprep.subr.bf16.mxu1 %v17973_v12  ;;  %v3033_v10 = vld [vmem:[#allocation11 + $0x18f8] sm:$0xff]  ;;  %v17892_v12 = vcombine.low %v3041_v56, %v3049_v4  ;;  %v19240_v56 = vld [vmem:[#allocation14 + $0x2a4] ss:$28 sps:$4 sm:$0xff]  }
 0x611   :  { %15475 = vmatprep.subr.bf16.mxu0 %v19207_v15  ;;  %v19220_v15 = vld [vmem:[#allocation14 + $0x70] ss:$28 sps:$4 sm:$0xff]   ;;  %v17877_v1 = vcombine.high %v3025_v53, %v3033_v10 }
 0x612   :  { %v9439_v63 = vpop.f32.mrf.mxu1  ;;  %9684 = vmatmul.mubr.bf16.vlgmr.msra.gmra.mxu1 %v20887_v55  ;;  %v3201_v48 = vld [vmem:[#allocation11 + $0x1e38] sm:$0xff] }
 0x613   :  { %v21111_v47 = vadd.f32 %v9439_v63, %v21101_v27  ;;  %v21113_v34 = vpop.f32.mrf.mxu0  ;;  %9725 = vmatmul.mubr.bf16.vlgmr.msra.gmra.mxu0 %v20917_v19  ;;  %9734 = vmatpush1.bf16.msra.mxu1 %v17972_v29  ;;  %v19213_v27 = vld [vmem:[#allocation14 + $0x11c] ss:$28 sps:$4 sm:$0xff]   ;;  %v3017_v29 = vld [vmem:[#allocation11 + $0x1878] sm:$0xff] }
 0x614   :  { %9765 = vmatprep.mubr.bf16.mxu1 %v20932_v5  ;;  %15476 = vmatpush1.bf16.msra.mxu0 %v19205_v11  ;;  %v9441_v35 = vpop.f32.mrf.mxu1  ;;  %v17940_v5 = vcombine.low %v3089_v14, %v3097_v61  ;;  %v17876_v11 = vcombine.low %v3025_v53, %v3033_v10  ;;  %v17861_v14 = vcombine.high %v3009_v21, %v3017_v29  ;;  %v19228_v61 = vld [vmem:[#allocation14 + $0x4] ss:$28 sps:$4 sm:$0xff]   ;;  %v3249_v63 = vld [vmem:[#allocation11 + $0x1fb8] sm:$0xff] }
 0x615   :  { %15507 = vmatprep.mubr.bf16.mxu0 %v21108_v20  ;;  %v21119_v55 = vadd.f32 %v9441_v35, %v21104_v0  ;;  %v21121_v39 = vpop.f32.mrf.mxu0  ;;  %9735 = vmatprep.subr.bf16.mxu1 %v17957_v33  ;;  %v19216_v0 = vld [vmem:[#allocation14 + $0xe4] ss:$28 sps:$4 sm:$0xff]   ;;  %v19223_v33 = vld [vmem:[#allocation14 + $0x38] ss:$28 sps:$4 sm:$0xff]   ;;  %v3185_v4 = vld [vmem:[#allocation11 + $0x1db8] sm:$0xff] }
 0x616   :  { %v9443_v19 = vpop.f32.mrf.mxu1  ;;  %15477 = vmatprep.subr.bf16.mxu0 %v19210_v13  ;;  %v3257_v13 = vld [vmem:[#allocation11 + $0x1ff8] sm:$0xff]  ;;  %v19226_v35 = vld [vmem:[#allocation14] ss:$28 sps:$4 sm:$0xff]  }
 0x617   :  { %v9484_v37 = vpop.f32.mrf.mxu0  ;;  %9736 = vmatpush1.bf16.msra.mxu1 %v17956_v3  ;;  %v17860_v3 = vcombine.low %v3009_v21, %v3017_v29  ;;  %v18100_v9 = vcombine.low %v3249_v63, %v3257_v13  ;;  %v19229_v19 = vld [vmem:[#allocation14 + $0x348] ss:$28 sps:$4 sm:$0xff]   ;;  %v19246_v21 = vld [vmem:[#allocation14 + $0x234] ss:$28 sps:$4 sm:$0xff]  }
 0x618   :  { %15478 = vmatpush1.bf16.msra.mxu0 %v19208_v43  ;;  %v9444_v16 = vpop.f32.mrf.mxu1  ;;  %9737 = vmatprep.subr.bf16.mxu1 %v17941_v17  ;;  %v18101_v43 = vcombine.high %v3249_v63, %v3257_v13  ;;  %v19231_v17 = vld [vmem:[#allocation14 + $0x34c] ss:$28 sps:$4 sm:$0xff]   ;;  %v19249_v63 = vld [vmem:[#allocation14 + $0x1fc] ss:$28 sps:$4 sm:$0xff]  }
 0x619   :  { %v9485_v40 = vpop.f32.mrf.mxu0  ;;  %15479 = vmatprep.subr.bf16.mxu0 %v19213_v27  ;;  %v3233_v27 = vld [vmem:[#allocation11 + $0x1f38] sm:$0xff] }
 0x61a   :  { %v18085_v37 = vcombine.high %v3233_v27, %v3241_v57  ;;  %v3217_v16 = vld [vmem:[#allocation11 + $0x1eb8] sm:$0xff] }
 0x61b   :  { %9738 = vmatpush1.bf16.msra.mxu1 %v17940_v5  ;;  %v19234_v5 = vld [vmem:[#allocation14 + $0x314] ss:$28 sps:$4 sm:$0xff]   ;;  %v19243_v53 = vld [vmem:[#allocation14 + $0x26c] ss:$28 sps:$4 sm:$0xff]  }
 0x61c   :  { %15480 = vmatpush1.bf16.msra.mxu0 %v19211_v30  ;;  %9739 = vmatprep.subr.bf16.mxu1 %v17925_v58  ;;  %v3225_v30 = vld [vmem:[#allocation11 + $0x1ef8] sm:$0xff]  ;;  %v18084_v58 = vcombine.low %v3233_v27, %v3241_v57  ;;  %v19252_v27 = vld [vmem:[#allocation14 + $0x1c4] ss:$28 sps:$4 sm:$0xff]  }
 0x61d   :  { %15481 = vmatprep.subr.bf16.mxu0 %v19216_v0  ;;  %v19232_v40 = vld [vmem:[#allocation14 + $0x310] ss:$28 sps:$4 sm:$0xff]   ;;  %v18069_v0 = vcombine.high %v3217_v16, %v3225_v30 }
 0x61e   :  { %v3169_v10 = vld [vmem:[#allocation11 + $0x1d38] sm:$0xff] }
 0x61f   :  { %9740 = vmatpush1.bf16.msra.mxu1 %v17924_v42  ;;  %v3209_v42 = vld [vmem:[#allocation11 + $0x1e78] sm:$0xff] }
 0x620   :  { %15482 = vmatpush1.bf16.msra.mxu0 %v19214_v46  ;;  %9741 = vmatprep.subr.bf16.mxu1 %v17909_v51  ;;  %v18068_v46 = vcombine.low %v3217_v16, %v3225_v30  ;;  %v19235_v51 = vld [vmem:[#allocation14 + $0x2d8] ss:$28 sps:$4 sm:$0xff]   ;;  %v3153_v29 = vld [vmem:[#allocation11 + $0x1cb8] sm:$0xff] }
 0x621   :  { %15483 = vmatprep.subr.bf16.mxu0 %v19219_v60  ;;  %v18053_v60 = vcombine.high %v3201_v48, %v3209_v42  ;;  %v3137_v13 = vld [vmem:[#allocation11 + $0x1c38] sm:$0xff] }
 0x622   :  { %v19258_v30 = vld [vmem:[#allocation14 + $0x88c] ss:$28 sps:$4 sm:$0xff]  }
 0x623   :  { %9742 = vmatpush1.bf16.msra.mxu1 %v17908_v36  ;;  %v3193_v36 = vld [vmem:[#allocation11 + $0x1df8] sm:$0xff] }
 0x624   :  { %15484 = vmatpush1.bf16.msra.mxu0 %v19217_v52  ;;  %9743 = vmatprep.subr.bf16.mxu1 %v17893_v50  ;;  %v18052_v52 = vcombine.low %v3201_v48, %v3209_v42  ;;  %v19238_v50 = vld [vmem:[#allocation14 + $0x2a0] ss:$28 sps:$4 sm:$0xff]   ;;  %v19256_v48 = vld [vmem:[#allocation14 + $0x888] ss:$28 sps:$4 sm:$0xff]  }
 0x625   :  { %15485 = vmatprep.subr.bf16.mxu0 %v19222_v7  ;;  %v18037_v7 = vcombine.high %v3185_v4, %v3193_v36 }
 0x627   :  { %9744 = vmatpush1.bf16.msra.mxu1 %v17892_v12  ;;  %v3177_v12 = vld [vmem:[#allocation11 + $0x1d78] sm:$0xff] }
 0x628   :  { %15486 = vmatpush1.bf16.msra.mxu0 %v19220_v15  ;;  %9745 = vmatprep.subr.bf16.mxu1 %v17877_v1  ;;  %v18036_v15 = vcombine.low %v3185_v4, %v3193_v36  ;;  %v19241_v1 = vld [vmem:[#allocation14 + $0x268] ss:$28 sps:$4 sm:$0xff]  }
 0x629   :  { %15487 = vmatprep.subr.bf16.mxu0 %v19225_v18  ;;  %v18021_v18 = vcombine.high %v3169_v10, %v3177_v12 }
 0x62b   :  { %9746 = vmatpush1.bf16.msra.mxu1 %v17876_v11  ;;  %v3161_v11 = vld [vmem:[#allocation11 + $0x1cf8] sm:$0xff] }
 0x62c   :  { %15488 = vmatpush1.bf16.msra.mxu0 %v19223_v33  ;;  %9747 = vmatprep.subr.bf16.mxu1 %v17861_v14  ;;  %v18020_v33 = vcombine.low %v3169_v10, %v3177_v12  ;;  %v19244_v14 = vld [vmem:[#allocation14 + $0x230] ss:$28 sps:$4 sm:$0xff]  }
 0x62d   :  { %15489 = vmatprep.subr.bf16.mxu0 %v19228_v61  ;;  %v18005_v61 = vcombine.high %v3153_v29, %v3161_v11 }
 0x62f   :  { %9748 = vmatpush1.bf16.msra.mxu1 %v17860_v3  ;;  %v3145_v3 = vld [vmem:[#allocation11 + $0x1c78] sm:$0xff] }
 0x630   :  { %15490 = vmatpush1.bf16.msra.mxu0 %v19226_v35  ;;  %9749 = vmatprep.subr.bf16.mxu1 %v18101_v43  ;;  %v18004_v35 = vcombine.low %v3153_v29, %v3161_v11  ;;  %v19247_v43 = vld [vmem:[#allocation14 + $0x1f8] ss:$28 sps:$4 sm:$0xff]   ;;  %v17988_v57 = vcombine.low %v3137_v13, %v3145_v3  ;;  %v19273_v11 = vld [vmem:[#allocation14 + $0x464] ss:$28 sps:$4 sm:$0xff]  }
 0x631   :  { %15491 = vmatprep.subr.bf16.mxu0 %v19231_v17  ;;  %v17989_v17 = vcombine.high %v3137_v13, %v3145_v3  ;;  %v19268_v29 = vld [vmem:[#allocation14 + $0x818] ss:$28 sps:$4 sm:$0xff]   ;;  %v19279_v13 = vld [vmem:[#allocation14 + $0x42c] ss:$28 sps:$4 sm:$0xff]  }
 0x632   :  { %v19282_v3 = vld [vmem:[#allocation14 + $0x7ac] ss:$28 sps:$4 sm:$0xff]  }
 0x633   :  { %9750 = vmatpush2.bf16.msra.mxu1 %v18100_v9  ;;  %v19250_v9 = vld [vmem:[#allocation14 + $0x1c0] ss:$28 sps:$4 sm:$0xff]  }
 0x634   :  { %15492 = vmatpush2.bf16.msra.mxu0 %v19229_v19  ;;  %9751 = vmatprep.subr.bf16.mxu1 %v18085_v37  ;;  %v19255_v19 = vld [vmem:[#allocation14 + $0x50c] ss:$28 sps:$4 sm:$0xff]   ;;  %v9774_v37 = vmax.f32 %v20969_v49, 0.0 }
 0x635   :  { %15493 = vmatprep.subr.bf16.mxu0 %v19234_v5  ;;  %v21124_v5 = vld [vmem:[#allocation13 + $0x8] sm:$0xff] }
 0x636   :  { %v3313_v16 = vrot.slane %v21124_v5, %v20900_v38  ;;  %v21132_v49 = vpack.c.bf16 %v9774_v37, %v9774_v37  ;;  %v19294_v37 = vld [vmem:[#allocation14 + $0x73c] ss:$28 sps:$4 sm:$0xff]  }
 0x637   :  { %9752 = vmatpush2.bf16.msra.mxu1 %v18084_v58  ;;  %v9777_v58 = vmax.f32 %v21004_v31, 0.0  ;;  %v19264_v31 = vld [vmem:[#allocation14 + $0x854] ss:$28 sps:$4 sm:$0xff]  }
 0x638   :  { %15494 = vmatpush2.bf16.msra.mxu0 %v19232_v40  ;;  %9753 = vmatprep.subr.bf16.mxu1 %v18069_v0  ;;  %v9779_v40 = vmax.f32 %v21032_v8, 0.0  ;;  %v3317_v0 = vrot.slane %v21124_v5, %v20904_v44  ;;  %v9481_v42 = vadd.f32 %v21113_v34, %v3313_v16  ;;  %v19289_v16 = vld [vmem:[#allocation14 + $0x3b8] ss:$28 sps:$4 sm:$0xff]  }
 0x639   :  { %15495 = vmatprep.subr.bf16.mxu0 %v19237_v45  ;;  %v19253_v45 = vld [vmem:[#allocation14 + $0x508] ss:$28 sps:$4 sm:$0xff]  }
 0x63a   :  { %v21138_v8 = vpack.c.bf16 %v9779_v40, %v9779_v40  ;;  %v19300_v40 = vld [vmem:[#allocation14 + $0x704] ss:$28 sps:$4 sm:$0xff]  }
 0x63b   :  { %9754 = vmatpush2.bf16.msra.mxu1 %v18068_v46  ;;  %v19261_v46 = vld [vmem:[#allocation14 + $0x4d4] ss:$28 sps:$4 sm:$0xff]  }
 0x63c   :  { %15496 = vmatpush2.bf16.msra.mxu0 %v19235_v51  ;;  %9755 = vmatprep.subr.bf16.mxu1 %v18053_v60  ;;  %v21135_v51 = vpack.c.bf16 %v9777_v58, %v9777_v58  ;;  %v19297_v58 = vld [vmem:[#allocation14 + $0x384] ss:$28 sps:$4 sm:$0xff]  }
 0x63d   :  { %15497 = vmatprep.subr.bf16.mxu0 %v19240_v56  ;;  %v9483_v56 = vadd.f32 %v21121_v39, %v3317_v0  ;;  %v19270_v39 = vld [vmem:[#allocation14 + $0x81c] ss:$28 sps:$4 sm:$0xff]  }
 0x63e   :  { %v19295_v0 = vld [vmem:[#allocation14 + $0x380] ss:$28 sps:$4 sm:$0xff]  }
 0x63f   :  { %9756 = vmatpush2.bf16.msra.mxu1 %v18052_v52  ;;  %v19259_v52 = vld [vmem:[#allocation14 + $0x4d0] ss:$28 sps:$4 sm:$0xff]  }
 0x640   :  { %15498 = vmatpush2.bf16.msra.mxu0 %v19238_v50  ;;  %9757 = vmatprep.subr.bf16.mxu1 %v18037_v7  ;;  %v19262_v50 = vld [vmem:[#allocation14 + $0x850] ss:$28 sps:$4 sm:$0xff]   ;;  %v19267_v7 = vld [vmem:[#allocation14 + $0x49c] ss:$28 sps:$4 sm:$0xff]  }
 0x641   :  { %15499 = vmatprep.subr.bf16.mxu0 %v19243_v53 }
 0x643   :  { %9758 = vmatpush2.bf16.msra.mxu1 %v18036_v15 }
 0x644   :  { %15500 = vmatpush2.bf16.msra.mxu0 %v19241_v1  ;;  %9759 = vmatprep.subr.bf16.mxu1 %v18021_v18  ;;  %v19265_v18 = vld [vmem:[#allocation14 + $0x498] ss:$28 sps:$4 sm:$0xff]  }
 0x645   :  { %15501 = vmatprep.subr.bf16.mxu0 %v19246_v21 }
 0x647   :  { %9760 = vmatpush2.bf16.msra.mxu1 %v18020_v33 }
 0x648   :  { %15502 = vmatpush2.bf16.msra.mxu0 %v19244_v14  ;;  %9761 = vmatprep.subr.bf16.mxu1 %v18005_v61  ;;  %v19276_v14 = vld [vmem:[#allocation14 + $0x7e4] ss:$28 sps:$4 sm:$0xff]  }
 0x649   :  { %15503 = vmatprep.subr.bf16.mxu0 %v19249_v63  ;;  %v19271_v61 = vld [vmem:[#allocation14 + $0x460] ss:$28 sps:$4 sm:$0xff]  }
 0x64a   :  { %v19274_v63 = vld [vmem:[#allocation14 + $0x7e0] ss:$28 sps:$4 sm:$0xff]  }
 0x64b   :  { %9762 = vmatpush2.bf16.msra.mxu1 %v18004_v35  ;;  %v19277_v35 = vld [vmem:[#allocation14 + $0x428] ss:$28 sps:$4 sm:$0xff]  }
 0x64c   :  { %15504 = vmatpush2.bf16.msra.mxu0 %v19247_v43  ;;  %9763 = vmatprep.subr.bf16.mxu1 %v17989_v17  ;;  %v19280_v43 = vld [vmem:[#allocation14 + $0x7a8] ss:$28 sps:$4 sm:$0xff]   ;;  %v19285_v17 = vld [vmem:[#allocation14 + $0x3f4] ss:$28 sps:$4 sm:$0xff]  }
 0x64d   :  { %15505 = vmatprep.subr.bf16.mxu0 %v19252_v27  ;;  %v19288_v27 = vld [vmem:[#allocation14 + $0x774] ss:$28 sps:$4 sm:$0xff]  }
 0x64f   :  { %9764 = vmatpush2.bf16.msra.mxu1 %v17988_v57  ;;  %v19283_v57 = vld [vmem:[#allocation14 + $0x3f0] ss:$28 sps:$4 sm:$0xff]  }
 0x650   :  { %15506 = vmatpush2.bf16.msra.mxu0 %v19250_v9  ;;  %15516 = vmatprep.subr.bf16.mxu1 %v19255_v19  ;;  %v19286_v9 = vld [vmem:[#allocation14 + $0x770] ss:$28 sps:$4 sm:$0xff]   ;;  %v19291_v19 = vld [vmem:[#allocation14 + $0x3bc] ss:$28 sps:$4 sm:$0xff]  }
 0x651   :  { %15557 = vmatprep.subr.bf16.mxu0 %v19258_v30  ;;  %v19292_v30 = vld [vmem:[#allocation14 + $0x738] ss:$28 sps:$4 sm:$0xff]  }
 0x652   :  { %v9521_v60 = vpop.f32.mrf.mxu1  ;;  %9766 = vmatmul.mubr.bf16.vlgmr.msra.gmra.mxu1 %v20934_v6 }
 0x653   :  { %v9522_v4 = vadd.f32 %v9521_v60, %v9481_v42  ;;  %v9562_v36 = vpop.f32.mrf.mxu0  ;;  %15508 = vmatmul.mubr.bf16.vlgmr.msra.gmra.mxu0 %v21132_v49  ;;  %15517 = vmatpush1.bf16.msra.mxu1 %v19253_v45  ;;  %v19298_v45 = vld [vmem:[#allocation14 + $0x700] ss:$28 sps:$4 sm:$0xff]   ;;  %v19306_v42 = vld [vmem:[#allocation14 + $0xa4c] ss:$28 sps:$4 sm:$0xff]  }
 0x654   :  { %15548 = vmatprep.mubr.bf16.mxu1 %v21135_v51  ;;  %15558 = vmatpush1.bf16.msra.mxu0 %v19256_v48  ;;  %v9523_v34 = vpop.f32.mrf.mxu1  ;;  %v19303_v48 = vld [vmem:[#allocation14 + $0x6cc] ss:$28 sps:$4 sm:$0xff]  }
 0x655   :  { %v21143_v53 = vadd.f32 %v9562_v36, %v9522_v4  ;;  %15589 = vmatprep.mubr.bf16.mxu0 %v21138_v8  ;;  %v9524_v6 = vadd.f32 %v9523_v34, %v9483_v56  ;;  %v9564_v10 = vpop.f32.mrf.mxu0  ;;  %15518 = vmatprep.subr.bf16.mxu1 %v19261_v46  ;;  %v19301_v46 = vld [vmem:[#allocation14 + $0x6c8] ss:$28 sps:$4 sm:$0xff]   ;;  %v19312_v56 = vld [vmem:[#allocation14 + $0xa14] ss:$28 sps:$4 sm:$0xff]   ;;  %v19318_v34 = vld [vmem:[#allocation14 + $0x9dc] ss:$28 sps:$4 sm:$0xff]  }
 0x656   :  { %v9525_v12 = vpop.f32.mrf.mxu1  ;;  %15559 = vmatprep.subr.bf16.mxu0 %v19264_v31  ;;  %v19304_v60 = vld [vmem:[#allocation14 + $0xa48] ss:$28 sps:$4 sm:$0xff]   ;;  %v19309_v31 = vld [vmem:[#allocation14 + $0x694] ss:$28 sps:$4 sm:$0xff]  }
 0x657   :  { %v21146_v15 = vadd.f32 %v9564_v10, %v9524_v6  ;;  %v9566_v1 = vpop.f32.mrf.mxu0  ;;  %15519 = vmatpush1.bf16.msra.mxu1 %v19259_v52  ;;  %v19307_v4 = vld [vmem:[#allocation14 + $0x690] ss:$28 sps:$4 sm:$0xff]   ;;  %v19315_v52 = vld [vmem:[#allocation14 + $0x65c] ss:$28 sps:$4 sm:$0xff]   ;;  %v19321_v6 = vld [vmem:[#allocation14 + $0x624] ss:$28 sps:$4 sm:$0xff]  }
 0x658   :  { %15560 = vmatpush1.bf16.msra.mxu0 %v19262_v50  ;;  %v9526_v21 = vpop.f32.mrf.mxu1  ;;  %15520 = vmatprep.subr.bf16.mxu1 %v19267_v7  ;;  %v19310_v36 = vld [vmem:[#allocation14 + $0xa10] ss:$28 sps:$4 sm:$0xff]   ;;  %v19313_v50 = vld [vmem:[#allocation14 + $0x658] ss:$28 sps:$4 sm:$0xff]   ;;  %v19324_v10 = vld [vmem:[#allocation14 + $0x9a4] ss:$28 sps:$4 sm:$0xff]  }
 0x659   :  { %v9567_v33 = vpop.f32.mrf.mxu0  ;;  %15561 = vmatprep.subr.bf16.mxu0 %v19270_v39  ;;  %v19316_v7 = vld [vmem:[#allocation14 + $0x9d8] ss:$28 sps:$4 sm:$0xff]   ;;  %v19319_v39 = vld [vmem:[#allocation14 + $0x620] ss:$28 sps:$4 sm:$0xff]   ;;  %v19327_v1 = vld [vmem:[#allocation14 + $0x5ec] ss:$28 sps:$4 sm:$0xff]  }
 0x65a   :  { %v19322_v12 = vld [vmem:[#allocation14 + $0x9a0] ss:$28 sps:$4 sm:$0xff]   ;;  %v19325_v21 = vld [vmem:[#allocation14 + $0x5e8] ss:$28 sps:$4 sm:$0xff]   ;;  %v19336_v33 = vld [vmem:[#allocation14 + $0x934] ss:$28 sps:$4 sm:$0xff]  }
 0x65b   :  { %15521 = vmatpush1.bf16.msra.mxu1 %v19265_v18  ;;  %v19330_v18 = vld [vmem:[#allocation14 + $0x96c] ss:$28 sps:$4 sm:$0xff]  }
 0x65c   :  { %15562 = vmatpush1.bf16.msra.mxu0 %v19268_v29  ;;  %15522 = vmatprep.subr.bf16.mxu1 %v19273_v11  ;;  %v19328_v29 = vld [vmem:[#allocation14 + $0x968] ss:$28 sps:$4 sm:$0xff]   ;;  %v19333_v11 = vld [vmem:[#allocation14 + $0x5b4] ss:$28 sps:$4 sm:$0xff]  }
 0x65d   :  { %15563 = vmatprep.subr.bf16.mxu0 %v19276_v14  ;;  %v19331_v14 = vld [vmem:[#allocation14 + $0x5b0] ss:$28 sps:$4 sm:$0xff]  }
 0x65f   :  { %15523 = vmatpush1.bf16.msra.mxu1 %v19271_v61  ;;  %v19334_v61 = vld [vmem:[#allocation14 + $0x930] ss:$28 sps:$4 sm:$0xff]  }
 0x660   :  { %15564 = vmatpush1.bf16.msra.mxu0 %v19274_v63  ;;  %15524 = vmatprep.subr.bf16.mxu1 %v19279_v13  ;;  %v19339_v63 = vld [vmem:[#allocation14 + $0x57c] ss:$28 sps:$4 sm:$0xff]  }
 0x661   :  { %15565 = vmatprep.subr.bf16.mxu0 %v19282_v3  ;;  %v19342_v13 = vld [vmem:[#allocation14 + $0x8fc] ss:$28 sps:$4 sm:$0xff]  }
 0x662   :  { %v19337_v3 = vld [vmem:[#allocation14 + $0x578] ss:$28 sps:$4 sm:$0xff]  }
 0x663   :  { %15525 = vmatpush1.bf16.msra.mxu1 %v19277_v35  ;;  %v19340_v35 = vld [vmem:[#allocation14 + $0x8f8] ss:$28 sps:$4 sm:$0xff]  }
 0x664   :  { %15566 = vmatpush1.bf16.msra.mxu0 %v19280_v43  ;;  %15526 = vmatprep.subr.bf16.mxu1 %v19285_v17  ;;  %v19345_v43 = vld [vmem:[#allocation14 + $0x544] ss:$28 sps:$4 sm:$0xff]  }
 0x665   :  { %15567 = vmatprep.subr.bf16.mxu0 %v19288_v27  ;;  %v19348_v17 = vld [vmem:[#allocation14 + $0x8c4] ss:$28 sps:$4 sm:$0xff]  }
 0x666   :  { %v19343_v27 = vld [vmem:[#allocation14 + $0x540] ss:$28 sps:$4 sm:$0xff]  }
 0x667   :  { %15527 = vmatpush1.bf16.msra.mxu1 %v19283_v57  ;;  %v9776_v57 = vmax.f32 %v20996_v62, 0.0 }
 0x668   :  { %15568 = vmatpush1.bf16.msra.mxu0 %v19286_v9  ;;  %15528 = vmatprep.subr.bf16.mxu1 %v19291_v19  ;;  %v19346_v9 = vld [vmem:[#allocation14 + $0x8c0] ss:$28 sps:$4 sm:$0xff]   ;;  %v19351_v19 = vld [vmem:[#allocation14 + $0xc0c] ss:$28 sps:$4 sm:$0xff]  }
 0x669   :  { %15569 = vmatprep.subr.bf16.mxu0 %v19294_v37  ;;  %v9778_v37 = vmax.f32 %v21024_v59, 0.0 }
 0x66b   :  { %15529 = vmatpush1.bf16.msra.mxu1 %v19289_v16  ;;  %v19354_v16 = vld [vmem:[#allocation14 + $0xf8c] ss:$28 sps:$4 sm:$0xff]   ;;  %v21154_v62 = vpack.c.bf16 %v9778_v37, %v9778_v37  ;;  %v19394_v37 = vld [vmem:[#allocation14 + $0xe00] ss:$28 sps:$4 sm:$0xff]  }
 0x66c   :  { %15570 = vmatpush1.bf16.msra.mxu0 %v19292_v30  ;;  %15530 = vmatprep.subr.bf16.mxu1 %v19297_v58  ;;  %v9781_v30 = vmax.f32 %v21058_v2, 0.0  ;;  %v9783_v58 = vmax.f32 %v21088_v32, 0.0 }
 0x66d   :  { %15571 = vmatprep.subr.bf16.mxu0 %v19300_v40  ;;  %v19349_v40 = vld [vmem:[#allocation14 + $0xc08] ss:$28 sps:$4 sm:$0xff]  }
 0x66e   :  { %v21159_v2 = vpack.c.bf16 %v9783_v58, %v9783_v58  ;;  %v19397_v58 = vld [vmem:[#allocation14 + $0xdc8] ss:$28 sps:$4 sm:$0xff]  }
 0x66f   :  { %15531 = vmatpush1.bf16.msra.mxu1 %v19295_v0  ;;  %v21152_v0 = vpack.c.bf16 %v9776_v57, %v9776_v57  ;;  %v19393_v57 = vld [vmem:[#allocation14 + $0xa84] ss:$28 sps:$4 sm:$0xff]  }
 0x670   :  { %15572 = vmatpush1.bf16.msra.mxu0 %v19298_v45  ;;  %15532 = vmatprep.subr.bf16.mxu1 %v19303_v48  ;;  %v19352_v45 = vld [vmem:[#allocation14 + $0xf88] ss:$28 sps:$4 sm:$0xff]   ;;  %v19357_v48 = vld [vmem:[#allocation14 + $0xbd4] ss:$28 sps:$4 sm:$0xff]  }
 0x671   :  { %15573 = vmatprep.subr.bf16.mxu0 %v19306_v42  ;;  %v21156_v42 = vpack.c.bf16 %v9781_v30, %v9781_v30  ;;  %v19402_v30 = vld [vmem:[#allocation14 + $0x114c] ss:$28 sps:$4 sm:$0xff]  }
 0x673   :  { %15533 = vmatpush2.bf16.msra.mxu1 %v19301_v46  ;;  %v19360_v46 = vld [vmem:[#allocation14 + $0xf54] ss:$28 sps:$4 sm:$0xff]  }
 0x674   :  { %15574 = vmatpush2.bf16.msra.mxu0 %v19304_v60  ;;  %15534 = vmatprep.subr.bf16.mxu1 %v19309_v31  ;;  %v19355_v31 = vld [vmem:[#allocation14 + $0xbd0] ss:$28 sps:$4 sm:$0xff]  }
 0x675   :  { %15575 = vmatprep.subr.bf16.mxu0 %v19312_v56 }
 0x677   :  { %15535 = vmatpush2.bf16.msra.mxu1 %v19307_v4  ;;  %v19358_v4 = vld [vmem:[#allocation14 + $0xf50] ss:$28 sps:$4 sm:$0xff]  }
 0x678   :  { %15576 = vmatpush2.bf16.msra.mxu0 %v19310_v36  ;;  %15536 = vmatprep.subr.bf16.mxu1 %v19315_v52  ;;  %v19363_v36 = vld [vmem:[#allocation14 + $0xb9c] ss:$28 sps:$4 sm:$0xff]  }
 0x679   :  { %15577 = vmatprep.subr.bf16.mxu0 %v19318_v34 }
 0x67b   :  { %15537 = vmatpush2.bf16.msra.mxu1 %v19313_v50 }
 0x67c   :  { %15578 = vmatpush2.bf16.msra.mxu0 %v19316_v7  ;;  %15538 = vmatprep.subr.bf16.mxu1 %v19321_v6  ;;  %v19361_v7 = vld [vmem:[#allocation14 + $0xb98] ss:$28 sps:$4 sm:$0xff]  }
 0x67d   :  { %15579 = vmatprep.subr.bf16.mxu0 %v19324_v10  ;;  %v19364_v10 = vld [vmem:[#allocation14 + $0xf18] ss:$28 sps:$4 sm:$0xff]  }
 0x67f   :  { %15539 = vmatpush2.bf16.msra.mxu1 %v19319_v39  ;;  %v19369_v39 = vld [vmem:[#allocation14 + $0xb64] ss:$28 sps:$4 sm:$0xff]  }
 0x680   :  { %15580 = vmatpush2.bf16.msra.mxu0 %v19322_v12  ;;  %15540 = vmatprep.subr.bf16.mxu1 %v19327_v1  ;;  %v19372_v1 = vld [vmem:[#allocation14 + $0xee4] ss:$28 sps:$4 sm:$0xff]  }
 0x681   :  { %15581 = vmatprep.subr.bf16.mxu0 %v19330_v18  ;;  %v19367_v18 = vld [vmem:[#allocation14 + $0xb60] ss:$28 sps:$4 sm:$0xff]  }
 0x683   :  { %15541 = vmatpush2.bf16.msra.mxu1 %v19325_v21  ;;  %v19370_v21 = vld [vmem:[#allocation14 + $0xee0] ss:$28 sps:$4 sm:$0xff]  }
 0x684   :  { %15582 = vmatpush2.bf16.msra.mxu0 %v19328_v29  ;;  %15542 = vmatprep.subr.bf16.mxu1 %v19333_v11  ;;  %v19375_v29 = vld [vmem:[#allocation14 + $0xb2c] ss:$28 sps:$4 sm:$0xff]  }
 0x685   :  { %15583 = vmatprep.subr.bf16.mxu0 %v19336_v33  ;;  %v19378_v11 = vld [vmem:[#allocation14 + $0xeac] ss:$28 sps:$4 sm:$0xff]  }
 0x686   :  { %v19373_v33 = vld [vmem:[#allocation14 + $0xb28] ss:$28 sps:$4 sm:$0xff]  }
 0x687   :  { %15543 = vmatpush2.bf16.msra.mxu1 %v19331_v14  ;;  %v19376_v14 = vld [vmem:[#allocation14 + $0xea8] ss:$28 sps:$4 sm:$0xff]  }
 0x688   :  { %15584 = vmatpush2.bf16.msra.mxu0 %v19334_v61  ;;  %15544 = vmatprep.subr.bf16.mxu1 %v19339_v63  ;;  %v19381_v61 = vld [vmem:[#allocation14 + $0xaf4] ss:$28 sps:$4 sm:$0xff]  }
 0x689   :  { %15585 = vmatprep.subr.bf16.mxu0 %v19342_v13  ;;  %v19384_v63 = vld [vmem:[#allocation14 + $0xe74] ss:$28 sps:$4 sm:$0xff]  }
 0x68a   :  { %v19379_v13 = vld [vmem:[#allocation14 + $0xaf0] ss:$28 sps:$4 sm:$0xff]  }
 0x68b   :  { %15545 = vmatpush2.bf16.msra.mxu1 %v19337_v3  ;;  %v19382_v3 = vld [vmem:[#allocation14 + $0xe70] ss:$28 sps:$4 sm:$0xff]  }
 0x68c   :  { %15586 = vmatpush2.bf16.msra.mxu0 %v19340_v35  ;;  %15546 = vmatprep.subr.bf16.mxu1 %v19345_v43  ;;  %v19387_v35 = vld [vmem:[#allocation14 + $0xabc] ss:$28 sps:$4 sm:$0xff]  }
 0x68d   :  { %15587 = vmatprep.subr.bf16.mxu0 %v19348_v17  ;;  %v19390_v43 = vld [vmem:[#allocation14 + $0xe3c] ss:$28 sps:$4 sm:$0xff]  }
 0x68e   :  { %v19385_v17 = vld [vmem:[#allocation14 + $0xab8] ss:$28 sps:$4 sm:$0xff]  }
 0x68f   :  { %15547 = vmatpush2.bf16.msra.mxu1 %v19343_v27  ;;  %v19388_v27 = vld [vmem:[#allocation14 + $0xe38] ss:$28 sps:$4 sm:$0xff]  }
 0x690   :  { %15588 = vmatpush2.bf16.msra.mxu0 %v19346_v9  ;;  %15598 = vmatprep.subr.bf16.mxu1 %v19351_v19  ;;  %v19396_v9 = vld [vmem:[#allocation14 + $0xe04] ss:$28 sps:$4 sm:$0xff]  }
 0x691   :  { %15639 = vmatprep.subr.bf16.mxu0 %v19354_v16  ;;  %v19391_v19 = vld [vmem:[#allocation14 + $0xa80] ss:$28 sps:$4 sm:$0xff]   ;;  %v19399_v16 = vld [vmem:[#allocation14 + $0xdcc] ss:$28 sps:$4 sm:$0xff]  }
 0x692   :  { %v9603_v59 = vpop.f32.mrf.mxu1  ;;  %15549 = vmatmul.mubr.bf16.vlgmr.msra.gmra.mxu1 %v21152_v0 }
 0x693   :  { %v21162_v32 = vadd.f32 %v9603_v59, %v21143_v53  ;;  %v21164_v60 = vpop.f32.mrf.mxu0  ;;  %15590 = vmatmul.mubr.bf16.vlgmr.msra.gmra.mxu0 %v21154_v62  ;;  %15599 = vmatpush1.bf16.msra.mxu1 %v19349_v40  ;;  %v19366_v53 = vld [vmem:[#allocation14 + $0xf1c] ss:$28 sps:$4 sm:$0xff]   ;;  %v19400_v40 = vld [vmem:[#allocation14 + $0x1148] ss:$28 sps:$4 sm:$0xff]   ;;  %v19403_v59 = vld [vmem:[#allocation14 + $0xd90] ss:$28 sps:$4 sm:$0xff]  }
 0x694   :  { %15630 = vmatprep.mubr.bf16.mxu1 %v21156_v42  ;;  %15640 = vmatpush1.bf16.msra.mxu0 %v19352_v45  ;;  %v21168_v56 = vpop.f32.mrf.mxu1  ;;  %v19405_v45 = vld [vmem:[#allocation14 + $0xd94] ss:$28 sps:$4 sm:$0xff]  }
 0x695   :  { %15671 = vmatprep.mubr.bf16.mxu0 %v21159_v2  ;;  %v21171_v52 = vpop.f32.mrf.mxu0  ;;  %15600 = vmatprep.subr.bf16.mxu1 %v19357_v48  ;;  %v19408_v48 = vld [vmem:[#allocation14 + $0x1114] ss:$28 sps:$4 sm:$0xff]  }
 0x696   :  { %v9607_v34 = vpop.f32.mrf.mxu1  ;;  %15641 = vmatprep.subr.bf16.mxu0 %v19360_v46  ;;  %v19406_v46 = vld [vmem:[#allocation14 + $0x1110] ss:$28 sps:$4 sm:$0xff]  }
 0x697   :  { %v9648_v50 = vpop.f32.mrf.mxu0  ;;  %15601 = vmatpush1.bf16.msra.mxu1 %v19355_v31  ;;  %v19411_v31 = vld [vmem:[#allocation14 + $0xd5c] ss:$28 sps:$4 sm:$0xff]   ;;  %v19417_v34 = vld [vmem:[#allocation14 + $0xd24] ss:$28 sps:$4 sm:$0xff]  }
 0x698   :  { %15642 = vmatpush1.bf16.msra.mxu0 %v19358_v4  ;;  %v9608_v6 = vpop.f32.mrf.mxu1  ;;  %15602 = vmatprep.subr.bf16.mxu1 %v19363_v36  ;;  %v19414_v4 = vld [vmem:[#allocation14 + $0x10dc] ss:$28 sps:$4 sm:$0xff]   ;;  %v19420_v50 = vld [vmem:[#allocation14 + $0x10a4] ss:$28 sps:$4 sm:$0xff]  }
 0x699   :  { %v9649_v12 = vpop.f32.mrf.mxu0  ;;  %15643 = vmatprep.subr.bf16.mxu0 %v19366_v53  ;;  %v19409_v36 = vld [vmem:[#allocation14 + $0xd58] ss:$28 sps:$4 sm:$0xff]   ;;  %v19418_v6 = vld [vmem:[#allocation14 + $0x10a0] ss:$28 sps:$4 sm:$0xff]  }
 0x69a   :  { %v19412_v53 = vld [vmem:[#allocation14 + $0x10d8] ss:$28 sps:$4 sm:$0xff]   ;;  %v19421_v12 = vld [vmem:[#allocation14 + $0xce8] ss:$28 sps:$4 sm:$0xff]  }
 0x69b   :  { %15603 = vmatpush1.bf16.msra.mxu1 %v19361_v7  ;;  %v19415_v7 = vld [vmem:[#allocation14 + $0xd20] ss:$28 sps:$4 sm:$0xff]  }
 0x69c   :  { %15644 = vmatpush1.bf16.msra.mxu0 %v19364_v10  ;;  %15604 = vmatprep.subr.bf16.mxu1 %v19369_v39  ;;  %v19423_v10 = vld [vmem:[#allocation14 + $0xcec] ss:$28 sps:$4 sm:$0xff]  }
 0x69d   :  { %15645 = vmatprep.subr.bf16.mxu0 %v19372_v1  ;;  %v19426_v39 = vld [vmem:[#allocation14 + $0x106c] ss:$28 sps:$4 sm:$0xff]  }
 0x69e   :  { %v19424_v1 = vld [vmem:[#allocation14 + $0x1068] ss:$28 sps:$4 sm:$0xff]  }
 0x69f   :  { %15605 = vmatpush1.bf16.msra.mxu1 %v19367_v18  ;;  %v19429_v18 = vld [vmem:[#allocation14 + $0xcb4] ss:$28 sps:$4 sm:$0xff]  }
 0x6a0   :  { %15646 = vmatpush1.bf16.msra.mxu0 %v19370_v21  ;;  %15606 = vmatprep.subr.bf16.mxu1 %v19375_v29  ;;  %v19432_v21 = vld [vmem:[#allocation14 + $0x1034] ss:$28 sps:$4 sm:$0xff]  }
 0x6a1   :  { %15647 = vmatprep.subr.bf16.mxu0 %v19378_v11  ;;  %v19427_v29 = vld [vmem:[#allocation14 + $0xcb0] ss:$28 sps:$4 sm:$0xff]  }
 0x6a2   :  { %v19430_v11 = vld [vmem:[#allocation14 + $0x1030] ss:$28 sps:$4 sm:$0xff]  }
 0x6a3   :  { %15607 = vmatpush1.bf16.msra.mxu1 %v19373_v33  ;;  %v19435_v33 = vld [vmem:[#allocation14 + $0xc7c] ss:$28 sps:$4 sm:$0xff]  }
 0x6a4   :  { %15648 = vmatpush1.bf16.msra.mxu0 %v19376_v14  ;;  %15608 = vmatprep.subr.bf16.mxu1 %v19381_v61  ;;  %v19438_v14 = vld [vmem:[#allocation14 + $0xffc] ss:$28 sps:$4 sm:$0xff]  }
 0x6a5   :  { %15649 = vmatprep.subr.bf16.mxu0 %v19384_v63  ;;  %v19433_v61 = vld [vmem:[#allocation14 + $0xc78] ss:$28 sps:$4 sm:$0xff]  }
 0x6a6   :  { %v19436_v63 = vld [vmem:[#allocation14 + $0xff8] ss:$28 sps:$4 sm:$0xff]  }
 0x6a7   :  { %15609 = vmatpush1.bf16.msra.mxu1 %v19379_v13  ;;  %v19441_v13 = vld [vmem:[#allocation14 + $0xc44] ss:$28 sps:$4 sm:$0xff]  }
 0x6a8   :  { %15650 = vmatpush1.bf16.msra.mxu0 %v19382_v3  ;;  %15610 = vmatprep.subr.bf16.mxu1 %v19387_v35  ;;  %v19444_v3 = vld [vmem:[#allocation14 + $0xfc4] ss:$28 sps:$4 sm:$0xff]   ;;  %v9606_v35 = vadd.f32 %v21168_v56, %v21146_v15 }
 0x6a9   :  { %15651 = vmatprep.subr.bf16.mxu0 %v19390_v43  ;;  %v19439_v43 = vld [vmem:[#allocation14 + $0xc40] ss:$28 sps:$4 sm:$0xff]   ;;  %v19445_v15 = vld [vmem:[#allocation14 + $0x1308] ss:$28 sps:$4 sm:$0xff]  }
 0x6ab   :  { %15611 = vmatpush1.bf16.msra.mxu1 %v19385_v17  ;;  %v9780_v17 = vmax.f32 %v21050_v54, 0.0  ;;  %v19448_v54 = vld [vmem:[#allocation14 + $0x1688] ss:$28 sps:$4 sm:$0xff]  }
 0x6ac   :  { %15652 = vmatpush1.bf16.msra.mxu0 %v19388_v27  ;;  %15612 = vmatprep.subr.bf16.mxu1 %v19393_v57  ;;  %v19442_v27 = vld [vmem:[#allocation14 + $0xfc0] ss:$28 sps:$4 sm:$0xff]   ;;  %v19447_v57 = vld [vmem:[#allocation14 + $0x130c] ss:$28 sps:$4 sm:$0xff]  }
 0x6ad   :  { %15653 = vmatprep.subr.bf16.mxu0 %v19396_v9  ;;  %v9782_v9 = vmax.f32 %v21080_v41, 0.0  ;;  %v21180_v56 = vpack.c.bf16 %v9780_v17, %v9780_v17  ;;  %v19453_v41 = vld [vmem:[#allocation14 + $0x12d4] ss:$28 sps:$4 sm:$0xff]  }
 0x6ae   :  { %v19478_v17 = vld [vmem:[#allocation14 + $0x1570] ss:$28 sps:$4 sm:$0xff]  }
 0x6af   :  { %15613 = vmatpush1.bf16.msra.mxu1 %v19391_v19  ;;  %v3321_v19 = vrot.slane %v21124_v5, %v20923_v26 }
 0x6b0   :  { %15654 = vmatpush1.bf16.msra.mxu0 %v19394_v37  ;;  %15614 = vmatprep.subr.bf16.mxu1 %v19399_v16  ;;  %v19450_v37 = vld [vmem:[#allocation14 + $0x168c] ss:$28 sps:$4 sm:$0xff]   ;;  %v9785_v16 = vmax.f32 %v21119_v55, 0.0  ;;  %v19456_v55 = vld [vmem:[#allocation14 + $0x1654] ss:$28 sps:$4 sm:$0xff]  }
 0x6b1   :  { %15655 = vmatprep.subr.bf16.mxu0 %v19402_v30  ;;  %v9787_v30 = vmax.f32 %v9606_v35, 0.0  ;;  %v19480_v35 = vld [vmem:[#allocation14 + $0x1574] ss:$28 sps:$4 sm:$0xff]  }
 0x6b3   :  { %15615 = vmatpush2.bf16.msra.mxu1 %v19397_v58  ;;  %v21182_v58 = vpack.c.bf16 %v9782_v9, %v9782_v9  ;;  %v19481_v9 = vld [vmem:[#allocation14 + $0x11b8] ss:$28 sps:$4 sm:$0xff]  }
 0x6b4   :  { %15656 = vmatpush2.bf16.msra.mxu0 %v19400_v40  ;;  %15616 = vmatprep.subr.bf16.mxu1 %v19405_v45  ;;  %v9645_v40 = vadd.f32 %v21164_v60, %v3321_v19  ;;  %v21185_v45 = vpack.c.bf16 %v9785_v16, %v9785_v16  ;;  %v19484_v19 = vld [vmem:[#allocation14 + $0x1538] ss:$28 sps:$4 sm:$0xff]   ;;  %v19492_v16 = vld [vmem:[#allocation14 + $0x1504] ss:$28 sps:$4 sm:$0xff]  }
 0x6b5   :  { %15657 = vmatprep.subr.bf16.mxu0 %v19408_v48 }
 0x6b7   :  { %15617 = vmatpush2.bf16.msra.mxu1 %v19403_v59  ;;  %v21188_v59 = vpack.c.bf16 %v9787_v30, %v9787_v30  ;;  %v19487_v30 = vld [vmem:[#allocation14 + $0x1180] ss:$28 sps:$4 sm:$0xff]  }
 0x6b8   :  { %15658 = vmatpush2.bf16.msra.mxu0 %v19406_v46  ;;  %15618 = vmatprep.subr.bf16.mxu1 %v19411_v31 }
 0x6b9   :  { %15659 = vmatprep.subr.bf16.mxu0 %v19414_v4  ;;  %v19451_v4 = vld [vmem:[#allocation14 + $0x12d0] ss:$28 sps:$4 sm:$0xff]  }
 0x6bb   :  { %15619 = vmatpush2.bf16.msra.mxu1 %v19409_v36  ;;  %v19454_v36 = vld [vmem:[#allocation14 + $0x1650] ss:$28 sps:$4 sm:$0xff]  }
 0x6bc   :  { %15660 = vmatpush2.bf16.msra.mxu0 %v19412_v53  ;;  %15620 = vmatprep.subr.bf16.mxu1 %v19417_v34  ;;  %v19459_v53 = vld [vmem:[#allocation14 + $0x129c] ss:$28 sps:$4 sm:$0xff]  }
 0x6bd   :  { %15661 = vmatprep.subr.bf16.mxu0 %v19420_v50 }
 0x6bf   :  { %15621 = vmatpush2.bf16.msra.mxu1 %v19415_v7  ;;  %v19462_v7 = vld [vmem:[#allocation14 + $0x161c] ss:$28 sps:$4 sm:$0xff]  }
 0x6c0   :  { %15662 = vmatpush2.bf16.msra.mxu0 %v19418_v6  ;;  %15622 = vmatprep.subr.bf16.mxu1 %v19423_v10 }
 0x6c1   :  { %15663 = vmatprep.subr.bf16.mxu0 %v19426_v39  ;;  %v19457_v39 = vld [vmem:[#allocation14 + $0x1298] ss:$28 sps:$4 sm:$0xff]  }
 0x6c3   :  { %15623 = vmatpush2.bf16.msra.mxu1 %v19421_v12 }
 0x6c4   :  { %15664 = vmatpush2.bf16.msra.mxu0 %v19424_v1  ;;  %15624 = vmatprep.subr.bf16.mxu1 %v19429_v18  ;;  %v19460_v1 = vld [vmem:[#allocation14 + $0x1618] ss:$28 sps:$4 sm:$0xff]   ;;  %v19465_v18 = vld [vmem:[#allocation14 + $0x1264] ss:$28 sps:$4 sm:$0xff]  }
 0x6c5   :  { %15665 = vmatprep.subr.bf16.mxu0 %v19432_v21 }
 0x6c7   :  { %15625 = vmatpush2.bf16.msra.mxu1 %v19427_v29  ;;  %v19468_v29 = vld [vmem:[#allocation14 + $0x15e4] ss:$28 sps:$4 sm:$0xff]  }
 0x6c8   :  { %15666 = vmatpush2.bf16.msra.mxu0 %v19430_v11  ;;  %15626 = vmatprep.subr.bf16.mxu1 %v19435_v33  ;;  %v19463_v11 = vld [vmem:[#allocation14 + $0x1260] ss:$28 sps:$4 sm:$0xff]  }
 0x6c9   :  { %15667 = vmatprep.subr.bf16.mxu0 %v19438_v14  ;;  %v19466_v33 = vld [vmem:[#allocation14 + $0x15e0] ss:$28 sps:$4 sm:$0xff]   ;;  %v19471_v14 = vld [vmem:[#allocation14 + $0x122c] ss:$28 sps:$4 sm:$0xff]  }
 0x6cb   :  { %15627 = vmatpush2.bf16.msra.mxu1 %v19433_v61  ;;  %v19474_v61 = vld [vmem:[#allocation14 + $0x15ac] ss:$28 sps:$4 sm:$0xff]  }
 0x6cc   :  { %15668 = vmatpush2.bf16.msra.mxu0 %v19436_v63  ;;  %15628 = vmatprep.subr.bf16.mxu1 %v19441_v13  ;;  %v19469_v63 = vld [vmem:[#allocation14 + $0x1228] ss:$28 sps:$4 sm:$0xff]  }
 0x6cd   :  { %15669 = vmatprep.subr.bf16.mxu0 %v19444_v3  ;;  %v19472_v13 = vld [vmem:[#allocation14 + $0x15a8] ss:$28 sps:$4 sm:$0xff]   ;;  %v19477_v3 = vld [vmem:[#allocation14 + $0x11f4] ss:$28 sps:$4 sm:$0xff]  }
 0x6cf   :  { %15629 = vmatpush2.bf16.msra.mxu1 %v19439_v43  ;;  %v19475_v43 = vld [vmem:[#allocation14 + $0x11f0] ss:$28 sps:$4 sm:$0xff]  }
 0x6d0   :  { %15670 = vmatpush2.bf16.msra.mxu0 %v19442_v27  ;;  %15680 = vmatprep.subr.bf16.mxu1 %v19447_v57  ;;  %v19483_v27 = vld [vmem:[#allocation14 + $0x11bc] ss:$28 sps:$4 sm:$0xff]  }
 0x6d1   :  { %15721 = vmatprep.subr.bf16.mxu0 %v19450_v37  ;;  %v19486_v57 = vld [vmem:[#allocation14 + $0x153c] ss:$28 sps:$4 sm:$0xff]   ;;  %v19489_v37 = vld [vmem:[#allocation14 + $0x1184] ss:$28 sps:$4 sm:$0xff]  }
 0x6d2   :  { %v9685_v48 = vpop.f32.mrf.mxu1  ;;  %15631 = vmatmul.mubr.bf16.vlgmr.msra.gmra.mxu1 %v21180_v56 }
 0x6d3   :  { %v9686_v46 = vadd.f32 %v9685_v48, %v9645_v40  ;;  %v9726_v31 = vpop.f32.mrf.mxu0  ;;  %15672 = vmatmul.mubr.bf16.vlgmr.msra.gmra.mxu0 %v21182_v58  ;;  %15681 = vmatpush1.bf16.msra.mxu1 %v19445_v15  ;;  %v19490_v15 = vld [vmem:[#allocation14 + $0x1500] ss:$28 sps:$4 sm:$0xff]   ;;  %v19498_v40 = vld [vmem:[#allocation14 + $0x184c] ss:$28 sps:$4 sm:$0xff]  }
 0x6d4   :  { %15712 = vmatprep.mubr.bf16.mxu1 %v21185_v45  ;;  %15722 = vmatpush1.bf16.msra.mxu0 %v19448_v54  ;;  %v21192_v60 = vpop.f32.mrf.mxu1  ;;  %v19495_v54 = vld [vmem:[#allocation14 + $0x14cc] ss:$28 sps:$4 sm:$0xff]  }
 0x6d5   :  { %v21194_v34 = vadd.f32 %v9726_v31, %v9686_v46  ;;  %15753 = vmatprep.mubr.bf16.mxu0 %v21188_v59  ;;  %v21197_v50 = vpop.f32.mrf.mxu0  ;;  %15682 = vmatprep.subr.bf16.mxu1 %v19453_v41  ;;  %v19493_v41 = vld [vmem:[#allocation14 + $0x14c8] ss:$28 sps:$4 sm:$0xff]   ;;  %v19504_v46 = vld [vmem:[#allocation14 + $0x1814] ss:$28 sps:$4 sm:$0xff]  }
 0x6d6   :  { %v9689_v6 = vpop.f32.mrf.mxu1  ;;  %15723 = vmatprep.subr.bf16.mxu0 %v19456_v55  ;;  %v19496_v48 = vld [vmem:[#allocation14 + $0x1848] ss:$28 sps:$4 sm:$0xff]   ;;  %v19501_v55 = vld [vmem:[#allocation14 + $0x1494] ss:$28 sps:$4 sm:$0xff]  }
 0x6d7   :  { %v9730_v10 = vpop.f32.mrf.mxu0  ;;  %15683 = vmatpush1.bf16.msra.mxu1 %v19451_v4  ;;  %v19499_v31 = vld [vmem:[#allocation14 + $0x1490] ss:$28 sps:$4 sm:$0xff]   ;;  %v19508_v6 = vld [vmem:[#allocation14 + $0x17d8] ss:$28 sps:$4 sm:$0xff]  }
 0x6d8   :  { %15724 = vmatpush1.bf16.msra.mxu0 %v19454_v36  ;;  %v9690_v12 = vpop.f32.mrf.mxu1  ;;  %15684 = vmatprep.subr.bf16.mxu1 %v19459_v53  ;;  %v19502_v4 = vld [vmem:[#allocation14 + $0x1810] ss:$28 sps:$4 sm:$0xff]   ;;  %v19507_v36 = vld [vmem:[#allocation14 + $0x145c] ss:$28 sps:$4 sm:$0xff]   ;;  %v19513_v10 = vld [vmem:[#allocation14 + $0x1424] ss:$28 sps:$4 sm:$0xff]  }
 0x6d9   :  { %v9731_v21 = vpop.f32.mrf.mxu0  ;;  %15725 = vmatprep.subr.bf16.mxu0 %v19462_v7  ;;  %v19510_v53 = vld [vmem:[#allocation14 + $0x17dc] ss:$28 sps:$4 sm:$0xff]  }
 0x6da   :  { %v19505_v7 = vld [vmem:[#allocation14 + $0x1458] ss:$28 sps:$4 sm:$0xff]   ;;  %v19511_v12 = vld [vmem:[#allocation14 + $0x1420] ss:$28 sps:$4 sm:$0xff]   ;;  %v19522_v21 = vld [vmem:[#allocation14 + $0x176c] ss:$28 sps:$4 sm:$0xff]  }
 0x6db   :  { %15685 = vmatpush1.bf16.msra.mxu1 %v19457_v39  ;;  %v19516_v39 = vld [vmem:[#allocation14 + $0x17a4] ss:$28 sps:$4 sm:$0xff]  }
 0x6dc   :  { %15726 = vmatpush1.bf16.msra.mxu0 %v19460_v1  ;;  %15686 = vmatprep.subr.bf16.mxu1 %v19465_v18  ;;  %v19514_v1 = vld [vmem:[#allocation14 + $0x17a0] ss:$28 sps:$4 sm:$0xff]   ;;  %v19519_v18 = vld [vmem:[#allocation14 + $0x13ec] ss:$28 sps:$4 sm:$0xff]  }
 0x6dd   :  { %15727 = vmatprep.subr.bf16.mxu0 %v19468_v29  ;;  %v19517_v29 = vld [vmem:[#allocation14 + $0x13e8] ss:$28 sps:$4 sm:$0xff]  }
 0x6df   :  { %15687 = vmatpush1.bf16.msra.mxu1 %v19463_v11  ;;  %v19520_v11 = vld [vmem:[#allocation14 + $0x1768] ss:$28 sps:$4 sm:$0xff]  }
 0x6e0   :  { %15728 = vmatpush1.bf16.msra.mxu0 %v19466_v33  ;;  %15688 = vmatprep.subr.bf16.mxu1 %v19471_v14  ;;  %v19525_v33 = vld [vmem:[#allocation14 + $0x13b4] ss:$28 sps:$4 sm:$0xff]  }
 0x6e1   :  { %15729 = vmatprep.subr.bf16.mxu0 %v19474_v61  ;;  %v19528_v14 = vld [vmem:[#allocation14 + $0x1734] ss:$28 sps:$4 sm:$0xff]  }
 0x6e2   :  { %v19523_v61 = vld [vmem:[#allocation14 + $0x13b0] ss:$28 sps:$4 sm:$0xff]  }
 0x6e3   :  { %15689 = vmatpush1.bf16.msra.mxu1 %v19469_v63  ;;  %v19526_v63 = vld [vmem:[#allocation14 + $0x1730] ss:$28 sps:$4 sm:$0xff]  }
 0x6e4   :  { %15730 = vmatpush1.bf16.msra.mxu0 %v19472_v13  ;;  %15690 = vmatprep.subr.bf16.mxu1 %v19477_v3  ;;  %v19531_v13 = vld [vmem:[#allocation14 + $0x137c] ss:$28 sps:$4 sm:$0xff]  }
 0x6e5   :  { %15731 = vmatprep.subr.bf16.mxu0 %v19480_v35  ;;  %v19534_v3 = vld [vmem:[#allocation14 + $0x16fc] ss:$28 sps:$4 sm:$0xff]  }
 0x6e6   :  { %v19529_v35 = vld [vmem:[#allocation14 + $0x1378] ss:$28 sps:$4 sm:$0xff]  }
 0x6e7   :  { %15691 = vmatpush1.bf16.msra.mxu1 %v19475_v43  ;;  %v19532_v43 = vld [vmem:[#allocation14 + $0x16f8] ss:$28 sps:$4 sm:$0xff]  }
 0x6e8   :  { %15732 = vmatpush1.bf16.msra.mxu0 %v19478_v17  ;;  %15692 = vmatprep.subr.bf16.mxu1 %v19483_v27  ;;  %v19537_v17 = vld [vmem:[#allocation14 + $0x1344] ss:$28 sps:$4 sm:$0xff]   ;;  %v3325_v27 = vrot.slane %v21124_v5, %v20926_v28 }
 0x6e9   :  { %15733 = vmatprep.subr.bf16.mxu0 %v19486_v57  ;;  %v19540_v57 = vld [vmem:[#allocation14 + $0x16c4] ss:$28 sps:$4 sm:$0xff]  }
 0x6ea   :  { %v19541_v28 = vld [vmem:[#allocation14 + $0x1a08] ss:$28 sps:$4 sm:$0xff]  }
 0x6eb   :  { %15693 = vmatpush1.bf16.msra.mxu1 %v19481_v9  ;;  %v19535_v9 = vld [vmem:[#allocation14 + $0x1340] ss:$28 sps:$4 sm:$0xff]  }
 0x6ec   :  { %15734 = vmatpush1.bf16.msra.mxu0 %v19484_v19  ;;  %15694 = vmatprep.subr.bf16.mxu1 %v19489_v37  ;;  %v9784_v19 = vmax.f32 %v21111_v47, 0.0  ;;  %v19538_v37 = vld [vmem:[#allocation14 + $0x16c0] ss:$28 sps:$4 sm:$0xff]  }
 0x6ed   :  { %15735 = vmatprep.subr.bf16.mxu0 %v19492_v16  ;;  %v19543_v16 = vld [vmem:[#allocation14 + $0x1a0c] ss:$28 sps:$4 sm:$0xff]  }
 0x6ee   :  { %v21205_v5 = vpack.c.bf16 %v9784_v19, %v9784_v19  ;;  %v19582_v19 = vld [vmem:[#allocation14 + $0x44] ss:$28 sps:$4 sm:$0xff]  }
 0x6ef   :  { %15695 = vmatpush1.bf16.msra.mxu1 %v19487_v30  ;;  %v9786_v30 = vmax.f32 %v21162_v32, 0.0 }
 0x6f0   :  { %15736 = vmatpush1.bf16.msra.mxu0 %v19490_v15  ;;  %15696 = vmatprep.subr.bf16.mxu1 %v19495_v54  ;;  %v9647_v15 = vadd.f32 %v21171_v52, %v3325_v27  ;;  %v19546_v54 = vld [vmem:[#allocation14 + $0x194] ss:$28 sps:$4 sm:$0xff]  }
 0x6f1   :  { %15737 = vmatprep.subr.bf16.mxu0 %v19498_v40  ;;  %v21207_v47 = vpack.c.bf16 %v9786_v30, %v9786_v30  ;;  %v19571_v27 = vld [vmem:[#allocation14 + $0x18f0] ss:$28 sps:$4 sm:$0xff]   ;;  %v19585_v30 = vld [vmem:[#allocation14 + $0x1884] ss:$28 sps:$4 sm:$0xff]  }
 0x6f2   :  { %v9688_v40 = vadd.f32 %v21192_v60, %v9647_v15  ;;  %v19547_v60 = vld [vmem:[#allocation14 + $0x19d0] ss:$28 sps:$4 sm:$0xff]  }
 0x6f3   :  { %15697 = vmatpush2.bf16.msra.mxu1 %v19493_v41  ;;  %v19544_v41 = vld [vmem:[#allocation14 + $0x190] ss:$28 sps:$4 sm:$0xff]  }
 0x6f4   :  { %15738 = vmatpush2.bf16.msra.mxu0 %v19496_v48  ;;  %15698 = vmatprep.subr.bf16.mxu1 %v19501_v55  ;;  %v19549_v48 = vld [vmem:[#allocation14 + $0x19d4] ss:$28 sps:$4 sm:$0xff]   ;;  %v19552_v55 = vld [vmem:[#allocation14 + $0x15c] ss:$28 sps:$4 sm:$0xff]   ;;  %v9729_v32 = vadd.f32 %v21197_v50, %v9688_v40  ;;  %v19588_v15 = vld [vmem:[#allocation14 + $0xc] ss:$28 sps:$4 sm:$0xff]  }
 0x6f5   :  { %15739 = vmatprep.subr.bf16.mxu0 %v19504_v46  ;;  %v19586_v40 = vld [vmem:[#allocation14 + $0x8] ss:$28 sps:$4 sm:$0xff]  }
 0x6f7   :  { %15699 = vmatpush2.bf16.msra.mxu1 %v19499_v31 }
 0x6f8   :  { %15740 = vmatpush2.bf16.msra.mxu0 %v19502_v4  ;;  %15700 = vmatprep.subr.bf16.mxu1 %v19507_v36  ;;  %v19550_v4 = vld [vmem:[#allocation14 + $0x158] ss:$28 sps:$4 sm:$0xff]  }
 0x6f9   :  { %15741 = vmatprep.subr.bf16.mxu0 %v19510_v53  ;;  %v19555_v36 = vld [vmem:[#allocation14 + $0x199c] ss:$28 sps:$4 sm:$0xff]  }
 0x6fb   :  { %15701 = vmatpush2.bf16.msra.mxu1 %v19505_v7 }
 0x6fc   :  { %15742 = vmatpush2.bf16.msra.mxu0 %v19508_v6  ;;  %15702 = vmatprep.subr.bf16.mxu1 %v19513_v10  ;;  %v19558_v6 = vld [vmem:[#allocation14 + $0x124] ss:$28 sps:$4 sm:$0xff]  }
 0x6fd   :  { %15743 = vmatprep.subr.bf16.mxu0 %v19516_v39 }
 0x6ff   :  { %15703 = vmatpush2.bf16.msra.mxu1 %v19511_v12  ;;  %v19553_v12 = vld [vmem:[#allocation14 + $0x1998] ss:$28 sps:$4 sm:$0xff]  }
 0x700   :  { %15744 = vmatpush2.bf16.msra.mxu0 %v19514_v1  ;;  %15704 = vmatprep.subr.bf16.mxu1 %v19519_v18  ;;  %v19556_v18 = vld [vmem:[#allocation14 + $0x120] ss:$28 sps:$4 sm:$0xff]  }
 0x701   :  { %15745 = vmatprep.subr.bf16.mxu0 %v19522_v21  ;;  %v19561_v21 = vld [vmem:[#allocation14 + $0x1964] ss:$28 sps:$4 sm:$0xff]  }
 0x703   :  { %15705 = vmatpush2.bf16.msra.mxu1 %v19517_v29 }
 0x704   :  { %15746 = vmatpush2.bf16.msra.mxu0 %v19520_v11  ;;  %15706 = vmatprep.subr.bf16.mxu1 %v19525_v33  ;;  %v19564_v33 = vld [vmem:[#allocation14 + $0xec] ss:$28 sps:$4 sm:$0xff]  }
 0x705   :  { %15747 = vmatprep.subr.bf16.mxu0 %v19528_v14  ;;  %v19559_v14 = vld [vmem:[#allocation14 + $0x1960] ss:$28 sps:$4 sm:$0xff]  }
 0x707   :  { %15707 = vmatpush2.bf16.msra.mxu1 %v19523_v61  ;;  %v19562_v61 = vld [vmem:[#allocation14 + $0xe8] ss:$28 sps:$4 sm:$0xff]  }
 0x708   :  { %15748 = vmatpush2.bf16.msra.mxu0 %v19526_v63  ;;  %15708 = vmatprep.subr.bf16.mxu1 %v19531_v13  ;;  %v19567_v63 = vld [vmem:[#allocation14 + $0x192c] ss:$28 sps:$4 sm:$0xff]   ;;  %v19570_v13 = vld [vmem:[#allocation14 + $0xb4] ss:$28 sps:$4 sm:$0xff]  }
 0x709   :  { %15749 = vmatprep.subr.bf16.mxu0 %v19534_v3  ;;  %v19565_v3 = vld [vmem:[#allocation14 + $0x1928] ss:$28 sps:$4 sm:$0xff]  }
 0x70b   :  { %15709 = vmatpush2.bf16.msra.mxu1 %v19529_v35  ;;  %v19568_v35 = vld [vmem:[#allocation14 + $0xb0] ss:$28 sps:$4 sm:$0xff]  }
 0x70c   :  { %15750 = vmatpush2.bf16.msra.mxu0 %v19532_v43  ;;  %15710 = vmatprep.subr.bf16.mxu1 %v19537_v17  ;;  %v19573_v43 = vld [vmem:[#allocation14 + $0x18f4] ss:$28 sps:$4 sm:$0xff]   ;;  %v19576_v17 = vld [vmem:[#allocation14 + $0x7c] ss:$28 sps:$4 sm:$0xff]  }
 0x70d   :  { %15751 = vmatprep.subr.bf16.mxu0 %v19540_v57  ;;  %v19574_v57 = vld [vmem:[#allocation14 + $0x78] ss:$28 sps:$4 sm:$0xff]  }
 0x70f   :  { %15711 = vmatpush2.bf16.msra.mxu1 %v19535_v9  ;;  %v19579_v9 = vld [vmem:[#allocation14 + $0x18bc] ss:$28 sps:$4 sm:$0xff]  }
 0x710   :  { %15752 = vmatpush2.bf16.msra.mxu0 %v19538_v37  ;;  %15762 = vmatprep.subr.bf16.mxu1 %v19543_v16  ;;  %v19577_v37 = vld [vmem:[#allocation14 + $0x18b8] ss:$28 sps:$4 sm:$0xff]   ;;  %v19580_v16 = vld [vmem:[#allocation14 + $0x40] ss:$28 sps:$4 sm:$0xff]  }
 0x711   :  { %15803 = vmatprep.subr.bf16.mxu0 %v19546_v54  ;;  %v19583_v54 = vld [vmem:[#allocation14 + $0x1880] ss:$28 sps:$4 sm:$0xff]  }
 0x712   :  { %v21209_v46 = vpop.f32.mrf.mxu1  ;;  %15713 = vmatmul.mubr.bf16.vlgmr.msra.gmra.mxu1 %v21205_v5 }
 0x713   :  { %v21213_v52 = vpop.f32.mrf.mxu0  ;;  %15754 = vmatmul.mubr.bf16.vlgmr.msra.gmra.mxu0 %v21207_v47  ;;  %15763 = vmatpush1.bf16.msra.mxu1 %v19541_v28  ;;  %v19591_v28 = vld [vmem:[#allocation14 + $0x1bcc] ss:$28 sps:$4 sm:$0xff]  }
 0x714   :  { %15804 = vmatpush1.bf16.msra.mxu0 %v19544_v41  ;;  %15835 = vmatprep.mubr.bf16.mxu0 %v21108_v20  ;;  %v9769_v31 = vpop.f32.mrf.mxu1  ;;  %v19594_v41 = vld [vmem:[#allocation14 + $0x354] ss:$28 sps:$4 sm:$0xff]  }
 0x715   :  { %v9770_v53 = vadd.f32 %v9769_v31, %v9729_v32  ;;  %v21217_v7 = vpop.f32.mrf.mxu0  ;;  %15764 = vmatprep.subr.bf16.mxu1 %v19549_v48  ;;  %15805 = vmatprep.subr.bf16.mxu0 %v19552_v55  ;;  %v19589_v48 = vld [vmem:[#allocation14 + $0x1bc8] ss:$28 sps:$4 sm:$0xff]   ;;  %v19592_v55 = vld [vmem:[#allocation14 + $0x350] ss:$28 sps:$4 sm:$0xff]  }
 0x716   :  { %v9771_v10 = vpop.f32.mrf.mxu1  ;;  %v19597_v32 = vld [vmem:[#allocation14 + $0x1b94] ss:$28 sps:$4 sm:$0xff]  }
 0x717   :  { %v9789_v50 = vmax.f32 %v9770_v53, 0.0  ;;  %v15513_v39 = vpop.f32.mrf.mxu0  ;;  %15765 = vmatpush1.bf16.msra.mxu1 %v19547_v60  ;;  %v19600_v60 = vld [vmem:[#allocation14 + $0x31c] ss:$28 sps:$4 sm:$0xff]   ;;  %v19595_v31 = vld [vmem:[#allocation14 + $0x1b90] ss:$28 sps:$4 sm:$0xff]  }
 0x718   :  { %15806 = vmatpush1.bf16.msra.mxu0 %v19550_v4  ;;  %v9772_v1 = vpop.f32.mrf.mxu1  ;;  %15766 = vmatprep.subr.bf16.mxu1 %v19555_v36  ;;  %v19598_v4 = vld [vmem:[#allocation14 + $0x318] ss:$28 sps:$4 sm:$0xff]   ;;  %v19606_v53 = vld [vmem:[#allocation14 + $0x2e4] ss:$28 sps:$4 sm:$0xff]   ;;  %v19612_v39 = vld [vmem:[#allocation14 + $0x2ac] ss:$28 sps:$4 sm:$0xff]  }
 0x719   :  { %v21219_v29 = vpack.c.bf16 %v9789_v50, %v9789_v50  ;;  %v15514_v11 = vpop.f32.mrf.mxu0  ;;  %15807 = vmatprep.subr.bf16.mxu0 %v19558_v6  ;;  %v19603_v36 = vld [vmem:[#allocation14 + $0x1b5c] ss:$28 sps:$4 sm:$0xff]   ;;  %v19609_v50 = vld [vmem:[#allocation14 + $0x1b24] ss:$28 sps:$4 sm:$0xff]  }
 0x71a   :  { %v19601_v6 = vld [vmem:[#allocation14 + $0x1b58] ss:$28 sps:$4 sm:$0xff]   ;;  %v19604_v10 = vld [vmem:[#allocation14 + $0x2e0] ss:$28 sps:$4 sm:$0xff]   ;;  %v19610_v1 = vld [vmem:[#allocation14 + $0x2a8] ss:$28 sps:$4 sm:$0xff]  }
 0x71b   :  { %15767 = vmatpush1.bf16.msra.mxu1 %v19553_v12  ;;  %15794 = vmatprep.mubr.bf16.mxu1 %v21219_v29  ;;  %v19607_v12 = vld [vmem:[#allocation14 + $0x1b20] ss:$28 sps:$4 sm:$0xff]   ;;  %v19613_v11 = vld [vmem:[#allocation14 + $0x1ae8] ss:$28 sps:$4 sm:$0xff]  }
 0x71c   :  { %15808 = vmatpush1.bf16.msra.mxu0 %v19556_v18  ;;  %15768 = vmatprep.subr.bf16.mxu1 %v19561_v21  ;;  %v19615_v18 = vld [vmem:[#allocation14 + $0x1aec] ss:$28 sps:$4 sm:$0xff]   ;;  %v19618_v21 = vld [vmem:[#allocation14 + $0x274] ss:$28 sps:$4 sm:$0xff]  }
 0x71d   :  { %15809 = vmatprep.subr.bf16.mxu0 %v19564_v33  ;;  %v19616_v33 = vld [vmem:[#allocation14 + $0x270] ss:$28 sps:$4 sm:$0xff]  }
 0x71f   :  { %15769 = vmatpush1.bf16.msra.mxu1 %v19559_v14  ;;  %v19621_v14 = vld [vmem:[#allocation14 + $0x1ab4] ss:$28 sps:$4 sm:$0xff]  }
 0x720   :  { %15810 = vmatpush1.bf16.msra.mxu0 %v19562_v61  ;;  %15770 = vmatprep.subr.bf16.mxu1 %v19567_v63  ;;  %v19624_v61 = vld [vmem:[#allocation14 + $0x23c] ss:$28 sps:$4 sm:$0xff]   ;;  %v19619_v63 = vld [vmem:[#allocation14 + $0x1ab0] ss:$28 sps:$4 sm:$0xff]  }
 0x721   :  { %15811 = vmatprep.subr.bf16.mxu0 %v19570_v13  ;;  %v19622_v13 = vld [vmem:[#allocation14 + $0x238] ss:$28 sps:$4 sm:$0xff]  }
 0x723   :  { %15771 = vmatpush1.bf16.msra.mxu1 %v19565_v3  ;;  %v19627_v3 = vld [vmem:[#allocation14 + $0x1a7c] ss:$28 sps:$4 sm:$0xff]  }
 0x724   :  { %15812 = vmatpush1.bf16.msra.mxu0 %v19568_v35  ;;  %15772 = vmatprep.subr.bf16.mxu1 %v19573_v43  ;;  %v19630_v35 = vld [vmem:[#allocation14 + $0x204] ss:$28 sps:$4 sm:$0xff]   ;;  %v19625_v43 = vld [vmem:[#allocation14 + $0x1a78] ss:$28 sps:$4 sm:$0xff]  }
 0x725   :  { %15813 = vmatprep.subr.bf16.mxu0 %v19576_v17  ;;  %v9768_v17 = vadd.f32 %v21209_v46, %v21194_v34  ;;  %v19637_v46 = vld [vmem:[#allocation14 + $0x510] ss:$28 sps:$4 sm:$0xff]  }
 0x727   :  { %15773 = vmatpush1.bf16.msra.mxu1 %v19571_v27  ;;  %v19628_v27 = vld [vmem:[#allocation14 + $0x200] ss:$28 sps:$4 sm:$0xff]  }
 0x728   :  { %15814 = vmatpush1.bf16.msra.mxu0 %v19574_v57  ;;  %15774 = vmatprep.subr.bf16.mxu1 %v19579_v9  ;;  %v19633_v57 = vld [vmem:[#allocation14 + $0x1a44] ss:$28 sps:$4 sm:$0xff]   ;;  %v19636_v9 = vld [vmem:[#allocation14 + $0x1cc] ss:$28 sps:$4 sm:$0xff]  }
 0x729   :  { %15815 = vmatprep.subr.bf16.mxu0 %v19582_v19  ;;  %v10830_v19 = vld [vmem:[#allocation16] sm:$0xff] }
 0x72a   :  { %v10839_v34 = vrot.slane %v10830_v19, %v20822_v24  ;;  %v19643_v24 = vld [vmem:[#allocation14 + $0x4d8] ss:$28 sps:$4 sm:$0xff]  }
 0x72b   :  { %15775 = vmatpush1.bf16.msra.mxu1 %v19577_v37  ;;  %v19631_v37 = vld [vmem:[#allocation14 + $0x1a40] ss:$28 sps:$4 sm:$0xff]  }
 0x72c   :  { %15816 = vmatpush1.bf16.msra.mxu0 %v19580_v16  ;;  %15776 = vmatprep.subr.bf16.mxu1 %v19585_v30  ;;  %v9788_v16 = vmax.f32 %v9768_v17, 0.0  ;;  %v19634_v30 = vld [vmem:[#allocation14 + $0x1c8] ss:$28 sps:$4 sm:$0xff]   ;;  %v19664_v17 = vld [vmem:[#allocation14 + $0x7b0] ss:$28 sps:$4 sm:$0xff]  }
 0x72d   :  { %15817 = vmatprep.subr.bf16.mxu0 %v19588_v15  ;;  %v19639_v15 = vld [vmem:[#allocation14 + $0x514] ss:$28 sps:$4 sm:$0xff]  }
 0x72f   :  { %15777 = vmatpush1.bf16.msra.mxu1 %v19583_v54  ;;  %v10835_v54 = vrot.slane %v10830_v19, %v20816_v22  ;;  %v15512_v22 = vadd.f32 %v21217_v7, %v10839_v34  ;;  %v19654_v7 = vld [vmem:[#allocation14 + $0x824] ss:$28 sps:$4 sm:$0xff]   ;;  %v19670_v19 = vld [vmem:[#allocation14 + $0x778] ss:$28 sps:$4 sm:$0xff]  }
 0x730   :  { %15818 = vmatpush1.bf16.msra.mxu0 %v19586_v40  ;;  %15778 = vmatprep.subr.bf16.mxu1 %v19591_v28  ;;  %v19642_v40 = vld [vmem:[#allocation14 + $0x894] ss:$28 sps:$4 sm:$0xff]   ;;  %v21226_v28 = vpack.c.bf16 %v9788_v16, %v9788_v16  ;;  %v19678_v16 = vld [vmem:[#allocation14 + $0x744] ss:$28 sps:$4 sm:$0xff]  }
 0x731   :  { %15819 = vmatprep.subr.bf16.mxu0 %v19594_v41  ;;  %v19640_v41 = vld [vmem:[#allocation14 + $0x890] ss:$28 sps:$4 sm:$0xff]   ;;  %v19679_v34 = vld [vmem:[#allocation14 + $0x388] ss:$28 sps:$4 sm:$0xff]  }
 0x733   :  { %15779 = vmatpush2.bf16.msra.mxu1 %v19589_v48  ;;  %v15510_v48 = vadd.f32 %v21213_v52, %v10835_v54  ;;  %v19651_v52 = vld [vmem:[#allocation14 + $0x4a4] ss:$28 sps:$4 sm:$0xff]   ;;  %v19681_v54 = vld [vmem:[#allocation14 + $0x38c] ss:$28 sps:$4 sm:$0xff]  }
 0x734   :  { %15820 = vmatpush2.bf16.msra.mxu0 %v19592_v55  ;;  %15780 = vmatprep.subr.bf16.mxu1 %v19597_v32  ;;  %v19645_v55 = vld [vmem:[#allocation14 + $0x4dc] ss:$28 sps:$4 sm:$0xff]  }
 0x735   :  { %15821 = vmatprep.subr.bf16.mxu0 %v19600_v60  ;;  %v19648_v60 = vld [vmem:[#allocation14 + $0x85c] ss:$28 sps:$4 sm:$0xff]  }
 0x737   :  { %15781 = vmatpush2.bf16.msra.mxu1 %v19595_v31 }
 0x738   :  { %15822 = vmatpush2.bf16.msra.mxu0 %v19598_v4  ;;  %15782 = vmatprep.subr.bf16.mxu1 %v19603_v36 }
 0x739   :  { %15823 = vmatprep.subr.bf16.mxu0 %v19606_v53  ;;  %v19646_v53 = vld [vmem:[#allocation14 + $0x858] ss:$28 sps:$4 sm:$0xff]  }
 0x73b   :  { %15783 = vmatpush2.bf16.msra.mxu1 %v19601_v6 }
 0x73c   :  { %15824 = vmatpush2.bf16.msra.mxu0 %v19604_v10  ;;  %15784 = vmatprep.subr.bf16.mxu1 %v19609_v50 }
 0x73d   :  { %15825 = vmatprep.subr.bf16.mxu0 %v19612_v39 }
 0x73f   :  { %15785 = vmatpush2.bf16.msra.mxu1 %v19607_v12 }
 0x740   :  { %15826 = vmatpush2.bf16.msra.mxu0 %v19610_v1  ;;  %15786 = vmatprep.subr.bf16.mxu1 %v19615_v18  ;;  %v19649_v18 = vld [vmem:[#allocation14 + $0x4a0] ss:$28 sps:$4 sm:$0xff]  }
 0x741   :  { %15827 = vmatprep.subr.bf16.mxu0 %v19618_v21 }
 0x743   :  { %15787 = vmatpush2.bf16.msra.mxu1 %v19613_v11  ;;  %v19652_v11 = vld [vmem:[#allocation14 + $0x820] ss:$28 sps:$4 sm:$0xff]  }
 0x744   :  { %15828 = vmatpush2.bf16.msra.mxu0 %v19616_v33  ;;  %15788 = vmatprep.subr.bf16.mxu1 %v19621_v14  ;;  %v19657_v33 = vld [vmem:[#allocation14 + $0x46c] ss:$28 sps:$4 sm:$0xff]  }
 0x745   :  { %15829 = vmatprep.subr.bf16.mxu0 %v19624_v61  ;;  %v19660_v61 = vld [vmem:[#allocation14 + $0x7ec] ss:$28 sps:$4 sm:$0xff]  }
 0x747   :  { %15789 = vmatpush2.bf16.msra.mxu1 %v19619_v63  ;;  %v19655_v63 = vld [vmem:[#allocation14 + $0x468] ss:$28 sps:$4 sm:$0xff]  }
 0x748   :  { %15830 = vmatpush2.bf16.msra.mxu0 %v19622_v13  ;;  %15790 = vmatprep.subr.bf16.mxu1 %v19627_v3  ;;  %v19658_v13 = vld [vmem:[#allocation14 + $0x7e8] ss:$28 sps:$4 sm:$0xff]   ;;  %v19663_v3 = vld [vmem:[#allocation14 + $0x434] ss:$28 sps:$4 sm:$0xff]  }
 0x749   :  { %15831 = vmatprep.subr.bf16.mxu0 %v19630_v35  ;;  %v19666_v35 = vld [vmem:[#allocation14 + $0x7b4] ss:$28 sps:$4 sm:$0xff]  }
 0x74b   :  { %15791 = vmatpush2.bf16.msra.mxu1 %v19625_v43  ;;  %v19661_v43 = vld [vmem:[#allocation14 + $0x430] ss:$28 sps:$4 sm:$0xff]  }
 0x74c   :  { %15832 = vmatpush2.bf16.msra.mxu0 %v19628_v27  ;;  %15792 = vmatprep.subr.bf16.mxu1 %v19633_v57  ;;  %v19669_v27 = vld [vmem:[#allocation14 + $0x3fc] ss:$28 sps:$4 sm:$0xff]  }
 0x74d   :  { %15833 = vmatprep.subr.bf16.mxu0 %v19636_v9  ;;  %v19672_v57 = vld [vmem:[#allocation14 + $0x77c] ss:$28 sps:$4 sm:$0xff]  }
 0x74e   :  { %v19667_v9 = vld [vmem:[#allocation14 + $0x3f8] ss:$28 sps:$4 sm:$0xff]  }
 0x74f   :  { %15793 = vmatpush2.bf16.msra.mxu1 %v19631_v37  ;;  %v19675_v37 = vld [vmem:[#allocation14 + $0x3c4] ss:$28 sps:$4 sm:$0xff]  }
 0x750   :  { %15834 = vmatpush2.bf16.msra.mxu0 %v19634_v30  ;;  %15844 = vmatprep.subr.bf16.mxu1 %v19639_v15  ;;  %v19673_v30 = vld [vmem:[#allocation14 + $0x3c0] ss:$28 sps:$4 sm:$0xff]  }
 0x751   :  { %15885 = vmatprep.subr.bf16.mxu0 %v19642_v40  ;;  %v19676_v15 = vld [vmem:[#allocation14 + $0x740] ss:$28 sps:$4 sm:$0xff]   ;;  %v19684_v40 = vld [vmem:[#allocation14 + $0x70c] ss:$28 sps:$4 sm:$0xff]  }
 0x752   :  { %v15550_v32 = vpop.f32.mrf.mxu1  ;;  %15795 = vmatmul.mubr.bf16.vlgmr.msra.gmra.mxu1 %v21226_v28 }
 0x753   :  { %v15551_v31 = vadd.f32 %v15550_v32, %v15510_v48  ;;  %v15591_v4 = vpop.f32.mrf.mxu0  ;;  %15836 = vmatmul.mubr.bf16.vlgmr.msra.gmra.mxu0 %v21132_v49  ;;  %15845 = vmatpush1.bf16.msra.mxu1 %v19637_v46  ;;  %v19682_v46 = vld [vmem:[#allocation14 + $0x708] ss:$28 sps:$4 sm:$0xff]   ;;  %v19690_v48 = vld [vmem:[#allocation14 + $0xa54] ss:$28 sps:$4 sm:$0xff]  }
 0x754   :  { %15876 = vmatprep.mubr.bf16.mxu1 %v21135_v51  ;;  %15886 = vmatpush1.bf16.msra.mxu0 %v19640_v41  ;;  %v15552_v36 = vpop.f32.mrf.mxu1  ;;  %v19687_v41 = vld [vmem:[#allocation14 + $0x6d4] ss:$28 sps:$4 sm:$0xff]  }
 0x755   :  { %v21233_v6 = vadd.f32 %v15591_v4, %v15551_v31  ;;  %15917 = vmatprep.mubr.bf16.mxu0 %v21138_v8  ;;  %v15553_v10 = vadd.f32 %v15552_v36, %v15512_v22  ;;  %v15593_v50 = vpop.f32.mrf.mxu0  ;;  %15846 = vmatprep.subr.bf16.mxu1 %v19645_v55  ;;  %v19685_v55 = vld [vmem:[#allocation14 + $0x6d0] ss:$28 sps:$4 sm:$0xff]   ;;  %v19696_v22 = vld [vmem:[#allocation14 + $0xa1c] ss:$28 sps:$4 sm:$0xff]   ;;  %v19702_v36 = vld [vmem:[#allocation14 + $0x9e4] ss:$28 sps:$4 sm:$0xff]  }
 0x756   :  { %v15554_v39 = vpop.f32.mrf.mxu1  ;;  %15887 = vmatprep.subr.bf16.mxu0 %v19648_v60  ;;  %v19688_v32 = vld [vmem:[#allocation14 + $0xa50] ss:$28 sps:$4 sm:$0xff]   ;;  %v19693_v60 = vld [vmem:[#allocation14 + $0x69c] ss:$28 sps:$4 sm:$0xff]  }
 0x757   :  { %v21236_v12 = vadd.f32 %v15593_v50, %v15553_v10  ;;  %v15595_v1 = vpop.f32.mrf.mxu0  ;;  %15847 = vmatpush1.bf16.msra.mxu1 %v19643_v24  ;;  %v19691_v31 = vld [vmem:[#allocation14 + $0x698] ss:$28 sps:$4 sm:$0xff]   ;;  %v19699_v24 = vld [vmem:[#allocation14 + $0x664] ss:$28 sps:$4 sm:$0xff]   ;;  %v19705_v10 = vld [vmem:[#allocation14 + $0x62c] ss:$28 sps:$4 sm:$0xff]  }
 0x758   :  { %15888 = vmatpush1.bf16.msra.mxu0 %v19646_v53  ;;  %v15555_v21 = vpop.f32.mrf.mxu1  ;;  %15848 = vmatprep.subr.bf16.mxu1 %v19651_v52  ;;  %v19694_v4 = vld [vmem:[#allocation14 + $0xa18] ss:$28 sps:$4 sm:$0xff]   ;;  %v19697_v53 = vld [vmem:[#allocation14 + $0x660] ss:$28 sps:$4 sm:$0xff]   ;;  %v19708_v50 = vld [vmem:[#allocation14 + $0x9ac] ss:$28 sps:$4 sm:$0xff]  }
 0x759   :  { %v15596_v14 = vpop.f32.mrf.mxu0  ;;  %15889 = vmatprep.subr.bf16.mxu0 %v19654_v7  ;;  %v19700_v52 = vld [vmem:[#allocation14 + $0x9e0] ss:$28 sps:$4 sm:$0xff]   ;;  %v19703_v7 = vld [vmem:[#allocation14 + $0x628] ss:$28 sps:$4 sm:$0xff]   ;;  %v19711_v1 = vld [vmem:[#allocation14 + $0x5f4] ss:$28 sps:$4 sm:$0xff]  }
 0x75a   :  { %v19706_v39 = vld [vmem:[#allocation14 + $0x9a8] ss:$28 sps:$4 sm:$0xff]   ;;  %v19709_v21 = vld [vmem:[#allocation14 + $0x5f0] ss:$28 sps:$4 sm:$0xff]   ;;  %v19720_v14 = vld [vmem:[#allocation14 + $0x93c] ss:$28 sps:$4 sm:$0xff]  }
 0x75b   :  { %15849 = vmatpush1.bf16.msra.mxu1 %v19649_v18  ;;  %v19714_v18 = vld [vmem:[#allocation14 + $0x974] ss:$28 sps:$4 sm:$0xff]  }
 0x75c   :  { %15890 = vmatpush1.bf16.msra.mxu0 %v19652_v11  ;;  %15850 = vmatprep.subr.bf16.mxu1 %v19657_v33  ;;  %v19712_v11 = vld [vmem:[#allocation14 + $0x970] ss:$28 sps:$4 sm:$0xff]   ;;  %v19717_v33 = vld [vmem:[#allocation14 + $0x5bc] ss:$28 sps:$4 sm:$0xff]  }
 0x75d   :  { %15891 = vmatprep.subr.bf16.mxu0 %v19660_v61  ;;  %v19715_v61 = vld [vmem:[#allocation14 + $0x5b8] ss:$28 sps:$4 sm:$0xff]  }
 0x75f   :  { %15851 = vmatpush1.bf16.msra.mxu1 %v19655_v63  ;;  %v19718_v63 = vld [vmem:[#allocation14 + $0x938] ss:$28 sps:$4 sm:$0xff]  }
 0x760   :  { %15892 = vmatpush1.bf16.msra.mxu0 %v19658_v13  ;;  %15852 = vmatprep.subr.bf16.mxu1 %v19663_v3  ;;  %v19723_v13 = vld [vmem:[#allocation14 + $0x584] ss:$28 sps:$4 sm:$0xff]  }
 0x761   :  { %15893 = vmatprep.subr.bf16.mxu0 %v19666_v35  ;;  %v19726_v3 = vld [vmem:[#allocation14 + $0x904] ss:$28 sps:$4 sm:$0xff]  }
 0x762   :  { %v19721_v35 = vld [vmem:[#allocation14 + $0x580] ss:$28 sps:$4 sm:$0xff]  }
 0x763   :  { %15853 = vmatpush1.bf16.msra.mxu1 %v19661_v43  ;;  %v19724_v43 = vld [vmem:[#allocation14 + $0x900] ss:$28 sps:$4 sm:$0xff]  }
 0x764   :  { %15894 = vmatpush1.bf16.msra.mxu0 %v19664_v17  ;;  %15854 = vmatprep.subr.bf16.mxu1 %v19669_v27  ;;  %v19729_v17 = vld [vmem:[#allocation14 + $0x54c] ss:$28 sps:$4 sm:$0xff]  }
 0x765   :  { %15895 = vmatprep.subr.bf16.mxu0 %v19672_v57  ;;  %v19732_v27 = vld [vmem:[#allocation14 + $0x8cc] ss:$28 sps:$4 sm:$0xff]  }
 0x766   :  { %v19727_v57 = vld [vmem:[#allocation14 + $0x548] ss:$28 sps:$4 sm:$0xff]  }
 0x767   :  { %15855 = vmatpush1.bf16.msra.mxu1 %v19667_v9  ;;  %v19730_v9 = vld [vmem:[#allocation14 + $0x8c8] ss:$28 sps:$4 sm:$0xff]  }
 0x768   :  { %15896 = vmatpush1.bf16.msra.mxu0 %v19670_v19  ;;  %15856 = vmatprep.subr.bf16.mxu1 %v19675_v37  ;;  %v19735_v19 = vld [vmem:[#allocation14 + $0xc14] ss:$28 sps:$4 sm:$0xff]  }
 0x769   :  { %15897 = vmatprep.subr.bf16.mxu0 %v19678_v16  ;;  %v19738_v37 = vld [vmem:[#allocation14 + $0xf94] ss:$28 sps:$4 sm:$0xff]  }
 0x76a   :  { %v19733_v16 = vld [vmem:[#allocation14 + $0xc10] ss:$28 sps:$4 sm:$0xff]  }
 0x76b   :  { %15857 = vmatpush1.bf16.msra.mxu1 %v19673_v30  ;;  %v19736_v30 = vld [vmem:[#allocation14 + $0xf90] ss:$28 sps:$4 sm:$0xff]  }
 0x76c   :  { %15898 = vmatpush1.bf16.msra.mxu0 %v19676_v15  ;;  %15858 = vmatprep.subr.bf16.mxu1 %v19681_v54  ;;  %v19741_v15 = vld [vmem:[#allocation14 + $0xbdc] ss:$28 sps:$4 sm:$0xff]  }
 0x76d   :  { %15899 = vmatprep.subr.bf16.mxu0 %v19684_v40  ;;  %v19744_v40 = vld [vmem:[#allocation14 + $0xf5c] ss:$28 sps:$4 sm:$0xff]  }
 0x76f   :  { %15859 = vmatpush1.bf16.msra.mxu1 %v19679_v34 }
 0x770   :  { %15900 = vmatpush1.bf16.msra.mxu0 %v19682_v46  ;;  %15860 = vmatprep.subr.bf16.mxu1 %v19687_v41  ;;  %v19739_v41 = vld [vmem:[#allocation14 + $0xbd8] ss:$28 sps:$4 sm:$0xff]  }
 0x771   :  { %15901 = vmatprep.subr.bf16.mxu0 %v19690_v48 }
 0x773   :  { %15861 = vmatpush2.bf16.msra.mxu1 %v19685_v55  ;;  %v19742_v55 = vld [vmem:[#allocation14 + $0xf58] ss:$28 sps:$4 sm:$0xff]  }
 0x774   :  { %15902 = vmatpush2.bf16.msra.mxu0 %v19688_v32  ;;  %15862 = vmatprep.subr.bf16.mxu1 %v19693_v60  ;;  %v19747_v32 = vld [vmem:[#allocation14 + $0xba4] ss:$28 sps:$4 sm:$0xff]  }
 0x775   :  { %15903 = vmatprep.subr.bf16.mxu0 %v19696_v22 }
 0x777   :  { %15863 = vmatpush2.bf16.msra.mxu1 %v19691_v31 }
 0x778   :  { %15904 = vmatpush2.bf16.msra.mxu0 %v19694_v4  ;;  %15864 = vmatprep.subr.bf16.mxu1 %v19699_v24 }
 0x779   :  { %15905 = vmatprep.subr.bf16.mxu0 %v19702_v36 }
 0x77b   :  { %15865 = vmatpush2.bf16.msra.mxu1 %v19697_v53  ;;  %v19745_v53 = vld [vmem:[#allocation14 + $0xba0] ss:$28 sps:$4 sm:$0xff]  }
 0x77c   :  { %15906 = vmatpush2.bf16.msra.mxu0 %v19700_v52  ;;  %15866 = vmatprep.subr.bf16.mxu1 %v19705_v10  ;;  %v19748_v10 = vld [vmem:[#allocation14 + $0xf20] ss:$28 sps:$4 sm:$0xff]  }
 0x77d   :  { %15907 = vmatprep.subr.bf16.mxu0 %v19708_v50  ;;  %v19753_v50 = vld [vmem:[#allocation14 + $0xb6c] ss:$28 sps:$4 sm:$0xff]  }
 0x77f   :  { %15867 = vmatpush2.bf16.msra.mxu1 %v19703_v7 }
 0x780   :  { %15908 = vmatpush2.bf16.msra.mxu0 %v19706_v39  ;;  %15868 = vmatprep.subr.bf16.mxu1 %v19711_v1  ;;  %v19756_v39 = vld [vmem:[#allocation14 + $0xeec] ss:$28 sps:$4 sm:$0xff]  }
 0x781   :  { %15909 = vmatprep.subr.bf16.mxu0 %v19714_v18  ;;  %v19754_v1 = vld [vmem:[#allocation14 + $0xee8] ss:$28 sps:$4 sm:$0xff]   ;;  %v19759_v18 = vld [vmem:[#allocation14 + $0xb34] ss:$28 sps:$4 sm:$0xff]  }
 0x783   :  { %15869 = vmatpush2.bf16.msra.mxu1 %v19709_v21  ;;  %v19762_v21 = vld [vmem:[#allocation14 + $0xeb4] ss:$28 sps:$4 sm:$0xff]  }
 0x784   :  { %15910 = vmatpush2.bf16.msra.mxu0 %v19712_v11  ;;  %15870 = vmatprep.subr.bf16.mxu1 %v19717_v33  ;;  %v19757_v11 = vld [vmem:[#allocation14 + $0xb30] ss:$28 sps:$4 sm:$0xff]  }
 0x785   :  { %15911 = vmatprep.subr.bf16.mxu0 %v19720_v14  ;;  %v19760_v33 = vld [vmem:[#allocation14 + $0xeb0] ss:$28 sps:$4 sm:$0xff]   ;;  %v19765_v14 = vld [vmem:[#allocation14 + $0xafc] ss:$28 sps:$4 sm:$0xff]  }
 0x787   :  { %15871 = vmatpush2.bf16.msra.mxu1 %v19715_v61  ;;  %v19768_v61 = vld [vmem:[#allocation14 + $0xe7c] ss:$28 sps:$4 sm:$0xff]  }
 0x788   :  { %15912 = vmatpush2.bf16.msra.mxu0 %v19718_v63  ;;  %15872 = vmatprep.subr.bf16.mxu1 %v19723_v13  ;;  %v19763_v63 = vld [vmem:[#allocation14 + $0xaf8] ss:$28 sps:$4 sm:$0xff]  }
 0x789   :  { %15913 = vmatprep.subr.bf16.mxu0 %v19726_v3  ;;  %v19766_v13 = vld [vmem:[#allocation14 + $0xe78] ss:$28 sps:$4 sm:$0xff]   ;;  %v19771_v3 = vld [vmem:[#allocation14 + $0xac4] ss:$28 sps:$4 sm:$0xff]  }
 0x78b   :  { %15873 = vmatpush2.bf16.msra.mxu1 %v19721_v35  ;;  %v19774_v35 = vld [vmem:[#allocation14 + $0xe44] ss:$28 sps:$4 sm:$0xff]  }
 0x78c   :  { %15914 = vmatpush2.bf16.msra.mxu0 %v19724_v43  ;;  %15874 = vmatprep.subr.bf16.mxu1 %v19729_v17  ;;  %v19769_v43 = vld [vmem:[#allocation14 + $0xac0] ss:$28 sps:$4 sm:$0xff]  }
 0x78d   :  { %15915 = vmatprep.subr.bf16.mxu0 %v19732_v27  ;;  %v19772_v17 = vld [vmem:[#allocation14 + $0xe40] ss:$28 sps:$4 sm:$0xff]   ;;  %v19777_v27 = vld [vmem:[#allocation14 + $0xa8c] ss:$28 sps:$4 sm:$0xff]  }
 0x78f   :  { %15875 = vmatpush2.bf16.msra.mxu1 %v19727_v57  ;;  %v19780_v57 = vld [vmem:[#allocation14 + $0xe0c] ss:$28 sps:$4 sm:$0xff]  }
 0x790   :  { %15916 = vmatpush2.bf16.msra.mxu0 %v19730_v9  ;;  %15926 = vmatprep.subr.bf16.mxu1 %v19735_v19  ;;  %v19775_v9 = vld [vmem:[#allocation14 + $0xa88] ss:$28 sps:$4 sm:$0xff]  }
 0x791   :  { %15967 = vmatprep.subr.bf16.mxu0 %v19738_v37  ;;  %v19778_v19 = vld [vmem:[#allocation14 + $0xe08] ss:$28 sps:$4 sm:$0xff]   ;;  %v19783_v37 = vld [vmem:[#allocation14 + $0xdd4] ss:$28 sps:$4 sm:$0xff]  }
 0x792   :  { %v15632_v54 = vpop.f32.mrf.mxu1  ;;  %15877 = vmatmul.mubr.bf16.vlgmr.msra.gmra.mxu1 %v21152_v0 }
 0x793   :  { %v15633_v34 = vadd.f32 %v15632_v54, %v21233_v6  ;;  %v15673_v46 = vpop.f32.mrf.mxu0  ;;  %15918 = vmatmul.mubr.bf16.vlgmr.msra.gmra.mxu0 %v21154_v62  ;;  %15927 = vmatpush1.bf16.msra.mxu1 %v19733_v16  ;;  %v19750_v6 = vld [vmem:[#allocation14 + $0xf24] ss:$28 sps:$4 sm:$0xff]   ;;  %v19786_v16 = vld [vmem:[#allocation14 + $0x1154] ss:$28 sps:$4 sm:$0xff]   ;;  %v19789_v54 = vld [vmem:[#allocation14 + $0xd9c] ss:$28 sps:$4 sm:$0xff]  }
 0x794   :  { %15958 = vmatprep.mubr.bf16.mxu1 %v21156_v42  ;;  %15968 = vmatpush1.bf16.msra.mxu0 %v19736_v30  ;;  %v15634_v48 = vpop.f32.mrf.mxu1  ;;  %v19781_v30 = vld [vmem:[#allocation14 + $0xdd0] ss:$28 sps:$4 sm:$0xff]  }
 0x795   :  { %v21242_v60 = vadd.f32 %v15673_v46, %v15633_v34  ;;  %15999 = vmatprep.mubr.bf16.mxu0 %v21159_v2  ;;  %v15635_v22 = vadd.f32 %v15634_v48, %v21236_v12  ;;  %v15675_v31 = vpop.f32.mrf.mxu0  ;;  %15928 = vmatprep.subr.bf16.mxu1 %v19741_v15  ;;  %v19751_v12 = vld [vmem:[#allocation14 + $0xb68] ss:$28 sps:$4 sm:$0xff]   ;;  %v19784_v15 = vld [vmem:[#allocation14 + $0x1150] ss:$28 sps:$4 sm:$0xff]   ;;  %v19787_v34 = vld [vmem:[#allocation14 + $0xd98] ss:$28 sps:$4 sm:$0xff]  }
 0x796   :  { %v15636_v4 = vpop.f32.mrf.mxu1  ;;  %15969 = vmatprep.subr.bf16.mxu0 %v19744_v40  ;;  %v19792_v40 = vld [vmem:[#allocation14 + $0x111c] ss:$28 sps:$4 sm:$0xff]   ;;  %v19798_v48 = vld [vmem:[#allocation14 + $0x10e4] ss:$28 sps:$4 sm:$0xff]  }
 0x797   :  { %v21246_v24 = vadd.f32 %v15675_v31, %v15635_v22  ;;  %v15677_v36 = vpop.f32.mrf.mxu0  ;;  %15929 = vmatpush1.bf16.msra.mxu1 %v19739_v41  ;;  %v19790_v46 = vld [vmem:[#allocation14 + $0x1118] ss:$28 sps:$4 sm:$0xff]   ;;  %v19795_v41 = vld [vmem:[#allocation14 + $0xd64] ss:$28 sps:$4 sm:$0xff]   ;;  %v19801_v22 = vld [vmem:[#allocation14 + $0xd2c] ss:$28 sps:$4 sm:$0xff]  }
 0x798   :  { %15970 = vmatpush1.bf16.msra.mxu0 %v19742_v55  ;;  %v15637_v52 = vpop.f32.mrf.mxu1  ;;  %15930 = vmatprep.subr.bf16.mxu1 %v19747_v32  ;;  %v19793_v55 = vld [vmem:[#allocation14 + $0xd60] ss:$28 sps:$4 sm:$0xff]   ;;  %v19804_v31 = vld [vmem:[#allocation14 + $0x10ac] ss:$28 sps:$4 sm:$0xff]   ;;  %v19807_v36 = vld [vmem:[#allocation14 + $0xcf4] ss:$28 sps:$4 sm:$0xff]  }
 0x799   :  { %v15678_v7 = vpop.f32.mrf.mxu0  ;;  %15971 = vmatprep.subr.bf16.mxu0 %v19750_v6  ;;  %v19796_v32 = vld [vmem:[#allocation14 + $0x10e0] ss:$28 sps:$4 sm:$0xff]   ;;  %v19799_v6 = vld [vmem:[#allocation14 + $0xd28] ss:$28 sps:$4 sm:$0xff]   ;;  %v19805_v52 = vld [vmem:[#allocation14 + $0xcf0] ss:$28 sps:$4 sm:$0xff]  }
 0x79a   :  { %v19802_v4 = vld [vmem:[#allocation14 + $0x10a8] ss:$28 sps:$4 sm:$0xff]   ;;  %v19816_v7 = vld [vmem:[#allocation14 + $0x103c] ss:$28 sps:$4 sm:$0xff]  }
 0x79b   :  { %15931 = vmatpush1.bf16.msra.mxu1 %v19745_v53  ;;  %v19810_v53 = vld [vmem:[#allocation14 + $0x1074] ss:$28 sps:$4 sm:$0xff]  }
 0x79c   :  { %15972 = vmatpush1.bf16.msra.mxu0 %v19748_v10  ;;  %15932 = vmatprep.subr.bf16.mxu1 %v19753_v50  ;;  %v19808_v10 = vld [vmem:[#allocation14 + $0x1070] ss:$28 sps:$4 sm:$0xff]   ;;  %v19813_v50 = vld [vmem:[#allocation14 + $0xcbc] ss:$28 sps:$4 sm:$0xff]  }
 0x79d   :  { %15973 = vmatprep.subr.bf16.mxu0 %v19756_v39  ;;  %v19811_v39 = vld [vmem:[#allocation14 + $0xcb8] ss:$28 sps:$4 sm:$0xff]  }
 0x79f   :  { %15933 = vmatpush1.bf16.msra.mxu1 %v19751_v12  ;;  %v19814_v12 = vld [vmem:[#allocation14 + $0x1038] ss:$28 sps:$4 sm:$0xff]  }
 0x7a0   :  { %15974 = vmatpush1.bf16.msra.mxu0 %v19754_v1  ;;  %15934 = vmatprep.subr.bf16.mxu1 %v19759_v18  ;;  %v19819_v1 = vld [vmem:[#allocation14 + $0xc84] ss:$28 sps:$4 sm:$0xff]  }
 0x7a1   :  { %15975 = vmatprep.subr.bf16.mxu0 %v19762_v21  ;;  %v19822_v18 = vld [vmem:[#allocation14 + $0x1004] ss:$28 sps:$4 sm:$0xff]  }
 0x7a2   :  { %v19817_v21 = vld [vmem:[#allocation14 + $0xc80] ss:$28 sps:$4 sm:$0xff]  }
 0x7a3   :  { %15935 = vmatpush1.bf16.msra.mxu1 %v19757_v11  ;;  %v19820_v11 = vld [vmem:[#allocation14 + $0x1000] ss:$28 sps:$4 sm:$0xff]  }
 0x7a4   :  { %15976 = vmatpush1.bf16.msra.mxu0 %v19760_v33  ;;  %15936 = vmatprep.subr.bf16.mxu1 %v19765_v14  ;;  %v19825_v33 = vld [vmem:[#allocation14 + $0xc4c] ss:$28 sps:$4 sm:$0xff]  }
 0x7a5   :  { %15977 = vmatprep.subr.bf16.mxu0 %v19768_v61  ;;  %v19828_v14 = vld [vmem:[#allocation14 + $0xfcc] ss:$28 sps:$4 sm:$0xff]  }
 0x7a6   :  { %v19823_v61 = vld [vmem:[#allocation14 + $0xc48] ss:$28 sps:$4 sm:$0xff]  }
 0x7a7   :  { %15937 = vmatpush1.bf16.msra.mxu1 %v19763_v63  ;;  %v19826_v63 = vld [vmem:[#allocation14 + $0xfc8] ss:$28 sps:$4 sm:$0xff]  }
 0x7a8   :  { %15978 = vmatpush1.bf16.msra.mxu0 %v19766_v13  ;;  %15938 = vmatprep.subr.bf16.mxu1 %v19771_v3  ;;  %v19831_v13 = vld [vmem:[#allocation14 + $0x1314] ss:$28 sps:$4 sm:$0xff]  }
 0x7a9   :  { %15979 = vmatprep.subr.bf16.mxu0 %v19774_v35  ;;  %v19834_v3 = vld [vmem:[#allocation14 + $0x1694] ss:$28 sps:$4 sm:$0xff]  }
 0x7aa   :  { %v19829_v35 = vld [vmem:[#allocation14 + $0x1310] ss:$28 sps:$4 sm:$0xff]  }
 0x7ab   :  { %15939 = vmatpush1.bf16.msra.mxu1 %v19769_v43  ;;  %v19832_v43 = vld [vmem:[#allocation14 + $0x1690] ss:$28 sps:$4 sm:$0xff]  }
 0x7ac   :  { %15980 = vmatpush1.bf16.msra.mxu0 %v19772_v17  ;;  %15940 = vmatprep.subr.bf16.mxu1 %v19777_v27  ;;  %v19837_v17 = vld [vmem:[#allocation14 + $0x12dc] ss:$28 sps:$4 sm:$0xff]  }
 0x7ad   :  { %15981 = vmatprep.subr.bf16.mxu0 %v19780_v57  ;;  %v19840_v57 = vld [vmem:[#allocation14 + $0x165c] ss:$28 sps:$4 sm:$0xff]  }
 0x7af   :  { %15941 = vmatpush1.bf16.msra.mxu1 %v19775_v9 }
 0x7b0   :  { %15982 = vmatpush1.bf16.msra.mxu0 %v19778_v19  ;;  %15942 = vmatprep.subr.bf16.mxu1 %v19783_v37  ;;  %v19835_v19 = vld [vmem:[#allocation14 + $0x12d8] ss:$28 sps:$4 sm:$0xff]  }
 0x7b1   :  { %15983 = vmatprep.subr.bf16.mxu0 %v19786_v16  ;;  %v19838_v16 = vld [vmem:[#allocation14 + $0x1658] ss:$28 sps:$4 sm:$0xff]  }
 0x7b3   :  { %15943 = vmatpush2.bf16.msra.mxu1 %v19781_v30  ;;  %v19843_v30 = vld [vmem:[#allocation14 + $0x12a4] ss:$28 sps:$4 sm:$0xff]  }
 0x7b4   :  { %15984 = vmatpush2.bf16.msra.mxu0 %v19784_v15  ;;  %15944 = vmatprep.subr.bf16.mxu1 %v19789_v54  ;;  %v19846_v54 = vld [vmem:[#allocation14 + $0x1624] ss:$28 sps:$4 sm:$0xff]  }
 0x7b5   :  { %15985 = vmatprep.subr.bf16.mxu0 %v19792_v40 }
 0x7b7   :  { %15945 = vmatpush2.bf16.msra.mxu1 %v19787_v34 }
 0x7b8   :  { %15986 = vmatpush2.bf16.msra.mxu0 %v19790_v46  ;;  %15946 = vmatprep.subr.bf16.mxu1 %v19795_v41  ;;  %v19841_v46 = vld [vmem:[#allocation14 + $0x12a0] ss:$28 sps:$4 sm:$0xff]  }
 0x7b9   :  { %15987 = vmatprep.subr.bf16.mxu0 %v19798_v48  ;;  %v19844_v48 = vld [vmem:[#allocation14 + $0x1620] ss:$28 sps:$4 sm:$0xff]  }
 0x7bb   :  { %15947 = vmatpush2.bf16.msra.mxu1 %v19793_v55  ;;  %v19849_v55 = vld [vmem:[#allocation14 + $0x126c] ss:$28 sps:$4 sm:$0xff]  }
 0x7bc   :  { %15988 = vmatpush2.bf16.msra.mxu0 %v19796_v32  ;;  %15948 = vmatprep.subr.bf16.mxu1 %v19801_v22  ;;  %v19852_v22 = vld [vmem:[#allocation14 + $0x15ec] ss:$28 sps:$4 sm:$0xff]  }
 0x7bd   :  { %15989 = vmatprep.subr.bf16.mxu0 %v19804_v31  ;;  %v19847_v31 = vld [vmem:[#allocation14 + $0x1268] ss:$28 sps:$4 sm:$0xff]  }
 0x7bf   :  { %15949 = vmatpush2.bf16.msra.mxu1 %v19799_v6  ;;  %v19850_v6 = vld [vmem:[#allocation14 + $0x15e8] ss:$28 sps:$4 sm:$0xff]  }
 0x7c0   :  { %15990 = vmatpush2.bf16.msra.mxu0 %v19802_v4  ;;  %15950 = vmatprep.subr.bf16.mxu1 %v19807_v36  ;;  %v19855_v4 = vld [vmem:[#allocation14 + $0x1234] ss:$28 sps:$4 sm:$0xff]  }
 0x7c1   :  { %15991 = vmatprep.subr.bf16.mxu0 %v19810_v53  ;;  %v19858_v36 = vld [vmem:[#allocation14 + $0x15b4] ss:$28 sps:$4 sm:$0xff]  }
 0x7c2   :  { %v19853_v53 = vld [vmem:[#allocation14 + $0x1230] ss:$28 sps:$4 sm:$0xff]  }
 0x7c3   :  { %15951 = vmatpush2.bf16.msra.mxu1 %v19805_v52  ;;  %v19856_v52 = vld [vmem:[#allocation14 + $0x15b0] ss:$28 sps:$4 sm:$0xff]  }
 0x7c4   :  { %15992 = vmatpush2.bf16.msra.mxu0 %v19808_v10  ;;  %15952 = vmatprep.subr.bf16.mxu1 %v19813_v50  ;;  %v19861_v10 = vld [vmem:[#allocation14 + $0x11fc] ss:$28 sps:$4 sm:$0xff]  }
 0x7c5   :  { %15993 = vmatprep.subr.bf16.mxu0 %v19816_v7  ;;  %v19864_v50 = vld [vmem:[#allocation14 + $0x157c] ss:$28 sps:$4 sm:$0xff]  }
 0x7c6   :  { %v19859_v7 = vld [vmem:[#allocation14 + $0x11f8] ss:$28 sps:$4 sm:$0xff]  }
 0x7c7   :  { %15953 = vmatpush2.bf16.msra.mxu1 %v19811_v39  ;;  %v19862_v39 = vld [vmem:[#allocation14 + $0x1578] ss:$28 sps:$4 sm:$0xff]  }
 0x7c8   :  { %15994 = vmatpush2.bf16.msra.mxu0 %v19814_v12  ;;  %15954 = vmatprep.subr.bf16.mxu1 %v19819_v1  ;;  %v19867_v12 = vld [vmem:[#allocation14 + $0x11c4] ss:$28 sps:$4 sm:$0xff]  }
 0x7c9   :  { %15995 = vmatprep.subr.bf16.mxu0 %v19822_v18  ;;  %v19870_v1 = vld [vmem:[#allocation14 + $0x1544] ss:$28 sps:$4 sm:$0xff]  }
 0x7ca   :  { %v19865_v18 = vld [vmem:[#allocation14 + $0x11c0] ss:$28 sps:$4 sm:$0xff]  }
 0x7cb   :  { %15955 = vmatpush2.bf16.msra.mxu1 %v19817_v21  ;;  %v19868_v21 = vld [vmem:[#allocation14 + $0x1540] ss:$28 sps:$4 sm:$0xff]  }
 0x7cc   :  { %15996 = vmatpush2.bf16.msra.mxu0 %v19820_v11  ;;  %15956 = vmatprep.subr.bf16.mxu1 %v19825_v33  ;;  %v19873_v11 = vld [vmem:[#allocation14 + $0x118c] ss:$28 sps:$4 sm:$0xff]  }
 0x7cd   :  { %15997 = vmatprep.subr.bf16.mxu0 %v19828_v14  ;;  %v19876_v33 = vld [vmem:[#allocation14 + $0x150c] ss:$28 sps:$4 sm:$0xff]  }
 0x7ce   :  { %v19871_v14 = vld [vmem:[#allocation14 + $0x1188] ss:$28 sps:$4 sm:$0xff]  }
 0x7cf   :  { %15957 = vmatpush2.bf16.msra.mxu1 %v19823_v61  ;;  %v19874_v61 = vld [vmem:[#allocation14 + $0x1508] ss:$28 sps:$4 sm:$0xff]  }
 0x7d0   :  { %15998 = vmatpush2.bf16.msra.mxu0 %v19826_v63  ;;  %16008 = vmatprep.subr.bf16.mxu1 %v19831_v13  ;;  %v19879_v63 = vld [vmem:[#allocation14 + $0x14d4] ss:$28 sps:$4 sm:$0xff]  }
 0x7d1   :  { %16049 = vmatprep.subr.bf16.mxu0 %v19834_v3  ;;  %v19882_v13 = vld [vmem:[#allocation14 + $0x1854] ss:$28 sps:$4 sm:$0xff]  }
 0x7d2   :  { %v21248_v27 = vpop.f32.mrf.mxu1  ;;  %15959 = vmatmul.mubr.bf16.vlgmr.msra.gmra.mxu1 %v21180_v56  ;;  %v19877_v3 = vld [vmem:[#allocation14 + $0x14d0] ss:$28 sps:$4 sm:$0xff]  }
 0x7d3   :  { %v21251_v9 = vpop.f32.mrf.mxu0  ;;  %16000 = vmatmul.mubr.bf16.vlgmr.msra.gmra.mxu0 %v21182_v58  ;;  %16009 = vmatpush1.bf16.msra.mxu1 %v19829_v35  ;;  %v19880_v35 = vld [vmem:[#allocation14 + $0x1850] ss:$28 sps:$4 sm:$0xff]  }
 0x7d4   :  { %16040 = vmatprep.mubr.bf16.mxu1 %v21185_v45  ;;  %16050 = vmatpush1.bf16.msra.mxu0 %v19832_v43  ;;  %v21255_v37 = vpop.f32.mrf.mxu1  ;;  %v19885_v43 = vld [vmem:[#allocation14 + $0x149c] ss:$28 sps:$4 sm:$0xff]  }
 0x7d5   :  { %16081 = vmatprep.mubr.bf16.mxu0 %v21188_v59  ;;  %v21258_v15 = vpop.f32.mrf.mxu0  ;;  %16010 = vmatprep.subr.bf16.mxu1 %v19837_v17  ;;  %v19888_v17 = vld [vmem:[#allocation14 + $0x181c] ss:$28 sps:$4 sm:$0xff]  }
 0x7d6   :  { %v15718_v40 = vpop.f32.mrf.mxu1  ;;  %16051 = vmatprep.subr.bf16.mxu0 %v19840_v57  ;;  %v19883_v57 = vld [vmem:[#allocation14 + $0x1498] ss:$28 sps:$4 sm:$0xff]  }
 0x7d7   :  { %v15759_v34 = vpop.f32.mrf.mxu0  ;;  %16011 = vmatpush1.bf16.msra.mxu1 %v19835_v19  ;;  %v19886_v19 = vld [vmem:[#allocation14 + $0x1818] ss:$28 sps:$4 sm:$0xff]   ;;  %v19892_v40 = vld [vmem:[#allocation14 + $0x17e0] ss:$28 sps:$4 sm:$0xff]  }
 0x7d8   :  { %16052 = vmatpush1.bf16.msra.mxu0 %v19838_v16  ;;  %v15719_v41 = vpop.f32.mrf.mxu1  ;;  %16012 = vmatprep.subr.bf16.mxu1 %v19843_v30  ;;  %v19891_v16 = vld [vmem:[#allocation14 + $0x1464] ss:$28 sps:$4 sm:$0xff]   ;;  %v19897_v34 = vld [vmem:[#allocation14 + $0x142c] ss:$28 sps:$4 sm:$0xff]  }
 0x7d9   :  { %v15760_v32 = vpop.f32.mrf.mxu0  ;;  %16053 = vmatprep.subr.bf16.mxu0 %v19846_v54  ;;  %v19894_v30 = vld [vmem:[#allocation14 + $0x17e4] ss:$28 sps:$4 sm:$0xff]  }
 0x7da   :  { %v19889_v54 = vld [vmem:[#allocation14 + $0x1460] ss:$28 sps:$4 sm:$0xff]   ;;  %v19895_v41 = vld [vmem:[#allocation14 + $0x1428] ss:$28 sps:$4 sm:$0xff]   ;;  %v19906_v32 = vld [vmem:[#allocation14 + $0x1774] ss:$28 sps:$4 sm:$0xff]  }
 0x7db   :  { %16013 = vmatpush1.bf16.msra.mxu1 %v19841_v46  ;;  %v19900_v46 = vld [vmem:[#allocation14 + $0x17ac] ss:$28 sps:$4 sm:$0xff]  }
 0x7dc   :  { %16054 = vmatpush1.bf16.msra.mxu0 %v19844_v48  ;;  %16014 = vmatprep.subr.bf16.mxu1 %v19849_v55  ;;  %v19898_v48 = vld [vmem:[#allocation14 + $0x17a8] ss:$28 sps:$4 sm:$0xff]   ;;  %v19903_v55 = vld [vmem:[#allocation14 + $0x13f4] ss:$28 sps:$4 sm:$0xff]  }
 0x7dd   :  { %16055 = vmatprep.subr.bf16.mxu0 %v19852_v22  ;;  %v19901_v22 = vld [vmem:[#allocation14 + $0x13f0] ss:$28 sps:$4 sm:$0xff]  }
 0x7df   :  { %16015 = vmatpush1.bf16.msra.mxu1 %v19847_v31  ;;  %v19904_v31 = vld [vmem:[#allocation14 + $0x1770] ss:$28 sps:$4 sm:$0xff]  }
 0x7e0   :  { %16056 = vmatpush1.bf16.msra.mxu0 %v19850_v6  ;;  %16016 = vmatprep.subr.bf16.mxu1 %v19855_v4  ;;  %v19909_v6 = vld [vmem:[#allocation14 + $0x13bc] ss:$28 sps:$4 sm:$0xff]  }
 0x7e1   :  { %16057 = vmatprep.subr.bf16.mxu0 %v19858_v36  ;;  %v19912_v4 = vld [vmem:[#allocation14 + $0x173c] ss:$28 sps:$4 sm:$0xff]  }
 0x7e2   :  { %v19907_v36 = vld [vmem:[#allocation14 + $0x13b8] ss:$28 sps:$4 sm:$0xff]  }
 0x7e3   :  { %16017 = vmatpush1.bf16.msra.mxu1 %v19853_v53  ;;  %v19910_v53 = vld [vmem:[#allocation14 + $0x1738] ss:$28 sps:$4 sm:$0xff]  }
 0x7e4   :  { %16058 = vmatpush1.bf16.msra.mxu0 %v19856_v52  ;;  %16018 = vmatprep.subr.bf16.mxu1 %v19861_v10  ;;  %v19915_v52 = vld [vmem:[#allocation14 + $0x1384] ss:$28 sps:$4 sm:$0xff]  }
 0x7e5   :  { %16059 = vmatprep.subr.bf16.mxu0 %v19864_v50  ;;  %v19918_v10 = vld [vmem:[#allocation14 + $0x1704] ss:$28 sps:$4 sm:$0xff]  }
 0x7e6   :  { %v19913_v50 = vld [vmem:[#allocation14 + $0x1380] ss:$28 sps:$4 sm:$0xff]  }
 0x7e7   :  { %16019 = vmatpush1.bf16.msra.mxu1 %v19859_v7  ;;  %v19916_v7 = vld [vmem:[#allocation14 + $0x1700] ss:$28 sps:$4 sm:$0xff]  }
 0x7e8   :  { %16060 = vmatpush1.bf16.msra.mxu0 %v19862_v39  ;;  %16020 = vmatprep.subr.bf16.mxu1 %v19867_v12  ;;  %v19921_v39 = vld [vmem:[#allocation14 + $0x134c] ss:$28 sps:$4 sm:$0xff]  }
 0x7e9   :  { %16061 = vmatprep.subr.bf16.mxu0 %v19870_v1  ;;  %v19924_v12 = vld [vmem:[#allocation14 + $0x16cc] ss:$28 sps:$4 sm:$0xff]  }
 0x7ea   :  { %v19919_v1 = vld [vmem:[#allocation14 + $0x1348] ss:$28 sps:$4 sm:$0xff]  }
 0x7eb   :  { %16021 = vmatpush1.bf16.msra.mxu1 %v19865_v18  ;;  %v19922_v18 = vld [vmem:[#allocation14 + $0x16c8] ss:$28 sps:$4 sm:$0xff]  }
 0x7ec   :  { %16062 = vmatpush1.bf16.msra.mxu0 %v19868_v21  ;;  %16022 = vmatprep.subr.bf16.mxu1 %v19873_v11  ;;  %v19927_v21 = vld [vmem:[#allocation14 + $0x1a14] ss:$28 sps:$4 sm:$0xff]   ;;  %v15715_v11 = vadd.f32 %v21248_v27, %v21242_v60 }
 0x7ed   :  { %16063 = vmatprep.subr.bf16.mxu0 %v19876_v33  ;;  %v19930_v33 = vld [vmem:[#allocation14 + $0x19c] ss:$28 sps:$4 sm:$0xff]  }
 0x7ef   :  { %16023 = vmatpush1.bf16.msra.mxu1 %v19871_v14  ;;  %v15717_v14 = vadd.f32 %v21255_v37, %v21246_v24  ;;  %v19931_v24 = vld [vmem:[#allocation14 + $0x19d8] ss:$28 sps:$4 sm:$0xff]  }
 0x7f0   :  { %16064 = vmatpush1.bf16.msra.mxu0 %v19874_v61  ;;  %16024 = vmatprep.subr.bf16.mxu1 %v19879_v63  ;;  %v19925_v61 = vld [vmem:[#allocation14 + $0x1a10] ss:$28 sps:$4 sm:$0xff]   ;;  %v19928_v63 = vld [vmem:[#allocation14 + $0x198] ss:$28 sps:$4 sm:$0xff]  }
 0x7f1   :  { %16065 = vmatprep.subr.bf16.mxu0 %v19882_v13  ;;  %v15756_v13 = vadd.f32 %v21251_v9, %v15715_v11  ;;  %v15758_v60 = vadd.f32 %v21258_v15, %v15717_v14  ;;  %v19934_v9 = vld [vmem:[#allocation14 + $0x160] ss:$28 sps:$4 sm:$0xff]   ;;  %v19942_v15 = vld [vmem:[#allocation14 + $0x12c] ss:$28 sps:$4 sm:$0xff]  }
 0x7f2   :  { %v19969_v11 = vld [vmem:[#allocation14 + $0x188c] ss:$28 sps:$4 sm:$0xff]  }
 0x7f3   :  { %16025 = vmatpush2.bf16.msra.mxu1 %v19877_v3  ;;  %v19933_v3 = vld [vmem:[#allocation14 + $0x19dc] ss:$28 sps:$4 sm:$0xff]   ;;  %v19967_v14 = vld [vmem:[#allocation14 + $0x1888] ss:$28 sps:$4 sm:$0xff]  }
 0x7f4   :  { %16066 = vmatpush2.bf16.msra.mxu0 %v19880_v35  ;;  %16026 = vmatprep.subr.bf16.mxu1 %v19885_v43  ;;  %v19936_v43 = vld [vmem:[#allocation14 + $0x164] ss:$28 sps:$4 sm:$0xff]  }
 0x7f5   :  { %16067 = vmatprep.subr.bf16.mxu0 %v19888_v17 }
 0x7f7   :  { %16027 = vmatpush2.bf16.msra.mxu1 %v19883_v57  ;;  %v19939_v57 = vld [vmem:[#allocation14 + $0x19a4] ss:$28 sps:$4 sm:$0xff]  }
 0x7f8   :  { %16068 = vmatpush2.bf16.msra.mxu0 %v19886_v19  ;;  %16028 = vmatprep.subr.bf16.mxu1 %v19891_v16 }
 0x7f9   :  { %16069 = vmatprep.subr.bf16.mxu0 %v19894_v30 }
 0x7fb   :  { %16029 = vmatpush2.bf16.msra.mxu1 %v19889_v54 }
 0x7fc   :  { %16070 = vmatpush2.bf16.msra.mxu0 %v19892_v40  ;;  %16030 = vmatprep.subr.bf16.mxu1 %v19897_v34  ;;  %v19937_v40 = vld [vmem:[#allocation14 + $0x19a0] ss:$28 sps:$4 sm:$0xff]  }
 0x7fd   :  { %16071 = vmatprep.subr.bf16.mxu0 %v19900_v46  ;;  %v19940_v46 = vld [vmem:[#allocation14 + $0x128] ss:$28 sps:$4 sm:$0xff]  }
 0x7ff   :  { %16031 = vmatpush2.bf16.msra.mxu1 %v19895_v41  ;;  %v19945_v41 = vld [vmem:[#allocation14 + $0x196c] ss:$28 sps:$4 sm:$0xff]  }
 0x800   :  { %16072 = vmatpush2.bf16.msra.mxu0 %v19898_v48  ;;  %16032 = vmatprep.subr.bf16.mxu1 %v19903_v55  ;;  %v19948_v55 = vld [vmem:[#allocation14 + $0xf4] ss:$28 sps:$4 sm:$0xff]  }
 0x801   :  { %16073 = vmatprep.subr.bf16.mxu0 %v19906_v32  ;;  %v19943_v32 = vld [vmem:[#allocation14 + $0x1968] ss:$28 sps:$4 sm:$0xff]  }
 0x803   :  { %16033 = vmatpush2.bf16.msra.mxu1 %v19901_v22  ;;  %v19946_v22 = vld [vmem:[#allocation14 + $0xf0] ss:$28 sps:$4 sm:$0xff]  }
 0x804   :  { %16074 = vmatpush2.bf16.msra.mxu0 %v19904_v31  ;;  %16034 = vmatprep.subr.bf16.mxu1 %v19909_v6  ;;  %v19951_v31 = vld [vmem:[#allocation14 + $0x1934] ss:$28 sps:$4 sm:$0xff]   ;;  %v19954_v6 = vld [vmem:[#allocation14 + $0xbc] ss:$28 sps:$4 sm:$0xff]  }
 0x805   :  { %16075 = vmatprep.subr.bf16.mxu0 %v19912_v4  ;;  %v19949_v4 = vld [vmem:[#allocation14 + $0x1930] ss:$28 sps:$4 sm:$0xff]  }
 0x807   :  { %16035 = vmatpush2.bf16.msra.mxu1 %v19907_v36  ;;  %v19952_v36 = vld [vmem:[#allocation14 + $0xb8] ss:$28 sps:$4 sm:$0xff]  }
 0x808   :  { %16076 = vmatpush2.bf16.msra.mxu0 %v19910_v53  ;;  %16036 = vmatprep.subr.bf16.mxu1 %v19915_v52  ;;  %v19957_v53 = vld [vmem:[#allocation14 + $0x18fc] ss:$28 sps:$4 sm:$0xff]   ;;  %v19960_v52 = vld [vmem:[#allocation14 + $0x84] ss:$28 sps:$4 sm:$0xff]  }
 0x809   :  { %16077 = vmatprep.subr.bf16.mxu0 %v19918_v10 }
 0x80b   :  { %16037 = vmatpush2.bf16.msra.mxu1 %v19913_v50  ;;  %v19955_v50 = vld [vmem:[#allocation14 + $0x18f8] ss:$28 sps:$4 sm:$0xff]  }
 0x80c   :  { %16078 = vmatpush2.bf16.msra.mxu0 %v19916_v7  ;;  %16038 = vmatprep.subr.bf16.mxu1 %v19921_v39  ;;  %v19958_v39 = vld [vmem:[#allocation14 + $0x80] ss:$28 sps:$4 sm:$0xff]  }
 0x80d   :  { %16079 = vmatprep.subr.bf16.mxu0 %v19924_v12  ;;  %v19963_v12 = vld [vmem:[#allocation14 + $0x18c4] ss:$28 sps:$4 sm:$0xff]  }
 0x80f   :  { %16039 = vmatpush2.bf16.msra.mxu1 %v19919_v1  ;;  %v19966_v1 = vld [vmem:[#allocation14 + $0x4c] ss:$28 sps:$4 sm:$0xff]  }
 0x810   :  { %16080 = vmatpush2.bf16.msra.mxu0 %v19922_v18  ;;  %16090 = vmatprep.subr.bf16.mxu1 %v19927_v21  ;;  %v19961_v18 = vld [vmem:[#allocation14 + $0x18c0] ss:$28 sps:$4 sm:$0xff]   ;;  %v19964_v21 = vld [vmem:[#allocation14 + $0x48] ss:$28 sps:$4 sm:$0xff]  }
 0x811   :  { %16131 = vmatprep.subr.bf16.mxu0 %v19930_v33  ;;  %v19972_v33 = vld [vmem:[#allocation14 + $0x14] ss:$28 sps:$4 sm:$0xff]  }
 0x812   :  { %v15796_v35 = vpop.f32.mrf.mxu1  ;;  %16041 = vmatmul.mubr.bf16.vlgmr.msra.gmra.mxu1 %v21205_v5 }
 0x813   :  { %v15797_v27 = vadd.f32 %v15796_v35, %v15756_v13  ;;  %v21267_v17 = vpop.f32.mrf.mxu0  ;;  %16082 = vmatmul.mubr.bf16.vlgmr.msra.gmra.mxu0 %v21207_v47  ;;  %16091 = vmatpush1.bf16.msra.mxu1 %v19925_v61  ;;  %v19970_v61 = vld [vmem:[#allocation14 + $0x10] ss:$28 sps:$4 sm:$0xff]   ;;  %v19978_v13 = vld [vmem:[#allocation14 + $0x35c] ss:$28 sps:$4 sm:$0xff]  }
 0x814   :  { %16122 = vmatprep.mubr.bf16.mxu1 %v21219_v29  ;;  %16132 = vmatpush1.bf16.msra.mxu0 %v19928_v63  ;;  %v15798_v37 = vpop.f32.mrf.mxu1  ;;  %v19975_v63 = vld [vmem:[#allocation14 + $0x1bd4] ss:$28 sps:$4 sm:$0xff]  }
 0x815   :  { %20485 = vtanh.f32 %v15797_v27  ;;  %16163 = vmatprep.mubr.bf16.mxu0 %v21108_v20  ;;  %v15799_v19 = vadd.f32 %v15798_v37, %v15758_v60  ;;  %v21272_v16 = vpop.f32.mrf.mxu0  ;;  %16092 = vmatprep.subr.bf16.mxu1 %v19933_v3  ;;  %v19973_v3 = vld [vmem:[#allocation14 + $0x1bd0] ss:$28 sps:$4 sm:$0xff]   ;;  %v19976_v35 = vld [vmem:[#allocation14 + $0x358] ss:$28 sps:$4 sm:$0xff]   ;;  %v19984_v60 = vld [vmem:[#allocation14 + $0x324] ss:$28 sps:$4 sm:$0xff]  }
 0x816   :  { %v15800_v30 = vpop.f32.mrf.mxu1  ;;  %16133 = vmatprep.subr.bf16.mxu0 %v19936_v43  ;;  %v19981_v43 = vld [vmem:[#allocation14 + $0x1b9c] ss:$28 sps:$4 sm:$0xff]   ;;  %v19987_v37 = vld [vmem:[#allocation14 + $0x1b64] ss:$28 sps:$4 sm:$0xff]  }
 0x817   :  { %20487 = vtanh.f32 %v15799_v19  ;;  %v15841_v54 = vpop.f32.mrf.mxu0  ;;  %16093 = vmatpush1.bf16.msra.mxu1 %v19931_v24  ;;  %v19979_v27 = vld [vmem:[#allocation14 + $0x1b98] ss:$28 sps:$4 sm:$0xff]   ;;  %v19982_v24 = vld [vmem:[#allocation14 + $0x320] ss:$28 sps:$4 sm:$0xff]   ;;  %v19988_v19 = vld [vmem:[#allocation14 + $0x2e8] ss:$28 sps:$4 sm:$0xff]  }
 0x818   :  { %16134 = vmatpush1.bf16.msra.mxu0 %v19934_v9  ;;  %v15801_v34 = vpop.f32.mrf.mxu1  ;;  %16094 = vmatprep.subr.bf16.mxu1 %v19939_v57  ;;  %v19990_v9 = vld [vmem:[#allocation14 + $0x2ec] ss:$28 sps:$4 sm:$0xff]   ;;  %v19985_v57 = vld [vmem:[#allocation14 + $0x1b60] ss:$28 sps:$4 sm:$0xff]   ;;  %v19996_v30 = vld [vmem:[#allocation14 + $0x2b4] ss:$28 sps:$4 sm:$0xff]  }
 0x819   :  { %v15842_v48 = vpop.f32.mrf.mxu0  ;;  %16135 = vmatprep.subr.bf16.mxu0 %v19942_v15  ;;  %v19993_v15 = vld [vmem:[#allocation14 + $0x1b2c] ss:$28 sps:$4 sm:$0xff]   ;;  %v19999_v34 = vld [vmem:[#allocation14 + $0x1af4] ss:$28 sps:$4 sm:$0xff]  }
 0x81a   :  { %v19991_v54 = vld [vmem:[#allocation14 + $0x1b28] ss:$28 sps:$4 sm:$0xff]   ;;  %v20000_v48 = vld [vmem:[#allocation14 + $0x278] ss:$28 sps:$4 sm:$0xff]  }
 0x81b   :  { %16095 = vmatpush1.bf16.msra.mxu1 %v19937_v40  ;;  %v19994_v40 = vld [vmem:[#allocation14 + $0x2b0] ss:$28 sps:$4 sm:$0xff]  }
 0x81c   :  { %16136 = vmatpush1.bf16.msra.mxu0 %v19940_v46  ;;  %16096 = vmatprep.subr.bf16.mxu1 %v19945_v41  ;;  %v20002_v46 = vld [vmem:[#allocation14 + $0x27c] ss:$28 sps:$4 sm:$0xff]   ;;  %v19997_v41 = vld [vmem:[#allocation14 + $0x1af0] ss:$28 sps:$4 sm:$0xff]  }
 0x81d   :  { %16137 = vmatprep.subr.bf16.mxu0 %v19948_v55  ;;  %v20005_v55 = vld [vmem:[#allocation14 + $0x1abc] ss:$28 sps:$4 sm:$0xff]  }
 0x81f   :  { %16097 = vmatpush1.bf16.msra.mxu1 %v19943_v32  ;;  %v20008_v32 = vld [vmem:[#allocation14 + $0x244] ss:$28 sps:$4 sm:$0xff]  }
 0x820   :  { %16138 = vmatpush1.bf16.msra.mxu0 %v19946_v22  ;;  %16098 = vmatprep.subr.bf16.mxu1 %v19951_v31  ;;  %v20003_v22 = vld [vmem:[#allocation14 + $0x1ab8] ss:$28 sps:$4 sm:$0xff]   ;;  %v20006_v31 = vld [vmem:[#allocation14 + $0x240] ss:$28 sps:$4 sm:$0xff]  }
 0x821   :  { %16139 = vmatprep.subr.bf16.mxu0 %v19954_v6  ;;  %v20011_v6 = vld [vmem:[#allocation14 + $0x1a84] ss:$28 sps:$4 sm:$0xff]  }
 0x822   :  { %v20486_v10 = vpop.eup %20485 }
 0x823   :  { %16786 = vst [vmem:[#allocation17] sm:$0xff] %v20486_v10  ;;  %16099 = vmatpush1.bf16.msra.mxu1 %v19949_v4  ;;  %v20014_v4 = vld [vmem:[#allocation14 + $0x20c] ss:$28 sps:$4 sm:$0xff]   ;;  %v20020_v10 = vld [vmem:[#allocation14 + $0x1d4] ss:$28 sps:$4 sm:$0xff]  }
 0x824   :  { %v20488_v7 = vpop.eup %20487  ;;  %16140 = vmatpush1.bf16.msra.mxu0 %v19952_v36  ;;  %16100 = vmatprep.subr.bf16.mxu1 %v19957_v53  ;;  %v20009_v36 = vld [vmem:[#allocation14 + $0x1a80] ss:$28 sps:$4 sm:$0xff]   ;;  %v20012_v53 = vld [vmem:[#allocation14 + $0x208] ss:$28 sps:$4 sm:$0xff]  }
 0x825   :  { %16787 = vst [vmem:[#allocation17 + $0x8] sm:$0xff] %v20488_v7  ;;  %16141 = vmatprep.subr.bf16.mxu0 %v19960_v52  ;;  %v20017_v52 = vld [vmem:[#allocation14 + $0x1a4c] ss:$28 sps:$4 sm:$0xff]  }
 0x826   :  { %v20018_v7 = vld [vmem:[#allocation14 + $0x1d0] ss:$28 sps:$4 sm:$0xff]  }
 0x827   :  { %16101 = vmatpush1.bf16.msra.mxu1 %v19955_v50  ;;  %v20015_v50 = vld [vmem:[#allocation14 + $0x1a48] ss:$28 sps:$4 sm:$0xff]  }
 0x828   :  { %16142 = vmatpush1.bf16.msra.mxu0 %v19958_v39  ;;  %16102 = vmatprep.subr.bf16.mxu1 %v19963_v12  ;;  %v20023_v39 = vld [vmem:[#allocation14 + $0x51c] ss:$28 sps:$4 sm:$0xff]   ;;  %v20503_v12 = vld [vmem:[#allocation16] sm:$0xff] }
 0x829   :  { %16143 = vmatprep.subr.bf16.mxu0 %v19966_v1  ;;  %v10843_v1 = vrot.slane %v20503_v12, %v20819_v23 }
 0x82b   :  { %16103 = vmatpush1.bf16.msra.mxu1 %v19961_v18  ;;  %v20026_v18 = vld [vmem:[#allocation14 + $0x89c] ss:$28 sps:$4 sm:$0xff]  }
 0x82c   :  { %16144 = vmatpush1.bf16.msra.mxu0 %v19964_v21  ;;  %16104 = vmatprep.subr.bf16.mxu1 %v19969_v11  ;;  %v10847_v21 = vrot.slane %v20503_v12, %v20825_v25  ;;  %v20021_v11 = vld [vmem:[#allocation14 + $0x518] ss:$28 sps:$4 sm:$0xff]   ;;  %v20027_v25 = vld [vmem:[#allocation14 + $0x4e0] ss:$28 sps:$4 sm:$0xff]  }
 0x82d   :  { %16145 = vmatprep.subr.bf16.mxu0 %v19972_v33  ;;  %v20024_v33 = vld [vmem:[#allocation14 + $0x898] ss:$28 sps:$4 sm:$0xff]  }
 0x82e   :  { %v20068_v12 = vld [vmem:[#allocation14 + $0x714] ss:$28 sps:$4 sm:$0xff]  }
 0x82f   :  { %16105 = vmatpush1.bf16.msra.mxu1 %v19967_v14  ;;  %v15838_v14 = vadd.f32 %v21267_v17, %v10843_v1  ;;  %v20035_v17 = vld [vmem:[#allocation14 + $0x4ac] ss:$28 sps:$4 sm:$0xff]  }
 0x830   :  { %16146 = vmatpush1.bf16.msra.mxu0 %v19970_v61  ;;  %16106 = vmatprep.subr.bf16.mxu1 %v19975_v63  ;;  %v20029_v61 = vld [vmem:[#allocation14 + $0x4e4] ss:$28 sps:$4 sm:$0xff]   ;;  %v20063_v1 = vld [vmem:[#allocation14 + $0x390] ss:$28 sps:$4 sm:$0xff]  }
 0x831   :  { %16147 = vmatprep.subr.bf16.mxu0 %v19978_v13  ;;  %v20032_v13 = vld [vmem:[#allocation14 + $0x864] ss:$28 sps:$4 sm:$0xff]  }
 0x833   :  { %16107 = vmatpush2.bf16.msra.mxu1 %v19973_v3  ;;  %v15840_v3 = vadd.f32 %v21272_v16, %v10847_v21  ;;  %v20038_v16 = vld [vmem:[#allocation14 + $0x82c] ss:$28 sps:$4 sm:$0xff]   ;;  %v20071_v21 = vld [vmem:[#allocation14 + $0x6dc] ss:$28 sps:$4 sm:$0xff]  }
 0x834   :  { %16148 = vmatpush2.bf16.msra.mxu0 %v19976_v35  ;;  %16108 = vmatprep.subr.bf16.mxu1 %v19981_v43 }
 0x835   :  { %16149 = vmatprep.subr.bf16.mxu0 %v19984_v60  ;;  %v20030_v60 = vld [vmem:[#allocation14 + $0x860] ss:$28 sps:$4 sm:$0xff]  }
 0x837   :  { %16109 = vmatpush2.bf16.msra.mxu1 %v19979_v27 }
 0x838   :  { %16150 = vmatpush2.bf16.msra.mxu0 %v19982_v24  ;;  %16110 = vmatprep.subr.bf16.mxu1 %v19987_v37 }
 0x839   :  { %16151 = vmatprep.subr.bf16.mxu0 %v19990_v9 }
 0x83b   :  { %16111 = vmatpush2.bf16.msra.mxu1 %v19985_v57 }
 0x83c   :  { %16152 = vmatpush2.bf16.msra.mxu0 %v19988_v19  ;;  %16112 = vmatprep.subr.bf16.mxu1 %v19993_v15  ;;  %v20033_v15 = vld [vmem:[#allocation14 + $0x4a8] ss:$28 sps:$4 sm:$0xff]  }
 0x83d   :  { %16153 = vmatprep.subr.bf16.mxu0 %v19996_v30 }
 0x83f   :  { %16113 = vmatpush2.bf16.msra.mxu1 %v19991_v54  ;;  %v20036_v54 = vld [vmem:[#allocation14 + $0x828] ss:$28 sps:$4 sm:$0xff]  }
 0x840   :  { %16154 = vmatpush2.bf16.msra.mxu0 %v19994_v40  ;;  %16114 = vmatprep.subr.bf16.mxu1 %v19999_v34  ;;  %v20041_v40 = vld [vmem:[#allocation14 + $0x474] ss:$28 sps:$4 sm:$0xff]  }
 0x841   :  { %16155 = vmatprep.subr.bf16.mxu0 %v20002_v46  ;;  %v20044_v46 = vld [vmem:[#allocation14 + $0x7f4] ss:$28 sps:$4 sm:$0xff]  }
 0x843   :  { %16115 = vmatpush2.bf16.msra.mxu1 %v19997_v41  ;;  %v20039_v41 = vld [vmem:[#allocation14 + $0x470] ss:$28 sps:$4 sm:$0xff]  }
 0x844   :  { %16156 = vmatpush2.bf16.msra.mxu0 %v20000_v48  ;;  %16116 = vmatprep.subr.bf16.mxu1 %v20005_v55  ;;  %v20042_v48 = vld [vmem:[#allocation14 + $0x7f0] ss:$28 sps:$4 sm:$0xff]   ;;  %v20047_v55 = vld [vmem:[#allocation14 + $0x43c] ss:$28 sps:$4 sm:$0xff]  }
 0x845   :  { %16157 = vmatprep.subr.bf16.mxu0 %v20008_v32  ;;  %v20050_v32 = vld [vmem:[#allocation14 + $0x7bc] ss:$28 sps:$4 sm:$0xff]  }
 0x847   :  { %16117 = vmatpush2.bf16.msra.mxu1 %v20003_v22  ;;  %v20045_v22 = vld [vmem:[#allocation14 + $0x438] ss:$28 sps:$4 sm:$0xff]  }
 0x848   :  { %16158 = vmatpush2.bf16.msra.mxu0 %v20006_v31  ;;  %16118 = vmatprep.subr.bf16.mxu1 %v20011_v6  ;;  %v20048_v31 = vld [vmem:[#allocation14 + $0x7b8] ss:$28 sps:$4 sm:$0xff]   ;;  %v20053_v6 = vld [vmem:[#allocation14 + $0x404] ss:$28 sps:$4 sm:$0xff]  }
 0x849   :  { %16159 = vmatprep.subr.bf16.mxu0 %v20014_v4  ;;  %v20056_v4 = vld [vmem:[#allocation14 + $0x784] ss:$28 sps:$4 sm:$0xff]  }
 0x84b   :  { %16119 = vmatpush2.bf16.msra.mxu1 %v20009_v36  ;;  %v20051_v36 = vld [vmem:[#allocation14 + $0x400] ss:$28 sps:$4 sm:$0xff]  }
 0x84c   :  { %16160 = vmatpush2.bf16.msra.mxu0 %v20012_v53  ;;  %16120 = vmatprep.subr.bf16.mxu1 %v20017_v52  ;;  %v20054_v53 = vld [vmem:[#allocation14 + $0x780] ss:$28 sps:$4 sm:$0xff]   ;;  %v20059_v52 = vld [vmem:[#allocation14 + $0x3cc] ss:$28 sps:$4 sm:$0xff]  }
 0x84d   :  { %16161 = vmatprep.subr.bf16.mxu0 %v20020_v10  ;;  %v20062_v10 = vld [vmem:[#allocation14 + $0x74c] ss:$28 sps:$4 sm:$0xff]  }
 0x84f   :  { %16121 = vmatpush2.bf16.msra.mxu1 %v20015_v50  ;;  %v20057_v50 = vld [vmem:[#allocation14 + $0x3c8] ss:$28 sps:$4 sm:$0xff]  }
 0x850   :  { %16162 = vmatpush2.bf16.msra.mxu0 %v20018_v7  ;;  %16172 = vmatprep.subr.bf16.mxu1 %v20023_v39  ;;  %v20060_v7 = vld [vmem:[#allocation14 + $0x748] ss:$28 sps:$4 sm:$0xff]   ;;  %v20065_v39 = vld [vmem:[#allocation14 + $0x394] ss:$28 sps:$4 sm:$0xff]  }
 0x851   :  { %16213 = vmatprep.subr.bf16.mxu0 %v20026_v18  ;;  %v20066_v18 = vld [vmem:[#allocation14 + $0x710] ss:$28 sps:$4 sm:$0xff]  }
 0x852   :  { %v15878_v63 = vpop.f32.mrf.mxu1  ;;  %16123 = vmatmul.mubr.bf16.vlgmr.msra.gmra.mxu1 %v21226_v28 }
 0x853   :  { %v15879_v23 = vadd.f32 %v15878_v63, %v15838_v14  ;;  %v15919_v35 = vpop.f32.mrf.mxu0  ;;  %16164 = vmatmul.mubr.bf16.vlgmr.msra.gmra.mxu0 %v21132_v49  ;;  %16173 = vmatpush1.bf16.msra.mxu1 %v20021_v11  ;;  %v20074_v11 = vld [vmem:[#allocation14 + $0xa5c] ss:$28 sps:$4 sm:$0xff]   ;;  %v20080_v63 = vld [vmem:[#allocation14 + $0xa24] ss:$28 sps:$4 sm:$0xff]  }
 0x854   :  { %16204 = vmatprep.mubr.bf16.mxu1 %v21135_v51  ;;  %16214 = vmatpush1.bf16.msra.mxu0 %v20024_v33  ;;  %v15880_v43 = vpop.f32.mrf.mxu1  ;;  %v20069_v33 = vld [vmem:[#allocation14 + $0x6d8] ss:$28 sps:$4 sm:$0xff]  }
 0x855   :  { %v21281_v27 = vadd.f32 %v15919_v35, %v15879_v23  ;;  %16245 = vmatprep.mubr.bf16.mxu0 %v21138_v8  ;;  %v15881_v24 = vadd.f32 %v15880_v43, %v15840_v3  ;;  %v15921_v37 = vpop.f32.mrf.mxu0  ;;  %16174 = vmatprep.subr.bf16.mxu1 %v20029_v61  ;;  %v20072_v14 = vld [vmem:[#allocation14 + $0xa58] ss:$28 sps:$4 sm:$0xff]   ;;  %v20077_v61 = vld [vmem:[#allocation14 + $0x6a4] ss:$28 sps:$4 sm:$0xff]   ;;  %v20083_v23 = vld [vmem:[#allocation14 + $0x66c] ss:$28 sps:$4 sm:$0xff]  }
 0x856   :  { %v15882_v9 = vpop.f32.mrf.mxu1  ;;  %16215 = vmatprep.subr.bf16.mxu0 %v20032_v13  ;;  %v20075_v13 = vld [vmem:[#allocation14 + $0x6a0] ss:$28 sps:$4 sm:$0xff]   ;;  %v20086_v35 = vld [vmem:[#allocation14 + $0x9ec] ss:$28 sps:$4 sm:$0xff]  }
 0x857   :  { %v21284_v57 = vadd.f32 %v15921_v37, %v15881_v24  ;;  %v15923_v19 = vpop.f32.mrf.mxu0  ;;  %16175 = vmatpush1.bf16.msra.mxu1 %v20027_v25  ;;  %v20078_v3 = vld [vmem:[#allocation14 + $0xa20] ss:$28 sps:$4 sm:$0xff]   ;;  %v20081_v25 = vld [vmem:[#allocation14 + $0x668] ss:$28 sps:$4 sm:$0xff]   ;;  %v20087_v24 = vld [vmem:[#allocation14 + $0x630] ss:$28 sps:$4 sm:$0xff]  }
 0x858   :  { %16216 = vmatpush1.bf16.msra.mxu0 %v20030_v60  ;;  %v15883_v30 = vpop.f32.mrf.mxu1  ;;  %16176 = vmatprep.subr.bf16.mxu1 %v20035_v17  ;;  %v20084_v43 = vld [vmem:[#allocation14 + $0x9e8] ss:$28 sps:$4 sm:$0xff]   ;;  %v20089_v60 = vld [vmem:[#allocation14 + $0x634] ss:$28 sps:$4 sm:$0xff]   ;;  %v20098_v9 = vld [vmem:[#allocation14 + $0x97c] ss:$28 sps:$4 sm:$0xff]  }
 0x859   :  { %v15924_v34 = vpop.f32.mrf.mxu0  ;;  %16217 = vmatprep.subr.bf16.mxu0 %v20038_v16  ;;  %v20092_v17 = vld [vmem:[#allocation14 + $0x9b4] ss:$28 sps:$4 sm:$0xff]   ;;  %v20095_v16 = vld [vmem:[#allocation14 + $0x5fc] ss:$28 sps:$4 sm:$0xff]   ;;  %v20101_v30 = vld [vmem:[#allocation14 + $0x5c4] ss:$28 sps:$4 sm:$0xff]  }
 0x85a   :  { %v20090_v37 = vld [vmem:[#allocation14 + $0x9b0] ss:$28 sps:$4 sm:$0xff]   ;;  %v20093_v19 = vld [vmem:[#allocation14 + $0x5f8] ss:$28 sps:$4 sm:$0xff]   ;;  %v20102_v34 = vld [vmem:[#allocation14 + $0x940] ss:$28 sps:$4 sm:$0xff]  }
 0x85b   :  { %16177 = vmatpush1.bf16.msra.mxu1 %v20033_v15  ;;  %v20096_v15 = vld [vmem:[#allocation14 + $0x978] ss:$28 sps:$4 sm:$0xff]  }
 0x85c   :  { %16218 = vmatpush1.bf16.msra.mxu0 %v20036_v54  ;;  %16178 = vmatprep.subr.bf16.mxu1 %v20041_v40  ;;  %v20104_v54 = vld [vmem:[#allocation14 + $0x944] ss:$28 sps:$4 sm:$0xff]  }
 0x85d   :  { %16219 = vmatprep.subr.bf16.mxu0 %v20044_v46  ;;  %v20099_v40 = vld [vmem:[#allocation14 + $0x5c0] ss:$28 sps:$4 sm:$0xff]   ;;  %v20107_v46 = vld [vmem:[#allocation14 + $0x58c] ss:$28 sps:$4 sm:$0xff]  }
 0x85f   :  { %16179 = vmatpush1.bf16.msra.mxu1 %v20039_v41  ;;  %v20110_v41 = vld [vmem:[#allocation14 + $0x90c] ss:$28 sps:$4 sm:$0xff]  }
 0x860   :  { %16220 = vmatpush1.bf16.msra.mxu0 %v20042_v48  ;;  %16180 = vmatprep.subr.bf16.mxu1 %v20047_v55  ;;  %v20105_v48 = vld [vmem:[#allocation14 + $0x588] ss:$28 sps:$4 sm:$0xff]  }
 0x861   :  { %16221 = vmatprep.subr.bf16.mxu0 %v20050_v32  ;;  %v20108_v55 = vld [vmem:[#allocation14 + $0x908] ss:$28 sps:$4 sm:$0xff]   ;;  %v20113_v32 = vld [vmem:[#allocation14 + $0x554] ss:$28 sps:$4 sm:$0xff]  }
 0x863   :  { %16181 = vmatpush1.bf16.msra.mxu1 %v20045_v22  ;;  %v20116_v22 = vld [vmem:[#allocation14 + $0x8d4] ss:$28 sps:$4 sm:$0xff]  }
 0x864   :  { %16222 = vmatpush1.bf16.msra.mxu0 %v20048_v31  ;;  %16182 = vmatprep.subr.bf16.mxu1 %v20053_v6  ;;  %v20111_v31 = vld [vmem:[#allocation14 + $0x550] ss:$28 sps:$4 sm:$0xff]  }
 0x865   :  { %16223 = vmatprep.subr.bf16.mxu0 %v20056_v4  ;;  %v20114_v6 = vld [vmem:[#allocation14 + $0x8d0] ss:$28 sps:$4 sm:$0xff]   ;;  %v20119_v4 = vld [vmem:[#allocation14 + $0xc1c] ss:$28 sps:$4 sm:$0xff]  }
 0x867   :  { %16183 = vmatpush1.bf16.msra.mxu1 %v20051_v36  ;;  %v20122_v36 = vld [vmem:[#allocation14 + $0xf9c] ss:$28 sps:$4 sm:$0xff]  }
 0x868   :  { %16224 = vmatpush1.bf16.msra.mxu0 %v20054_v53  ;;  %16184 = vmatprep.subr.bf16.mxu1 %v20059_v52  ;;  %v20117_v53 = vld [vmem:[#allocation14 + $0xc18] ss:$28 sps:$4 sm:$0xff]  }
 0x869   :  { %16225 = vmatprep.subr.bf16.mxu0 %v20062_v10  ;;  %v20120_v52 = vld [vmem:[#allocation14 + $0xf98] ss:$28 sps:$4 sm:$0xff]   ;;  %v20125_v10 = vld [vmem:[#allocation14 + $0xbe4] ss:$28 sps:$4 sm:$0xff]  }
 0x86b   :  { %16185 = vmatpush1.bf16.msra.mxu1 %v20057_v50 }
 0x86c   :  { %16226 = vmatpush1.bf16.msra.mxu0 %v20060_v7  ;;  %16186 = vmatprep.subr.bf16.mxu1 %v20065_v39  ;;  %v20128_v7 = vld [vmem:[#allocation14 + $0xf64] ss:$28 sps:$4 sm:$0xff]  }
 0x86d   :  { %16227 = vmatprep.subr.bf16.mxu0 %v20068_v12 }
 0x86f   :  { %16187 = vmatpush1.bf16.msra.mxu1 %v20063_v1  ;;  %v20123_v1 = vld [vmem:[#allocation14 + $0xbe0] ss:$28 sps:$4 sm:$0xff]  }
 0x870   :  { %16228 = vmatpush1.bf16.msra.mxu0 %v20066_v18  ;;  %16188 = vmatprep.subr.bf16.mxu1 %v20071_v21  ;;  %v20126_v21 = vld [vmem:[#allocation14 + $0xf60] ss:$28 sps:$4 sm:$0xff]  }
 0x871   :  { %16229 = vmatprep.subr.bf16.mxu0 %v20074_v11  ;;  %v20131_v11 = vld [vmem:[#allocation14 + $0xbac] ss:$28 sps:$4 sm:$0xff]  }
 0x873   :  { %16189 = vmatpush2.bf16.msra.mxu1 %v20069_v33 }
 0x874   :  { %16230 = vmatpush2.bf16.msra.mxu0 %v20072_v14  ;;  %16190 = vmatprep.subr.bf16.mxu1 %v20077_v61 }
 0x875   :  { %16231 = vmatprep.subr.bf16.mxu0 %v20080_v63 }
 0x877   :  { %16191 = vmatpush2.bf16.msra.mxu1 %v20075_v13 }
 0x878   :  { %16232 = vmatpush2.bf16.msra.mxu0 %v20078_v3  ;;  %16192 = vmatprep.subr.bf16.mxu1 %v20083_v23  ;;  %v20129_v23 = vld [vmem:[#allocation14 + $0xba8] ss:$28 sps:$4 sm:$0xff]  }
 0x879   :  { %16233 = vmatprep.subr.bf16.mxu0 %v20086_v35 }
 0x87b   :  { %16193 = vmatpush2.bf16.msra.mxu1 %v20081_v25  ;;  %v20132_v25 = vld [vmem:[#allocation14 + $0xf28] ss:$28 sps:$4 sm:$0xff]  }
 0x87c   :  { %16234 = vmatpush2.bf16.msra.mxu0 %v20084_v43  ;;  %16194 = vmatprep.subr.bf16.mxu1 %v20089_v60  ;;  %v20137_v43 = vld [vmem:[#allocation14 + $0xb74] ss:$28 sps:$4 sm:$0xff]  }
 0x87d   :  { %16235 = vmatprep.subr.bf16.mxu0 %v20092_v17  ;;  %v20140_v17 = vld [vmem:[#allocation14 + $0xef4] ss:$28 sps:$4 sm:$0xff]  }
 0x87f   :  { %16195 = vmatpush2.bf16.msra.mxu1 %v20087_v24  ;;  %v20138_v24 = vld [vmem:[#allocation14 + $0xef0] ss:$28 sps:$4 sm:$0xff]  }
 0x880   :  { %16236 = vmatpush2.bf16.msra.mxu0 %v20090_v37  ;;  %16196 = vmatprep.subr.bf16.mxu1 %v20095_v16  ;;  %v20143_v37 = vld [vmem:[#allocation14 + $0xb3c] ss:$28 sps:$4 sm:$0xff]  }
 0x881   :  { %16237 = vmatprep.subr.bf16.mxu0 %v20098_v9  ;;  %v20146_v16 = vld [vmem:[#allocation14 + $0xebc] ss:$28 sps:$4 sm:$0xff]  }
 0x882   :  { %v20141_v9 = vld [vmem:[#allocation14 + $0xb38] ss:$28 sps:$4 sm:$0xff]  }
 0x883   :  { %16197 = vmatpush2.bf16.msra.mxu1 %v20093_v19  ;;  %v20144_v19 = vld [vmem:[#allocation14 + $0xeb8] ss:$28 sps:$4 sm:$0xff]  }
 0x884   :  { %16238 = vmatpush2.bf16.msra.mxu0 %v20096_v15  ;;  %16198 = vmatprep.subr.bf16.mxu1 %v20101_v30  ;;  %v20149_v15 = vld [vmem:[#allocation14 + $0xb04] ss:$28 sps:$4 sm:$0xff]  }
 0x885   :  { %16239 = vmatprep.subr.bf16.mxu0 %v20104_v54  ;;  %v20152_v30 = vld [vmem:[#allocation14 + $0xe84] ss:$28 sps:$4 sm:$0xff]  }
 0x886   :  { %v20147_v54 = vld [vmem:[#allocation14 + $0xb00] ss:$28 sps:$4 sm:$0xff]  }
 0x887   :  { %16199 = vmatpush2.bf16.msra.mxu1 %v20099_v40  ;;  %v20150_v40 = vld [vmem:[#allocation14 + $0xe80] ss:$28 sps:$4 sm:$0xff]  }
 0x888   :  { %16240 = vmatpush2.bf16.msra.mxu0 %v20102_v34  ;;  %16200 = vmatprep.subr.bf16.mxu1 %v20107_v46  ;;  %v20155_v34 = vld [vmem:[#allocation14 + $0xacc] ss:$28 sps:$4 sm:$0xff]  }
 0x889   :  { %16241 = vmatprep.subr.bf16.mxu0 %v20110_v41  ;;  %v20158_v46 = vld [vmem:[#allocation14 + $0xe4c] ss:$28 sps:$4 sm:$0xff]  }
 0x88a   :  { %v20153_v41 = vld [vmem:[#allocation14 + $0xac8] ss:$28 sps:$4 sm:$0xff]  }
 0x88b   :  { %16201 = vmatpush2.bf16.msra.mxu1 %v20105_v48  ;;  %v20156_v48 = vld [vmem:[#allocation14 + $0xe48] ss:$28 sps:$4 sm:$0xff]  }
 0x88c   :  { %16242 = vmatpush2.bf16.msra.mxu0 %v20108_v55  ;;  %16202 = vmatprep.subr.bf16.mxu1 %v20113_v32  ;;  %v20161_v55 = vld [vmem:[#allocation14 + $0xa94] ss:$28 sps:$4 sm:$0xff]  }
 0x88d   :  { %16243 = vmatprep.subr.bf16.mxu0 %v20116_v22  ;;  %v20164_v32 = vld [vmem:[#allocation14 + $0xe14] ss:$28 sps:$4 sm:$0xff]  }
 0x88e   :  { %v20159_v22 = vld [vmem:[#allocation14 + $0xa90] ss:$28 sps:$4 sm:$0xff]  }
 0x88f   :  { %16203 = vmatpush2.bf16.msra.mxu1 %v20111_v31  ;;  %v20162_v31 = vld [vmem:[#allocation14 + $0xe10] ss:$28 sps:$4 sm:$0xff]  }
 0x890   :  { %16244 = vmatpush2.bf16.msra.mxu0 %v20114_v6  ;;  %16254 = vmatprep.subr.bf16.mxu1 %v20119_v4  ;;  %v20167_v6 = vld [vmem:[#allocation14 + $0xddc] ss:$28 sps:$4 sm:$0xff]  }
 0x891   :  { %16295 = vmatprep.subr.bf16.mxu0 %v20122_v36  ;;  %v20170_v4 = vld [vmem:[#allocation14 + $0x115c] ss:$28 sps:$4 sm:$0xff]  }
 0x892   :  { %v15960_v50 = vpop.f32.mrf.mxu1  ;;  %16205 = vmatmul.mubr.bf16.vlgmr.msra.gmra.mxu1 %v21152_v0  ;;  %v20165_v36 = vld [vmem:[#allocation14 + $0xdd8] ss:$28 sps:$4 sm:$0xff]  }
 0x893   :  { %v15961_v39 = vadd.f32 %v15960_v50, %v21281_v27  ;;  %v16001_v12 = vpop.f32.mrf.mxu0  ;;  %16246 = vmatmul.mubr.bf16.vlgmr.msra.gmra.mxu0 %v21154_v62  ;;  %16255 = vmatpush1.bf16.msra.mxu1 %v20117_v53  ;;  %v20134_v27 = vld [vmem:[#allocation14 + $0xf2c] ss:$28 sps:$4 sm:$0xff]   ;;  %v20168_v53 = vld [vmem:[#allocation14 + $0x1158] ss:$28 sps:$4 sm:$0xff]   ;;  %v20171_v50 = vld [vmem:[#allocation14 + $0xda0] ss:$28 sps:$4 sm:$0xff]  }
 0x894   :  { %16286 = vmatprep.mubr.bf16.mxu1 %v21156_v42  ;;  %16296 = vmatpush1.bf16.msra.mxu0 %v20120_v52  ;;  %v15962_v18 = vpop.f32.mrf.mxu1  ;;  %v20173_v52 = vld [vmem:[#allocation14 + $0xda4] ss:$28 sps:$4 sm:$0xff]  }
 0x895   :  { %v21290_v33 = vadd.f32 %v16001_v12, %v15961_v39  ;;  %16327 = vmatprep.mubr.bf16.mxu0 %v21159_v2  ;;  %v15963_v14 = vadd.f32 %v15962_v18, %v21284_v57  ;;  %v16003_v61 = vpop.f32.mrf.mxu0  ;;  %16256 = vmatprep.subr.bf16.mxu1 %v20125_v10  ;;  %v20135_v57 = vld [vmem:[#allocation14 + $0xb70] ss:$28 sps:$4 sm:$0xff]   ;;  %v20176_v10 = vld [vmem:[#allocation14 + $0x1124] ss:$28 sps:$4 sm:$0xff]  }
 0x896   :  { %v15964_v63 = vpop.f32.mrf.mxu1  ;;  %16297 = vmatprep.subr.bf16.mxu0 %v20128_v7  ;;  %v20174_v7 = vld [vmem:[#allocation14 + $0x1120] ss:$28 sps:$4 sm:$0xff]   ;;  %v20179_v39 = vld [vmem:[#allocation14 + $0xd6c] ss:$28 sps:$4 sm:$0xff]  }
 0x897   :  { %v21294_v13 = vadd.f32 %v16003_v61, %v15963_v14  ;;  %v16005_v3 = vpop.f32.mrf.mxu0  ;;  %16257 = vmatpush1.bf16.msra.mxu1 %v20123_v1  ;;  %v20182_v12 = vld [vmem:[#allocation14 + $0x10ec] ss:$28 sps:$4 sm:$0xff]   ;;  %v20194_v63 = vld [vmem:[#allocation14 + $0x107c] ss:$28 sps:$4 sm:$0xff]  }
 0x898   :  { %16298 = vmatpush1.bf16.msra.mxu0 %v20126_v21  ;;  %v15965_v35 = vpop.f32.mrf.mxu1  ;;  %16258 = vmatprep.subr.bf16.mxu1 %v20131_v11  ;;  %v20177_v1 = vld [vmem:[#allocation14 + $0xd68] ss:$28 sps:$4 sm:$0xff]   ;;  %v20185_v21 = vld [vmem:[#allocation14 + $0xd34] ss:$28 sps:$4 sm:$0xff]  }
 0x899   :  { %v16006_v60 = vpop.f32.mrf.mxu0  ;;  %16299 = vmatprep.subr.bf16.mxu0 %v20134_v27  ;;  %v20180_v18 = vld [vmem:[#allocation14 + $0x10e8] ss:$28 sps:$4 sm:$0xff]   ;;  %v20188_v11 = vld [vmem:[#allocation14 + $0x10b4] ss:$28 sps:$4 sm:$0xff]   ;;  %v20191_v27 = vld [vmem:[#allocation14 + $0xcfc] ss:$28 sps:$4 sm:$0xff]  }
 0x89a   :  { %v20183_v14 = vld [vmem:[#allocation14 + $0xd30] ss:$28 sps:$4 sm:$0xff]   ;;  %v20189_v3 = vld [vmem:[#allocation14 + $0xcf8] ss:$28 sps:$4 sm:$0xff]   ;;  %v20197_v35 = vld [vmem:[#allocation14 + $0xcc4] ss:$28 sps:$4 sm:$0xff]  }
 0x89b   :  { %16259 = vmatpush1.bf16.msra.mxu1 %v20129_v23  ;;  %v20186_v61 = vld [vmem:[#allocation14 + $0x10b0] ss:$28 sps:$4 sm:$0xff]   ;;  %v20192_v23 = vld [vmem:[#allocation14 + $0x1078] ss:$28 sps:$4 sm:$0xff]   ;;  %v20198_v60 = vld [vmem:[#allocation14 + $0x1040] ss:$28 sps:$4 sm:$0xff]  }
 0x89c   :  { %16300 = vmatpush1.bf16.msra.mxu0 %v20132_v25  ;;  %16260 = vmatprep.subr.bf16.mxu1 %v20137_v43  ;;  %v20200_v25 = vld [vmem:[#allocation14 + $0x1044] ss:$28 sps:$4 sm:$0xff]  }
 0x89d   :  { %16301 = vmatprep.subr.bf16.mxu0 %v20140_v17  ;;  %v20195_v43 = vld [vmem:[#allocation14 + $0xcc0] ss:$28 sps:$4 sm:$0xff]   ;;  %v20203_v17 = vld [vmem:[#allocation14 + $0xc8c] ss:$28 sps:$4 sm:$0xff]  }
 0x89f   :  { %16261 = vmatpush1.bf16.msra.mxu1 %v20135_v57  ;;  %v20206_v57 = vld [vmem:[#allocation14 + $0x100c] ss:$28 sps:$4 sm:$0xff]  }
 0x8a0   :  { %16302 = vmatpush1.bf16.msra.mxu0 %v20138_v24  ;;  %16262 = vmatprep.subr.bf16.mxu1 %v20143_v37  ;;  %v20201_v24 = vld [vmem:[#allocation14 + $0xc88] ss:$28 sps:$4 sm:$0xff]  }
 0x8a1   :  { %16303 = vmatprep.subr.bf16.mxu0 %v20146_v16  ;;  %v20204_v37 = vld [vmem:[#allocation14 + $0x1008] ss:$28 sps:$4 sm:$0xff]   ;;  %v20209_v16 = vld [vmem:[#allocation14 + $0xc54] ss:$28 sps:$4 sm:$0xff]  }
 0x8a3   :  { %16263 = vmatpush1.bf16.msra.mxu1 %v20141_v9  ;;  %v20212_v9 = vld [vmem:[#allocation14 + $0xfd4] ss:$28 sps:$4 sm:$0xff]  }
 0x8a4   :  { %16304 = vmatpush1.bf16.msra.mxu0 %v20144_v19  ;;  %16264 = vmatprep.subr.bf16.mxu1 %v20149_v15  ;;  %v20207_v19 = vld [vmem:[#allocation14 + $0xc50] ss:$28 sps:$4 sm:$0xff]  }
 0x8a5   :  { %16305 = vmatprep.subr.bf16.mxu0 %v20152_v30  ;;  %v20210_v15 = vld [vmem:[#allocation14 + $0xfd0] ss:$28 sps:$4 sm:$0xff]   ;;  %v20215_v30 = vld [vmem:[#allocation14 + $0x131c] ss:$28 sps:$4 sm:$0xff]  }
 0x8a7   :  { %16265 = vmatpush1.bf16.msra.mxu1 %v20147_v54  ;;  %v20218_v54 = vld [vmem:[#allocation14 + $0x169c] ss:$28 sps:$4 sm:$0xff]  }
 0x8a8   :  { %16306 = vmatpush1.bf16.msra.mxu0 %v20150_v40  ;;  %16266 = vmatprep.subr.bf16.mxu1 %v20155_v34  ;;  %v20213_v40 = vld [vmem:[#allocation14 + $0x1318] ss:$28 sps:$4 sm:$0xff]  }
 0x8a9   :  { %16307 = vmatprep.subr.bf16.mxu0 %v20158_v46  ;;  %v20216_v34 = vld [vmem:[#allocation14 + $0x1698] ss:$28 sps:$4 sm:$0xff]   ;;  %v20221_v46 = vld [vmem:[#allocation14 + $0x12e4] ss:$28 sps:$4 sm:$0xff]  }
 0x8ab   :  { %16267 = vmatpush1.bf16.msra.mxu1 %v20153_v41 }
 0x8ac   :  { %16308 = vmatpush1.bf16.msra.mxu0 %v20156_v48  ;;  %16268 = vmatprep.subr.bf16.mxu1 %v20161_v55  ;;  %v20224_v48 = vld [vmem:[#allocation14 + $0x1664] ss:$28 sps:$4 sm:$0xff]  }
 0x8ad   :  { %16309 = vmatprep.subr.bf16.mxu0 %v20164_v32  ;;  %v20219_v32 = vld [vmem:[#allocation14 + $0x12e0] ss:$28 sps:$4 sm:$0xff]  }
 0x8af   :  { %16269 = vmatpush1.bf16.msra.mxu1 %v20159_v22 }
 0x8b0   :  { %16310 = vmatpush1.bf16.msra.mxu0 %v20162_v31  ;;  %16270 = vmatprep.subr.bf16.mxu1 %v20167_v6  ;;  %v20222_v31 = vld [vmem:[#allocation14 + $0x1660] ss:$28 sps:$4 sm:$0xff]   ;;  %v20227_v6 = vld [vmem:[#allocation14 + $0x12ac] ss:$28 sps:$4 sm:$0xff]  }
 0x8b1   :  { %16311 = vmatprep.subr.bf16.mxu0 %v20170_v4 }
 0x8b3   :  { %16271 = vmatpush2.bf16.msra.mxu1 %v20165_v36  ;;  %v20230_v36 = vld [vmem:[#allocation14 + $0x162c] ss:$28 sps:$4 sm:$0xff]  }
 0x8b4   :  { %16312 = vmatpush2.bf16.msra.mxu0 %v20168_v53  ;;  %16272 = vmatprep.subr.bf16.mxu1 %v20173_v52 }
 0x8b5   :  { %16313 = vmatprep.subr.bf16.mxu0 %v20176_v10  ;;  %v20225_v10 = vld [vmem:[#allocation14 + $0x12a8] ss:$28 sps:$4 sm:$0xff]  }
 0x8b7   :  { %16273 = vmatpush2.bf16.msra.mxu1 %v20171_v50 }
 0x8b8   :  { %16314 = vmatpush2.bf16.msra.mxu0 %v20174_v7  ;;  %16274 = vmatprep.subr.bf16.mxu1 %v20179_v39  ;;  %v20228_v7 = vld [vmem:[#allocation14 + $0x1628] ss:$28 sps:$4 sm:$0xff]   ;;  %v20233_v39 = vld [vmem:[#allocation14 + $0x1274] ss:$28 sps:$4 sm:$0xff]  }
 0x8b9   :  { %16315 = vmatprep.subr.bf16.mxu0 %v20182_v12 }
 0x8bb   :  { %16275 = vmatpush2.bf16.msra.mxu1 %v20177_v1  ;;  %v20236_v1 = vld [vmem:[#allocation14 + $0x15f4] ss:$28 sps:$4 sm:$0xff]  }
 0x8bc   :  { %16316 = vmatpush2.bf16.msra.mxu0 %v20180_v18  ;;  %16276 = vmatprep.subr.bf16.mxu1 %v20185_v21  ;;  %v20231_v18 = vld [vmem:[#allocation14 + $0x1270] ss:$28 sps:$4 sm:$0xff]  }
 0x8bd   :  { %16317 = vmatprep.subr.bf16.mxu0 %v20188_v11  ;;  %v20234_v21 = vld [vmem:[#allocation14 + $0x15f0] ss:$28 sps:$4 sm:$0xff]   ;;  %v20239_v11 = vld [vmem:[#allocation14 + $0x123c] ss:$28 sps:$4 sm:$0xff]  }
 0x8bf   :  { %16277 = vmatpush2.bf16.msra.mxu1 %v20183_v14  ;;  %v20242_v14 = vld [vmem:[#allocation14 + $0x15bc] ss:$28 sps:$4 sm:$0xff]  }
 0x8c0   :  { %16318 = vmatpush2.bf16.msra.mxu0 %v20186_v61  ;;  %16278 = vmatprep.subr.bf16.mxu1 %v20191_v27  ;;  %v20237_v61 = vld [vmem:[#allocation14 + $0x1238] ss:$28 sps:$4 sm:$0xff]  }
 0x8c1   :  { %16319 = vmatprep.subr.bf16.mxu0 %v20194_v63  ;;  %v20240_v27 = vld [vmem:[#allocation14 + $0x15b8] ss:$28 sps:$4 sm:$0xff]   ;;  %v20245_v63 = vld [vmem:[#allocation14 + $0x1204] ss:$28 sps:$4 sm:$0xff]  }
 0x8c3   :  { %16279 = vmatpush2.bf16.msra.mxu1 %v20189_v3  ;;  %v20248_v3 = vld [vmem:[#allocation14 + $0x1584] ss:$28 sps:$4 sm:$0xff]  }
 0x8c4   :  { %16320 = vmatpush2.bf16.msra.mxu0 %v20192_v23  ;;  %16280 = vmatprep.subr.bf16.mxu1 %v20197_v35  ;;  %v20243_v23 = vld [vmem:[#allocation14 + $0x1200] ss:$28 sps:$4 sm:$0xff]  }
 0x8c5   :  { %16321 = vmatprep.subr.bf16.mxu0 %v20200_v25  ;;  %v20246_v35 = vld [vmem:[#allocation14 + $0x1580] ss:$28 sps:$4 sm:$0xff]   ;;  %v20251_v25 = vld [vmem:[#allocation14 + $0x11cc] ss:$28 sps:$4 sm:$0xff]  }
 0x8c7   :  { %16281 = vmatpush2.bf16.msra.mxu1 %v20195_v43  ;;  %v20254_v43 = vld [vmem:[#allocation14 + $0x154c] ss:$28 sps:$4 sm:$0xff]  }
 0x8c8   :  { %16322 = vmatpush2.bf16.msra.mxu0 %v20198_v60  ;;  %16282 = vmatprep.subr.bf16.mxu1 %v20203_v17  ;;  %v20249_v60 = vld [vmem:[#allocation14 + $0x11c8] ss:$28 sps:$4 sm:$0xff]  }
 0x8c9   :  { %16323 = vmatprep.subr.bf16.mxu0 %v20206_v57  ;;  %v20252_v17 = vld [vmem:[#allocation14 + $0x1548] ss:$28 sps:$4 sm:$0xff]   ;;  %v20257_v57 = vld [vmem:[#allocation14 + $0x1194] ss:$28 sps:$4 sm:$0xff]  }
 0x8cb   :  { %16283 = vmatpush2.bf16.msra.mxu1 %v20201_v24  ;;  %v20260_v24 = vld [vmem:[#allocation14 + $0x1514] ss:$28 sps:$4 sm:$0xff]  }
 0x8cc   :  { %16324 = vmatpush2.bf16.msra.mxu0 %v20204_v37  ;;  %16284 = vmatprep.subr.bf16.mxu1 %v20209_v16  ;;  %v20255_v37 = vld [vmem:[#allocation14 + $0x1190] ss:$28 sps:$4 sm:$0xff]  }
 0x8cd   :  { %16325 = vmatprep.subr.bf16.mxu0 %v20212_v9  ;;  %v20258_v16 = vld [vmem:[#allocation14 + $0x1510] ss:$28 sps:$4 sm:$0xff]   ;;  %v20263_v9 = vld [vmem:[#allocation14 + $0x14dc] ss:$28 sps:$4 sm:$0xff]  }
 0x8cf   :  { %16285 = vmatpush2.bf16.msra.mxu1 %v20207_v19  ;;  %v20266_v19 = vld [vmem:[#allocation14 + $0x185c] ss:$28 sps:$4 sm:$0xff]  }
 0x8d0   :  { %16326 = vmatpush2.bf16.msra.mxu0 %v20210_v15  ;;  %16336 = vmatprep.subr.bf16.mxu1 %v20215_v30  ;;  %v20261_v15 = vld [vmem:[#allocation14 + $0x14d8] ss:$28 sps:$4 sm:$0xff]  }
 0x8d1   :  { %16377 = vmatprep.subr.bf16.mxu0 %v20218_v54  ;;  %v20264_v30 = vld [vmem:[#allocation14 + $0x1858] ss:$28 sps:$4 sm:$0xff]   ;;  %v20269_v54 = vld [vmem:[#allocation14 + $0x14a4] ss:$28 sps:$4 sm:$0xff]  }
 0x8d2   :  { %v21296_v41 = vpop.f32.mrf.mxu1  ;;  %16287 = vmatmul.mubr.bf16.vlgmr.msra.gmra.mxu1 %v21180_v56 }
 0x8d3   :  { %v21299_v55 = vpop.f32.mrf.mxu0  ;;  %16328 = vmatmul.mubr.bf16.vlgmr.msra.gmra.mxu0 %v21182_v58  ;;  %16337 = vmatpush1.bf16.msra.mxu1 %v20213_v40  ;;  %v20272_v40 = vld [vmem:[#allocation14 + $0x1824] ss:$28 sps:$4 sm:$0xff]  }
 0x8d4   :  { %16368 = vmatprep.mubr.bf16.mxu1 %v21185_v45  ;;  %16378 = vmatpush1.bf16.msra.mxu0 %v20216_v34  ;;  %v21303_v22 = vpop.f32.mrf.mxu1  ;;  %v20267_v34 = vld [vmem:[#allocation14 + $0x14a0] ss:$28 sps:$4 sm:$0xff]  }
 0x8d5   :  { %16409 = vmatprep.mubr.bf16.mxu0 %v21188_v59  ;;  %v21306_v4 = vpop.f32.mrf.mxu0  ;;  %16338 = vmatprep.subr.bf16.mxu1 %v20221_v46  ;;  %v20270_v46 = vld [vmem:[#allocation14 + $0x1820] ss:$28 sps:$4 sm:$0xff]  }
 0x8d6   :  { %v16046_v53 = vpop.f32.mrf.mxu1  ;;  %16379 = vmatprep.subr.bf16.mxu0 %v20224_v48  ;;  %v20275_v48 = vld [vmem:[#allocation14 + $0x146c] ss:$28 sps:$4 sm:$0xff]  }
 0x8d7   :  { %v16087_v52 = vpop.f32.mrf.mxu0  ;;  %16339 = vmatpush1.bf16.msra.mxu1 %v20219_v32  ;;  %v20278_v32 = vld [vmem:[#allocation14 + $0x17ec] ss:$28 sps:$4 sm:$0xff]   ;;  %v20284_v53 = vld [vmem:[#allocation14 + $0x17b4] ss:$28 sps:$4 sm:$0xff]  }
 0x8d8   :  { %16380 = vmatpush1.bf16.msra.mxu0 %v20222_v31  ;;  %v16047_v50 = vpop.f32.mrf.mxu1  ;;  %16340 = vmatprep.subr.bf16.mxu1 %v20227_v6  ;;  %v20273_v31 = vld [vmem:[#allocation14 + $0x1468] ss:$28 sps:$4 sm:$0xff]   ;;  %v20279_v52 = vld [vmem:[#allocation14 + $0x1430] ss:$28 sps:$4 sm:$0xff]  }
 0x8d9   :  { %v16088_v12 = vpop.f32.mrf.mxu0  ;;  %16381 = vmatprep.subr.bf16.mxu0 %v20230_v36  ;;  %v20276_v6 = vld [vmem:[#allocation14 + $0x17e8] ss:$28 sps:$4 sm:$0xff]   ;;  %v20281_v36 = vld [vmem:[#allocation14 + $0x1434] ss:$28 sps:$4 sm:$0xff]   ;;  %v20287_v50 = vld [vmem:[#allocation14 + $0x13fc] ss:$28 sps:$4 sm:$0xff]  }
 0x8da   :  { %v20288_v12 = vld [vmem:[#allocation14 + $0x1778] ss:$28 sps:$4 sm:$0xff]  }
 0x8db   :  { %16341 = vmatpush1.bf16.msra.mxu1 %v20225_v10  ;;  %v20282_v10 = vld [vmem:[#allocation14 + $0x17b0] ss:$28 sps:$4 sm:$0xff]  }
 0x8dc   :  { %16382 = vmatpush1.bf16.msra.mxu0 %v20228_v7  ;;  %16342 = vmatprep.subr.bf16.mxu1 %v20233_v39  ;;  %v20290_v7 = vld [vmem:[#allocation14 + $0x177c] ss:$28 sps:$4 sm:$0xff]  }
 0x8dd   :  { %16383 = vmatprep.subr.bf16.mxu0 %v20236_v1  ;;  %v20285_v39 = vld [vmem:[#allocation14 + $0x13f8] ss:$28 sps:$4 sm:$0xff]   ;;  %v20293_v1 = vld [vmem:[#allocation14 + $0x13c4] ss:$28 sps:$4 sm:$0xff]  }
 0x8df   :  { %16343 = vmatpush1.bf16.msra.mxu1 %v20231_v18  ;;  %v20296_v18 = vld [vmem:[#allocation14 + $0x1744] ss:$28 sps:$4 sm:$0xff]  }
 0x8e0   :  { %16384 = vmatpush1.bf16.msra.mxu0 %v20234_v21  ;;  %16344 = vmatprep.subr.bf16.mxu1 %v20239_v11  ;;  %v20291_v21 = vld [vmem:[#allocation14 + $0x13c0] ss:$28 sps:$4 sm:$0xff]  }
 0x8e1   :  { %16385 = vmatprep.subr.bf16.mxu0 %v20242_v14  ;;  %v20294_v11 = vld [vmem:[#allocation14 + $0x1740] ss:$28 sps:$4 sm:$0xff]   ;;  %v20299_v14 = vld [vmem:[#allocation14 + $0x138c] ss:$28 sps:$4 sm:$0xff]  }
 0x8e3   :  { %16345 = vmatpush1.bf16.msra.mxu1 %v20237_v61  ;;  %v20302_v61 = vld [vmem:[#allocation14 + $0x170c] ss:$28 sps:$4 sm:$0xff]  }
 0x8e4   :  { %16386 = vmatpush1.bf16.msra.mxu0 %v20240_v27  ;;  %16346 = vmatprep.subr.bf16.mxu1 %v20245_v63  ;;  %v20297_v27 = vld [vmem:[#allocation14 + $0x1388] ss:$28 sps:$4 sm:$0xff]  }
 0x8e5   :  { %16387 = vmatprep.subr.bf16.mxu0 %v20248_v3  ;;  %v20300_v63 = vld [vmem:[#allocation14 + $0x1708] ss:$28 sps:$4 sm:$0xff]   ;;  %v20305_v3 = vld [vmem:[#allocation14 + $0x1354] ss:$28 sps:$4 sm:$0xff]  }
 0x8e7   :  { %16347 = vmatpush1.bf16.msra.mxu1 %v20243_v23  ;;  %v20308_v23 = vld [vmem:[#allocation14 + $0x16d4] ss:$28 sps:$4 sm:$0xff]  }
 0x8e8   :  { %16388 = vmatpush1.bf16.msra.mxu0 %v20246_v35  ;;  %16348 = vmatprep.subr.bf16.mxu1 %v20251_v25  ;;  %v20303_v35 = vld [vmem:[#allocation14 + $0x1350] ss:$28 sps:$4 sm:$0xff]  }
 0x8e9   :  { %16389 = vmatprep.subr.bf16.mxu0 %v20254_v43  ;;  %v20306_v25 = vld [vmem:[#allocation14 + $0x16d0] ss:$28 sps:$4 sm:$0xff]   ;;  %v20311_v43 = vld [vmem:[#allocation14 + $0x1a1c] ss:$28 sps:$4 sm:$0xff]  }
 0x8eb   :  { %16349 = vmatpush1.bf16.msra.mxu1 %v20249_v60  ;;  %v16043_v60 = vadd.f32 %v21296_v41, %v21290_v33 }
 0x8ec   :  { %16390 = vmatpush1.bf16.msra.mxu0 %v20252_v17  ;;  %16350 = vmatprep.subr.bf16.mxu1 %v20257_v57  ;;  %v20312_v17 = vld [vmem:[#allocation14 + $0x360] ss:$28 sps:$4 sm:$0xff]   ;;  %v16045_v57 = vadd.f32 %v21303_v22, %v21294_v13 }
 0x8ed   :  { %16391 = vmatprep.subr.bf16.mxu0 %v20260_v24  ;;  %v20309_v24 = vld [vmem:[#allocation14 + $0x1a18] ss:$28 sps:$4 sm:$0xff]   ;;  %v20314_v13 = vld [vmem:[#allocation14 + $0x19e0] ss:$28 sps:$4 sm:$0xff]  }
 0x8ee   :  { %v16086_v33 = vadd.f32 %v21306_v4, %v16045_v57  ;;  %v20322_v4 = vld [vmem:[#allocation14 + $0x2f0] ss:$28 sps:$4 sm:$0xff]   ;;  %v20352_v57 = vld [vmem:[#allocation14 + $0xa60] ss:$28 sps:$4 sm:$0xff]  }
 0x8ef   :  { %16351 = vmatpush1.bf16.msra.mxu1 %v20255_v37  ;;  %v20313_v37 = vld [vmem:[#allocation14 + $0x1a0] ss:$28 sps:$4 sm:$0xff]  }
 0x8f0   :  { %16392 = vmatpush1.bf16.msra.mxu0 %v20258_v16  ;;  %16352 = vmatprep.subr.bf16.mxu1 %v20263_v9  ;;  %v16084_v16 = vadd.f32 %v21299_v55, %v16043_v60  ;;  %v20316_v9 = vld [vmem:[#allocation14 + $0x19e4] ss:$28 sps:$4 sm:$0xff]   ;;  %v20348_v60 = vld [vmem:[#allocation14 + $0x18] ss:$28 sps:$4 sm:$0xff]  }
 0x8f1   :  { %16393 = vmatprep.subr.bf16.mxu0 %v20266_v19  ;;  %v20318_v55 = vld [vmem:[#allocation14 + $0x168] ss:$28 sps:$4 sm:$0xff]  }
 0x8f3   :  { %16353 = vmatpush2.bf16.msra.mxu1 %v20261_v15  ;;  %v20317_v15 = vld [vmem:[#allocation14 + $0x328] ss:$28 sps:$4 sm:$0xff]  }
 0x8f4   :  { %16394 = vmatpush2.bf16.msra.mxu0 %v20264_v30  ;;  %16354 = vmatprep.subr.bf16.mxu1 %v20269_v54  ;;  %v20321_v54 = vld [vmem:[#allocation14 + $0x19ac] ss:$28 sps:$4 sm:$0xff]  }
 0x8f5   :  { %16395 = vmatprep.subr.bf16.mxu0 %v20272_v40 }
 0x8f7   :  { %16355 = vmatpush2.bf16.msra.mxu1 %v20267_v34 }
 0x8f8   :  { %16396 = vmatpush2.bf16.msra.mxu0 %v20270_v46  ;;  %16356 = vmatprep.subr.bf16.mxu1 %v20275_v48 }
 0x8f9   :  { %16397 = vmatprep.subr.bf16.mxu0 %v20278_v32  ;;  %v20319_v32 = vld [vmem:[#allocation14 + $0x19a8] ss:$28 sps:$4 sm:$0xff]  }
 0x8fb   :  { %16357 = vmatpush2.bf16.msra.mxu1 %v20273_v31 }
 0x8fc   :  { %16398 = vmatpush2.bf16.msra.mxu0 %v20276_v6  ;;  %16358 = vmatprep.subr.bf16.mxu1 %v20281_v36  ;;  %v20323_v6 = vld [vmem:[#allocation14 + $0x130] ss:$28 sps:$4 sm:$0xff]  }
 0x8fd   :  { %16399 = vmatprep.subr.bf16.mxu0 %v20284_v53  ;;  %v20326_v36 = vld [vmem:[#allocation14 + $0x1974] ss:$28 sps:$4 sm:$0xff]  }
 0x8ff   :  { %16359 = vmatpush2.bf16.msra.mxu1 %v20279_v52  ;;  %v20327_v52 = vld [vmem:[#allocation14 + $0x2b8] ss:$28 sps:$4 sm:$0xff]  }
 0x900   :  { %16400 = vmatpush2.bf16.msra.mxu0 %v20282_v10  ;;  %16360 = vmatprep.subr.bf16.mxu1 %v20287_v50  ;;  %v20328_v10 = vld [vmem:[#allocation14 + $0xf8] ss:$28 sps:$4 sm:$0xff]  }
 0x901   :  { %16401 = vmatprep.subr.bf16.mxu0 %v20290_v7  ;;  %v20331_v50 = vld [vmem:[#allocation14 + $0x193c] ss:$28 sps:$4 sm:$0xff]  }
 0x902   :  { %v20332_v7 = vld [vmem:[#allocation14 + $0x280] ss:$28 sps:$4 sm:$0xff]  }
 0x903   :  { %16361 = vmatpush2.bf16.msra.mxu1 %v20285_v39  ;;  %v20329_v39 = vld [vmem:[#allocation14 + $0x1938] ss:$28 sps:$4 sm:$0xff]  }
 0x904   :  { %16402 = vmatpush2.bf16.msra.mxu0 %v20288_v12  ;;  %16362 = vmatprep.subr.bf16.mxu1 %v20293_v1  ;;  %v20333_v12 = vld [vmem:[#allocation14 + $0xc0] ss:$28 sps:$4 sm:$0xff]  }
 0x905   :  { %16403 = vmatprep.subr.bf16.mxu0 %v20296_v18  ;;  %v20336_v1 = vld [vmem:[#allocation14 + $0x1904] ss:$28 sps:$4 sm:$0xff]  }
 0x906   :  { %v20337_v18 = vld [vmem:[#allocation14 + $0x248] ss:$28 sps:$4 sm:$0xff]  }
 0x907   :  { %16363 = vmatpush2.bf16.msra.mxu1 %v20291_v21 }
 0x908   :  { %16404 = vmatpush2.bf16.msra.mxu0 %v20294_v11  ;;  %16364 = vmatprep.subr.bf16.mxu1 %v20299_v14  ;;  %v20334_v11 = vld [vmem:[#allocation14 + $0x1900] ss:$28 sps:$4 sm:$0xff]  }
 0x909   :  { %16405 = vmatprep.subr.bf16.mxu0 %v20302_v61  ;;  %v20338_v61 = vld [vmem:[#allocation14 + $0x88] ss:$28 sps:$4 sm:$0xff]  }
 0x90b   :  { %16365 = vmatpush2.bf16.msra.mxu1 %v20297_v27  ;;  %v20341_v27 = vld [vmem:[#allocation14 + $0x18cc] ss:$28 sps:$4 sm:$0xff]  }
 0x90c   :  { %16406 = vmatpush2.bf16.msra.mxu0 %v20300_v63  ;;  %16366 = vmatprep.subr.bf16.mxu1 %v20305_v3  ;;  %v20342_v63 = vld [vmem:[#allocation14 + $0x210] ss:$28 sps:$4 sm:$0xff]   ;;  %v20339_v3 = vld [vmem:[#allocation14 + $0x18c8] ss:$28 sps:$4 sm:$0xff]  }
 0x90d   :  { %16407 = vmatprep.subr.bf16.mxu0 %v20308_v23  ;;  %v20343_v23 = vld [vmem:[#allocation14 + $0x50] ss:$28 sps:$4 sm:$0xff]  }
 0x90f   :  { %16367 = vmatpush2.bf16.msra.mxu1 %v20303_v35  ;;  %v20346_v35 = vld [vmem:[#allocation14 + $0x1894] ss:$28 sps:$4 sm:$0xff]  }
 0x910   :  { %16408 = vmatpush2.bf16.msra.mxu0 %v20306_v25  ;;  %16418 = vmatprep.subr.bf16.mxu1 %v20311_v43  ;;  %v20347_v25 = vld [vmem:[#allocation14 + $0x1d8] ss:$28 sps:$4 sm:$0xff]   ;;  %v20344_v43 = vld [vmem:[#allocation14 + $0x1890] ss:$28 sps:$4 sm:$0xff]  }
 0x911   :  { %18998 = vmatprep.subr.bf16.mxu0 %v20312_v17  ;;  %v20351_v17 = vld [vmem:[#allocation14 + $0x1bdc] ss:$28 sps:$4 sm:$0xff]  }
 0x912   :  { %v16124_v19 = vpop.f32.mrf.mxu1  ;;  %16369 = vmatmul.mubr.bf16.vlgmr.msra.gmra.mxu1 %v21205_v5 }
 0x913   :  { %v16125_v41 = vadd.f32 %v16124_v19, %v16084_v16  ;;  %v21315_v30 = vpop.f32.mrf.mxu0  ;;  %16410 = vmatmul.mubr.bf16.vlgmr.msra.gmra.mxu0 %v21207_v47  ;;  %16419 = vmatpush1.bf16.msra.mxu1 %v20309_v24  ;;  %v20349_v24 = vld [vmem:[#allocation14 + $0x1bd8] ss:$28 sps:$4 sm:$0xff]   ;;  %v20356_v16 = vld [vmem:[#allocation14 + $0x1ba4] ss:$28 sps:$4 sm:$0xff]  }
 0x914   :  { %16450 = vmatprep.mubr.bf16.mxu1 %v21219_v29  ;;  %18999 = vmatpush3.bf16.msra.mxu0 %v20313_v37  ;;  %v16126_v22 = vpop.f32.mrf.mxu1  ;;  %v20353_v37 = vld [vmem:[#allocation14 + $0x8a0] ss:$28 sps:$4 sm:$0xff]  }
 0x915   :  { %20489 = vtanh.f32 %v16125_v41  ;;  %16491 = vmatprep.mubr.bf16.mxu0 %v21108_v20  ;;  %v16127_v40 = vadd.f32 %v16126_v22, %v16086_v33  ;;  %v21320_v34 = vpop.f32.mrf.mxu0  ;;  %16420 = vmatprep.subr.bf16.mxu1 %v20316_v9  ;;  %v20324_v20 = vld [vmem:[#allocation14 + $0x1970] ss:$28 sps:$4 sm:$0xff]   ;;  %v20357_v9 = vld [vmem:[#allocation14 + $0xa28] ss:$28 sps:$4 sm:$0xff]   ;;  %v20354_v19 = vld [vmem:[#allocation14 + $0x1ba0] ss:$28 sps:$4 sm:$0xff]  }
 0x916   :  { %v16128_v46 = vpop.f32.mrf.mxu1  ;;  %19000 = vmatprep.subr.bf16.mxu0 %v20317_v15  ;;  %v20358_v15 = vld [vmem:[#allocation14 + $0x868] ss:$28 sps:$4 sm:$0xff]   ;;  %v20362_v41 = vld [vmem:[#allocation14 + $0x9f0] ss:$28 sps:$4 sm:$0xff]  }
 0x917   :  { %20491 = vtanh.f32 %v16127_v40  ;;  %v16169_v48 = vpop.f32.mrf.mxu0  ;;  %16421 = vmatpush1.bf16.msra.mxu1 %v20314_v13  ;;  %v20361_v33 = vld [vmem:[#allocation14 + $0x1b6c] ss:$28 sps:$4 sm:$0xff]   ;;  %v20368_v40 = vld [vmem:[#allocation14 + $0x7f8] ss:$28 sps:$4 sm:$0xff]  }
 0x918   :  { %19001 = vmatpush3.bf16.msra.mxu0 %v20318_v55  ;;  %v16129_v31 = vpop.f32.mrf.mxu1  ;;  %16422 = vmatprep.subr.bf16.mxu1 %v20321_v54  ;;  %v20359_v13 = vld [vmem:[#allocation14 + $0x1b68] ss:$28 sps:$4 sm:$0xff]   ;;  %v20363_v22 = vld [vmem:[#allocation14 + $0x830] ss:$28 sps:$4 sm:$0xff]   ;;  %v20367_v54 = vld [vmem:[#allocation14 + $0x9b8] ss:$28 sps:$4 sm:$0xff]  }
 0x919   :  { %v16170_v53 = vpop.f32.mrf.mxu0  ;;  %19002 = vmatprep.subr.bf16.mxu0 %v20322_v4  ;;  %v20366_v55 = vld [vmem:[#allocation14 + $0x1b34] ss:$28 sps:$4 sm:$0xff]   ;;  %v20371_v4 = vld [vmem:[#allocation14 + $0x1afc] ss:$28 sps:$4 sm:$0xff]   ;;  %v20377_v31 = vld [vmem:[#allocation14 + $0x948] ss:$28 sps:$4 sm:$0xff]  }
 0x91a   :  { %v20369_v46 = vld [vmem:[#allocation14 + $0x1af8] ss:$28 sps:$4 sm:$0xff]   ;;  %v20373_v48 = vld [vmem:[#allocation14 + $0x7c0] ss:$28 sps:$4 sm:$0xff]   ;;  %v20381_v53 = vld [vmem:[#allocation14 + $0x1a8c] ss:$28 sps:$4 sm:$0xff]  }
 0x91b   :  { %16423 = vmatpush1.bf16.msra.mxu1 %v20319_v32  ;;  %v20376_v32 = vld [vmem:[#allocation14 + $0x1ac4] ss:$28 sps:$4 sm:$0xff]  }
 0x91c   :  { %19003 = vmatpush3.bf16.msra.mxu0 %v20323_v6  ;;  %16424 = vmatprep.subr.bf16.mxu1 %v20326_v36  ;;  %v20374_v6 = vld [vmem:[#allocation14 + $0x1ac0] ss:$28 sps:$4 sm:$0xff]   ;;  %v20378_v36 = vld [vmem:[#allocation14 + $0x788] ss:$28 sps:$4 sm:$0xff]  }
 0x91d   :  { %19004 = vmatprep.subr.bf16.mxu0 %v20327_v52  ;;  %v20382_v52 = vld [vmem:[#allocation14 + $0x910] ss:$28 sps:$4 sm:$0xff]  }
 0x91f   :  { %16425 = vmatpush1.bf16.msra.mxu1 %v20324_v20  ;;  %v20379_v20 = vld [vmem:[#allocation14 + $0x1a88] ss:$28 sps:$4 sm:$0xff]  }
 0x920   :  { %19005 = vmatpush3.bf16.msra.mxu0 %v20328_v10  ;;  %16426 = vmatprep.subr.bf16.mxu1 %v20331_v50  ;;  %v20383_v10 = vld [vmem:[#allocation14 + $0x750] ss:$28 sps:$4 sm:$0xff]  }
 0x921   :  { %19006 = vmatprep.subr.bf16.mxu0 %v20332_v7  ;;  %v20386_v50 = vld [vmem:[#allocation14 + $0x1a54] ss:$28 sps:$4 sm:$0xff]  }
 0x922   :  { %v20490_v21 = vpop.eup %20489  ;;  %v20387_v7 = vld [vmem:[#allocation14 + $0x8d8] ss:$28 sps:$4 sm:$0xff]  }
 0x923   :  { %16788 = vst [vmem:[#allocation17 + $0x10] sm:$0xff] %v20490_v21  ;;  %16427 = vmatpush1.bf16.msra.mxu1 %v20329_v39  ;;  %v20384_v39 = vld [vmem:[#allocation14 + $0x1a50] ss:$28 sps:$4 sm:$0xff]  }
 0x924   :  { %v20492_v14 = vpop.eup %20491  ;;  %19007 = vmatpush3.bf16.msra.mxu0 %v20333_v12  ;;  %16428 = vmatprep.subr.bf16.mxu1 %v20336_v1  ;;  %v20388_v12 = vld [vmem:[#allocation14 + $0x718] ss:$28 sps:$4 sm:$0xff]   ;;  %v20389_v1 = vld [vmem:[#allocation14 + $0x6e0] ss:$28 sps:$4 sm:$0xff]  }
 0x925   :  { %16789 = vst [vmem:[#allocation17 + $0x18] sm:$0xff] %v20492_v14  ;;  %19008 = vmatprep.subr.bf16.mxu0 %v20337_v18  ;;  %v21324_v18 = vld [vmem:[#allocation16] sm:$0xff] }
 0x926   :  { %v10851_v21 = vrot.slane %v21324_v18, %v20900_v38  ;;  %v10855_v14 = vrot.slane %v21324_v18, %v20904_v44  ;;  %v20395_v44 = vld [vmem:[#allocation14 + $0x4e8] ss:$28 sps:$4 sm:$0xff]  }
 0x927   :  { %16429 = vmatpush1.bf16.msra.mxu1 %v20334_v11  ;;  %v20390_v11 = vld [vmem:[#allocation14 + $0x1160] ss:$28 sps:$4 sm:$0xff]  }
 0x928   :  { %19009 = vmatpush3.bf16.msra.mxu0 %v20338_v61  ;;  %16430 = vmatprep.subr.bf16.mxu1 %v20341_v27  ;;  %v20391_v61 = vld [vmem:[#allocation14 + $0x520] ss:$28 sps:$4 sm:$0xff]   ;;  %v16168_v38 = vadd.f32 %v21320_v34, %v10855_v14  ;;  %v20398_v34 = vld [vmem:[#allocation14 + $0x10f0] ss:$28 sps:$4 sm:$0xff]   ;;  %v20428_v14 = vld [vmem:[#allocation14 + $0x1668] ss:$28 sps:$4 sm:$0xff]  }
 0x929   :  { %19010 = vmatprep.subr.bf16.mxu0 %v20342_v63  ;;  %v20392_v27 = vld [vmem:[#allocation14 + $0xfa0] ss:$28 sps:$4 sm:$0xff]   ;;  %v16166_v63 = vadd.f32 %v21315_v30, %v10851_v21  ;;  %v20397_v30 = vld [vmem:[#allocation14 + $0x670] ss:$28 sps:$4 sm:$0xff]   ;;  %v20426_v21 = vld [vmem:[#allocation14 + $0x1828] ss:$28 sps:$4 sm:$0xff]  }
 0x92b   :  { %16431 = vmatpush1.bf16.msra.mxu1 %v20339_v3  ;;  %v20393_v3 = vld [vmem:[#allocation14 + $0x6a8] ss:$28 sps:$4 sm:$0xff]  }
 0x92c   :  { %19011 = vmatpush3.bf16.msra.mxu0 %v20343_v23  ;;  %16432 = vmatprep.subr.bf16.mxu1 %v20346_v35  ;;  %v20394_v35 = vld [vmem:[#allocation14 + $0x1128] ss:$28 sps:$4 sm:$0xff]  }
 0x92d   :  { %19012 = vmatprep.subr.bf16.mxu0 %v20347_v25 }
 0x92f   :  { %16433 = vmatpush1.bf16.msra.mxu1 %v20344_v43 }
 0x930   :  { %19013 = vmatpush3.bf16.msra.mxu0 %v20348_v60  ;;  %16434 = vmatprep.subr.bf16.mxu1 %v20351_v17  ;;  %v20396_v17 = vld [vmem:[#allocation14 + $0xf68] ss:$28 sps:$4 sm:$0xff]  }
 0x931   :  { %19042 = vmatprep.subr.bf16.mxu0 %v20352_v57 }
 0x933   :  { %16492 = vmatmul.mubr.bf16.vlgmr.msra.gmra.mxu0 %v21132_v49  ;;  %16435 = vmatpush2.bf16.msra.mxu1 %v20349_v24  ;;  %v20364_v49 = vld [vmem:[#allocation14 + $0x1b30] ss:$28 sps:$4 sm:$0xff]  }
 0x934   :  { %19043 = vmatpush3.bf16.msra.mxu0 %v20353_v37  ;;  %16571 = vmatprep.mubr.bf16.mxu0 %v21138_v8  ;;  %v20372_v8 = vld [vmem:[#allocation14 + $0x980] ss:$28 sps:$4 sm:$0xff]  }
 0x935   :  { %16436 = vmatprep.subr.bf16.mxu1 %v20356_v16  ;;  %19044 = vmatprep.subr.bf16.mxu0 %v20357_v9 }
 0x937   :  { %16437 = vmatpush2.bf16.msra.mxu1 %v20354_v19  ;;  %v20399_v19 = vld [vmem:[#allocation14 + $0x4b0] ss:$28 sps:$4 sm:$0xff]  }
 0x938   :  { %19045 = vmatpush3.bf16.msra.mxu0 %v20358_v15  ;;  %16438 = vmatprep.subr.bf16.mxu1 %v20361_v33  ;;  %v20400_v15 = vld [vmem:[#allocation14 + $0xf30] ss:$28 sps:$4 sm:$0xff]   ;;  %v20401_v33 = vld [vmem:[#allocation14 + $0x638] ss:$28 sps:$4 sm:$0xff]  }
 0x939   :  { %19046 = vmatprep.subr.bf16.mxu0 %v20362_v41 }
 0x93b   :  { %16439 = vmatpush2.bf16.msra.mxu1 %v20359_v13  ;;  %v20402_v13 = vld [vmem:[#allocation14 + $0x10b8] ss:$28 sps:$4 sm:$0xff]  }
 0x93c   :  { %19047 = vmatpush3.bf16.msra.mxu0 %v20363_v22  ;;  %16440 = vmatprep.subr.bf16.mxu1 %v20366_v55  ;;  %v20404_v22 = vld [vmem:[#allocation14 + $0xef8] ss:$28 sps:$4 sm:$0xff]   ;;  %v20405_v55 = vld [vmem:[#allocation14 + $0x600] ss:$28 sps:$4 sm:$0xff]  }
 0x93d   :  { %19048 = vmatprep.subr.bf16.mxu0 %v20367_v54  ;;  %v20406_v54 = vld [vmem:[#allocation14 + $0x1080] ss:$28 sps:$4 sm:$0xff]  }
 0x93f   :  { %16441 = vmatpush2.bf16.msra.mxu1 %v20364_v49  ;;  %v20407_v49 = vld [vmem:[#allocation14 + $0x440] ss:$28 sps:$4 sm:$0xff]  }
 0x940   :  { %19049 = vmatpush3.bf16.msra.mxu0 %v20368_v40  ;;  %16442 = vmatprep.subr.bf16.mxu1 %v20371_v4  ;;  %v20408_v40 = vld [vmem:[#allocation14 + $0xec0] ss:$28 sps:$4 sm:$0xff]   ;;  %v20409_v4 = vld [vmem:[#allocation14 + $0x5c8] ss:$28 sps:$4 sm:$0xff]  }
 0x941   :  { %19050 = vmatprep.subr.bf16.mxu0 %v20372_v8  ;;  %v20410_v8 = vld [vmem:[#allocation14 + $0x1048] ss:$28 sps:$4 sm:$0xff]  }
 0x943   :  { %16443 = vmatpush2.bf16.msra.mxu1 %v20369_v46  ;;  %v20411_v46 = vld [vmem:[#allocation14 + $0x408] ss:$28 sps:$4 sm:$0xff]  }
 0x944   :  { %19051 = vmatpush3.bf16.msra.mxu0 %v20373_v48  ;;  %16444 = vmatprep.subr.bf16.mxu1 %v20376_v32  ;;  %v20412_v48 = vld [vmem:[#allocation14 + $0xe88] ss:$28 sps:$4 sm:$0xff]   ;;  %v20413_v32 = vld [vmem:[#allocation14 + $0x590] ss:$28 sps:$4 sm:$0xff]  }
 0x945   :  { %19052 = vmatprep.subr.bf16.mxu0 %v20377_v31  ;;  %v20414_v31 = vld [vmem:[#allocation14 + $0x1010] ss:$28 sps:$4 sm:$0xff]  }
 0x947   :  { %16445 = vmatpush2.bf16.msra.mxu1 %v20374_v6  ;;  %v20415_v6 = vld [vmem:[#allocation14 + $0x3d0] ss:$28 sps:$4 sm:$0xff]  }
 0x948   :  { %19053 = vmatpush3.bf16.msra.mxu0 %v20378_v36  ;;  %16446 = vmatprep.subr.bf16.mxu1 %v20381_v53  ;;  %v20416_v36 = vld [vmem:[#allocation14 + $0xe50] ss:$28 sps:$4 sm:$0xff]   ;;  %v20417_v53 = vld [vmem:[#allocation14 + $0x558] ss:$28 sps:$4 sm:$0xff]  }
 0x949   :  { %19054 = vmatprep.subr.bf16.mxu0 %v20382_v52  ;;  %v20418_v52 = vld [vmem:[#allocation14 + $0xfd8] ss:$28 sps:$4 sm:$0xff]  }
 0x94b   :  { %16447 = vmatpush2.bf16.msra.mxu1 %v20379_v20  ;;  %v20419_v20 = vld [vmem:[#allocation14 + $0x398] ss:$28 sps:$4 sm:$0xff]  }
 0x94c   :  { %19055 = vmatpush3.bf16.msra.mxu0 %v20383_v10  ;;  %16448 = vmatprep.subr.bf16.mxu1 %v20386_v50  ;;  %v20420_v10 = vld [vmem:[#allocation14 + $0xe18] ss:$28 sps:$4 sm:$0xff]   ;;  %v20421_v50 = vld [vmem:[#allocation14 + $0xde0] ss:$28 sps:$4 sm:$0xff]  }
 0x94d   :  { %19056 = vmatprep.subr.bf16.mxu0 %v20387_v7  ;;  %v20422_v7 = vld [vmem:[#allocation14 + $0x1860] ss:$28 sps:$4 sm:$0xff]  }
 0x94f   :  { %16449 = vmatpush2.bf16.msra.mxu1 %v20384_v39  ;;  %v20423_v39 = vld [vmem:[#allocation14 + $0xc20] ss:$28 sps:$4 sm:$0xff]  }
 0x950   :  { %19057 = vmatpush3.bf16.msra.mxu0 %v20388_v12  ;;  %19020 = vmatprep.subr.bf16.mxu1 %v20389_v1  ;;  %v20424_v12 = vld [vmem:[#allocation14 + $0x16a0] ss:$28 sps:$4 sm:$0xff]   ;;  %v20425_v1 = vld [vmem:[#allocation14 + $0xda8] ss:$28 sps:$4 sm:$0xff]  }
 0x951   :  { %19086 = vmatprep.subr.bf16.mxu0 %v20390_v11  ;;  %v20427_v11 = vld [vmem:[#allocation14 + $0xbe8] ss:$28 sps:$4 sm:$0xff]  }
 0x952   :  { %v16206_v23 = vpop.f32.mrf.mxu1  ;;  %16451 = vmatmul.mubr.bf16.vlgmr.msra.gmra.mxu1 %v21226_v28 }
 0x953   :  { %v16207_v25 = vadd.f32 %v16206_v23, %v16166_v63  ;;  %v16247_v43 = vpop.f32.mrf.mxu0  ;;  %16572 = vmatmul.mubr.bf16.vlgmr.msra.gmra.mxu0 %v21154_v62  ;;  %19021 = vmatpush3.bf16.msra.mxu1 %v20391_v61  ;;  %v20429_v61 = vld [vmem:[#allocation14 + $0xd70] ss:$28 sps:$4 sm:$0xff]   ;;  %v20435_v23 = vld [vmem:[#allocation14 + $0xb78] ss:$28 sps:$4 sm:$0xff]  }
 0x954   :  { %16531 = vmatprep.mubr.bf16.mxu1 %v21135_v51  ;;  %19087 = vmatpush3.bf16.msra.mxu0 %v20392_v27  ;;  %v16208_v60 = vpop.f32.mrf.mxu1  ;;  %v20430_v27 = vld [vmem:[#allocation14 + $0x17f0] ss:$28 sps:$4 sm:$0xff]  }
 0x955   :  { %v21335_v57 = vadd.f32 %v16247_v43, %v16207_v25  ;;  %16651 = vmatprep.mubr.bf16.mxu0 %v21159_v2  ;;  %v16209_v24 = vadd.f32 %v16208_v60, %v16168_v38  ;;  %v16249_v37 = vpop.f32.mrf.mxu0  ;;  %19022 = vmatprep.subr.bf16.mxu1 %v20393_v3  ;;  %v20403_v2 = vld [vmem:[#allocation14 + $0x478] ss:$28 sps:$4 sm:$0xff]   ;;  %v20431_v63 = vld [vmem:[#allocation14 + $0xbb0] ss:$28 sps:$4 sm:$0xff]   ;;  %v20438_v38 = vld [vmem:[#allocation14 + $0x1780] ss:$28 sps:$4 sm:$0xff]  }
 0x956   :  { %v16210_v16 = vpop.f32.mrf.mxu1  ;;  %19088 = vmatprep.subr.bf16.mxu0 %v20394_v35  ;;  %v20433_v3 = vld [vmem:[#allocation14 + $0xd38] ss:$28 sps:$4 sm:$0xff]   ;;  %v20437_v35 = vld [vmem:[#allocation14 + $0xd00] ss:$28 sps:$4 sm:$0xff]   ;;  %v20441_v43 = vld [vmem:[#allocation14 + $0xcc8] ss:$28 sps:$4 sm:$0xff]  }
 0x957   :  { %v21338_v9 = vadd.f32 %v16249_v37, %v16209_v24  ;;  %v16251_v62 = vpop.f32.mrf.mxu0  ;;  %19023 = vmatpush3.bf16.msra.mxu1 %v20395_v44  ;;  %v20440_v25 = vld [vmem:[#allocation14 + $0x15c0] ss:$28 sps:$4 sm:$0xff]   ;;  %v20442_v44 = vld [vmem:[#allocation14 + $0x1748] ss:$28 sps:$4 sm:$0xff]   ;;  %v20446_v24 = vld [vmem:[#allocation14 + $0x1710] ss:$28 sps:$4 sm:$0xff]  }
 0x958   :  { %19089 = vmatpush3.bf16.msra.mxu0 %v20396_v17  ;;  %v16211_v51 = vpop.f32.mrf.mxu1  ;;  %19024 = vmatprep.subr.bf16.mxu1 %v20397_v30  ;;  %v20443_v60 = vld [vmem:[#allocation14 + $0xb08] ss:$28 sps:$4 sm:$0xff]   ;;  %v20445_v30 = vld [vmem:[#allocation14 + $0xc90] ss:$28 sps:$4 sm:$0xff]   ;;  %v20449_v16 = vld [vmem:[#allocation14 + $0xc58] ss:$28 sps:$4 sm:$0xff]  }
 0x959   :  { %v16252_v41 = vpop.f32.mrf.mxu0  ;;  %19090 = vmatprep.subr.bf16.mxu0 %v20398_v34  ;;  %v20444_v17 = vld [vmem:[#allocation14 + $0x1588] ss:$28 sps:$4 sm:$0xff]   ;;  %v20447_v37 = vld [vmem:[#allocation14 + $0xad0] ss:$28 sps:$4 sm:$0xff]   ;;  %v20450_v62 = vld [vmem:[#allocation14 + $0x16d8] ss:$28 sps:$4 sm:$0xff]  }
 0x95a   :  { %v20448_v34 = vld [vmem:[#allocation14 + $0x1550] ss:$28 sps:$4 sm:$0xff]   ;;  %v20452_v51 = vld [vmem:[#allocation14 + $0x1518] ss:$28 sps:$4 sm:$0xff]   ;;  %v20455_v41 = vld [vmem:[#allocation14 + $0x14a8] ss:$28 sps:$4 sm:$0xff]  }
 0x95b   :  { %19025 = vmatpush3.bf16.msra.mxu1 %v20399_v19  ;;  %v20451_v19 = vld [vmem:[#allocation14 + $0xa98] ss:$28 sps:$4 sm:$0xff]  }
 0x95c   :  { %19091 = vmatpush3.bf16.msra.mxu0 %v20400_v15  ;;  %19026 = vmatprep.subr.bf16.mxu1 %v20401_v33  ;;  %v20453_v15 = vld [vmem:[#allocation14 + $0x14e0] ss:$28 sps:$4 sm:$0xff]  }
 0x95d   :  { %19092 = vmatprep.subr.bf16.mxu0 %v20402_v13  ;;  %v20454_v33 = vld [vmem:[#allocation14 + $0x1320] ss:$28 sps:$4 sm:$0xff]  }
 0x95f   :  { %19027 = vmatpush3.bf16.msra.mxu1 %v20403_v2 }
 0x960   :  { %19093 = vmatpush3.bf16.msra.mxu0 %v20404_v22  ;;  %19028 = vmatprep.subr.bf16.mxu1 %v20405_v55  ;;  %v20456_v55 = vld [vmem:[#allocation14 + $0x12e8] ss:$28 sps:$4 sm:$0xff]  }
 0x961   :  { %19094 = vmatprep.subr.bf16.mxu0 %v20406_v54 }
 0x963   :  { %19029 = vmatpush3.bf16.msra.mxu1 %v20407_v49  ;;  %v20457_v49 = vld [vmem:[#allocation14 + $0x1470] ss:$28 sps:$4 sm:$0xff]  }
 0x964   :  { %19095 = vmatpush3.bf16.msra.mxu0 %v20408_v40  ;;  %19030 = vmatprep.subr.bf16.mxu1 %v20409_v4 }
 0x965   :  { %19096 = vmatprep.subr.bf16.mxu0 %v20410_v8 }
 0x967   :  { %19031 = vmatpush3.bf16.msra.mxu1 %v20411_v46 }
 0x968   :  { %19097 = vmatpush3.bf16.msra.mxu0 %v20412_v48  ;;  %19032 = vmatprep.subr.bf16.mxu1 %v20413_v32 }
 0x969   :  { %19098 = vmatprep.subr.bf16.mxu0 %v20414_v31 }
 0x96b   :  { %19033 = vmatpush3.bf16.msra.mxu1 %v20415_v6  ;;  %v20461_v6 = vld [vmem:[#allocation14 + $0x1400] ss:$28 sps:$4 sm:$0xff]  }
 0x96c   :  { %19099 = vmatpush3.bf16.msra.mxu0 %v20416_v36  ;;  %19034 = vmatprep.subr.bf16.mxu1 %v20417_v53  ;;  %v20462_v36 = vld [vmem:[#allocation14 + $0x1240] ss:$28 sps:$4 sm:$0xff]   ;;  %v20463_v53 = vld [vmem:[#allocation14 + $0x13c8] ss:$28 sps:$4 sm:$0xff]  }
 0x96d   :  { %19100 = vmatprep.subr.bf16.mxu0 %v20418_v52  ;;  %v20465_v52 = vld [vmem:[#allocation14 + $0x1390] ss:$28 sps:$4 sm:$0xff]  }
 0x96f   :  { %19035 = vmatpush3.bf16.msra.mxu1 %v20419_v20  ;;  %v20466_v20 = vld [vmem:[#allocation14 + $0x11d0] ss:$28 sps:$4 sm:$0xff]  }
 0x970   :  { %19101 = vmatpush3.bf16.msra.mxu0 %v20420_v10  ;;  %19064 = vmatprep.subr.bf16.mxu1 %v20421_v50  ;;  %v20467_v10 = vld [vmem:[#allocation14 + $0x1358] ss:$28 sps:$4 sm:$0xff]  }
 0x971   :  { %19130 = vmatprep.subr.bf16.mxu0 %v20422_v7  ;;  %v20468_v50 = vld [vmem:[#allocation14 + $0x1198] ss:$28 sps:$4 sm:$0xff]   ;;  %v20469_v7 = vld [vmem:[#allocation14 + $0x1be0] ss:$28 sps:$4 sm:$0xff]  }
 0x972   :  { %16532 = vmatmul.mubr.bf16.vlgmr.msra.gmra.mxu1 %v21152_v0  ;;  %v20432_v0 = vld [vmem:[#allocation14 + $0x1630] ss:$28 sps:$4 sm:$0xff]  }
 0x973   :  { %16652 = vmatmul.mubr.bf16.vlgmr.msra.gmra.mxu0 %v21182_v58  ;;  %19065 = vmatpush3.bf16.msra.mxu1 %v20423_v39  ;;  %v20434_v58 = vld [vmem:[#allocation14 + $0x17b8] ss:$28 sps:$4 sm:$0xff]   ;;  %v20470_v39 = vld [vmem:[#allocation14 + $0x1a20] ss:$28 sps:$4 sm:$0xff]  }
 0x974   :  { %16611 = vmatprep.mubr.bf16.mxu1 %v21156_v42  ;;  %19131 = vmatpush3.bf16.msra.mxu0 %v20424_v12  ;;  %v20436_v42 = vld [vmem:[#allocation14 + $0x15f8] ss:$28 sps:$4 sm:$0xff]   ;;  %v20471_v12 = vld [vmem:[#allocation14 + $0x1ba8] ss:$28 sps:$4 sm:$0xff]  }
 0x975   :  { %16731 = vmatprep.mubr.bf16.mxu0 %v21188_v59  ;;  %19066 = vmatprep.subr.bf16.mxu1 %v20425_v1  ;;  %v20439_v59 = vld [vmem:[#allocation14 + $0xb40] ss:$28 sps:$4 sm:$0xff]   ;;  %v20472_v1 = vld [vmem:[#allocation14 + $0x19e8] ss:$28 sps:$4 sm:$0xff]  }
 0x976   :  { %19132 = vmatprep.subr.bf16.mxu0 %v20426_v21  ;;  %v20473_v21 = vld [vmem:[#allocation14 + $0x1b70] ss:$28 sps:$4 sm:$0xff]  }
 0x977   :  { %19067 = vmatpush3.bf16.msra.mxu1 %v20427_v11  ;;  %v20474_v11 = vld [vmem:[#allocation14 + $0x19b0] ss:$28 sps:$4 sm:$0xff]  }
 0x978   :  { %19133 = vmatpush3.bf16.msra.mxu0 %v20428_v14  ;;  %19068 = vmatprep.subr.bf16.mxu1 %v20429_v61  ;;  %v20475_v14 = vld [vmem:[#allocation14 + $0x1b38] ss:$28 sps:$4 sm:$0xff]  }
 0x979   :  { %19134 = vmatprep.subr.bf16.mxu0 %v20430_v27  ;;  %v20476_v61 = vld [vmem:[#allocation14 + $0x1978] ss:$28 sps:$4 sm:$0xff]   ;;  %v20477_v27 = vld [vmem:[#allocation14 + $0x1b00] ss:$28 sps:$4 sm:$0xff]  }
 0x97b   :  { %19069 = vmatpush3.bf16.msra.mxu1 %v20431_v63  ;;  %v20478_v63 = vld [vmem:[#allocation14 + $0x1940] ss:$28 sps:$4 sm:$0xff]  }
 0x97c   :  { %19135 = vmatpush3.bf16.msra.mxu0 %v20432_v0  ;;  %19070 = vmatprep.subr.bf16.mxu1 %v20433_v3  ;;  %v20479_v0 = vld [vmem:[#allocation14 + $0x1ac8] ss:$28 sps:$4 sm:$0xff]   ;;  %v20481_v3 = vld [vmem:[#allocation14 + $0x1a90] ss:$28 sps:$4 sm:$0xff]  }
 0x97d   :  { %19136 = vmatprep.subr.bf16.mxu0 %v20434_v58  ;;  %v20483_v58 = vld [vmem:[#allocation14 + $0x1a58] ss:$28 sps:$4 sm:$0xff]  }
 0x97f   :  { %19071 = vmatpush3.bf16.msra.mxu1 %v20435_v23  ;;  %v20484_v23 = vld [vmem:[#allocation14 + $0x1898] ss:$28 sps:$4 sm:$0xff]  }
 0x980   :  { %19137 = vmatpush3.bf16.msra.mxu0 %v20436_v42  ;;  %19072 = vmatprep.subr.bf16.mxu1 %v20437_v35 }
 0x981   :  { %19138 = vmatprep.subr.bf16.mxu0 %v20438_v38 }
 0x983   :  { %19073 = vmatpush3.bf16.msra.mxu1 %v20439_v59 }
 0x984   :  { %19139 = vmatpush3.bf16.msra.mxu0 %v20440_v25  ;;  %19074 = vmatprep.subr.bf16.mxu1 %v20441_v43 }
 0x985   :  { %19140 = vmatprep.subr.bf16.mxu0 %v20442_v44 }
 0x987   :  { %19075 = vmatpush3.bf16.msra.mxu1 %v20443_v60 }
 0x988   :  { %19141 = vmatpush3.bf16.msra.mxu0 %v20444_v17  ;;  %19076 = vmatprep.subr.bf16.mxu1 %v20445_v30 }
 0x989   :  { %19142 = vmatprep.subr.bf16.mxu0 %v20446_v24 }
 0x98b   :  { %19077 = vmatpush3.bf16.msra.mxu1 %v20447_v37 }
 0x98c   :  { %19143 = vmatpush3.bf16.msra.mxu0 %v20448_v34  ;;  %19078 = vmatprep.subr.bf16.mxu1 %v20449_v16 }
 0x98d   :  { %19144 = vmatprep.subr.bf16.mxu0 %v20450_v62 }
 0x98f   :  { %19079 = vmatpush3.bf16.msra.mxu1 %v20451_v19 }
 0x990   :  { %19145 = vmatpush3.bf16.msra.mxu0 %v20452_v51  ;;  %19108 = vmatprep.subr.bf16.mxu1 %v20453_v15 }
 0x992   :  { %v16288_v13 = vpop.f32.mrf.mxu1  ;;  %16612 = vmatmul.mubr.bf16.vlgmr.msra.gmra.mxu1 %v21180_v56 }
 0x993   :  { %v16289_v2 = vadd.f32 %v16288_v13, %v21335_v57  ;;  %v16329_v22 = vpop.f32.mrf.mxu0  ;;  %16732 = vmatmul.mubr.bf16.vlgmr.msra.gmra.mxu0 %v21207_v47  ;;  %19109 = vmatpush3.bf16.msra.mxu1 %v20454_v33  ;;  %v20458_v57 = vld [vmem:[#allocation14 + $0x12b0] ss:$28 sps:$4 sm:$0xff]   ;;  %v20459_v47 = vld [vmem:[#allocation14 + $0x1438] ss:$28 sps:$4 sm:$0xff]  }
 0x994   :  { %16691 = vmatprep.mubr.bf16.mxu1 %v21185_v45  ;;  %v16290_v54 = vpop.f32.mrf.mxu1  ;;  %19110 = vmatprep.subr.bf16.mxu1 %v20455_v41  ;;  %v20460_v45 = vld [vmem:[#allocation14 + $0x1278] ss:$28 sps:$4 sm:$0xff]  }
 0x995   :  { %v21348_v40 = vadd.f32 %v16329_v22, %v16289_v2  ;;  %v16291_v4 = vadd.f32 %v16290_v54, %v21338_v9  ;;  %v16331_v8 = vpop.f32.mrf.mxu0  ;;  %v20464_v9 = vld [vmem:[#allocation14 + $0x1208] ss:$28 sps:$4 sm:$0xff]  }
 0x996   :  { %v16292_v46 = vpop.f32.mrf.mxu1 }
 0x997   :  { %v21351_v48 = vadd.f32 %v16331_v8, %v16291_v4  ;;  %v16333_v56 = vpop.f32.mrf.mxu0  ;;  %19111 = vmatpush3.bf16.msra.mxu1 %v20456_v55  ;;  %v10859_v46 = vrot.slane %v21324_v18, %v20923_v26 }
 0x998   :  { %v16293_v32 = vpop.f32.mrf.mxu1  ;;  %19112 = vmatprep.subr.bf16.mxu1 %v20457_v49 }
 0x999   :  { %v16334_v31 = vpop.f32.mrf.mxu0 }
 0x99b   :  { %19113 = vmatpush3.bf16.msra.mxu1 %v20458_v57 }
 0x99c   :  { %19114 = vmatprep.subr.bf16.mxu1 %v20459_v47 }
 0x99f   :  { %19115 = vmatpush3.bf16.msra.mxu1 %v20460_v45 }
 0x9a0   :  { %19116 = vmatprep.subr.bf16.mxu1 %v20461_v6 }
 0x9a3   :  { %19117 = vmatpush3.bf16.msra.mxu1 %v20462_v36 }
 0x9a4   :  { %19118 = vmatprep.subr.bf16.mxu1 %v20463_v53 }
 0x9a7   :  { %19119 = vmatpush3.bf16.msra.mxu1 %v20464_v9 }
 0x9a8   :  { %19120 = vmatprep.subr.bf16.mxu1 %v20465_v52 }
 0x9ab   :  { %19121 = vmatpush3.bf16.msra.mxu1 %v20466_v20 }
 0x9ac   :  { %19122 = vmatprep.subr.bf16.mxu1 %v20467_v10 }
 0x9af   :  { %19123 = vmatpush3.bf16.msra.mxu1 %v20468_v50 }
 0x9b0   :  { %19152 = vmatprep.subr.bf16.mxu1 %v20469_v7 }
 0x9b2   :  { %16692 = vmatmul.mubr.bf16.vlgmr.msra.gmra.mxu1 %v21205_v5  ;;  %v20480_v5 = vld [vmem:[#allocation14 + $0x1908] ss:$28 sps:$4 sm:$0xff]  }
 0x9b3   :  { %19153 = vmatpush3.bf16.msra.mxu1 %v20470_v39  ;;  %16771 = vmatprep.mubr.bf16.mxu1 %v21219_v29  ;;  %v20482_v29 = vld [vmem:[#allocation14 + $0x18d0] ss:$28 sps:$4 sm:$0xff]  }
 0x9b4   :  { %19154 = vmatprep.subr.bf16.mxu1 %v20471_v12 }
 0x9b7   :  { %19155 = vmatpush3.bf16.msra.mxu1 %v20472_v1 }
 0x9b8   :  { %19156 = vmatprep.subr.bf16.mxu1 %v20473_v21 }
 0x9bb   :  { %19157 = vmatpush3.bf16.msra.mxu1 %v20474_v11 }
 0x9bc   :  { %19158 = vmatprep.subr.bf16.mxu1 %v20475_v14 }
 0x9bf   :  { %19159 = vmatpush3.bf16.msra.mxu1 %v20476_v61 }
 0x9c0   :  { %19160 = vmatprep.subr.bf16.mxu1 %v20477_v27 }
 0x9c3   :  { %19161 = vmatpush3.bf16.msra.mxu1 %v20478_v63 }
 0x9c4   :  { %19162 = vmatprep.subr.bf16.mxu1 %v20479_v0 }
 0x9c7   :  { %19163 = vmatpush3.bf16.msra.mxu1 %v20480_v5 }
 0x9c8   :  { %19164 = vmatprep.subr.bf16.mxu1 %v20481_v3 }
 0x9cb   :  { %19165 = vmatpush3.bf16.msra.mxu1 %v20482_v29 }
 0x9cc   :  { %19166 = vmatprep.subr.bf16.mxu1 %v20483_v58 }
 0x9cf   :  { %19167 = vmatpush3.bf16.msra.mxu1 %v20484_v23 }
 0x9d2   :  { %v16370_v42 = vpop.f32.mrf.mxu1  ;;  %16772 = vmatmul.mubr.bf16.vlgmr.msra.gmra.mxu1 %v21226_v28 }
 0x9d3   :  { %v16411_v35 = vpop.f32.mrf.mxu0  ;;  %v16371_v16 = vadd.f32 %v16370_v42, %v21348_v40 }
 0x9d4   :  { %v16372_v38 = vpop.f32.mrf.mxu1 }
 0x9d5   :  { %v16413_v59 = vpop.f32.mrf.mxu0  ;;  %v16373_v62 = vadd.f32 %v16372_v38, %v21351_v48  ;;  %v16412_v19 = vadd.f32 %v16411_v35, %v16371_v16 }
 0x9d6   :  { %v16374_v25 = vpop.f32.mrf.mxu1 }
 0x9d7   :  { %v16415_v43 = vpop.f32.mrf.mxu0  ;;  %v16414_v15 = vadd.f32 %v16413_v59, %v16373_v62 }
 0x9d8   :  { %v16375_v44 = vpop.f32.mrf.mxu1 }
 0x9d9   :  { %v16416_v60 = vpop.f32.mrf.mxu0 }
 0x9f3   :  { %v19014_v17 = vpop.f32.mrf.mxu0 }
 0x9f5   :  { %v19015_v30 = vpop.f32.mrf.mxu0 }
 0x9f6   :  { %v19016_v24 = vadd.f32 %v19015_v30, %v19014_v17 }
 0x9f7   :  { %v19017_v37 = vpop.f32.mrf.mxu0 }
 0x9f8   :  { %v16494_v32 = vadd.f32 %v19016_v24, %v10859_v46 }
 0x9f9   :  { %v19018_v34 = vpop.f32.mrf.mxu0 }
 0xa12   :  { %v16452_v51 = vpop.f32.mrf.mxu1 }
 0xa13   :  { %v16453_v28 = vadd.f32 %v16452_v51, %v16412_v19  ;;  %v19058_v33 = vpop.f32.mrf.mxu0 }
 0xa14   :  { %v16454_v41 = vpop.f32.mrf.mxu1 }
 0xa15   :  { %20493 = vtanh.f32 %v16453_v28  ;;  %v16455_v13 = vadd.f32 %v16454_v41, %v16414_v15  ;;  %v19059_v2 = vpop.f32.mrf.mxu0 }
 0xa16   :  { %v19060_v22 = vadd.f32 %v19059_v2, %v19058_v33  ;;  %v16456_v55 = vpop.f32.mrf.mxu1 }
 0xa17   :  { %20495 = vtanh.f32 %v16455_v13  ;;  %v19061_v54 = vpop.f32.mrf.mxu0 }
 0xa18   :  { %v16457_v49 = vpop.f32.mrf.mxu1 }
 0xa19   :  { %v19062_v4 = vpop.f32.mrf.mxu0 }
 0xa22   :  { %v20494_v8 = vpop.eup %20493 }
 0xa23   :  { %16790 = vst [vmem:[#allocation17 + $0x20] sm:$0xff] %v20494_v8 }
 0xa24   :  { %v20496_v40 = vpop.eup %20495 }
 0xa25   :  { %16791 = vst [vmem:[#allocation17 + $0x28] sm:$0xff] %v20496_v40 }
 0xa32   :  { %v19036_v48 = vpop.f32.mrf.mxu1 }
 0xa33   :  { %v19102_v56 = vpop.f32.mrf.mxu0 }
 0xa34   :  { %v19037_v57 = vpop.f32.mrf.mxu1 }
 0xa35   :  { %v19038_v47 = vadd.f32 %v19037_v57, %v19036_v48  ;;  %v19103_v31 = vpop.f32.mrf.mxu0 }
 0xa36   :  { %v19104_v45 = vadd.f32 %v19103_v31, %v19102_v56  ;;  %v19039_v6 = vpop.f32.mrf.mxu1 }
 0xa37   :  { %v16534_v36 = vadd.f32 %v19038_v47, %v16494_v32  ;;  %v19105_v53 = vpop.f32.mrf.mxu0 }
 0xa38   :  { %v19040_v9 = vpop.f32.mrf.mxu1 }
 0xa39   :  { %v19106_v52 = vpop.f32.mrf.mxu0  ;;  %v16574_v20 = vadd.f32 %v19060_v22, %v16534_v36 }
 0xa52   :  { %v19080_v10 = vpop.f32.mrf.mxu1 }
 0xa53   :  { %v19146_v50 = vpop.f32.mrf.mxu0 }
 0xa54   :  { %v19081_v7 = vpop.f32.mrf.mxu1 }
 0xa55   :  { %v19082_v39 = vadd.f32 %v19081_v7, %v19080_v10  ;;  %v19147_v12 = vpop.f32.mrf.mxu0 }
 0xa56   :  { %v19083_v1 = vpop.f32.mrf.mxu1  ;;  %v19148_v58 = vadd.f32 %v19147_v12, %v19146_v50 }
 0xa57   :  { %v16614_v26 = vadd.f32 %v19082_v39, %v16574_v20  ;;  %v19149_v18 = vpop.f32.mrf.mxu0 }
 0xa58   :  { %v19084_v21 = vpop.f32.mrf.mxu1 }
 0xa59   :  { %v19150_v11 = vpop.f32.mrf.mxu0  ;;  %v16654_v14 = vadd.f32 %v19104_v45, %v16614_v26 }
 0xa72   :  { %v19124_v61 = vpop.f32.mrf.mxu1 }
 0xa74   :  { %v19125_v27 = vpop.f32.mrf.mxu1 }
 0xa75   :  { %v19126_v5 = vadd.f32 %v19125_v27, %v19124_v61 }
 0xa76   :  { %v19127_v63 = vpop.f32.mrf.mxu1 }
 0xa77   :  { %v16694_v3 = vadd.f32 %v19126_v5, %v16654_v14 }
 0xa78   :  { %v19128_v0 = vpop.f32.mrf.mxu1 }
 0xa79   :  { %v16734_v42 = vadd.f32 %v19148_v58, %v16694_v3 }
 0xa92   :  { %v19168_v29 = vpop.f32.mrf.mxu1 }
 0xa94   :  { %v19169_v23 = vpop.f32.mrf.mxu1 }
 0xa95   :  { %v19170_v35 = vadd.f32 %v19169_v23, %v19168_v29 }
 0xa96   :  { %v19171_v38 = vpop.f32.mrf.mxu1 }
 0xa97   :  { %v16774_v59 = vadd.f32 %v19170_v35, %v16734_v42 }
 0xa98   :  { %v19172_v25 = vpop.f32.mrf.mxu1 }
 0xa99   :  { %20497 = vtanh.f32 %v16774_v59 }
 0xaa6   :  { %v20498_v43 = vpop.eup %20497 }
 0xaa7   :  { %16792 = vst [vmem:[#allocation17 + $0x30] sm:$0xff] %v20498_v43 }
 0xaa8   :  { %20696 = shalt.err (!%p20693_p7)
}
 0xaa9   :  { %16802 = dma.vmem_to_hbm [thread:$0]  %s16800_s8, 896, %s21372_s9, [#allocation4]  }
 0xaaa   :  { %20715 = dma.done.wait [#allocation4], 896  }
 0xaab   :  { %20716 = vsyncadd [#allocation4], 4294966400 }
 0xaac   :  { %16806 = vsyncpa [#allocation3], 1 }
 0xaad   :  { %16807 = vsyncpa [#allocation6], 1 }
 0xaae   :  { %16808 = vsyncpa [#allocation9], 1 }
 0xaaf   :  { %16809 = vsyncpa [#allocation12], 1 }
 0xab0   :  { %16810 = vsyncpa [#allocation15], 1 }
 0xab1   :  { %16811 = vsyncpa [#allocation4], 1 }

</bundles_post_ra>
